<compile_context>
chip_gen: v5e
topology: v5e:2x2
jax: 0.10.0
libtpu: 0.0.40
codegen_flags: <defaults>
</compile_context>

<pallas_src>
import math
from functools import partial

import jax
import jax.numpy as jnp
from jax.experimental import pallas as pl
from jax.experimental.pallas import tpu as pltpu

_VMEM = pl.BlockSpec(memory_space=pltpu.MemorySpace.VMEM)
_PAD = 8  # left padding on W: keeps the interior store sublane-aligned (multiple of 8)


# --------------------------------------------------------------------------- #
# Fused DoubleConv kernel
# --------------------------------------------------------------------------- #

def _double_conv_kernel(x_ref, t_ref, tw_ref, tb_ref,
                        w1_ref, b1_ref, g1_ref, be1_ref,
                        w2_ref, b2_ref, g2_ref, be2_ref,
                        o_ref, xp_scr, hp_scr, *, eps):
    N, H, W, Cin = x_ref.shape
    Cout = o_ref.shape[-1]
    M = N * H * W

    # ---- time MLP: (N, T) @ (T, Cout) + b, stays in VMEM --------------------
    temb = jnp.dot(t_ref[...].astype(jnp.bfloat16), tw_ref[...],
                   preferred_element_type=jnp.float32) + tb_ref[...]      # (N, Cout)

    # ---- 3x3 conv: 9 shifted taps accumulated on the MXU --------------------
    def conv3x3(src_scr, w_ref, b_ref, cin):
        acc = jnp.zeros((M, Cout), jnp.float32)
        for ky in range(3):
            for kx in range(3):
                patch = src_scr[:, ky:ky + H, _PAD - 1 + kx:_PAD - 1 + kx + W, :]
                patch = patch.reshape(M, cin).astype(jnp.bfloat16)
                acc = acc + jnp.dot(patch, w_ref[ky, kx, :, :],
                                    preferred_element_type=jnp.float32)
        return acc + b_ref[...]                                           # (M, Cout)

    # ---- training-mode BatchNorm2d over (N, H, W) per channel ---------------
    def batchnorm(v, g_ref, be_ref):
        mean = jnp.mean(v, axis=0, keepdims=True)
        var = jnp.mean(jnp.square(v - mean), axis=0, keepdims=True)       # biased var
        return (v - mean) * jax.lax.rsqrt(var + eps) * g_ref[...] + be_ref[...]

    # ---- conv1 -> BN1 -> ReLU(. + temb) --------------------------------------
    xp_scr[...] = jnp.zeros_like(xp_scr)                 # zero border
    xp_scr[:, 1:H + 1, _PAD:_PAD + W, :] = x_ref[...]    # aligned interior store
    h = conv3x3(xp_scr, w1_ref, b1_ref, Cin)
    h = batchnorm(h, g1_ref, be1_ref)
    h = h.reshape(N, H * W, Cout) + temb[:, None, :]     # in-kernel temb broadcast
    h = jnp.maximum(h, 0.0)

    # ---- conv2 -> BN2 -> ReLU (intermediate never leaves VMEM) ---------------
    hp_scr[...] = jnp.zeros_like(hp_scr)
    hp_scr[:, 1:H + 1, _PAD:_PAD + W, :] = h.reshape(N, H, W, Cout)
    h2 = conv3x3(hp_scr, w2_ref, b2_ref, Cout)
    h2 = batchnorm(h2, g2_ref, be2_ref)
    o_ref[...] = jnp.maximum(h2, 0.0).reshape(N, H, W, Cout)


# --------------------------------------------------------------------------- #
# Wrapper (NCHW in / NCHW out, like the torch module)
# --------------------------------------------------------------------------- #

def double_conv(params, x_nchw, t):
    """DoubleConv forward. x_nchw: (N, Cin, H, W) f32; t: (N, time_emb_dim) f32."""
    x = jnp.transpose(x_nchw, (0, 2, 3, 1)).astype(jnp.float32)           # -> NHWC
    N, H, W, Cin = x.shape
    Cout = params["conv1_w"].shape[-1]
    Wp = W + 2 * _PAD

    row = lambda v: v.reshape(1, -1).astype(jnp.float32)
    bf16 = lambda v: v.astype(jnp.bfloat16)    # halve weight DMA bytes; f32 accumulation

    out = pl.pallas_call(
        partial(_double_conv_kernel, eps=1e-5),
        out_shape=jax.ShapeDtypeStruct((N, H, W, Cout), jnp.float32),
        in_specs=[_VMEM] * 12,
        out_specs=_VMEM,
        scratch_shapes=[
            pltpu.VMEM((N, H + 2, Wp, Cin), jnp.float32),    # zero-padded conv1 input
            pltpu.VMEM((N, H + 2, Wp, Cout), jnp.float32),   # zero-padded conv2 input
        ],
    )(x, t.astype(jnp.float32),
      bf16(params["time_w"]), row(params["time_b"]),
      bf16(params["conv1_w"]), row(params["conv1_b"]),
      row(params["bn1_g"]), row(params["bn1_b"]),
      bf16(params["conv2_w"]), row(params["conv2_b"]),
      row(params["bn2_g"]), row(params["bn2_b"]))
    return jnp.transpose(out, (0, 3, 1, 2))                               # -> NCHW


# --------------------------------------------------------------------------- #
# Pure-JAX reference (for a sanity check)
# --------------------------------------------------------------------------- #

def _reference_double_conv(params, x_nchw, t, eps=1e-5):
    hi = jax.lax.Precision.HIGHEST

    def conv(x, w_hwio, b):
        w_oihw = jnp.transpose(w_hwio, (3, 2, 0, 1))
        y = jax.lax.conv_general_dilated(
            x, w_oihw, window_strides=(1, 1), padding=((1, 1), (1, 1)),
            dimension_numbers=("NCHW", "OIHW", "NCHW"), precision=hi)
        return y + b[None, :, None, None]

    def bn(x, g, b):
        mean = jnp.mean(x, axis=(0, 2, 3), keepdims=True)
        var = jnp.mean(jnp.square(x - mean), axis=(0, 2, 3), keepdims=True)
        return ((x - mean) * jax.lax.rsqrt(var + eps) * g[None, :, None, None]
                + b[None, :, None, None])

    temb = jnp.dot(t, params["time_w"], precision=hi) + params["time_b"]
    h = conv(x_nchw, params["conv1_w"], params["conv1_b"])
    h = bn(h, params["bn1_g"], params["bn1_b"])
    h = jax.nn.relu(h + temb[:, :, None, None])
    h = conv(h, params["conv2_w"], params["conv2_b"])
    h = bn(h, params["bn2_g"], params["bn2_b"])
    return jax.nn.relu(h)


# --------------------------------------------------------------------------- #
# Main
# --------------------------------------------------------------------------- #

if __name__ == "__main__":
    key = jax.random.PRNGKey(0)
    kx, kt, kw1, kw2, ktw, kb = jax.random.split(key, 6)

    B, C_IN, C_OUT, H, W, T_DIM = 2, 4, 16, 16, 16, 32

    params = {
        "time_w": jax.random.normal(ktw, (T_DIM, C_OUT), jnp.float32) / math.sqrt(T_DIM),
        "time_b": 0.01 * jax.random.normal(kb, (C_OUT,), jnp.float32),
        "conv1_w": jax.random.normal(kw1, (3, 3, C_IN, C_OUT), jnp.float32)
                   / math.sqrt(9 * C_IN),
        "conv1_b": 0.01 * jnp.ones((C_OUT,), jnp.float32),
        "conv2_w": jax.random.normal(kw2, (3, 3, C_OUT, C_OUT), jnp.float32)
                   / math.sqrt(9 * C_OUT),
        "conv2_b": -0.01 * jnp.ones((C_OUT,), jnp.float32),
        "bn1_g": jnp.ones((C_OUT,), jnp.float32),
        "bn1_b": jnp.zeros((C_OUT,), jnp.float32),
        "bn2_g": jnp.ones((C_OUT,), jnp.float32),
        "bn2_b": jnp.zeros((C_OUT,), jnp.float32),
    }
    x = jax.random.normal(kx, (B, C_IN, H, W), jnp.float32)
    t = jax.random.normal(kt, (B, T_DIM), jnp.float32)   # already-embedded time vector

    fwd = jax.jit(double_conv)
    out = jax.block_until_ready(fwd(params, x, t))

    assert out.shape == (B, C_OUT, H, W), out.shape
    assert bool(jnp.all(jnp.isfinite(out)))

    # Loose tolerance: kernel uses bf16 MXU operands (f32 accumulate); outputs are O(1).
    ref = _reference_double_conv(params, x, t)
    max_err = float(jnp.max(jnp.abs(out - ref)))
    assert max_err < 1e-1, f"mismatch vs reference: {max_err}"

    print("KERNEL_OK")
</pallas_src>

<mosaic_0001>
module attributes {stable_mosaic.version = 11 : i64} {
  func.func @_double_conv_kernel(%arg0: memref<2x16x16x4xf32, #tpu.memory_space<vmem>>, %arg1: memref<2x32xf32, #tpu.memory_space<vmem>>, %arg2: memref<32x16xbf16, #tpu.memory_space<vmem>>, %arg3: memref<1x16xf32, #tpu.memory_space<vmem>>, %arg4: memref<3x3x4x16xbf16, #tpu.memory_space<vmem>>, %arg5: memref<1x16xf32, #tpu.memory_space<vmem>>, %arg6: memref<1x16xf32, #tpu.memory_space<vmem>>, %arg7: memref<1x16xf32, #tpu.memory_space<vmem>>, %arg8: memref<3x3x16x16xbf16, #tpu.memory_space<vmem>>, %arg9: memref<1x16xf32, #tpu.memory_space<vmem>>, %arg10: memref<1x16xf32, #tpu.memory_space<vmem>>, %arg11: memref<1x16xf32, #tpu.memory_space<vmem>>, %arg12: memref<2x16x16x16xf32, #tpu.memory_space<vmem>>, %arg13: memref<2x18x32x4xf32, #tpu.memory_space<vmem>>, %arg14: memref<2x18x32x16xf32, #tpu.memory_space<vmem>>) attributes {dimension_semantics = [], scalar_prefetch = 0 : i64, scratch_operands = 2 : i64, tpu.core_type = #tpu.core_type<tc>} {
    %c0 = arith.constant 0 : index
    %c0_0 = arith.constant 0 : index
    %0 = vector.load %arg1[%c0, %c0_0] : memref<2x32xf32, #tpu.memory_space<vmem>>, vector<2x32xf32>
    %1 = arith.truncf %0 : vector<2x32xf32> to vector<2x32xbf16>
    %c0_1 = arith.constant 0 : index
    %c0_2 = arith.constant 0 : index
    %2 = vector.load %arg2[%c0_1, %c0_2] : memref<32x16xbf16, #tpu.memory_space<vmem>>, vector<32x16xbf16>
    %cst = arith.constant dense<0.000000e+00> : vector<2x16xf32>
    %3 = tpu.matmul %1, %2, %cst {dimension_numbers = #tpu.dot_dimension_numbers<[1], [0], [0], [1], [0, 0, 1, 1], [], []>} : vector<2x32xbf16>, vector<32x16xbf16>, vector<2x16xf32> -> vector<2x16xf32>
    %c0_3 = arith.constant 0 : index
    %c0_4 = arith.constant 0 : index
    %4 = vector.load %arg3[%c0_3, %c0_4] : memref<1x16xf32, #tpu.memory_space<vmem>>, vector<1x16xf32>
    %5 = vector.broadcast %4 : vector<1x16xf32> to vector<2x16xf32>
    %6 = arith.addf %3, %5 : vector<2x16xf32>
    %cst_5 = arith.constant 0.000000e+00 : f32
    %7 = vector.broadcast %cst_5 : f32 to vector<2x18x32x4xf32>
    %c0_6 = arith.constant 0 : index
    %c0_7 = arith.constant 0 : index
    %c0_8 = arith.constant 0 : index
    %c0_9 = arith.constant 0 : index
    %8 = vector.load %arg13[%c0_6, %c0_7, %c0_8, %c0_9] : memref<2x18x32x4xf32, #tpu.memory_space<vmem>>, vector<2x18x32x4xf32>
    tpu.vector_store %arg13[%c0_6, %c0_7, %c0_8, %c0_9], %7 {strides = array<i32>} : memref<2x18x32x4xf32, #tpu.memory_space<vmem>>, vector<2x18x32x4xf32>,
    %c0_10 = arith.constant 0 : index
    %c0_11 = arith.constant 0 : index
    %c0_12 = arith.constant 0 : index
    %c0_13 = arith.constant 0 : index
    %9 = vector.load %arg0[%c0_10, %c0_11, %c0_12, %c0_13] : memref<2x16x16x4xf32, #tpu.memory_space<vmem>>, vector<2x16x16x4xf32>
    %c0_14 = arith.constant 0 : index
    %c1 = arith.constant 1 : index
    %c8 = arith.constant 8 : index
    %c0_15 = arith.constant 0 : index
    %10 = vector.load %arg13[%c0_14, %c1, %c8, %c0_15] : memref<2x18x32x4xf32, #tpu.memory_space<vmem>>, vector<2x16x16x4xf32>
    tpu.vector_store %arg13[%c0_14, %c1, %c8, %c0_15], %9 {strides = array<i32>} : memref<2x18x32x4xf32, #tpu.memory_space<vmem>>, vector<2x16x16x4xf32>,
    %cst_16 = arith.constant 0.000000e+00 : f32
    %11 = vector.broadcast %cst_16 : f32 to vector<512x16xf32>
    %c0_17 = arith.constant 0 : index
    %c0_18 = arith.constant 0 : index
    %c7 = arith.constant 7 : index
    %c0_19 = arith.constant 0 : index
    %12 = vector.load %arg13[%c0_17, %c0_18, %c7, %c0_19] : memref<2x18x32x4xf32, #tpu.memory_space<vmem>>, vector<2x16x16x4xf32>
    %13 = vector.shape_cast %12 : vector<2x16x16x4xf32> to vector<512x4xf32>
    %14 = arith.truncf %13 : vector<512x4xf32> to vector<512x4xbf16>
    %c0_20 = arith.constant 0 : index
    %c0_21 = arith.constant 0 : index
    %c0_22 = arith.constant 0 : index
    %c0_23 = arith.constant 0 : index
    %15 = vector.load %arg4[%c0_20, %c0_21, %c0_22, %c0_23] : memref<3x3x4x16xbf16, #tpu.memory_space<vmem>>, vector<1x1x4x16xbf16>
    %16 = vector.shape_cast %15 : vector<1x1x4x16xbf16> to vector<4x16xbf16>
    %cst_24 = arith.constant dense<0.000000e+00> : vector<512x16xf32>
    %17 = tpu.matmul %14, %16, %cst_24 {dimension_numbers = #tpu.dot_dimension_numbers<[1], [0], [0], [1], [0, 0, 1, 1], [], []>} : vector<512x4xbf16>, vector<4x16xbf16>, vector<512x16xf32> -> vector<512x16xf32>
    %18 = arith.addf %11, %17 : vector<512x16xf32>
    %c0_25 = arith.constant 0 : index
    %c0_26 = arith.constant 0 : index
    %c8_27 = arith.constant 8 : index
    %c0_28 = arith.constant 0 : index
    %19 = vector.load %arg13[%c0_25, %c0_26, %c8_27, %c0_28] : memref<2x18x32x4xf32, #tpu.memory_space<vmem>>, vector<2x16x16x4xf32>
    %20 = vector.shape_cast %19 : vector<2x16x16x4xf32> to vector<512x4xf32>
    %21 = arith.truncf %20 : vector<512x4xf32> to vector<512x4xbf16>
    %c0_29 = arith.constant 0 : index
    %c1_30 = arith.constant 1 : index
    %c0_31 = arith.constant 0 : index
    %c0_32 = arith.constant 0 : index
    %22 = vector.load %arg4[%c0_29, %c1_30, %c0_31, %c0_32] : memref<3x3x4x16xbf16, #tpu.memory_space<vmem>>, vector<1x1x4x16xbf16>
    %23 = vector.shape_cast %22 : vector<1x1x4x16xbf16> to vector<4x16xbf16>
    %cst_33 = arith.constant dense<0.000000e+00> : vector<512x16xf32>
    %24 = tpu.matmul %21, %23, %cst_33 {dimension_numbers = #tpu.dot_dimension_numbers<[1], [0], [0], [1], [0, 0, 1, 1], [], []>} : vector<512x4xbf16>, vector<4x16xbf16>, vector<512x16xf32> -> vector<512x16xf32>
    %25 = arith.addf %18, %24 : vector<512x16xf32>
    %c0_34 = arith.constant 0 : index
    %c0_35 = arith.constant 0 : index
    %c9 = arith.constant 9 : index
    %c0_36 = arith.constant 0 : index
    %26 = vector.load %arg13[%c0_34, %c0_35, %c9, %c0_36] : memref<2x18x32x4xf32, #tpu.memory_space<vmem>>, vector<2x16x16x4xf32>
    %27 = vector.shape_cast %26 : vector<2x16x16x4xf32> to vector<512x4xf32>
    %28 = arith.truncf %27 : vector<512x4xf32> to vector<512x4xbf16>
    %c0_37 = arith.constant 0 : index
    %c2 = arith.constant 2 : index
    %c0_38 = arith.constant 0 : index
    %c0_39 = arith.constant 0 : index
    %29 = vector.load %arg4[%c0_37, %c2, %c0_38, %c0_39] : memref<3x3x4x16xbf16, #tpu.memory_space<vmem>>, vector<1x1x4x16xbf16>
    %30 = vector.shape_cast %29 : vector<1x1x4x16xbf16> to vector<4x16xbf16>
    %cst_40 = arith.constant dense<0.000000e+00> : vector<512x16xf32>
    %31 = tpu.matmul %28, %30, %cst_40 {dimension_numbers = #tpu.dot_dimension_numbers<[1], [0], [0], [1], [0, 0, 1, 1], [], []>} : vector<512x4xbf16>, vector<4x16xbf16>, vector<512x16xf32> -> vector<512x16xf32>
    %32 = arith.addf %25, %31 : vector<512x16xf32>
    %c0_41 = arith.constant 0 : index
    %c1_42 = arith.constant 1 : index
    %c7_43 = arith.constant 7 : index
    %c0_44 = arith.constant 0 : index
    %33 = vector.load %arg13[%c0_41, %c1_42, %c7_43, %c0_44] : memref<2x18x32x4xf32, #tpu.memory_space<vmem>>, vector<2x16x16x4xf32>
    %34 = vector.shape_cast %33 : vector<2x16x16x4xf32> to vector<512x4xf32>
    %35 = arith.truncf %34 : vector<512x4xf32> to vector<512x4xbf16>
    %c1_45 = arith.constant 1 : index
    %c0_46 = arith.constant 0 : index
    %c0_47 = arith.constant 0 : index
    %c0_48 = arith.constant 0 : index
    %36 = vector.load %arg4[%c1_45, %c0_46, %c0_47, %c0_48] : memref<3x3x4x16xbf16, #tpu.memory_space<vmem>>, vector<1x1x4x16xbf16>
    %37 = vector.shape_cast %36 : vector<1x1x4x16xbf16> to vector<4x16xbf16>
    %cst_49 = arith.constant dense<0.000000e+00> : vector<512x16xf32>
    %38 = tpu.matmul %35, %37, %cst_49 {dimension_numbers = #tpu.dot_dimension_numbers<[1], [0], [0], [1], [0, 0, 1, 1], [], []>} : vector<512x4xbf16>, vector<4x16xbf16>, vector<512x16xf32> -> vector<512x16xf32>
    %39 = arith.addf %32, %38 : vector<512x16xf32>
    %c0_50 = arith.constant 0 : index
    %c1_51 = arith.constant 1 : index
    %c8_52 = arith.constant 8 : index
    %c0_53 = arith.constant 0 : index
    %40 = vector.load %arg13[%c0_50, %c1_51, %c8_52, %c0_53] : memref<2x18x32x4xf32, #tpu.memory_space<vmem>>, vector<2x16x16x4xf32>
    %41 = vector.shape_cast %40 : vector<2x16x16x4xf32> to vector<512x4xf32>
    %42 = arith.truncf %41 : vector<512x4xf32> to vector<512x4xbf16>
    %c1_54 = arith.constant 1 : index
    %c1_55 = arith.constant 1 : index
    %c0_56 = arith.constant 0 : index
    %c0_57 = arith.constant 0 : index
    %43 = vector.load %arg4[%c1_54, %c1_55, %c0_56, %c0_57] : memref<3x3x4x16xbf16, #tpu.memory_space<vmem>>, vector<1x1x4x16xbf16>
    %44 = vector.shape_cast %43 : vector<1x1x4x16xbf16> to vector<4x16xbf16>
    %cst_58 = arith.constant dense<0.000000e+00> : vector<512x16xf32>
    %45 = tpu.matmul %42, %44, %cst_58 {dimension_numbers = #tpu.dot_dimension_numbers<[1], [0], [0], [1], [0, 0, 1, 1], [], []>} : vector<512x4xbf16>, vector<4x16xbf16>, vector<512x16xf32> -> vector<512x16xf32>
    %46 = arith.addf %39, %45 : vector<512x16xf32>
    %c0_59 = arith.constant 0 : index
    %c1_60 = arith.constant 1 : index
    %c9_61 = arith.constant 9 : index
    %c0_62 = arith.constant 0 : index
    %47 = vector.load %arg13[%c0_59, %c1_60, %c9_61, %c0_62] : memref<2x18x32x4xf32, #tpu.memory_space<vmem>>, vector<2x16x16x4xf32>
    %48 = vector.shape_cast %47 : vector<2x16x16x4xf32> to vector<512x4xf32>
    %49 = arith.truncf %48 : vector<512x4xf32> to vector<512x4xbf16>
    %c1_63 = arith.constant 1 : index
    %c2_64 = arith.constant 2 : index
    %c0_65 = arith.constant 0 : index
    %c0_66 = arith.constant 0 : index
    %50 = vector.load %arg4[%c1_63, %c2_64, %c0_65, %c0_66] : memref<3x3x4x16xbf16, #tpu.memory_space<vmem>>, vector<1x1x4x16xbf16>
    %51 = vector.shape_cast %50 : vector<1x1x4x16xbf16> to vector<4x16xbf16>
    %cst_67 = arith.constant dense<0.000000e+00> : vector<512x16xf32>
    %52 = tpu.matmul %49, %51, %cst_67 {dimension_numbers = #tpu.dot_dimension_numbers<[1], [0], [0], [1], [0, 0, 1, 1], [], []>} : vector<512x4xbf16>, vector<4x16xbf16>, vector<512x16xf32> -> vector<512x16xf32>
    %53 = arith.addf %46, %52 : vector<512x16xf32>
    %c0_68 = arith.constant 0 : index
    %c2_69 = arith.constant 2 : index
    %c7_70 = arith.constant 7 : index
    %c0_71 = arith.constant 0 : index
    %54 = vector.load %arg13[%c0_68, %c2_69, %c7_70, %c0_71] : memref<2x18x32x4xf32, #tpu.memory_space<vmem>>, vector<2x16x16x4xf32>
    %55 = vector.shape_cast %54 : vector<2x16x16x4xf32> to vector<512x4xf32>
    %56 = arith.truncf %55 : vector<512x4xf32> to vector<512x4xbf16>
    %c2_72 = arith.constant 2 : index
    %c0_73 = arith.constant 0 : index
    %c0_74 = arith.constant 0 : index
    %c0_75 = arith.constant 0 : index
    %57 = vector.load %arg4[%c2_72, %c0_73, %c0_74, %c0_75] : memref<3x3x4x16xbf16, #tpu.memory_space<vmem>>, vector<1x1x4x16xbf16>
    %58 = vector.shape_cast %57 : vector<1x1x4x16xbf16> to vector<4x16xbf16>
    %cst_76 = arith.constant dense<0.000000e+00> : vector<512x16xf32>
    %59 = tpu.matmul %56, %58, %cst_76 {dimension_numbers = #tpu.dot_dimension_numbers<[1], [0], [0], [1], [0, 0, 1, 1], [], []>} : vector<512x4xbf16>, vector<4x16xbf16>, vector<512x16xf32> -> vector<512x16xf32>
    %60 = arith.addf %53, %59 : vector<512x16xf32>
    %c0_77 = arith.constant 0 : index
    %c2_78 = arith.constant 2 : index
    %c8_79 = arith.constant 8 : index
    %c0_80 = arith.constant 0 : index
    %61 = vector.load %arg13[%c0_77, %c2_78, %c8_79, %c0_80] : memref<2x18x32x4xf32, #tpu.memory_space<vmem>>, vector<2x16x16x4xf32>
    %62 = vector.shape_cast %61 : vector<2x16x16x4xf32> to vector<512x4xf32>
    %63 = arith.truncf %62 : vector<512x4xf32> to vector<512x4xbf16>
    %c2_81 = arith.constant 2 : index
    %c1_82 = arith.constant 1 : index
    %c0_83 = arith.constant 0 : index
    %c0_84 = arith.constant 0 : index
    %64 = vector.load %arg4[%c2_81, %c1_82, %c0_83, %c0_84] : memref<3x3x4x16xbf16, #tpu.memory_space<vmem>>, vector<1x1x4x16xbf16>
    %65 = vector.shape_cast %64 : vector<1x1x4x16xbf16> to vector<4x16xbf16>
    %cst_85 = arith.constant dense<0.000000e+00> : vector<512x16xf32>
    %66 = tpu.matmul %63, %65, %cst_85 {dimension_numbers = #tpu.dot_dimension_numbers<[1], [0], [0], [1], [0, 0, 1, 1], [], []>} : vector<512x4xbf16>, vector<4x16xbf16>, vector<512x16xf32> -> vector<512x16xf32>
    %67 = arith.addf %60, %66 : vector<512x16xf32>
    %c0_86 = arith.constant 0 : index
    %c2_87 = arith.constant 2 : index
    %c9_88 = arith.constant 9 : index
    %c0_89 = arith.constant 0 : index
    %68 = vector.load %arg13[%c0_86, %c2_87, %c9_88, %c0_89] : memref<2x18x32x4xf32, #tpu.memory_space<vmem>>, vector<2x16x16x4xf32>
    %69 = vector.shape_cast %68 : vector<2x16x16x4xf32> to vector<512x4xf32>
    %70 = arith.truncf %69 : vector<512x4xf32> to vector<512x4xbf16>
    %c2_90 = arith.constant 2 : index
    %c2_91 = arith.constant 2 : index
    %c0_92 = arith.constant 0 : index
    %c0_93 = arith.constant 0 : index
    %71 = vector.load %arg4[%c2_90, %c2_91, %c0_92, %c0_93] : memref<3x3x4x16xbf16, #tpu.memory_space<vmem>>, vector<1x1x4x16xbf16>
    %72 = vector.shape_cast %71 : vector<1x1x4x16xbf16> to vector<4x16xbf16>
    %cst_94 = arith.constant dense<0.000000e+00> : vector<512x16xf32>
    %73 = tpu.matmul %70, %72, %cst_94 {dimension_numbers = #tpu.dot_dimension_numbers<[1], [0], [0], [1], [0, 0, 1, 1], [], []>} : vector<512x4xbf16>, vector<4x16xbf16>, vector<512x16xf32> -> vector<512x16xf32>
    %74 = arith.addf %67, %73 : vector<512x16xf32>
    %c0_95 = arith.constant 0 : index
    %c0_96 = arith.constant 0 : index
    %75 = vector.load %arg5[%c0_95, %c0_96] : memref<1x16xf32, #tpu.memory_space<vmem>>, vector<1x16xf32>
    %76 = vector.broadcast %75 : vector<1x16xf32> to vector<512x16xf32>
    %77 = arith.addf %74, %76 : vector<512x16xf32>
    %cst_97 = arith.constant dense<0.000000e+00> : vector<16xf32>
    %78 = vector.multi_reduction <add>, %77, %cst_97 [0] : vector<512x16xf32> to vector<16xf32>
    %79 = vector.shape_cast %78 : vector<16xf32> to vector<1x16xf32>
    %cst_98 = arith.constant 5.120000e+02 : f32
    %80 = vector.broadcast %cst_98 : f32 to vector<1x16xf32>
    %81 = arith.divf %79, %80 : vector<1x16xf32>
    %82 = vector.broadcast %81 : vector<1x16xf32> to vector<512x16xf32>
    %83 = arith.subf %77, %82 : vector<512x16xf32>
    %84 = arith.mulf %83, %83 : vector<512x16xf32>
    %cst_99 = arith.constant dense<0.000000e+00> : vector<16xf32>
    %85 = vector.multi_reduction <add>, %84, %cst_99 [0] : vector<512x16xf32> to vector<16xf32>
    %86 = vector.shape_cast %85 : vector<16xf32> to vector<1x16xf32>
    %cst_100 = arith.constant 5.120000e+02 : f32
    %87 = vector.broadcast %cst_100 : f32 to vector<1x16xf32>
    %88 = arith.divf %86, %87 : vector<1x16xf32>
    %89 = vector.broadcast %81 : vector<1x16xf32> to vector<512x16xf32>
    %90 = arith.subf %77, %89 : vector<512x16xf32>
    %cst_101 = arith.constant 9.99999974E-6 : f32
    %91 = vector.broadcast %cst_101 : f32 to vector<1x16xf32>
    %92 = arith.addf %88, %91 : vector<1x16xf32>
    %93 = math.rsqrt %92 : vector<1x16xf32>
    %94 = vector.broadcast %93 : vector<1x16xf32> to vector<512x16xf32>
    %95 = arith.mulf %90, %94 : vector<512x16xf32>
    %c0_102 = arith.constant 0 : index
    %c0_103 = arith.constant 0 : index
    %96 = vector.load %arg6[%c0_102, %c0_103] : memref<1x16xf32, #tpu.memory_space<vmem>>, vector<1x16xf32>
    %97 = vector.broadcast %96 : vector<1x16xf32> to vector<512x16xf32>
    %98 = arith.mulf %95, %97 : vector<512x16xf32>
    %c0_104 = arith.constant 0 : index
    %c0_105 = arith.constant 0 : index
    %99 = vector.load %arg7[%c0_104, %c0_105] : memref<1x16xf32, #tpu.memory_space<vmem>>, vector<1x16xf32>
    %100 = vector.broadcast %99 : vector<1x16xf32> to vector<512x16xf32>
    %101 = arith.addf %98, %100 : vector<512x16xf32>
    %102 = vector.shape_cast %101 : vector<512x16xf32> to vector<2x256x16xf32>
    %103 = vector.shape_cast %6 : vector<2x16xf32> to vector<2x1x16xf32>
    %104 = vector.broadcast %103 : vector<2x1x16xf32> to vector<2x256x16xf32>
    %105 = arith.addf %102, %104 : vector<2x256x16xf32>
    %cst_106 = arith.constant 0.000000e+00 : f32
    %106 = vector.broadcast %cst_106 : f32 to vector<2x256x16xf32>
    %107 = arith.maximumf %105, %106 : vector<2x256x16xf32>
    %cst_107 = arith.constant 0.000000e+00 : f32
    %108 = vector.broadcast %cst_107 : f32 to vector<2x18x32x16xf32>
    %c0_108 = arith.constant 0 : index
    %c0_109 = arith.constant 0 : index
    %c0_110 = arith.constant 0 : index
    %c0_111 = arith.constant 0 : index
    %109 = vector.load %arg14[%c0_108, %c0_109, %c0_110, %c0_111] : memref<2x18x32x16xf32, #tpu.memory_space<vmem>>, vector<2x18x32x16xf32>
    tpu.vector_store %arg14[%c0_108, %c0_109, %c0_110, %c0_111], %108 {strides = array<i32>} : memref<2x18x32x16xf32, #tpu.memory_space<vmem>>, vector<2x18x32x16xf32>,
    %110 = vector.shape_cast %107 : vector<2x256x16xf32> to vector<2x16x16x16xf32>
    %c0_112 = arith.constant 0 : index
    %c1_113 = arith.constant 1 : index
    %c8_114 = arith.constant 8 : index
    %c0_115 = arith.constant 0 : index
    %111 = vector.load %arg14[%c0_112, %c1_113, %c8_114, %c0_115] : memref<2x18x32x16xf32, #tpu.memory_space<vmem>>, vector<2x16x16x16xf32>
    tpu.vector_store %arg14[%c0_112, %c1_113, %c8_114, %c0_115], %110 {strides = array<i32>} : memref<2x18x32x16xf32, #tpu.memory_space<vmem>>, vector<2x16x16x16xf32>,
    %cst_116 = arith.constant 0.000000e+00 : f32
    %112 = vector.broadcast %cst_116 : f32 to vector<512x16xf32>
    %c0_117 = arith.constant 0 : index
    %c0_118 = arith.constant 0 : index
    %c7_119 = arith.constant 7 : index
    %c0_120 = arith.constant 0 : index
    %113 = vector.load %arg14[%c0_117, %c0_118, %c7_119, %c0_120] : memref<2x18x32x16xf32, #tpu.memory_space<vmem>>, vector<2x16x16x16xf32>
    %114 = vector.shape_cast %113 : vector<2x16x16x16xf32> to vector<512x16xf32>
    %115 = arith.truncf %114 : vector<512x16xf32> to vector<512x16xbf16>
    %c0_121 = arith.constant 0 : index
    %c0_122 = arith.constant 0 : index
    %c0_123 = arith.constant 0 : index
    %c0_124 = arith.constant 0 : index
    %116 = vector.load %arg8[%c0_121, %c0_122, %c0_123, %c0_124] : memref<3x3x16x16xbf16, #tpu.memory_space<vmem>>, vector<1x1x16x16xbf16>
    %117 = vector.shape_cast %116 : vector<1x1x16x16xbf16> to vector<16x16xbf16>
    %cst_125 = arith.constant dense<0.000000e+00> : vector<512x16xf32>
    %118 = tpu.matmul %115, %117, %cst_125 {dimension_numbers = #tpu.dot_dimension_numbers<[1], [0], [0], [1], [0, 0, 1, 1], [], []>} : vector<512x16xbf16>, vector<16x16xbf16>, vector<512x16xf32> -> vector<512x16xf32>
    %119 = arith.addf %112, %118 : vector<512x16xf32>
    %c0_126 = arith.constant 0 : index
    %c0_127 = arith.constant 0 : index
    %c8_128 = arith.constant 8 : index
    %c0_129 = arith.constant 0 : index
    %120 = vector.load %arg14[%c0_126, %c0_127, %c8_128, %c0_129] : memref<2x18x32x16xf32, #tpu.memory_space<vmem>>, vector<2x16x16x16xf32>
    %121 = vector.shape_cast %120 : vector<2x16x16x16xf32> to vector<512x16xf32>
    %122 = arith.truncf %121 : vector<512x16xf32> to vector<512x16xbf16>
    %c0_130 = arith.constant 0 : index
    %c1_131 = arith.constant 1 : index
    %c0_132 = arith.constant 0 : index
    %c0_133 = arith.constant 0 : index
    %123 = vector.load %arg8[%c0_130, %c1_131, %c0_132, %c0_133] : memref<3x3x16x16xbf16, #tpu.memory_space<vmem>>, vector<1x1x16x16xbf16>
    %124 = vector.shape_cast %123 : vector<1x1x16x16xbf16> to vector<16x16xbf16>
    %cst_134 = arith.constant dense<0.000000e+00> : vector<512x16xf32>
    %125 = tpu.matmul %122, %124, %cst_134 {dimension_numbers = #tpu.dot_dimension_numbers<[1], [0], [0], [1], [0, 0, 1, 1], [], []>} : vector<512x16xbf16>, vector<16x16xbf16>, vector<512x16xf32> -> vector<512x16xf32>
    %126 = arith.addf %119, %125 : vector<512x16xf32>
    %c0_135 = arith.constant 0 : index
    %c0_136 = arith.constant 0 : index
    %c9_137 = arith.constant 9 : index
    %c0_138 = arith.constant 0 : index
    %127 = vector.load %arg14[%c0_135, %c0_136, %c9_137, %c0_138] : memref<2x18x32x16xf32, #tpu.memory_space<vmem>>, vector<2x16x16x16xf32>
    %128 = vector.shape_cast %127 : vector<2x16x16x16xf32> to vector<512x16xf32>
    %129 = arith.truncf %128 : vector<512x16xf32> to vector<512x16xbf16>
    %c0_139 = arith.constant 0 : index
    %c2_140 = arith.constant 2 : index
    %c0_141 = arith.constant 0 : index
    %c0_142 = arith.constant 0 : index
    %130 = vector.load %arg8[%c0_139, %c2_140, %c0_141, %c0_142] : memref<3x3x16x16xbf16, #tpu.memory_space<vmem>>, vector<1x1x16x16xbf16>
    %131 = vector.shape_cast %130 : vector<1x1x16x16xbf16> to vector<16x16xbf16>
    %cst_143 = arith.constant dense<0.000000e+00> : vector<512x16xf32>
    %132 = tpu.matmul %129, %131, %cst_143 {dimension_numbers = #tpu.dot_dimension_numbers<[1], [0], [0], [1], [0, 0, 1, 1], [], []>} : vector<512x16xbf16>, vector<16x16xbf16>, vector<512x16xf32> -> vector<512x16xf32>
    %133 = arith.addf %126, %132 : vector<512x16xf32>
    %c0_144 = arith.constant 0 : index
    %c1_145 = arith.constant 1 : index
    %c7_146 = arith.constant 7 : index
    %c0_147 = arith.constant 0 : index
    %134 = vector.load %arg14[%c0_144, %c1_145, %c7_146, %c0_147] : memref<2x18x32x16xf32, #tpu.memory_space<vmem>>, vector<2x16x16x16xf32>
    %135 = vector.shape_cast %134 : vector<2x16x16x16xf32> to vector<512x16xf32>
    %136 = arith.truncf %135 : vector<512x16xf32> to vector<512x16xbf16>
    %c1_148 = arith.constant 1 : index
    %c0_149 = arith.constant 0 : index
    %c0_150 = arith.constant 0 : index
    %c0_151 = arith.constant 0 : index
    %137 = vector.load %arg8[%c1_148, %c0_149, %c0_150, %c0_151] : memref<3x3x16x16xbf16, #tpu.memory_space<vmem>>, vector<1x1x16x16xbf16>
    %138 = vector.shape_cast %137 : vector<1x1x16x16xbf16> to vector<16x16xbf16>
    %cst_152 = arith.constant dense<0.000000e+00> : vector<512x16xf32>
    %139 = tpu.matmul %136, %138, %cst_152 {dimension_numbers = #tpu.dot_dimension_numbers<[1], [0], [0], [1], [0, 0, 1, 1], [], []>} : vector<512x16xbf16>, vector<16x16xbf16>, vector<512x16xf32> -> vector<512x16xf32>
    %140 = arith.addf %133, %139 : vector<512x16xf32>
    %c0_153 = arith.constant 0 : index
    %c1_154 = arith.constant 1 : index
    %c8_155 = arith.constant 8 : index
    %c0_156 = arith.constant 0 : index
    %141 = vector.load %arg14[%c0_153, %c1_154, %c8_155, %c0_156] : memref<2x18x32x16xf32, #tpu.memory_space<vmem>>, vector<2x16x16x16xf32>
    %142 = vector.shape_cast %141 : vector<2x16x16x16xf32> to vector<512x16xf32>
    %143 = arith.truncf %142 : vector<512x16xf32> to vector<512x16xbf16>
    %c1_157 = arith.constant 1 : index
    %c1_158 = arith.constant 1 : index
    %c0_159 = arith.constant 0 : index
    %c0_160 = arith.constant 0 : index
    %144 = vector.load %arg8[%c1_157, %c1_158, %c0_159, %c0_160] : memref<3x3x16x16xbf16, #tpu.memory_space<vmem>>, vector<1x1x16x16xbf16>
    %145 = vector.shape_cast %144 : vector<1x1x16x16xbf16> to vector<16x16xbf16>
    %cst_161 = arith.constant dense<0.000000e+00> : vector<512x16xf32>
    %146 = tpu.matmul %143, %145, %cst_161 {dimension_numbers = #tpu.dot_dimension_numbers<[1], [0], [0], [1], [0, 0, 1, 1], [], []>} : vector<512x16xbf16>, vector<16x16xbf16>, vector<512x16xf32> -> vector<512x16xf32>
    %147 = arith.addf %140, %146 : vector<512x16xf32>
    %c0_162 = arith.constant 0 : index
    %c1_163 = arith.constant 1 : index
    %c9_164 = arith.constant 9 : index
    %c0_165 = arith.constant 0 : index
    %148 = vector.load %arg14[%c0_162, %c1_163, %c9_164, %c0_165] : memref<2x18x32x16xf32, #tpu.memory_space<vmem>>, vector<2x16x16x16xf32>
    %149 = vector.shape_cast %148 : vector<2x16x16x16xf32> to vector<512x16xf32>
    %150 = arith.truncf %149 : vector<512x16xf32> to vector<512x16xbf16>
    %c1_166 = arith.constant 1 : index
    %c2_167 = arith.constant 2 : index
    %c0_168 = arith.constant 0 : index
    %c0_169 = arith.constant 0 : index
    %151 = vector.load %arg8[%c1_166, %c2_167, %c0_168, %c0_169] : memref<3x3x16x16xbf16, #tpu.memory_space<vmem>>, vector<1x1x16x16xbf16>
    %152 = vector.shape_cast %151 : vector<1x1x16x16xbf16> to vector<16x16xbf16>
    %cst_170 = arith.constant dense<0.000000e+00> : vector<512x16xf32>
    %153 = tpu.matmul %150, %152, %cst_170 {dimension_numbers = #tpu.dot_dimension_numbers<[1], [0], [0], [1], [0, 0, 1, 1], [], []>} : vector<512x16xbf16>, vector<16x16xbf16>, vector<512x16xf32> -> vector<512x16xf32>
    %154 = arith.addf %147, %153 : vector<512x16xf32>
    %c0_171 = arith.constant 0 : index
    %c2_172 = arith.constant 2 : index
    %c7_173 = arith.constant 7 : index
    %c0_174 = arith.constant 0 : index
    %155 = vector.load %arg14[%c0_171, %c2_172, %c7_173, %c0_174] : memref<2x18x32x16xf32, #tpu.memory_space<vmem>>, vector<2x16x16x16xf32>
    %156 = vector.shape_cast %155 : vector<2x16x16x16xf32> to vector<512x16xf32>
    %157 = arith.truncf %156 : vector<512x16xf32> to vector<512x16xbf16>
    %c2_175 = arith.constant 2 : index
    %c0_176 = arith.constant 0 : index
    %c0_177 = arith.constant 0 : index
    %c0_178 = arith.constant 0 : index
    %158 = vector.load %arg8[%c2_175, %c0_176, %c0_177, %c0_178] : memref<3x3x16x16xbf16, #tpu.memory_space<vmem>>, vector<1x1x16x16xbf16>
    %159 = vector.shape_cast %158 : vector<1x1x16x16xbf16> to vector<16x16xbf16>
    %cst_179 = arith.constant dense<0.000000e+00> : vector<512x16xf32>
    %160 = tpu.matmul %157, %159, %cst_179 {dimension_numbers = #tpu.dot_dimension_numbers<[1], [0], [0], [1], [0, 0, 1, 1], [], []>} : vector<512x16xbf16>, vector<16x16xbf16>, vector<512x16xf32> -> vector<512x16xf32>
    %161 = arith.addf %154, %160 : vector<512x16xf32>
    %c0_180 = arith.constant 0 : index
    %c2_181 = arith.constant 2 : index
    %c8_182 = arith.constant 8 : index
    %c0_183 = arith.constant 0 : index
    %162 = vector.load %arg14[%c0_180, %c2_181, %c8_182, %c0_183] : memref<2x18x32x16xf32, #tpu.memory_space<vmem>>, vector<2x16x16x16xf32>
    %163 = vector.shape_cast %162 : vector<2x16x16x16xf32> to vector<512x16xf32>
    %164 = arith.truncf %163 : vector<512x16xf32> to vector<512x16xbf16>
    %c2_184 = arith.constant 2 : index
    %c1_185 = arith.constant 1 : index
    %c0_186 = arith.constant 0 : index
    %c0_187 = arith.constant 0 : index
    %165 = vector.load %arg8[%c2_184, %c1_185, %c0_186, %c0_187] : memref<3x3x16x16xbf16, #tpu.memory_space<vmem>>, vector<1x1x16x16xbf16>
    %166 = vector.shape_cast %165 : vector<1x1x16x16xbf16> to vector<16x16xbf16>
    %cst_188 = arith.constant dense<0.000000e+00> : vector<512x16xf32>
    %167 = tpu.matmul %164, %166, %cst_188 {dimension_numbers = #tpu.dot_dimension_numbers<[1], [0], [0], [1], [0, 0, 1, 1], [], []>} : vector<512x16xbf16>, vector<16x16xbf16>, vector<512x16xf32> -> vector<512x16xf32>
    %168 = arith.addf %161, %167 : vector<512x16xf32>
    %c0_189 = arith.constant 0 : index
    %c2_190 = arith.constant 2 : index
    %c9_191 = arith.constant 9 : index
    %c0_192 = arith.constant 0 : index
    %169 = vector.load %arg14[%c0_189, %c2_190, %c9_191, %c0_192] : memref<2x18x32x16xf32, #tpu.memory_space<vmem>>, vector<2x16x16x16xf32>
    %170 = vector.shape_cast %169 : vector<2x16x16x16xf32> to vector<512x16xf32>
    %171 = arith.truncf %170 : vector<512x16xf32> to vector<512x16xbf16>
    %c2_193 = arith.constant 2 : index
    %c2_194 = arith.constant 2 : index
    %c0_195 = arith.constant 0 : index
    %c0_196 = arith.constant 0 : index
    %172 = vector.load %arg8[%c2_193, %c2_194, %c0_195, %c0_196] : memref<3x3x16x16xbf16, #tpu.memory_space<vmem>>, vector<1x1x16x16xbf16>
    %173 = vector.shape_cast %172 : vector<1x1x16x16xbf16> to vector<16x16xbf16>
    %cst_197 = arith.constant dense<0.000000e+00> : vector<512x16xf32>
    %174 = tpu.matmul %171, %173, %cst_197 {dimension_numbers = #tpu.dot_dimension_numbers<[1], [0], [0], [1], [0, 0, 1, 1], [], []>} : vector<512x16xbf16>, vector<16x16xbf16>, vector<512x16xf32> -> vector<512x16xf32>
    %175 = arith.addf %168, %174 : vector<512x16xf32>
    %c0_198 = arith.constant 0 : index
    %c0_199 = arith.constant 0 : index
    %176 = vector.load %arg9[%c0_198, %c0_199] : memref<1x16xf32, #tpu.memory_space<vmem>>, vector<1x16xf32>
    %177 = vector.broadcast %176 : vector<1x16xf32> to vector<512x16xf32>
    %178 = arith.addf %175, %177 : vector<512x16xf32>
    %cst_200 = arith.constant dense<0.000000e+00> : vector<16xf32>
    %179 = vector.multi_reduction <add>, %178, %cst_200 [0] : vector<512x16xf32> to vector<16xf32>
    %180 = vector.shape_cast %179 : vector<16xf32> to vector<1x16xf32>
    %cst_201 = arith.constant 5.120000e+02 : f32
    %181 = vector.broadcast %cst_201 : f32 to vector<1x16xf32>
    %182 = arith.divf %180, %181 : vector<1x16xf32>
    %183 = vector.broadcast %182 : vector<1x16xf32> to vector<512x16xf32>
    %184 = arith.subf %178, %183 : vector<512x16xf32>
    %185 = arith.mulf %184, %184 : vector<512x16xf32>
    %cst_202 = arith.constant dense<0.000000e+00> : vector<16xf32>
    %186 = vector.multi_reduction <add>, %185, %cst_202 [0] : vector<512x16xf32> to vector<16xf32>
    %187 = vector.shape_cast %186 : vector<16xf32> to vector<1x16xf32>
    %cst_203 = arith.constant 5.120000e+02 : f32
    %188 = vector.broadcast %cst_203 : f32 to vector<1x16xf32>
    %189 = arith.divf %187, %188 : vector<1x16xf32>
    %190 = vector.broadcast %182 : vector<1x16xf32> to vector<512x16xf32>
    %191 = arith.subf %178, %190 : vector<512x16xf32>
    %cst_204 = arith.constant 9.99999974E-6 : f32
    %192 = vector.broadcast %cst_204 : f32 to vector<1x16xf32>
    %193 = arith.addf %189, %192 : vector<1x16xf32>
    %194 = math.rsqrt %193 : vector<1x16xf32>
    %195 = vector.broadcast %194 : vector<1x16xf32> to vector<512x16xf32>
    %196 = arith.mulf %191, %195 : vector<512x16xf32>
    %c0_205 = arith.constant 0 : index
    %c0_206 = arith.constant 0 : index
    %197 = vector.load %arg10[%c0_205, %c0_206] : memref<1x16xf32, #tpu.memory_space<vmem>>, vector<1x16xf32>
    %198 = vector.broadcast %197 : vector<1x16xf32> to vector<512x16xf32>
    %199 = arith.mulf %196, %198 : vector<512x16xf32>
    %c0_207 = arith.constant 0 : index
    %c0_208 = arith.constant 0 : index
    %200 = vector.load %arg11[%c0_207, %c0_208] : memref<1x16xf32, #tpu.memory_space<vmem>>, vector<1x16xf32>
    %201 = vector.broadcast %200 : vector<1x16xf32> to vector<512x16xf32>
    %202 = arith.addf %199, %201 : vector<512x16xf32>
    %cst_209 = arith.constant 0.000000e+00 : f32
    %203 = vector.broadcast %cst_209 : f32 to vector<512x16xf32>
    %204 = arith.maximumf %202, %203 : vector<512x16xf32>
    %205 = vector.shape_cast %204 : vector<512x16xf32> to vector<2x16x16x16xf32>
    %c0_210 = arith.constant 0 : index
    %c0_211 = arith.constant 0 : index
    %c0_212 = arith.constant 0 : index
    %c0_213 = arith.constant 0 : index
    %206 = vector.load %arg12[%c0_210, %c0_211, %c0_212, %c0_213] : memref<2x16x16x16xf32, #tpu.memory_space<vmem>>, vector<2x16x16x16xf32>
    tpu.vector_store %arg12[%c0_210, %c0_211, %c0_212, %c0_213], %205 {strides = array<i32>} : memref<2x16x16x16xf32, #tpu.memory_space<vmem>>, vector<2x16x16x16xf32>,
    return
  }
}

</mosaic_0001>

<bundles_post_ra>
// kernel: double_conv.1
= control target key start
LH: loop header
LB: loop body
LE: loop exit
PB: predicated region body
PF: predicated region fallthrough
CT: control target
= control target key end

     0   :  { %vm646_vm0 = vcmask 1041408   ;;  %vm81_vm1 = vcmask 31744   ;;  %v16550_v2 = vmov 0.0   ;;  %vm64_vm2 = vcmask 261120   ;;  %s16537_s2 = inlined_call_operand.vmem [shape: bf16[32,16], index: 2, kind: input, shape index: {}]   ;;  %s16538_s4 = inlined_call_operand.vmem [shape: bf16[3,3,4,16], index: 4, kind: input, shape index: {}]   ;;  %s16539_s1 = inlined_call_operand.vmem [shape: f32[2,32], index: 1, kind: input, shape index: {}]   ;;  %s16540_s0 = inlined_call_operand.vmem [shape: f32[2,16,16,4], index: 0, kind: input, shape index: {}]   ;;  %s16541_s3 = inlined_call_operand.vmem [shape: f32[1,16], index: 3, kind: input, shape index: {}]   ;;  %s16542_s5 = inlined_call_operand.vmem [shape: f32[1,16], index: 5, kind: input, shape index: {}]   ;;  %s16543_s6 = inlined_call_operand.vmem [shape: f32[1,16], index: 6, kind: input, shape index: {}]   ;;  %s16544_s7 = inlined_call_operand.vmem [shape: f32[1,16], index: 7, kind: input, shape index: {}]   ;;  %s16545_s8 = inlined_call_operand.vmem [shape: bf16[3,3,16,16], index: 8, kind: input, shape index: {}]   ;;  %s16546_s9 = inlined_call_operand.vmem [shape: f32[1,16], index: 9, kind: input, shape index: {}]   ;;  %s16547_s10 = inlined_call_operand.vmem [shape: f32[1,16], index: 10, kind: input, shape index: {}]   ;;  %s16548_s11 = inlined_call_operand.vmem [shape: f32[1,16], index: 11, kind: input, shape index: {}]   ;;  %s16549_s12 = inlined_call_operand.vmem [shape: f32[2,16,16,16], index: 12, kind: output, shape index: {}]  }
   0x1   :  { %v10355_v0 = vld [vmem:[%s16537_s2 + $0x8] sm:$0xff]  ;;  %v9718_v1 = vld [vmem:[%s16538_s4 + $0x2] sm:$0x3]  ;;  %83 = vst.msk [vmem:[#allocation2 + $0x8] sm:$0xff] %vm81_vm1, %v16550_v2  ;;  %v451_v4 = vld [vmem:[%s16538_s4] sm:$0x3] }
   0x2   :  { %v648_v3 = vsel %vm646_vm0, %v9718_v1, 0  ;;  %84 = vst.msk [vmem:[#allocation2 + $0x10] sm:$0xff] %vm81_vm1, %v16550_v2  ;;  %74 = vmatpush.bf16.msra.mxu0 %v10355_v0  ;;  %v10354_v5 = vld [vmem:[%s16537_s2] sm:$0xff]  ;;  %v916_v6 = vsel %vm646_vm0, %v451_v4, 0  ;;  %v9849_v12 = vld [vmem:[%s16538_s4 + $0x8] sm:$0x3] }
   0x3   :  { %657 = vmatpush.bf16.msra.mxu1 %v648_v3  ;;  %v42_v7 = vld [vmem:[%s16539_s1] sm:$0x3]  ;;  %82 = vst.msk [vmem:[#allocation2] sm:$0xff] %vm81_vm1, %v16550_v2  ;;  %10365 = vmatpush.bf16.msra.mxu3 %v648_v3  ;;  %v2142_v13 = vsel %vm646_vm0, %v9849_v12, 0  ;;  %v9783_v18 = vld [vmem:[%s16538_s4 + $0x4] sm:$0x3] }
   0x4   :  { %10366 = vmatpush.bf16.msra.mxu2 %v916_v6  ;;  %85 = vst.msk [vmem:[#allocation2 + $0x18] sm:$0xff] %vm81_vm1, %v16550_v2  ;;  %v43_v8 = vpack.c.bf16 %v42_v7, %v42_v7  ;;  %v258_v17 = vld [vmem:[%s16540_s0 + $0x100] sm:$0xff]  ;;  %v259_v20 = vld [vmem:[%s16540_s0 + $0x108] sm:$0xff]  ;;  %v1282_v21 = vsel %vm646_vm0, %v9783_v18, 0  ;;  %v260_v27 = vld [vmem:[%s16540_s0 + $0x110] sm:$0xff]  ;;  %vm4166_vm3 = vcmask 130048  }
   0x5   :  { %86 = vst.msk [vmem:[#allocation2 + $0x20] sm:$0xff] %vm81_vm1, %v16550_v2  ;;  %v9816_v19 = vld [vmem:[%s16538_s4 + $0x6] sm:$0x3]  ;;  %v255_v24 = vld [vmem:[%s16540_s0 + $0xe8] sm:$0xff]  ;;  %v261_v28 = vld [vmem:[%s16540_s0 + $0x118] sm:$0xff] }
   0x6   :  { %87 = vst.msk [vmem:[#allocation2 + $0x28] sm:$0xff] %vm81_vm1, %v16550_v2  ;;  %75 = vmatpush.bf16.msra.mxu0 %v10354_v5  ;;  %v1712_v22 = vsel %vm646_vm0, %v9816_v19, 0  ;;  %v254_v23 = vld [vmem:[%s16540_s0 + $0xe0] sm:$0xff]  ;;  %v227_v26 = vld [vmem:[%s16540_s0 + $0x8] sm:$0xff]  ;;  %v228_v29 = vld [vmem:[%s16540_s0 + $0x10] sm:$0xff] }
   0x7   :  { %88 = vst.msk [vmem:[#allocation2 + $0x30] sm:$0xff] %vm81_vm1, %v16550_v2  ;;  %2151 = vmatpush.bf16.msrb.mxu1 %v2142_v13  ;;  %1291 = vmatpush.bf16.msrb.mxu3 %v1282_v21  ;;  %v226_v25 = vld [vmem:[%s16540_s0] sm:$0xff]  ;;  %v229_v30 = vld [vmem:[%s16540_s0 + $0x18] sm:$0xff]  ;;  %v263_v34 = vld [vmem:[%s16540_s0 + $0x128] sm:$0xff] }
   0x8   :  { %v452_v9 = vld [vmem:[#allocation2 + $0x8] sm:$0xff]  ;;  %89 = vst.msk [vmem:[#allocation2 + $0x38] sm:$0xff] %vm81_vm1, %v16550_v2  ;;  %v262_v32 = vld [vmem:[%s16540_s0 + $0x120] sm:$0xff]  ;;  %v264_v47 = vld [vmem:[%s16540_s0 + $0x130] sm:$0xff] }
   0x9   :  { %v453_v10 = vld [vmem:[#allocation2 + $0x10] sm:$0xff]  ;;  %90 = vst.msk [vmem:[#allocation2 + $0x40] sm:$0xff] %vm81_vm1, %v16550_v2  ;;  %9717 = vmatmul.msk.bf16.vlgmr.msra.gmra.mxu0 %vm64_vm2, %v43_v8  ;;  %v230_v45 = vld [vmem:[%s16540_s0 + $0x20] sm:$0xff]  ;;  %v231_v46 = vld [vmem:[%s16540_s0 + $0x28] sm:$0xff] }
   0xa   :  { %925 = vmatpush.bf16.msrb.mxu0 %v916_v6  ;;  %v516_v11 = vpack.c.bf16 %v453_v10, %v452_v9  ;;  %91 = vst.msk [vmem:[#allocation2 + $0x48] sm:$0xff] %vm81_vm1, %v16550_v2  ;;  %v355_v14 = vld [vmem:[#allocation2 + $0x7] sm:$0xff]  ;;  %v356_v15 = vld [vmem:[#allocation2 + $0xf] sm:$0xff]  ;;  %v265_v48 = vld [vmem:[%s16540_s0 + $0x138] sm:$0xff] }
   0xb   :  { %92 = vst.msk [vmem:[#allocation2 + $0x50] sm:$0xff] %vm81_vm1, %v16550_v2  ;;  %v419_v16 = vpack.c.bf16 %v356_v15, %v355_v14  ;;  %v232_v61 = vld [vmem:[%s16540_s0 + $0x30] sm:$0xff]  ;;  %v233_v62 = vld [vmem:[%s16540_s0 + $0x38] sm:$0xff]  ;;  %v266_v63 = vld [vmem:[%s16540_s0 + $0x140] sm:$0xff] }
   0xc   :  { %9719 = vmatmul.msk.bf16.vlgmr.msra.gmra.mxu1 %vm81_vm1, %v516_v11  ;;  %93 = vst.msk [vmem:[#allocation2 + $0x58] sm:$0xff] %vm81_vm1, %v16550_v2  ;;  %v267_v0 = vld [vmem:[%s16540_s0 + $0x148] sm:$0xff]  ;;  %v234_v14 = vld [vmem:[%s16540_s0 + $0x40] sm:$0xff] }
   0xd   :  { %94 = vst.msk [vmem:[#allocation2 + $0x60] sm:$0xff] %vm81_vm1, %v16550_v2  ;;  %v235_v15 = vld [vmem:[%s16540_s0 + $0x48] sm:$0xff] }
   0xe   :  { %95 = vst.msk [vmem:[#allocation2 + $0x68] sm:$0xff] %vm81_vm1, %v16550_v2  ;;  %1721 = vmatpush.bf16.msra.mxu0 %v1712_v22 }
   0xf   :  { %96 = vst.msk [vmem:[#allocation2 + $0x70] sm:$0xff] %vm81_vm1, %v16550_v2 }
  0x10   :  { %97 = vst.msk [vmem:[#allocation2 + $0x78] sm:$0xff] %vm81_vm1, %v16550_v2 }
  0x11   :  { %98 = vst.msk [vmem:[#allocation2 + $0x80] sm:$0xff] %vm81_vm1, %v16550_v2 }
  0x12   :  { %99 = vst.msk [vmem:[#allocation2 + $0x88] sm:$0xff] %vm81_vm1, %v16550_v2 }
  0x13   :  { %100 = vst.msk [vmem:[#allocation2 + $0x90] sm:$0xff] %vm81_vm1, %v16550_v2 }
  0x14   :  { %101 = vst.msk [vmem:[#allocation2 + $0x98] sm:$0xff] %vm81_vm1, %v16550_v2 }
  0x15   :  { %102 = vst.msk [vmem:[#allocation2 + $0xa0] sm:$0xff] %vm81_vm1, %v16550_v2 }
  0x16   :  { %103 = vst.msk [vmem:[#allocation2 + $0xa8] sm:$0xff] %vm81_vm1, %v16550_v2 }
  0x17   :  { %104 = vst.msk [vmem:[#allocation2 + $0xb0] sm:$0xff] %vm81_vm1, %v16550_v2 }
  0x18   :  { %105 = vst.msk [vmem:[#allocation2 + $0xb8] sm:$0xff] %vm81_vm1, %v16550_v2 }
  0x19   :  { %106 = vst.msk [vmem:[#allocation2 + $0xc0] sm:$0xff] %vm81_vm1, %v16550_v2  ;;  %9751 = vmatmul.msk.bf16.vlgmr.msrb.gmra.mxu0 %vm81_vm1, %v419_v16  ;;  %v268_v16 = vld [vmem:[%s16540_s0 + $0x150] sm:$0xff] }
  0x1a   :  { %107 = vst.msk [vmem:[#allocation2 + $0xc8] sm:$0xff] %vm81_vm1, %v16550_v2 }
  0x1b   :  { %108 = vst.msk [vmem:[#allocation2 + $0xd0] sm:$0xff] %vm81_vm1, %v16550_v2 }
  0x1c   :  { %109 = vst.msk [vmem:[#allocation2 + $0xd8] sm:$0xff] %vm81_vm1, %v16550_v2 }
  0x1d   :  { %110 = vst.msk [vmem:[#allocation2 + $0xe0] sm:$0xff] %vm81_vm1, %v16550_v2 }
  0x1e   :  { %111 = vst.msk [vmem:[#allocation2 + $0xe8] sm:$0xff] %vm81_vm1, %v16550_v2 }
  0x1f   :  { %112 = vst.msk [vmem:[#allocation2 + $0xf0] sm:$0xff] %vm81_vm1, %v16550_v2 }
  0x20   :  { %113 = vst.msk [vmem:[#allocation2 + $0xf8] sm:$0xff] %vm81_vm1, %v16550_v2 }
  0x21   :  { %114 = vst.msk [vmem:[#allocation2 + $0x100] sm:$0xff] %vm81_vm1, %v16550_v2 }
  0x22   :  { %115 = vst.msk [vmem:[#allocation2 + $0x108] sm:$0xff] %vm81_vm1, %v16550_v2 }
  0x23   :  { %116 = vst.msk [vmem:[#allocation2 + $0x110] sm:$0xff] %vm81_vm1, %v16550_v2 }
  0x24   :  { %117 = vst.msk [vmem:[#allocation2 + $0x118] sm:$0xff] %vm81_vm1, %v16550_v2 }
  0x25   :  { %118 = vst.msk [vmem:[#allocation2 + $0x120] sm:$0xff] %vm81_vm1, %v16550_v2 }
  0x26   :  { %119 = vst.msk [vmem:[#allocation2 + $0x128] sm:$0xff] %vm81_vm1, %v16550_v2 }
  0x27   :  { %120 = vst.msk [vmem:[#allocation2 + $0x130] sm:$0xff] %vm81_vm1, %v16550_v2 }
  0x28   :  { %121 = vst.msk [vmem:[#allocation2 + $0x138] sm:$0xff] %vm81_vm1, %v16550_v2 }
  0x29   :  { %122 = vst.msk [vmem:[#allocation2 + $0x140] sm:$0xff] %vm81_vm1, %v16550_v2 }
  0x2a   :  { %123 = vst.msk [vmem:[#allocation2 + $0x148] sm:$0xff] %vm81_vm1, %v16550_v2 }
  0x2b   :  { %124 = vst.msk [vmem:[#allocation2 + $0x150] sm:$0xff] %vm81_vm1, %v16550_v2 }
  0x2c   :  { %125 = vst.msk [vmem:[#allocation2 + $0x158] sm:$0xff] %vm81_vm1, %v16550_v2 }
  0x2d   :  { %126 = vst.msk [vmem:[#allocation2 + $0x160] sm:$0xff] %vm81_vm1, %v16550_v2 }
  0x2e   :  { %127 = vst.msk [vmem:[#allocation2 + $0x168] sm:$0xff] %vm81_vm1, %v16550_v2 }
  0x2f   :  { %128 = vst.msk [vmem:[#allocation2 + $0x170] sm:$0xff] %vm81_vm1, %v16550_v2 }
  0x30   :  { %129 = vst.msk [vmem:[#allocation2 + $0x178] sm:$0xff] %vm81_vm1, %v16550_v2 }
  0x31   :  { %130 = vst.msk [vmem:[#allocation2 + $0x180] sm:$0xff] %vm81_vm1, %v16550_v2 }
  0x32   :  { %131 = vst.msk [vmem:[#allocation2 + $0x188] sm:$0xff] %vm81_vm1, %v16550_v2 }
  0x33   :  { %132 = vst.msk [vmem:[#allocation2 + $0x190] sm:$0xff] %vm81_vm1, %v16550_v2 }
  0x34   :  { %133 = vst.msk [vmem:[#allocation2 + $0x198] sm:$0xff] %vm81_vm1, %v16550_v2 }
  0x35   :  { %134 = vst.msk [vmem:[#allocation2 + $0x1a0] sm:$0xff] %vm81_vm1, %v16550_v2 }
  0x36   :  { %135 = vst.msk [vmem:[#allocation2 + $0x1a8] sm:$0xff] %vm81_vm1, %v16550_v2 }
  0x37   :  { %136 = vst.msk [vmem:[#allocation2 + $0x1b0] sm:$0xff] %vm81_vm1, %v16550_v2 }
  0x38   :  { %137 = vst.msk [vmem:[#allocation2 + $0x1b8] sm:$0xff] %vm81_vm1, %v16550_v2 }
  0x39   :  { %138 = vst.msk [vmem:[#allocation2 + $0x1c0] sm:$0xff] %vm81_vm1, %v16550_v2 }
  0x3a   :  { %139 = vst.msk [vmem:[#allocation2 + $0x1c8] sm:$0xff] %vm81_vm1, %v16550_v2 }
  0x3b   :  { %140 = vst.msk [vmem:[#allocation2 + $0x1d0] sm:$0xff] %vm81_vm1, %v16550_v2 }
  0x3c   :  { %141 = vst.msk [vmem:[#allocation2 + $0x1d8] sm:$0xff] %vm81_vm1, %v16550_v2 }
  0x3d   :  { %142 = vst.msk [vmem:[#allocation2 + $0x1e0] sm:$0xff] %vm81_vm1, %v16550_v2 }
  0x3e   :  { %143 = vst.msk [vmem:[#allocation2 + $0x1e8] sm:$0xff] %vm81_vm1, %v16550_v2 }
  0x3f   :  { %144 = vst.msk [vmem:[#allocation2 + $0x1f0] sm:$0xff] %vm81_vm1, %v16550_v2 }
  0x40   :  { %145 = vst.msk [vmem:[#allocation2 + $0x1f8] sm:$0xff] %vm81_vm1, %v16550_v2 }
  0x41   :  { %146 = vst.msk [vmem:[#allocation2 + $0x200] sm:$0xff] %vm81_vm1, %v16550_v2 }
  0x42   :  { %147 = vst.msk [vmem:[#allocation2 + $0x208] sm:$0xff] %vm81_vm1, %v16550_v2 }
  0x43   :  { %148 = vst.msk [vmem:[#allocation2 + $0x210] sm:$0xff] %vm81_vm1, %v16550_v2 }
  0x44   :  { %149 = vst.msk [vmem:[#allocation2 + $0x218] sm:$0xff] %vm81_vm1, %v16550_v2 }
  0x45   :  { %150 = vst.msk [vmem:[#allocation2 + $0x220] sm:$0xff] %vm81_vm1, %v16550_v2 }
  0x46   :  { %151 = vst.msk [vmem:[#allocation2 + $0x228] sm:$0xff] %vm81_vm1, %v16550_v2 }
  0x47   :  { %152 = vst.msk [vmem:[#allocation2 + $0x230] sm:$0xff] %vm81_vm1, %v16550_v2 }
  0x48   :  { %153 = vst.msk [vmem:[#allocation2 + $0x238] sm:$0xff] %vm81_vm1, %v16550_v2 }
  0x49   :  { %154 = vst.msk [vmem:[#allocation2 + $0x240] sm:$0xff] %vm81_vm1, %v16550_v2 }
  0x4a   :  { %155 = vst.msk [vmem:[#allocation2 + $0x248] sm:$0xff] %vm81_vm1, %v16550_v2 }
  0x4b   :  { %156 = vst.msk [vmem:[#allocation2 + $0x250] sm:$0xff] %vm81_vm1, %v16550_v2 }
  0x4c   :  { %157 = vst.msk [vmem:[#allocation2 + $0x258] sm:$0xff] %vm81_vm1, %v16550_v2 }
  0x4d   :  { %158 = vst.msk [vmem:[#allocation2 + $0x260] sm:$0xff] %vm81_vm1, %v16550_v2 }
  0x4e   :  { %159 = vst.msk [vmem:[#allocation2 + $0x268] sm:$0xff] %vm81_vm1, %v16550_v2 }
  0x4f   :  { %160 = vst.msk [vmem:[#allocation2 + $0x270] sm:$0xff] %vm81_vm1, %v16550_v2 }
  0x50   :  { %161 = vst.msk [vmem:[#allocation2 + $0x278] sm:$0xff] %vm81_vm1, %v16550_v2 }
  0x51   :  { %162 = vst.msk [vmem:[#allocation2 + $0x280] sm:$0xff] %vm81_vm1, %v16550_v2  ;;  %v387_v51 = vld [vmem:[#allocation2 + $0x247] sm:$0xff] }
  0x52   :  { %163 = vst.msk [vmem:[#allocation2 + $0x288] sm:$0xff] %vm81_vm1, %v16550_v2  ;;  %v388_v52 = vld [vmem:[#allocation2 + $0x24f] sm:$0xff] }
  0x53   :  { %164 = vst.msk [vmem:[#allocation2 + $0x290] sm:$0xff] %vm81_vm1, %v16550_v2  ;;  %v435_v58 = vpack.c.bf16 %v388_v52, %v387_v51  ;;  %v273_v51 = vld [vmem:[%s16540_s0 + $0x178] sm:$0xff] }
  0x54   :  { %165 = vst.msk [vmem:[#allocation2 + $0x298] sm:$0xff] %vm81_vm1, %v16550_v2 }
  0x55   :  { %166 = vst.msk [vmem:[#allocation2 + $0x2a0] sm:$0xff] %vm81_vm1, %v16550_v2 }
  0x56   :  { %167 = vst.msk [vmem:[#allocation2 + $0x2a8] sm:$0xff] %vm81_vm1, %v16550_v2 }
  0x57   :  { %168 = vst.msk [vmem:[#allocation2 + $0x2b0] sm:$0xff] %vm81_vm1, %v16550_v2 }
  0x58   :  { %169 = vst.msk [vmem:[#allocation2 + $0x2b8] sm:$0xff] %vm81_vm1, %v16550_v2 }
  0x59   :  { %170 = vst.msk [vmem:[#allocation2 + $0x2c0] sm:$0xff] %vm81_vm1, %v16550_v2 }
  0x5a   :  { %171 = vst.msk [vmem:[#allocation2 + $0x2c8] sm:$0xff] %vm81_vm1, %v16550_v2 }
  0x5b   :  { %172 = vst.msk [vmem:[#allocation2 + $0x2d0] sm:$0xff] %vm81_vm1, %v16550_v2 }
  0x5c   :  { %173 = vst.msk [vmem:[#allocation2 + $0x2d8] sm:$0xff] %vm81_vm1, %v16550_v2 }
  0x5d   :  { %174 = vst.msk [vmem:[#allocation2 + $0x2e0] sm:$0xff] %vm81_vm1, %v16550_v2 }
  0x5e   :  { %175 = vst.msk [vmem:[#allocation2 + $0x2e8] sm:$0xff] %vm81_vm1, %v16550_v2 }
  0x5f   :  { %176 = vst.msk [vmem:[#allocation2 + $0x2f0] sm:$0xff] %vm81_vm1, %v16550_v2 }
  0x60   :  { %177 = vst.msk [vmem:[#allocation2 + $0x2f8] sm:$0xff] %vm81_vm1, %v16550_v2 }
  0x61   :  { %178 = vst.msk [vmem:[#allocation2 + $0x300] sm:$0xff] %vm81_vm1, %v16550_v2 }
  0x62   :  { %179 = vst.msk [vmem:[#allocation2 + $0x308] sm:$0xff] %vm81_vm1, %v16550_v2 }
  0x63   :  { %180 = vst.msk [vmem:[#allocation2 + $0x310] sm:$0xff] %vm81_vm1, %v16550_v2 }
  0x64   :  { %181 = vst.msk [vmem:[#allocation2 + $0x318] sm:$0xff] %vm81_vm1, %v16550_v2 }
  0x65   :  { %182 = vst.msk [vmem:[#allocation2 + $0x320] sm:$0xff] %vm81_vm1, %v16550_v2 }
  0x66   :  { %183 = vst.msk [vmem:[#allocation2 + $0x328] sm:$0xff] %vm81_vm1, %v16550_v2 }
  0x67   :  { %184 = vst.msk [vmem:[#allocation2 + $0x330] sm:$0xff] %vm81_vm1, %v16550_v2 }
  0x68   :  { %185 = vst.msk [vmem:[#allocation2 + $0x338] sm:$0xff] %vm81_vm1, %v16550_v2 }
  0x69   :  { %186 = vst.msk [vmem:[#allocation2 + $0x340] sm:$0xff] %vm81_vm1, %v16550_v2 }
  0x6a   :  { %187 = vst.msk [vmem:[#allocation2 + $0x348] sm:$0xff] %vm81_vm1, %v16550_v2 }
  0x6b   :  { %188 = vst.msk [vmem:[#allocation2 + $0x350] sm:$0xff] %vm81_vm1, %v16550_v2 }
  0x6c   :  { %189 = vst.msk [vmem:[#allocation2 + $0x358] sm:$0xff] %vm81_vm1, %v16550_v2 }
  0x6d   :  { %190 = vst.msk [vmem:[#allocation2 + $0x360] sm:$0xff] %vm81_vm1, %v16550_v2 }
  0x6e   :  { %191 = vst.msk [vmem:[#allocation2 + $0x368] sm:$0xff] %vm81_vm1, %v16550_v2 }
  0x6f   :  { %192 = vst.msk [vmem:[#allocation2 + $0x370] sm:$0xff] %vm81_vm1, %v16550_v2 }
  0x70   :  { %193 = vst.msk [vmem:[#allocation2 + $0x378] sm:$0xff] %vm81_vm1, %v16550_v2 }
  0x71   :  { %194 = vst.msk [vmem:[#allocation2 + $0x380] sm:$0xff] %vm81_vm1, %v16550_v2 }
  0x72   :  { %195 = vst.msk [vmem:[#allocation2 + $0x388] sm:$0xff] %vm81_vm1, %v16550_v2 }
  0x73   :  { %196 = vst.msk [vmem:[#allocation2 + $0x390] sm:$0xff] %vm81_vm1, %v16550_v2 }
  0x74   :  { %197 = vst.msk [vmem:[#allocation2 + $0x398] sm:$0xff] %vm81_vm1, %v16550_v2 }
  0x75   :  { %198 = vst.msk [vmem:[#allocation2 + $0x3a0] sm:$0xff] %vm81_vm1, %v16550_v2 }
  0x76   :  { %199 = vst.msk [vmem:[#allocation2 + $0x3a8] sm:$0xff] %vm81_vm1, %v16550_v2 }
  0x77   :  { %200 = vst.msk [vmem:[#allocation2 + $0x3b0] sm:$0xff] %vm81_vm1, %v16550_v2 }
  0x78   :  { %201 = vst.msk [vmem:[#allocation2 + $0x3b8] sm:$0xff] %vm81_vm1, %v16550_v2 }
  0x79   :  { %202 = vst.msk [vmem:[#allocation2 + $0x3c0] sm:$0xff] %vm81_vm1, %v16550_v2 }
  0x7a   :  { %203 = vst.msk [vmem:[#allocation2 + $0x3c8] sm:$0xff] %vm81_vm1, %v16550_v2 }
  0x7b   :  { %204 = vst.msk [vmem:[#allocation2 + $0x3d0] sm:$0xff] %vm81_vm1, %v16550_v2 }
  0x7c   :  { %205 = vst.msk [vmem:[#allocation2 + $0x3d8] sm:$0xff] %vm81_vm1, %v16550_v2 }
  0x7d   :  { %206 = vst.msk [vmem:[#allocation2 + $0x3e0] sm:$0xff] %vm81_vm1, %v16550_v2 }
  0x7e   :  { %207 = vst.msk [vmem:[#allocation2 + $0x3e8] sm:$0xff] %vm81_vm1, %v16550_v2 }
  0x7f   :  { %208 = vst.msk [vmem:[#allocation2 + $0x3f0] sm:$0xff] %vm81_vm1, %v16550_v2 }
  0x80   :  { %209 = vst.msk [vmem:[#allocation2 + $0x3f8] sm:$0xff] %vm81_vm1, %v16550_v2 }
  0x81   :  { %210 = vst.msk [vmem:[#allocation2 + $0x400] sm:$0xff] %vm81_vm1, %v16550_v2 }
  0x82   :  { %211 = vst.msk [vmem:[#allocation2 + $0x408] sm:$0xff] %vm81_vm1, %v16550_v2 }
  0x83   :  { %212 = vst.msk [vmem:[#allocation2 + $0x410] sm:$0xff] %vm81_vm1, %v16550_v2 }
  0x84   :  { %213 = vst.msk [vmem:[#allocation2 + $0x418] sm:$0xff] %vm81_vm1, %v16550_v2 }
  0x85   :  { %214 = vst.msk [vmem:[#allocation2 + $0x420] sm:$0xff] %vm81_vm1, %v16550_v2 }
  0x86   :  { %215 = vst.msk [vmem:[#allocation2 + $0x428] sm:$0xff] %vm81_vm1, %v16550_v2 }
  0x87   :  { %216 = vst.msk [vmem:[#allocation2 + $0x430] sm:$0xff] %vm81_vm1, %v16550_v2 }
  0x88   :  { %217 = vst.msk [vmem:[#allocation2 + $0x438] sm:$0xff] %vm81_vm1, %v16550_v2 }
  0x89   :  { %218 = vst.msk [vmem:[#allocation2 + $0x440] sm:$0xff] %vm81_vm1, %v16550_v2 }
  0x8a   :  { %219 = vst.msk [vmem:[#allocation2 + $0x448] sm:$0xff] %vm81_vm1, %v16550_v2 }
  0x8b   :  { %220 = vst.msk [vmem:[#allocation2 + $0x450] sm:$0xff] %vm81_vm1, %v16550_v2 }
  0x8c   :  { %221 = vst.msk [vmem:[#allocation2 + $0x458] sm:$0xff] %vm81_vm1, %v16550_v2 }
  0x8d   :  { %222 = vst.msk [vmem:[#allocation2 + $0x460] sm:$0xff] %vm81_vm1, %v16550_v2 }
  0x8e   :  { %223 = vst.msk [vmem:[#allocation2 + $0x468] sm:$0xff] %vm81_vm1, %v16550_v2 }
  0x8f   :  { %224 = vst.msk [vmem:[#allocation2 + $0x470] sm:$0xff] %vm81_vm1, %v16550_v2 }
  0x90   :  { %225 = vst.msk [vmem:[#allocation2 + $0x478] sm:$0xff] %vm81_vm1, %v16550_v2 }
  0x91   :  { %323 = vst.msk [vmem:[#allocation2 + $0x268] sm:$0xff] %vm81_vm1, %v258_v17  ;;  %v269_v17 = vld [vmem:[%s16540_s0 + $0x158] sm:$0xff] }
  0x92   :  { %324 = vst.msk [vmem:[#allocation2 + $0x270] sm:$0xff] %vm81_vm1, %v259_v20 }
  0x93   :  { %319 = vst.msk [vmem:[#allocation2 + $0x1e8] sm:$0xff] %vm81_vm1, %v254_v23 }
  0x94   :  { %320 = vst.msk [vmem:[#allocation2 + $0x1f0] sm:$0xff] %vm81_vm1, %v255_v24 }
  0x95   :  { %291 = vst.msk [vmem:[#allocation2 + $0x28] sm:$0xff] %vm81_vm1, %v226_v25 }
  0x96   :  { %292 = vst.msk [vmem:[#allocation2 + $0x30] sm:$0xff] %vm81_vm1, %v227_v26 }
  0x97   :  { %325 = vst.msk [vmem:[#allocation2 + $0x288] sm:$0xff] %vm81_vm1, %v260_v27 }
  0x98   :  { %v486_v31 = vld [vmem:[#allocation2 + $0x268] sm:$0xff]  ;;  %326 = vst.msk [vmem:[#allocation2 + $0x290] sm:$0xff] %vm81_vm1, %v261_v28 }
  0x99   :  { %v487_v33 = vld [vmem:[#allocation2 + $0x270] sm:$0xff]  ;;  %293 = vst.msk [vmem:[#allocation2 + $0x48] sm:$0xff] %vm81_vm1, %v228_v29  ;;  %v389_v4 = vld [vmem:[#allocation2 + $0x267] sm:$0xff] }
  0x9a   :  { %v533_v35 = vpack.c.bf16 %v487_v33, %v486_v31  ;;  %v385_v36 = vld [vmem:[#allocation2 + $0x1e7] sm:$0xff]  ;;  %294 = vst.msk [vmem:[#allocation2 + $0x50] sm:$0xff] %vm81_vm1, %v229_v30  ;;  %v390_v5 = vld [vmem:[#allocation2 + $0x26f] sm:$0xff]  ;;  %v237_v31 = vld [vmem:[%s16540_s0 + $0x58] sm:$0xff] }
  0x9b   :  { %v386_v37 = vld [vmem:[#allocation2 + $0x1ef] sm:$0xff]  ;;  %327 = vst.msk [vmem:[#allocation2 + $0x2a8] sm:$0xff] %vm81_vm1, %v262_v32  ;;  %v436_v11 = vpack.c.bf16 %v390_v5, %v389_v4  ;;  %v270_v32 = vld [vmem:[%s16540_s0 + $0x160] sm:$0xff]  ;;  %v241_v5 = vld [vmem:[%s16540_s0 + $0x78] sm:$0xff] }
  0x9c   :  { %9736 = vmatmul.msk.bf16.vlgmr.msra.gmra.mxu3 %vm81_vm1, %v533_v35  ;;  %v434_v38 = vpack.c.bf16 %v386_v37, %v385_v36  ;;  %v454_v39 = vld [vmem:[#allocation2 + $0x28] sm:$0xff]  ;;  %328 = vst.msk [vmem:[#allocation2 + $0x2b0] sm:$0xff] %vm81_vm1, %v263_v34  ;;  %v236_v30 = vld [vmem:[%s16540_s0 + $0x50] sm:$0xff] }
  0x9d   :  { %v357_v40 = vld [vmem:[#allocation2 + $0x27] sm:$0xff]  ;;  %v455_v41 = vld [vmem:[#allocation2 + $0x30] sm:$0xff]  ;;  %295 = vst.msk [vmem:[#allocation2 + $0x68] sm:$0xff] %vm81_vm1, %v230_v45 }
  0x9e   :  { %v358_v42 = vld [vmem:[#allocation2 + $0x2f] sm:$0xff]  ;;  %9766 = vmatmul.msk.bf16.vlgmr.msra.gmra.mxu2 %vm81_vm1, %v434_v38  ;;  %v10818_v43 = vpack.c.bf16 %v455_v41, %v454_v39  ;;  %296 = vst.msk [vmem:[#allocation2 + $0x70] sm:$0xff] %vm81_vm1, %v231_v46  ;;  %v391_v20 = vld [vmem:[#allocation2 + $0x287] sm:$0xff] }
  0x9f   :  { %v10820_v44 = vpack.c.bf16 %v358_v42, %v357_v40  ;;  %329 = vst.msk [vmem:[#allocation2 + $0x2c8] sm:$0xff] %vm81_vm1, %v264_v47  ;;  %v488_v49 = vld [vmem:[#allocation2 + $0x288] sm:$0xff]  ;;  %v489_v50 = vld [vmem:[#allocation2 + $0x290] sm:$0xff] }
  0xa0   :  { %9720 = vmatmul.msk.bf16.gmra.mxu1 %vm81_vm1, %v10818_v43  ;;  %330 = vst.msk [vmem:[#allocation2 + $0x2d0] sm:$0xff] %vm81_vm1, %v265_v48  ;;  %v534_v53 = vpack.c.bf16 %v489_v50, %v488_v49  ;;  %v456_v54 = vld [vmem:[#allocation2 + $0x48] sm:$0xff]  ;;  %v238_v48 = vld [vmem:[%s16540_s0 + $0x60] sm:$0xff]  ;;  %v272_v50 = vld [vmem:[%s16540_s0 + $0x170] sm:$0xff] }
  0xa1   :  { %9752 = vmatmul.msk.bf16.gmra.mxu0 %vm81_vm1, %v10820_v44  ;;  %v457_v55 = vld [vmem:[#allocation2 + $0x50] sm:$0xff]  ;;  %v359_v56 = vld [vmem:[#allocation2 + $0x47] sm:$0xff]  ;;  %297 = vst.msk [vmem:[#allocation2 + $0x88] sm:$0xff] %vm81_vm1, %v232_v61 }
  0xa2   :  { %v360_v57 = vld [vmem:[#allocation2 + $0x4f] sm:$0xff]  ;;  %v10843_v59 = vpack.c.bf16 %v457_v55, %v456_v54  ;;  %298 = vst.msk [vmem:[#allocation2 + $0x90] sm:$0xff] %vm81_vm1, %v233_v62  ;;  %v393_v36 = vld [vmem:[#allocation2 + $0x2a7] sm:$0xff] }
  0xa3   :  { %v10845_v60 = vpack.c.bf16 %v360_v57, %v359_v56  ;;  %331 = vst.msk [vmem:[#allocation2 + $0x2e8] sm:$0xff] %vm81_vm1, %v266_v63  ;;  %v490_v1 = vld [vmem:[#allocation2 + $0x2a8] sm:$0xff]  ;;  %v491_v3 = vld [vmem:[#allocation2 + $0x2b0] sm:$0xff] }
  0xa4   :  { %332 = vst.msk [vmem:[#allocation2 + $0x2f0] sm:$0xff] %vm81_vm1, %v267_v0  ;;  %v535_v6 = vpack.c.bf16 %v491_v3, %v490_v1  ;;  %v458_v7 = vld [vmem:[#allocation2 + $0x68] sm:$0xff]  ;;  %v10952_v3 = vpop.f32.mrf.mxu0  ;;  %v240_v4 = vld [vmem:[%s16540_s0 + $0x70] sm:$0xff] }
  0xa5   :  { %v459_v8 = vld [vmem:[#allocation2 + $0x70] sm:$0xff]  ;;  %v361_v9 = vld [vmem:[#allocation2 + $0x67] sm:$0xff]  ;;  %299 = vst.msk [vmem:[#allocation2 + $0xa8] sm:$0xff] %vm81_vm1, %v234_v14 }
  0xa6   :  { %v362_v10 = vld [vmem:[#allocation2 + $0x6f] sm:$0xff]  ;;  %v10869_v12 = vpack.c.bf16 %v459_v8, %v458_v7  ;;  %300 = vst.msk [vmem:[#allocation2 + $0xb0] sm:$0xff] %vm81_vm1, %v235_v15  ;;  %v395_v54 = vld [vmem:[#allocation2 + $0x2c7] sm:$0xff] }
  0xa7   :  { %v10871_v13 = vpack.c.bf16 %v362_v10, %v361_v9  ;;  %333 = vst.msk [vmem:[#allocation2 + $0x308] sm:$0xff] %vm81_vm1, %v268_v16  ;;  %v492_v18 = vld [vmem:[#allocation2 + $0x2c8] sm:$0xff]  ;;  %v493_v19 = vld [vmem:[#allocation2 + $0x2d0] sm:$0xff] }
  0xa8   :  { %334 = vst.msk [vmem:[#allocation2 + $0x310] sm:$0xff] %vm81_vm1, %v269_v17  ;;  %v392_v21 = vld [vmem:[#allocation2 + $0x28f] sm:$0xff]  ;;  %v536_v22 = vpack.c.bf16 %v493_v19, %v492_v18  ;;  %v363_v25 = vld [vmem:[#allocation2 + $0x87] sm:$0xff] }
  0xa9   :  { %v460_v23 = vld [vmem:[#allocation2 + $0x88] sm:$0xff]  ;;  %v461_v24 = vld [vmem:[#allocation2 + $0x90] sm:$0xff]  ;;  %v437_v27 = vpack.c.bf16 %v392_v21, %v391_v20  ;;  %301 = vst.msk [vmem:[#allocation2 + $0xc8] sm:$0xff] %vm81_vm1, %v236_v30 }
  0xaa   :  { %v364_v26 = vld [vmem:[#allocation2 + $0x8f] sm:$0xff]  ;;  %v10895_v28 = vpack.c.bf16 %v461_v24, %v460_v23  ;;  %302 = vst.msk [vmem:[#allocation2 + $0xd0] sm:$0xff] %vm81_vm1, %v237_v31  ;;  %v242_v23 = vld [vmem:[%s16540_s0 + $0x80] sm:$0xff] }
  0xab   :  { %v10897_v29 = vpack.c.bf16 %v364_v26, %v363_v25  ;;  %v271_v33 = vld [vmem:[%s16540_s0 + $0x168] sm:$0xff]  ;;  %335 = vst.msk [vmem:[#allocation2 + $0x328] sm:$0xff] %vm81_vm1, %v270_v32  ;;  %v495_v35 = vld [vmem:[#allocation2 + $0x2f0] sm:$0xff]  ;;  %v277_v26 = vld [vmem:[%s16540_s0 + $0x198] sm:$0xff] }
  0xac   :  { %9737 = vmatmul.msk.bf16.gmra.mxu3 %vm81_vm1, %v534_v53  ;;  %336 = vst.msk [vmem:[#allocation2 + $0x330] sm:$0xff] %vm81_vm1, %v271_v33  ;;  %v494_v34 = vld [vmem:[#allocation2 + $0x2e8] sm:$0xff]  ;;  %v79_v10 = vpop.f32.mrf.mxu0  ;;  %v276_v25 = vld [vmem:[%s16540_s0 + $0x190] sm:$0xff]  ;;  %v659_v33 = vpop.f32.mrf.mxu1 }
  0xad   :  { %v394_v37 = vld [vmem:[#allocation2 + $0x2af] sm:$0xff]  ;;  %v537_v38 = vpack.c.bf16 %v495_v35, %v494_v34  ;;  %v365_v41 = vld [vmem:[#allocation2 + $0xa7] sm:$0xff]  ;;  %303 = vst.msk [vmem:[#allocation2 + $0xe8] sm:$0xff] %vm81_vm1, %v238_v48 }
  0xae   :  { %9767 = vmatmul.msk.bf16.gmra.mxu2 %vm81_vm1, %v435_v58  ;;  %v462_v39 = vld [vmem:[#allocation2 + $0xa8] sm:$0xff]  ;;  %v463_v40 = vld [vmem:[#allocation2 + $0xb0] sm:$0xff]  ;;  %v438_v45 = vpack.c.bf16 %v394_v37, %v393_v36  ;;  %337 = vst.msk [vmem:[#allocation2 + $0x348] sm:$0xff] %vm81_vm1, %v272_v50 }
  0xaf   :  { %v366_v42 = vld [vmem:[#allocation2 + $0xaf] sm:$0xff]  ;;  %v10921_v46 = vpack.c.bf16 %v463_v40, %v462_v39  ;;  %338 = vst.msk [vmem:[#allocation2 + $0x350] sm:$0xff] %vm81_vm1, %v273_v51  ;;  %v399_v31 = vld [vmem:[#allocation2 + $0x307] sm:$0xff] }
  0xb0   :  { %9721 = vmatmul.msk.bf16.gmra.mxu1 %vm81_vm1, %v10843_v59  ;;  %v10923_v47 = vpack.c.bf16 %v366_v42, %v365_v41  ;;  %v239_v49 = vld [vmem:[%s16540_s0 + $0x68] sm:$0xff]  ;;  %v497_v53 = vld [vmem:[#allocation2 + $0x310] sm:$0xff]  ;;  %16660 = vst [vmem:[#allocation4_spill] sm:$0xff] %v10952_v3 }
  0xb1   :  { %9753 = vmatmul.msk.bf16.gmra.mxu0 %vm81_vm1, %v10845_v60  ;;  %304 = vst.msk [vmem:[#allocation2 + $0xf0] sm:$0xff] %vm81_vm1, %v239_v49  ;;  %v496_v52 = vld [vmem:[#allocation2 + $0x308] sm:$0xff]  ;;  %v465_v58 = vld [vmem:[#allocation2 + $0xd0] sm:$0xff] }
  0xb2   :  { %v396_v55 = vld [vmem:[#allocation2 + $0x2cf] sm:$0xff]  ;;  %v538_v56 = vpack.c.bf16 %v497_v53, %v496_v52  ;;  %v367_v61 = vld [vmem:[#allocation2 + $0xc7] sm:$0xff]  ;;  %305 = vst.msk [vmem:[#allocation2 + $0x108] sm:$0xff] %vm81_vm1, %v240_v4  ;;  %v245_v52 = vld [vmem:[%s16540_s0 + $0x98] sm:$0xff] }
  0xb3   :  { %v464_v57 = vld [vmem:[#allocation2 + $0xc8] sm:$0xff]  ;;  %v439_v63 = vpack.c.bf16 %v396_v55, %v395_v54  ;;  %306 = vst.msk [vmem:[#allocation2 + $0x110] sm:$0xff] %vm81_vm1, %v241_v5  ;;  %v499_v9 = vld [vmem:[#allocation2 + $0x330] sm:$0xff]  ;;  %v278_v53 = vld [vmem:[%s16540_s0 + $0x1a0] sm:$0xff] }
  0xb4   :  { %v368_v62 = vld [vmem:[#allocation2 + $0xcf] sm:$0xff]  ;;  %v10947_v0 = vpack.c.bf16 %v465_v58, %v464_v57  ;;  %v369_v18 = vld [vmem:[#allocation2 + $0xe7] sm:$0xff]  ;;  %307 = vst.msk [vmem:[#allocation2 + $0x128] sm:$0xff] %vm81_vm1, %v242_v23  ;;  %v927_v37 = vpop.f32.mrf.mxu0  ;;  %v661_v48 = vpop.f32.mrf.mxu1 }
  0xb5   :  { %v10949_v1 = vpack.c.bf16 %v368_v62, %v367_v61  ;;  %v275_v7 = vld [vmem:[%s16540_s0 + $0x188] sm:$0xff]  ;;  %341 = vst.msk [vmem:[#allocation2 + $0x388] sm:$0xff] %vm81_vm1, %v276_v25  ;;  %v10997_v41 = vadd.f32 %v927_v37, %v659_v33  ;;  %v244_v51 = vld [vmem:[%s16540_s0 + $0x90] sm:$0xff] }
  0xb6   :  { %340 = vst.msk [vmem:[#allocation2 + $0x370] sm:$0xff] %vm81_vm1, %v275_v7  ;;  %v498_v8 = vld [vmem:[#allocation2 + $0x328] sm:$0xff]  ;;  %v501_v30 = vld [vmem:[#allocation2 + $0x350] sm:$0xff] }
  0xb7   :  { %v398_v14 = vld [vmem:[#allocation2 + $0x2ef] sm:$0xff]  ;;  %v539_v15 = vpack.c.bf16 %v499_v9, %v498_v8  ;;  %342 = vst.msk [vmem:[#allocation2 + $0x390] sm:$0xff] %vm81_vm1, %v277_v26  ;;  %v401_v57 = vld [vmem:[#allocation2 + $0x327] sm:$0xff] }
  0xb8   :  { %v466_v16 = vld [vmem:[#allocation2 + $0xe8] sm:$0xff]  ;;  %v467_v17 = vld [vmem:[#allocation2 + $0xf0] sm:$0xff]  ;;  %309 = vst.msk [vmem:[#allocation2 + $0x148] sm:$0xff] %vm81_vm1, %v244_v51 }
  0xb9   :  { %v370_v19 = vld [vmem:[#allocation2 + $0xef] sm:$0xff]  ;;  %v523_v21 = vpack.c.bf16 %v467_v17, %v466_v16  ;;  %310 = vst.msk [vmem:[#allocation2 + $0x150] sm:$0xff] %vm81_vm1, %v245_v52  ;;  %v246_v16 = vld [vmem:[%s16540_s0 + $0xa0] sm:$0xff] }
  0xba   :  { %v243_v24 = vld [vmem:[%s16540_s0 + $0x88] sm:$0xff]  ;;  %v469_v36 = vld [vmem:[#allocation2 + $0x110] sm:$0xff]  ;;  %343 = vst.msk [vmem:[#allocation2 + $0x3a8] sm:$0xff] %vm81_vm1, %v278_v53  ;;  %v249_v53 = vld [vmem:[%s16540_s0 + $0xb8] sm:$0xff] }
  0xbb   :  { %308 = vst.msk [vmem:[#allocation2 + $0x130] sm:$0xff] %vm81_vm1, %v243_v24  ;;  %v400_v32 = vld [vmem:[#allocation2 + $0x30f] sm:$0xff]  ;;  %v373_v4 = vld [vmem:[#allocation2 + $0x127] sm:$0xff] }
  0xbc   :  { %9738 = vmatmul.msk.bf16.gmra.mxu3 %vm81_vm1, %v535_v6  ;;  %v274_v6 = vld [vmem:[%s16540_s0 + $0x180] sm:$0xff]  ;;  %v468_v35 = vld [vmem:[#allocation2 + $0x108] sm:$0xff]  ;;  %v441_v40 = vpack.c.bf16 %v400_v32, %v399_v31  ;;  %v929_v49 = vpop.f32.mrf.mxu0  ;;  %311 = vst.msk [vmem:[#allocation2 + $0x168] sm:$0xff] %vm81_vm1, %v246_v16  ;;  %v248_v52 = vld [vmem:[%s16540_s0 + $0xb0] sm:$0xff] }
  0xbd   :  { %339 = vst.msk [vmem:[#allocation2 + $0x368] sm:$0xff] %vm81_vm1, %v274_v6  ;;  %v372_v39 = vld [vmem:[#allocation2 + $0x10f] sm:$0xff]  ;;  %v524_v42 = vpack.c.bf16 %v469_v36, %v468_v35  ;;  %v11006_v50 = vadd.f32 %v929_v49, %v661_v48 }
  0xbe   :  { %9768 = vmatmul.msk.bf16.gmra.mxu2 %vm81_vm1, %v436_v11  ;;  %v397_v11 = vld [vmem:[#allocation2 + $0x2e7] sm:$0xff]  ;;  %v402_v58 = vld [vmem:[#allocation2 + $0x32f] sm:$0xff]  ;;  %313 = vst.msk [vmem:[#allocation2 + $0x188] sm:$0xff] %vm81_vm1, %v248_v52 }
  0xbf   :  { %v440_v20 = vpack.c.bf16 %v398_v14, %v397_v11  ;;  %v279_v54 = vld [vmem:[%s16540_s0 + $0x1a8] sm:$0xff]  ;;  %v442_v6 = vpack.c.bf16 %v402_v58, %v401_v57  ;;  %314 = vst.msk [vmem:[#allocation2 + $0x190] sm:$0xff] %vm81_vm1, %v249_v53 }
  0xc0   :  { %9722 = vmatmul.msk.bf16.gmra.mxu1 %vm81_vm1, %v10869_v12  ;;  %344 = vst.msk [vmem:[#allocation2 + $0x3b0] sm:$0xff] %vm81_vm1, %v279_v54  ;;  %v470_v62 = vld [vmem:[#allocation2 + $0x128] sm:$0xff]  ;;  %v282_v54 = vld [vmem:[%s16540_s0 + $0x1c0] sm:$0xff] }
  0xc1   :  { %9754 = vmatmul.msk.bf16.gmra.mxu0 %vm81_vm1, %v10871_v13  ;;  %v247_v17 = vld [vmem:[%s16540_s0 + $0xa8] sm:$0xff]  ;;  %347 = vst.msk [vmem:[#allocation2 + $0x3e8] sm:$0xff] %vm81_vm1, %v282_v54 }
  0xc2   :  { %v374_v5 = vld [vmem:[#allocation2 + $0x12f] sm:$0xff]  ;;  %312 = vst.msk [vmem:[#allocation2 + $0x170] sm:$0xff] %vm81_vm1, %v247_v17  ;;  %v375_v35 = vld [vmem:[#allocation2 + $0x147] sm:$0xff] }
  0xc3   :  { %v11025_v8 = vpack.c.bf16 %v374_v5, %v373_v4  ;;  %v472_v32 = vld [vmem:[#allocation2 + $0x148] sm:$0xff] }
  0xc4   :  { %v502_v55 = vld [vmem:[#allocation2 + $0x368] sm:$0xff] }
  0xc5   :  { %v376_v36 = vld [vmem:[#allocation2 + $0x14f] sm:$0xff]  ;;  %v405_v4 = vld [vmem:[#allocation2 + $0x367] sm:$0xff] }
  0xc6   :  { %v406_v5 = vld [vmem:[#allocation2 + $0x36f] sm:$0xff]  ;;  %v377_v16 = vld [vmem:[#allocation2 + $0x167] sm:$0xff] }
  0xc7   :  { %v507_v57 = vld [vmem:[#allocation2 + $0x3b0] sm:$0xff]  ;;  %v407_v53 = vld [vmem:[#allocation2 + $0x387] sm:$0xff] }
  0xc8   :  { %v408_v54 = vld [vmem:[#allocation2 + $0x38f] sm:$0xff] }
  0xc9   :  { %v378_v17 = vld [vmem:[#allocation2 + $0x16f] sm:$0xff] }
  0xcc   :  { %9739 = vmatmul.msk.bf16.gmra.mxu3 %vm81_vm1, %v536_v22  ;;  %v10975_v22 = vpack.c.bf16 %v370_v19, %v369_v18  ;;  %v280_v18 = vld [vmem:[%s16540_s0 + $0x1b0] sm:$0xff]  ;;  %v281_v19 = vld [vmem:[%s16540_s0 + $0x1b8] sm:$0xff] }
  0xcd   :  { %345 = vst.msk [vmem:[#allocation2 + $0x3c8] sm:$0xff] %vm81_vm1, %v280_v18  ;;  %v444_v18 = vpack.c.bf16 %v406_v5, %v405_v4  ;;  %v380_v4 = vld [vmem:[#allocation2 + $0x18f] sm:$0xff] }
  0xce   :  { %9769 = vmatmul.msk.bf16.gmra.mxu2 %vm81_vm1, %v437_v27  ;;  %v500_v27 = vld [vmem:[#allocation2 + $0x348] sm:$0xff]  ;;  %346 = vst.msk [vmem:[#allocation2 + $0x3d0] sm:$0xff] %vm81_vm1, %v281_v19 }
  0xcf   :  { %v540_v34 = vpack.c.bf16 %v501_v30, %v500_v27  ;;  %v403_v27 = vld [vmem:[#allocation2 + $0x347] sm:$0xff]  ;;  %v404_v30 = vld [vmem:[#allocation2 + $0x34f] sm:$0xff] }
  0xd0   :  { %9723 = vmatmul.msk.bf16.gmra.mxu1 %vm81_vm1, %v10895_v28  ;;  %v443_v37 = vpack.c.bf16 %v404_v30, %v403_v27 }
  0xd1   :  { %9755 = vmatmul.msk.bf16.gmra.mxu0 %vm81_vm1, %v10897_v29 }
  0xdc   :  { %9740 = vmatmul.msk.bf16.gmra.mxu3 %vm81_vm1, %v537_v38  ;;  %v371_v38 = vld [vmem:[#allocation2 + $0x107] sm:$0xff] }
  0xde   :  { %9770 = vmatmul.msk.bf16.gmra.mxu2 %vm81_vm1, %v438_v45  ;;  %v11000_v45 = vpack.c.bf16 %v372_v39, %v371_v38  ;;  %v11060_v39 = vpack.c.bf16 %v376_v36, %v375_v35  ;;  %v284_v35 = vld [vmem:[%s16540_s0 + $0x1d0] sm:$0xff]  ;;  %v285_v36 = vld [vmem:[%s16540_s0 + $0x1d8] sm:$0xff] }
  0xdf   :  { %349 = vst.msk [vmem:[#allocation2 + $0x408] sm:$0xff] %vm81_vm1, %v284_v35  ;;  %v287_v35 = vld [vmem:[%s16540_s0 + $0x1e8] sm:$0xff] }
  0xe0   :  { %9724 = vmatmul.msk.bf16.gmra.mxu1 %vm81_vm1, %v10921_v46  ;;  %350 = vst.msk [vmem:[#allocation2 + $0x410] sm:$0xff] %vm81_vm1, %v285_v36 }
  0xe1   :  { %9756 = vmatmul.msk.bf16.gmra.mxu0 %vm81_vm1, %v10923_v47  ;;  %352 = vst.msk [vmem:[#allocation2 + $0x430] sm:$0xff] %vm81_vm1, %v287_v35 }
  0xec   :  { %9741 = vmatmul.msk.bf16.gmra.mxu3 %vm81_vm1, %v538_v56  ;;  %v503_v56 = vld [vmem:[#allocation2 + $0x370] sm:$0xff] }
  0xed   :  { %v541_v61 = vpack.c.bf16 %v503_v56, %v502_v55  ;;  %v283_v55 = vld [vmem:[%s16540_s0 + $0x1c8] sm:$0xff] }
  0xee   :  { %9771 = vmatmul.msk.bf16.gmra.mxu2 %vm81_vm1, %v439_v63  ;;  %v471_v63 = vld [vmem:[#allocation2 + $0x130] sm:$0xff]  ;;  %v506_v56 = vld [vmem:[#allocation2 + $0x3a8] sm:$0xff]  ;;  %348 = vst.msk [vmem:[#allocation2 + $0x3f0] sm:$0xff] %vm81_vm1, %v283_v55 }
  0xef   :  { %v525_v7 = vpack.c.bf16 %v471_v63, %v470_v62 }
  0xf0   :  { %9725 = vmatmul.msk.bf16.gmra.mxu1 %vm81_vm1, %v10947_v0 }
  0xf1   :  { %9757 = vmatmul.msk.bf16.gmra.mxu0 %vm81_vm1, %v10949_v1 }
  0xf5   :  { %v511_v36 = vld [vmem:[#allocation2 + $0x3f0] sm:$0xff] }
  0xfc   :  { %9742 = vmatmul.msk.bf16.gmra.mxu3 %vm81_vm1, %v539_v15 }
  0xfe   :  { %9772 = vmatmul.msk.bf16.gmra.mxu2 %vm81_vm1, %v440_v20  ;;  %v504_v20 = vld [vmem:[#allocation2 + $0x388] sm:$0xff] }
 0x100   :  { %9726 = vmatmul.msk.bf16.gmra.mxu1 %vm81_vm1, %v523_v21  ;;  %v505_v21 = vld [vmem:[#allocation2 + $0x390] sm:$0xff] }
 0x101   :  { %9758 = vmatmul.msk.bf16.gmra.mxu0 %vm81_vm1, %v10975_v22  ;;  %v542_v31 = vpack.c.bf16 %v505_v21, %v504_v20  ;;  %v11097_v20 = vpack.c.bf16 %v378_v17, %v377_v16 }
 0x10c   :  { %9743 = vmatmul.msk.bf16.gmra.mxu3 %vm81_vm1, %v540_v34  ;;  %v473_v34 = vld [vmem:[#allocation2 + $0x150] sm:$0xff] }
 0x10d   :  { %v526_v38 = vpack.c.bf16 %v473_v34, %v472_v32  ;;  %v250_v32 = vld [vmem:[%s16540_s0 + $0xc0] sm:$0xff]  ;;  %v251_v34 = vld [vmem:[%s16540_s0 + $0xc8] sm:$0xff] }
 0x10e   :  { %9773 = vmatmul.msk.bf16.gmra.mxu2 %vm81_vm1, %v441_v40  ;;  %315 = vst.msk [vmem:[#allocation2 + $0x1a8] sm:$0xff] %vm81_vm1, %v250_v32  ;;  %v253_v32 = vld [vmem:[%s16540_s0 + $0xd8] sm:$0xff] }
 0x10f   :  { %316 = vst.msk [vmem:[#allocation2 + $0x1b0] sm:$0xff] %vm81_vm1, %v251_v34  ;;  %v286_v34 = vld [vmem:[%s16540_s0 + $0x1e0] sm:$0xff] }
 0x110   :  { %9727 = vmatmul.msk.bf16.gmra.mxu1 %vm81_vm1, %v524_v42  ;;  %318 = vst.msk [vmem:[#allocation2 + $0x1d0] sm:$0xff] %vm81_vm1, %v253_v32 }
 0x111   :  { %9759 = vmatmul.msk.bf16.gmra.mxu0 %vm81_vm1, %v11000_v45  ;;  %351 = vst.msk [vmem:[#allocation2 + $0x428] sm:$0xff] %vm81_vm1, %v286_v34 }
 0x11c   :  { %9744 = vmatmul.msk.bf16.gmra.mxu3 %vm81_vm1, %v541_v61 }
 0x11d   :  { %v664_v9 = vpop.f32.mrf.mxu1 }
 0x11e   :  { %v932_v10 = vpop.f32.mrf.mxu0  ;;  %9774 = vmatmul.msk.bf16.gmra.mxu2 %vm81_vm1, %v442_v6  ;;  %v543_v6 = vpack.c.bf16 %v507_v57, %v506_v56  ;;  %v476_v56 = vld [vmem:[#allocation2 + $0x188] sm:$0xff] }
 0x11f   :  { %v11028_v11 = vadd.f32 %v932_v10, %v664_v9  ;;  %v11030_v14 = vpop.f32.mrf.mxu3  ;;  %v475_v10 = vld [vmem:[#allocation2 + $0x170] sm:$0xff] }
 0x120   :  { %9728 = vmatmul.msk.bf16.gmra.mxu1 %vm81_vm1, %v525_v7  ;;  %v474_v7 = vld [vmem:[#allocation2 + $0x168] sm:$0xff] }
 0x121   :  { %9760 = vmatmul.msk.bf16.gmra.mxu0 %vm81_vm1, %v11025_v8  ;;  %v11035_v15 = vpop.f32.mrf.mxu2  ;;  %v11095_v19 = vpack.c.bf16 %v475_v10, %v474_v7 }
 0x122   :  { %16661 = vst [vmem:[#allocation5_spill] sm:$0xff] %v11035_v15 }
 0x125   :  { %v666_v23 = vpop.f32.mrf.mxu1 }
 0x126   :  { %v934_v24 = vpop.f32.mrf.mxu0 }
 0x127   :  { %v11052_v25 = vadd.f32 %v934_v24, %v666_v23  ;;  %v11055_v26 = vpop.f32.mrf.mxu3 }
 0x129   :  { %v11057_v33 = vpop.f32.mrf.mxu2 }
 0x12a   :  { %16662 = vst [vmem:[#allocation6_spill] sm:$0xff] %v11057_v33 }
 0x12c   :  { %9745 = vmatmul.msk.bf16.gmra.mxu3 %vm81_vm1, %v542_v31 }
 0x12d   :  { %v669_v40 = vpop.f32.mrf.mxu1 }
 0x12e   :  { %v937_v42 = vpop.f32.mrf.mxu0  ;;  %9775 = vmatmul.msk.bf16.gmra.mxu2 %vm81_vm1, %v443_v37  ;;  %v509_v37 = vld [vmem:[#allocation2 + $0x3d0] sm:$0xff] }
 0x12f   :  { %v11063_v48 = vadd.f32 %v937_v42, %v669_v40  ;;  %v11065_v49 = vpop.f32.mrf.mxu3 }
 0x130   :  { %9729 = vmatmul.msk.bf16.gmra.mxu1 %vm81_vm1, %v526_v38 }
 0x131   :  { %9761 = vmatmul.msk.bf16.gmra.mxu0 %vm81_vm1, %v11060_v39  ;;  %v11070_v51 = vpop.f32.mrf.mxu2 }
 0x132   :  { %16663 = vst [vmem:[#allocation7_spill] sm:$0xff] %v11070_v51  ;;  %v1962_v51 = vld [vmem:[#allocation2 + $0x110] sm:$0xff] }
 0x135   :  { %v671_v58 = vpop.f32.mrf.mxu1 }
 0x136   :  { %v939_v61 = vpop.f32.mrf.mxu0 }
 0x137   :  { %v11087_v62 = vadd.f32 %v939_v61, %v671_v58  ;;  %v11090_v63 = vpop.f32.mrf.mxu3  ;;  %v477_v58 = vld [vmem:[#allocation2 + $0x190] sm:$0xff]  ;;  %v379_v61 = vld [vmem:[#allocation2 + $0x187] sm:$0xff] }
 0x138   :  { %v11135_v7 = vpack.c.bf16 %v477_v58, %v476_v56  ;;  %v11137_v10 = vpack.c.bf16 %v380_v4, %v379_v61  ;;  %v478_v56 = vld [vmem:[#allocation2 + $0x1a8] sm:$0xff]  ;;  %v479_v58 = vld [vmem:[#allocation2 + $0x1b0] sm:$0xff] }
 0x139   :  { %v11092_v9 = vpop.f32.mrf.mxu2  ;;  %v381_v61 = vld [vmem:[#allocation2 + $0x1a7] sm:$0xff]  ;;  %v382_v4 = vld [vmem:[#allocation2 + $0x1af] sm:$0xff] }
 0x13a   :  { %16664 = vst [vmem:[#allocation8_spill] sm:$0xff] %v11092_v9 }
 0x13c   :  { %9746 = vmatmul.msk.bf16.gmra.mxu3 %vm81_vm1, %v543_v6  ;;  %v445_v6 = vpack.c.bf16 %v408_v54, %v407_v53  ;;  %v409_v53 = vld [vmem:[#allocation2 + $0x3a7] sm:$0xff]  ;;  %v410_v54 = vld [vmem:[#allocation2 + $0x3af] sm:$0xff] }
 0x13d   :  { %v674_v21 = vpop.f32.mrf.mxu1 }
 0x13e   :  { %v942_v23 = vpop.f32.mrf.mxu0  ;;  %9776 = vmatmul.msk.bf16.gmra.mxu2 %vm81_vm1, %v444_v18 }
 0x13f   :  { %v11100_v24 = vadd.f32 %v942_v23, %v674_v21  ;;  %v11102_v27 = vpop.f32.mrf.mxu3 }
 0x140   :  { %9730 = vmatmul.msk.bf16.gmra.mxu1 %vm81_vm1, %v11095_v19 }
 0x141   :  { %9762 = vmatmul.msk.bf16.gmra.mxu0 %vm81_vm1, %v11097_v20  ;;  %v1012_v30 = vpop.f32.mrf.mxu2 }
 0x142   :  { %v11109_v31 = vadd.f32 %v1012_v30, %v11030_v14  ;;  %v508_v14 = vld [vmem:[#allocation2 + $0x3c8] sm:$0xff]  ;;  %v252_v30 = vld [vmem:[%s16540_s0 + $0xd0] sm:$0xff] }
 0x143   :  { %v544_v55 = vpack.c.bf16 %v509_v37, %v508_v14  ;;  %317 = vst.msk [vmem:[#allocation2 + $0x1c8] sm:$0xff] %vm81_vm1, %v252_v30 }
 0x144   :  { %16665 = vst [vmem:[#allocation9_spill] sm:$0xff] %v11109_v31 }
 0x145   :  { %v676_v38 = vpop.f32.mrf.mxu1 }
 0x146   :  { %v944_v40 = vpop.f32.mrf.mxu0 }
 0x147   :  { %v11126_v42 = vadd.f32 %v944_v40, %v676_v38  ;;  %v11129_v52 = vpop.f32.mrf.mxu3 }
 0x149   :  { %v1014_v57 = vpop.f32.mrf.mxu2 }
 0x14a   :  { %v11132_v5 = vadd.f32 %v1014_v57, %v11055_v26 }
 0x14c   :  { %16666 = vst [vmem:[#allocation10_spill] sm:$0xff] %v11132_v5  ;;  %9747 = vmatmul.msk.bf16.gmra.mxu3 %vm81_vm1, %v544_v55 }
 0x14d   :  { %v679_v16 = vpop.f32.mrf.mxu1 }
 0x14e   :  { %v947_v17 = vpop.f32.mrf.mxu0  ;;  %9777 = vmatmul.msk.bf16.gmra.mxu2 %vm81_vm1, %v445_v6 }
 0x14f   :  { %v11140_v18 = vadd.f32 %v947_v17, %v679_v16  ;;  %v11142_v21 = vpop.f32.mrf.mxu3  ;;  %v446_v16 = vpack.c.bf16 %v410_v54, %v409_v53  ;;  %v11175_v17 = vpack.c.bf16 %v479_v58, %v478_v56  ;;  %v411_v56 = vld [vmem:[#allocation2 + $0x3c7] sm:$0xff] }
 0x150   :  { %9731 = vmatmul.msk.bf16.gmra.mxu1 %vm81_vm1, %v11135_v7 }
 0x151   :  { %9763 = vmatmul.msk.bf16.gmra.mxu0 %vm81_vm1, %v11137_v10  ;;  %v1017_v26 = vpop.f32.mrf.mxu2 }
 0x152   :  { %v11149_v23 = vadd.f32 %v1017_v26, %v11065_v49  ;;  %v510_v49 = vld [vmem:[#allocation2 + $0x3e8] sm:$0xff]  ;;  %v11177_v26 = vpack.c.bf16 %v382_v4, %v381_v61 }
 0x153   :  { %v545_v55 = vpack.c.bf16 %v511_v36, %v510_v49  ;;  %v512_v36 = vld [vmem:[#allocation2 + $0x408] sm:$0xff] }
 0x154   :  { %16667 = vst [vmem:[#allocation11_spill] sm:$0xff] %v11149_v23  ;;  %v480_v61 = vld [vmem:[#allocation2 + $0x1c8] sm:$0xff] }
 0x155   :  { %v681_v14 = vpop.f32.mrf.mxu1 }
 0x156   :  { %v949_v37 = vpop.f32.mrf.mxu0 }
 0x157   :  { %v11166_v38 = vadd.f32 %v949_v37, %v681_v14  ;;  %v11169_v40 = vpop.f32.mrf.mxu3  ;;  %v513_v14 = vld [vmem:[#allocation2 + $0x410] sm:$0xff] }
 0x158   :  { %v546_v58 = vpack.c.bf16 %v513_v14, %v512_v36 }
 0x159   :  { %v1019_v57 = vpop.f32.mrf.mxu2 }
 0x15a   :  { %v11172_v6 = vadd.f32 %v1019_v57, %v11090_v63  ;;  %v412_v57 = vld [vmem:[#allocation2 + $0x3cf] sm:$0xff] }
 0x15c   :  { %16668 = vst [vmem:[#allocation12_spill] sm:$0xff] %v11172_v6  ;;  %9748 = vmatmul.msk.bf16.gmra.mxu3 %vm81_vm1, %v545_v55 }
 0x15d   :  { %v684_v30 = vpop.f32.mrf.mxu1 }
 0x15e   :  { %v952_v32 = vpop.f32.mrf.mxu0  ;;  %9778 = vmatmul.msk.bf16.gmra.mxu2 %vm81_vm1, %v446_v16  ;;  %v481_v16 = vld [vmem:[#allocation2 + $0x1d0] sm:$0xff] }
 0x15f   :  { %v11180_v34 = vadd.f32 %v952_v32, %v684_v30  ;;  %v764_v35 = vpop.f32.mrf.mxu3  ;;  %v383_v30 = vld [vmem:[#allocation2 + $0x1c7] sm:$0xff]  ;;  %v384_v32 = vld [vmem:[#allocation2 + $0x1cf] sm:$0xff] }
 0x160   :  { %9732 = vmatmul.msk.bf16.gmra.mxu1 %vm81_vm1, %v11175_v17 }
 0x161   :  { %9764 = vmatmul.msk.bf16.gmra.mxu0 %vm81_vm1, %v11177_v26  ;;  %v1022_v63 = vpop.f32.mrf.mxu2 }
 0x162   :  { %v11187_v49 = vadd.f32 %v1022_v63, %v11102_v27  ;;  %v447_v27 = vpack.c.bf16 %v412_v57, %v411_v56  ;;  %v11197_v63 = vpack.c.bf16 %v481_v16, %v480_v61  ;;  %v514_v57 = vld [vmem:[#allocation2 + $0x428] sm:$0xff] }
 0x164   :  { %16669 = vst [vmem:[#allocation13_spill] sm:$0xff] %v11187_v49  ;;  %v483_v49 = vld [vmem:[#allocation2 + $0x1f0] sm:$0xff] }
 0x165   :  { %v686_v37 = vpop.f32.mrf.mxu1 }
 0x166   :  { %v954_v53 = vpop.f32.mrf.mxu0 }
 0x167   :  { %v11189_v54 = vadd.f32 %v954_v53, %v686_v37  ;;  %v11191_v55 = vpop.f32.mrf.mxu3  ;;  %v11199_v37 = vpack.c.bf16 %v384_v32, %v383_v30  ;;  %v413_v30 = vld [vmem:[#allocation2 + $0x3e7] sm:$0xff]  ;;  %v414_v32 = vld [vmem:[#allocation2 + $0x3ef] sm:$0xff] }
 0x168   :  { %v448_v23 = vpack.c.bf16 %v414_v32, %v413_v30 }
 0x169   :  { %v1024_v4 = vpop.f32.mrf.mxu2 }
 0x16a   :  { %v11194_v2 = vadd.f32 %v1024_v4, %v11129_v52 }
 0x16c   :  { %16670 = vst [vmem:[#allocation14_spill] sm:$0xff] %v11194_v2  ;;  %9749 = vmatmul.msk.bf16.gmra.mxu3 %vm81_vm1, %v546_v58  ;;  %v515_v58 = vld [vmem:[#allocation2 + $0x430] sm:$0xff]  ;;  %v482_v2 = vld [vmem:[#allocation2 + $0x1e8] sm:$0xff] }
 0x16d   :  { %v689_v53 = vpop.f32.mrf.mxu1 }
 0x16e   :  { %v957_v3 = vpop.f32.mrf.mxu0  ;;  %9779 = vmatmul.msk.bf16.gmra.mxu2 %vm81_vm1, %v447_v27  ;;  %v547_v27 = vpack.c.bf16 %v515_v58, %v514_v57 }
 0x16f   :  { %v11202_v36 = vadd.f32 %v957_v3, %v689_v53  ;;  %v11204_v14 = vpop.f32.mrf.mxu3 }
 0x170   :  { %9733 = vmatmul.msk.bf16.gmra.mxu1 %vm81_vm1, %v11197_v63 }
 0x171   :  { %9765 = vmatmul.msk.bf16.gmra.mxu0 %vm81_vm1, %v11199_v37  ;;  %v1027_v52 = vpop.f32.mrf.mxu2 }
 0x172   :  { %v11211_v56 = vadd.f32 %v1027_v52, %v11142_v21  ;;  %v11221_v21 = vpack.c.bf16 %v483_v49, %v482_v2  ;;  %v9915_v2 = vld [vmem:[%s16538_s4 + $0xc] sm:$0x3] }
 0x173   :  { %v3003_v49 = vsel %vm646_vm0, %v9915_v2, 0 }
 0x174   :  { %16671 = vst [vmem:[#allocation15_spill] sm:$0xff] %v11211_v56  ;;  %3012 = vmatpush.bf16.msra.mxu3 %v3003_v49 }
 0x175   :  { %v691_v61 = vpop.f32.mrf.mxu1 }
 0x176   :  { %v959_v4 = vpop.f32.mrf.mxu0 }
 0x177   :  { %v11213_v16 = vadd.f32 %v959_v4, %v691_v61  ;;  %v11215_v3 = vpop.f32.mrf.mxu3 }
 0x179   :  { %v1029_v53 = vpop.f32.mrf.mxu2 }
 0x17a   :  { %v11218_v6 = vadd.f32 %v1029_v53, %v11169_v40  ;;  %v415_v53 = vld [vmem:[#allocation2 + $0x407] sm:$0xff] }
 0x17c   :  { %16672 = vst [vmem:[#allocation16_spill] sm:$0xff] %v11218_v6  ;;  %9750 = vmatmul.msk.bf16.gmra.mxu3 %vm81_vm1, %v547_v27 }
 0x17d   :  { %v694_v52 = vpop.f32.mrf.mxu1 }
 0x17e   :  { %v962_v56 = vpop.f32.mrf.mxu0  ;;  %9780 = vmatmul.msk.bf16.gmra.mxu2 %vm81_vm1, %v448_v23  ;;  %v1087_v23 = vld [vmem:[#allocation2 + $0x9] sm:$0xff] }
 0x17f   :  { %v11224_v61 = vadd.f32 %v962_v56, %v694_v52  ;;  %v11226_v4 = vpop.f32.mrf.mxu3  ;;  %v1088_v56 = vld [vmem:[#allocation2 + $0x11] sm:$0xff] }
 0x180   :  { %9734 = vmatmul.msk.bf16.gmra.mxu1 %vm81_vm1, %v11221_v21  ;;  %v416_v52 = vld [vmem:[#allocation2 + $0x40f] sm:$0xff] }
 0x181   :  { %9817 = vmatmul.msk.bf16.vlgmr.msra.gmra.mxu0 %vm81_vm1, %v10820_v44  ;;  %v1032_v40 = vpop.f32.mrf.mxu2  ;;  %v1151_v44 = vpack.c.bf16 %v1088_v56, %v1087_v23  ;;  %v449_v49 = vpack.c.bf16 %v416_v52, %v415_v53  ;;  %v9981_v23 = vld [vmem:[%s16538_s4 + $0x10] sm:$0x3] }
 0x182   :  { %v11232_v57 = vadd.f32 %v1032_v40, %v764_v35  ;;  %v484_v35 = vld [vmem:[#allocation2 + $0x248] sm:$0xff]  ;;  %v485_v40 = vld [vmem:[#allocation2 + $0x250] sm:$0xff] }
 0x184   :  { %16673 = vst [vmem:[#allocation17_spill] sm:$0xff] %v11232_v57  ;;  %v9882_v57 = vld [vmem:[%s16538_s4 + $0xa] sm:$0x3] }
 0x185   :  { %v696_v58 = vpop.f32.mrf.mxu1  ;;  %v2572_v5 = vsel %vm646_vm0, %v9882_v57, 0 }
 0x186   :  { %v964_v30 = vpop.f32.mrf.mxu0  ;;  %2581 = vmatpush.bf16.msrb.mxu2 %v2572_v5 }
 0x187   :  { %v11238_v32 = vadd.f32 %v964_v30, %v696_v58  ;;  %v776_v27 = vpop.f32.mrf.mxu3  ;;  %v9948_v58 = vld [vmem:[%s16538_s4 + $0xe] sm:$0x3]  ;;  %v3863_v30 = vsel %vm646_vm0, %v9981_v23, 0 }
 0x188   :  { %v3433_v56 = vsel %vm646_vm0, %v9948_v58, 0  ;;  %3872 = vmatpush.bf16.msra.mxu1 %v3863_v30 }
 0x189   :  { %v1034_v6 = vpop.f32.mrf.mxu2  ;;  %3442 = vmatpush.bf16.msrb.mxu0 %v3433_v56 }
 0x18a   :  { %v11244_v2 = vadd.f32 %v1034_v6, %v11191_v55  ;;  %v532_v6 = vpack.c.bf16 %v485_v40, %v484_v35  ;;  %v1090_v35 = vld [vmem:[#allocation2 + $0x31] sm:$0xff] }
 0x18c   :  { %16674 = vst [vmem:[#allocation18_spill] sm:$0xff] %v11244_v2  ;;  %9784 = vmatmul.msk.bf16.vlgmr.msrb.gmra.mxu3 %vm81_vm1, %v1151_v44  ;;  %v1089_v44 = vld [vmem:[#allocation2 + $0x29] sm:$0xff] }
 0x18d   :  { %v699_v55 = vpop.f32.mrf.mxu1 }
 0x18e   :  { %v967_v53 = vpop.f32.mrf.mxu0  ;;  %9781 = vmatmul.msk.bf16.gmra.mxu2 %vm81_vm1, %v449_v49  ;;  %v417_v49 = vld [vmem:[#allocation2 + $0x427] sm:$0xff] }
 0x18f   :  { %v11257_v57 = vadd.f32 %v967_v53, %v699_v55  ;;  %v779_v52 = vpop.f32.mrf.mxu3  ;;  %v418_v55 = vld [vmem:[#allocation2 + $0x42f] sm:$0xff]  ;;  %v1152_v53 = vpack.c.bf16 %v1090_v35, %v1089_v44 }
 0x190   :  { %9735 = vmatmul.msk.bf16.gmra.mxu1 %vm81_vm1, %v532_v6  ;;  %v450_v31 = vpack.c.bf16 %v418_v55, %v417_v49  ;;  %v1092_v35 = vld [vmem:[#allocation2 + $0x51] sm:$0xff] }
 0x191   :  { %9818 = vmatmul.msk.bf16.gmra.mxu0 %vm81_vm1, %v10845_v60  ;;  %v1037_v5 = vpop.f32.mrf.mxu2 }
 0x192   :  { %v11263_v58 = vadd.f32 %v1037_v5, %v11204_v14 }
 0x194   :  { %16675 = vst [vmem:[#allocation19_spill] sm:$0xff] %v11263_v58 }
 0x195   :  { %v701_v40 = vpop.f32.mrf.mxu1 }
 0x196   :  { %v969_v23 = vpop.f32.mrf.mxu0 }
 0x197   :  { %v11265_v56 = vadd.f32 %v969_v23, %v701_v40  ;;  %v781_v30 = vpop.f32.mrf.mxu3 }
 0x199   :  { %v1039_v2 = vpop.f32.mrf.mxu2 }
 0x19a   :  { %v11268_v6 = vadd.f32 %v1039_v2, %v11215_v3  ;;  %v1091_v2 = vld [vmem:[#allocation2 + $0x49] sm:$0xff] }
 0x19b   :  { %v1153_v55 = vpack.c.bf16 %v1092_v35, %v1091_v2  ;;  %v1094_v35 = vld [vmem:[#allocation2 + $0x71] sm:$0xff] }
 0x19c   :  { %16676 = vst [vmem:[#allocation20_spill] sm:$0xff] %v11268_v6  ;;  %9785 = vmatmul.msk.bf16.gmra.mxu3 %vm81_vm1, %v1152_v53 }
 0x19d   :  { %v704_v60 = vpop.f32.mrf.mxu1 }
 0x19e   :  { %v972_v14 = vpop.f32.mrf.mxu0  ;;  %9782 = vmatmul.msk.bf16.gmra.mxu2 %vm81_vm1, %v450_v31 }
 0x19f   :  { %v11272_v5 = vadd.f32 %v972_v14, %v704_v60  ;;  %v784_v58 = vpop.f32.mrf.mxu3 }
 0x1a0   :  { %9850 = vmatmul.msk.bf16.vlgmr.msrb.gmra.mxu1 %vm81_vm1, %v10818_v43 }
 0x1a1   :  { %9819 = vmatmul.msk.bf16.gmra.mxu0 %vm81_vm1, %v10871_v13  ;;  %v1042_v44 = vpop.f32.mrf.mxu2 }
 0x1a2   :  { %v11279_v3 = vadd.f32 %v1042_v44, %v11226_v4 }
 0x1a4   :  { %16677 = vst [vmem:[#allocation21_spill] sm:$0xff] %v11279_v3 }
 0x1a5   :  { %v706_v40 = vpop.f32.mrf.mxu1 }
 0x1a6   :  { %v974_v23 = vpop.f32.mrf.mxu0 }
 0x1a7   :  { %v11281_v49 = vadd.f32 %v974_v23, %v706_v40  ;;  %v786_v31 = vpop.f32.mrf.mxu3 }
 0x1a9   :  { %v1044_v60 = vpop.f32.mrf.mxu2 }
 0x1aa   :  { %v11283_v14 = vadd.f32 %v1044_v60, %v776_v27  ;;  %v1093_v27 = vld [vmem:[#allocation2 + $0x69] sm:$0xff] }
 0x1ac   :  { %16678 = vst [vmem:[#allocation22_spill] sm:$0xff] %v11283_v14  ;;  %9786 = vmatmul.msk.bf16.gmra.mxu3 %vm81_vm1, %v1153_v55 }
 0x1ad   :  { %v709_v43 = vpop.f32.mrf.mxu1 }
 0x1ae   :  { %v977_v6 = vpop.f32.mrf.mxu0  ;;  %9883 = vmatmul.msk.bf16.vlgmr.msrb.gmra.mxu2 %vm81_vm1, %v1152_v53  ;;  %v1154_v53 = vpack.c.bf16 %v1094_v35, %v1093_v27  ;;  %v1096_v35 = vld [vmem:[#allocation2 + $0x91] sm:$0xff] }
 0x1af   :  { %v11287_v13 = vadd.f32 %v977_v6, %v709_v43  ;;  %v789_v4 = vpop.f32.mrf.mxu3 }
 0x1b0   :  { %9851 = vmatmul.msk.bf16.gmra.mxu1 %vm81_vm1, %v10843_v59 }
 0x1b1   :  { %9820 = vmatmul.msk.bf16.gmra.mxu0 %vm81_vm1, %v10897_v29  ;;  %v1047_v44 = vpop.f32.mrf.mxu2 }
 0x1b2   :  { %v11293_v2 = vadd.f32 %v1047_v44, %v779_v52 }
 0x1b4   :  { %16679 = vst [vmem:[#allocation23_spill] sm:$0xff] %v11293_v2 }
 0x1b5   :  { %v711_v40 = vpop.f32.mrf.mxu1 }
 0x1b6   :  { %v979_v23 = vpop.f32.mrf.mxu0 }
 0x1b7   :  { %v11295_v60 = vadd.f32 %v979_v23, %v711_v40  ;;  %v791_v14 = vpop.f32.mrf.mxu3 }
 0x1b9   :  { %v1049_v6 = vpop.f32.mrf.mxu2 }
 0x1ba   :  { %v11297_v43 = vadd.f32 %v1049_v6, %v781_v30  ;;  %v1095_v30 = vld [vmem:[#allocation2 + $0x89] sm:$0xff] }
 0x1bc   :  { %16680 = vst [vmem:[#allocation24_spill] sm:$0xff] %v11297_v43  ;;  %9787 = vmatmul.msk.bf16.gmra.mxu3 %vm81_vm1, %v1154_v53 }
 0x1bd   :  { %v714_v59 = vpop.f32.mrf.mxu1 }
 0x1be   :  { %v982_v3 = vpop.f32.mrf.mxu0  ;;  %9884 = vmatmul.msk.bf16.gmra.mxu2 %vm81_vm1, %v1153_v55  ;;  %v1155_v55 = vpack.c.bf16 %v1096_v35, %v1095_v30  ;;  %v1098_v35 = vld [vmem:[#allocation2 + $0xb1] sm:$0xff] }
 0x1bf   :  { %v11301_v29 = vadd.f32 %v982_v3, %v714_v59  ;;  %v794_v52 = vpop.f32.mrf.mxu3 }
 0x1c0   :  { %9852 = vmatmul.msk.bf16.gmra.mxu1 %vm81_vm1, %v10869_v12 }
 0x1c1   :  { %9821 = vmatmul.msk.bf16.gmra.mxu0 %vm81_vm1, %v10923_v47  ;;  %v1052_v44 = vpop.f32.mrf.mxu2 }
 0x1c2   :  { %v11307_v27 = vadd.f32 %v1052_v44, %v784_v58 }
 0x1c4   :  { %16681 = vst [vmem:[#allocation25_spill] sm:$0xff] %v11307_v27 }
 0x1c5   :  { %v716_v40 = vpop.f32.mrf.mxu1 }
 0x1c6   :  { %v984_v23 = vpop.f32.mrf.mxu0 }
 0x1c7   :  { %v11309_v6 = vadd.f32 %v984_v23, %v716_v40  ;;  %v796_v43 = vpop.f32.mrf.mxu3 }
 0x1c9   :  { %v1054_v3 = vpop.f32.mrf.mxu2 }
 0x1ca   :  { %v11311_v59 = vadd.f32 %v1054_v3, %v786_v31  ;;  %v1097_v31 = vld [vmem:[#allocation2 + $0xa9] sm:$0xff] }
 0x1cc   :  { %16682 = vst [vmem:[#allocation26_spill] sm:$0xff] %v11311_v59  ;;  %9788 = vmatmul.msk.bf16.gmra.mxu3 %vm81_vm1, %v1155_v55 }
 0x1cd   :  { %v719_v12 = vpop.f32.mrf.mxu1 }
 0x1ce   :  { %v987_v2 = vpop.f32.mrf.mxu0  ;;  %9885 = vmatmul.msk.bf16.gmra.mxu2 %vm81_vm1, %v1154_v53  ;;  %v1156_v53 = vpack.c.bf16 %v1098_v35, %v1097_v31  ;;  %v1100_v35 = vld [vmem:[#allocation2 + $0xd1] sm:$0xff] }
 0x1cf   :  { %v11315_v47 = vadd.f32 %v987_v2, %v719_v12  ;;  %v799_v58 = vpop.f32.mrf.mxu3 }
 0x1d0   :  { %9853 = vmatmul.msk.bf16.gmra.mxu1 %vm81_vm1, %v10895_v28 }
 0x1d1   :  { %9822 = vmatmul.msk.bf16.gmra.mxu0 %vm81_vm1, %v10949_v1  ;;  %v1057_v44 = vpop.f32.mrf.mxu2 }
 0x1d2   :  { %v11321_v30 = vadd.f32 %v1057_v44, %v789_v4 }
 0x1d4   :  { %16683 = vst [vmem:[#allocation27_spill] sm:$0xff] %v11321_v30 }
 0x1d5   :  { %v721_v40 = vpop.f32.mrf.mxu1 }
 0x1d6   :  { %v989_v23 = vpop.f32.mrf.mxu0 }
 0x1d7   :  { %v11323_v3 = vadd.f32 %v989_v23, %v721_v40  ;;  %v801_v59 = vpop.f32.mrf.mxu3 }
 0x1d9   :  { %v1059_v2 = vpop.f32.mrf.mxu2 }
 0x1da   :  { %v11325_v12 = vadd.f32 %v1059_v2, %v791_v14  ;;  %v1099_v14 = vld [vmem:[#allocation2 + $0xc9] sm:$0xff] }
 0x1dc   :  { %16684 = vst [vmem:[#allocation28_spill] sm:$0xff] %v11325_v12  ;;  %9789 = vmatmul.msk.bf16.gmra.mxu3 %vm81_vm1, %v1156_v53 }
 0x1dd   :  { %v724_v28 = vpop.f32.mrf.mxu1 }
 0x1de   :  { %v992_v27 = vpop.f32.mrf.mxu0  ;;  %9886 = vmatmul.msk.bf16.gmra.mxu2 %vm81_vm1, %v1155_v55  ;;  %v1157_v55 = vpack.c.bf16 %v1100_v35, %v1099_v14  ;;  %v1102_v35 = vld [vmem:[#allocation2 + $0xf1] sm:$0xff] }
 0x1df   :  { %v11329_v1 = vadd.f32 %v992_v27, %v724_v28  ;;  %v804_v4 = vpop.f32.mrf.mxu3 }
 0x1e0   :  { %9854 = vmatmul.msk.bf16.gmra.mxu1 %vm81_vm1, %v10921_v46 }
 0x1e1   :  { %9823 = vmatmul.msk.bf16.gmra.mxu0 %vm81_vm1, %v10975_v22  ;;  %v1062_v44 = vpop.f32.mrf.mxu2 }
 0x1e2   :  { %v11335_v31 = vadd.f32 %v1062_v44, %v794_v52 }
 0x1e4   :  { %16685 = vst [vmem:[#allocation29_spill] sm:$0xff] %v11335_v31  ;;  %v1960_v31 = vld [vmem:[#allocation2 + $0xf0] sm:$0xff] }
 0x1e5   :  { %v726_v40 = vpop.f32.mrf.mxu1 }
 0x1e6   :  { %v994_v23 = vpop.f32.mrf.mxu0 }
 0x1e7   :  { %v11337_v2 = vadd.f32 %v994_v23, %v726_v40  ;;  %v806_v12 = vpop.f32.mrf.mxu3 }
 0x1e9   :  { %v1064_v27 = vpop.f32.mrf.mxu2 }
 0x1ea   :  { %v11339_v28 = vadd.f32 %v1064_v27, %v796_v43  ;;  %v1101_v43 = vld [vmem:[#allocation2 + $0xe9] sm:$0xff] }
 0x1ec   :  { %16686 = vst [vmem:[#allocation30_spill] sm:$0xff] %v11339_v28  ;;  %9790 = vmatmul.msk.bf16.gmra.mxu3 %vm81_vm1, %v1157_v55 }
 0x1ed   :  { %v729_v46 = vpop.f32.mrf.mxu1 }
 0x1ee   :  { %v997_v30 = vpop.f32.mrf.mxu0  ;;  %9887 = vmatmul.msk.bf16.gmra.mxu2 %vm81_vm1, %v1156_v53  ;;  %v1158_v53 = vpack.c.bf16 %v1102_v35, %v1101_v43 }
 0x1ef   :  { %v11343_v22 = vadd.f32 %v997_v30, %v729_v46  ;;  %v809_v52 = vpop.f32.mrf.mxu3  ;;  %v1959_v46 = vld [vmem:[#allocation2 + $0xe8] sm:$0xff] }
 0x1f0   :  { %9855 = vmatmul.msk.bf16.gmra.mxu1 %vm81_vm1, %v10947_v0  ;;  %v2017_v0 = vpack.c.bf16 %v1960_v31, %v1959_v46 }
 0x1f1   :  { %9824 = vmatmul.msk.bf16.gmra.mxu0 %vm81_vm1, %v11000_v45  ;;  %v1067_v44 = vpop.f32.mrf.mxu2 }
 0x1f2   :  { %v11349_v14 = vadd.f32 %v1067_v44, %v799_v58 }
 0x1f4   :  { %16687 = vst [vmem:[#allocation31_spill] sm:$0xff] %v11349_v14  ;;  %v1961_v14 = vld [vmem:[#allocation2 + $0x108] sm:$0xff] }
 0x1f5   :  { %v731_v40 = vpop.f32.mrf.mxu1 }
 0x1f6   :  { %v999_v23 = vpop.f32.mrf.mxu0 }
 0x1f7   :  { %v11351_v27 = vadd.f32 %v999_v23, %v731_v40  ;;  %v811_v28 = vpop.f32.mrf.mxu3  ;;  %v1103_v40 = vld [vmem:[#allocation2 + $0x109] sm:$0xff] }
 0x1f9   :  { %v1069_v30 = vpop.f32.mrf.mxu2 }
 0x1fa   :  { %v11353_v9 = vadd.f32 %v1069_v30, %v801_v59  ;;  %v1104_v59 = vld [vmem:[#allocation2 + $0x111] sm:$0xff] }
 0x1fb   :  { %v1159_v46 = vpack.c.bf16 %v1104_v59, %v1103_v40 }
 0x1fc   :  { %16688 = vst [vmem:[#allocation32_spill] sm:$0xff] %v11353_v9  ;;  %9791 = vmatmul.msk.bf16.gmra.mxu3 %vm81_vm1, %v1158_v53 }
 0x1fd   :  { %v11356_v45 = vpop.f32.mrf.mxu1 }
 0x1fe   :  { %v1723_v58 = vpop.f32.mrf.mxu0  ;;  %9888 = vmatmul.msk.bf16.gmra.mxu2 %vm81_vm1, %v1157_v55 }
 0x1ff   :  { %v814_v44 = vpop.f32.mrf.mxu3 }
 0x200   :  { %9856 = vmatmul.msk.bf16.gmra.mxu1 %vm81_vm1, %v2017_v0  ;;  %v2018_v0 = vpack.c.bf16 %v1962_v51, %v1961_v14 }
 0x201   :  { %9825 = vmatmul.msk.bf16.gmra.mxu0 %vm81_vm1, %v11025_v8  ;;  %v1072_v43 = vpop.f32.mrf.mxu2 }
 0x202   :  { %v11362_v35 = vadd.f32 %v1072_v43, %v804_v4 }
 0x204   :  { %16689 = vst [vmem:[#allocation33_spill] sm:$0xff] %v11362_v35 }
 0x205   :  { %v11364_v23 = vpop.f32.mrf.mxu1 }
 0x206   :  { %16690 = vst [vmem:[#allocation34_spill] sm:$0xff] %v11364_v23  ;;  %v1725_v30 = vpop.f32.mrf.mxu0 }
 0x207   :  { %v816_v31 = vpop.f32.mrf.mxu3 }
 0x209   :  { %v1074_v9 = vpop.f32.mrf.mxu2 }
 0x20a   :  { %v11366_v55 = vadd.f32 %v1074_v9, %v806_v12  ;;  %v1105_v12 = vld [vmem:[#allocation2 + $0x129] sm:$0xff] }
 0x20c   :  { %16691 = vst [vmem:[#allocation35_spill] sm:$0xff] %v11366_v55  ;;  %9792 = vmatmul.msk.bf16.gmra.mxu3 %vm81_vm1, %v1159_v46  ;;  %v1106_v55 = vld [vmem:[#allocation2 + $0x131] sm:$0xff] }
 0x20d   :  { %v11369_v33 = vpop.f32.mrf.mxu1 }
 0x20e   :  { %16692 = vst [vmem:[#allocation36_spill] sm:$0xff] %v11369_v33  ;;  %v1728_v8 = vpop.f32.mrf.mxu0  ;;  %9889 = vmatmul.msk.bf16.gmra.mxu2 %vm81_vm1, %v1158_v53  ;;  %v1160_v33 = vpack.c.bf16 %v1106_v55, %v1105_v12 }
 0x20f   :  { %v1293_v4 = vpop.f32.mrf.mxu3 }
 0x210   :  { %v1453_v43 = vadd.f32 %v1293_v4, %v10997_v41  ;;  %9857 = vmatmul.msk.bf16.gmra.mxu1 %vm81_vm1, %v2018_v0  ;;  %v1963_v41 = vld [vmem:[#allocation2 + $0x128] sm:$0xff]  ;;  %v1964_v4 = vld [vmem:[#allocation2 + $0x130] sm:$0xff] }
 0x211   :  { %9826 = vmatmul.msk.bf16.gmra.mxu0 %vm81_vm1, %v11060_v39  ;;  %v1077_v40 = vpop.f32.mrf.mxu2  ;;  %v2019_v39 = vpack.c.bf16 %v1964_v4, %v1963_v41 }
 0x212   :  { %v11376_v59 = vadd.f32 %v1077_v40, %v809_v52  ;;  %v1883_v9 = vadd.f32 %v1723_v58, %v1453_v43 }
 0x214   :  { %16693 = vst [vmem:[#allocation37_spill] sm:$0xff] %v11376_v59 }
 0x215   :  { %v11378_v51 = vpop.f32.mrf.mxu1 }
 0x216   :  { %v1730_v14 = vpop.f32.mrf.mxu0 }
 0x217   :  { %v1295_v35 = vpop.f32.mrf.mxu3 }
 0x218   :  { %v1454_v53 = vadd.f32 %v1295_v35, %v11006_v50 }
 0x219   :  { %v1079_v23 = vpop.f32.mrf.mxu2 }
 0x21a   :  { %v11381_v0 = vadd.f32 %v1079_v23, %v811_v28  ;;  %v1884_v15 = vadd.f32 %v1725_v30, %v1454_v53  ;;  %v1107_v23 = vld [vmem:[#allocation2 + $0x149] sm:$0xff]  ;;  %v1108_v30 = vld [vmem:[#allocation2 + $0x151] sm:$0xff] }
 0x21c   :  { %9793 = vmatmul.msk.bf16.gmra.mxu3 %vm81_vm1, %v1160_v33 }
 0x21d   :  { %v2153_v52 = vpop.f32.mrf.mxu1 }
 0x21e   :  { %v1733_v58 = vpop.f32.mrf.mxu0  ;;  %9890 = vmatmul.msk.bf16.gmra.mxu2 %vm81_vm1, %v1159_v46  ;;  %v2313_v43 = vadd.f32 %v2153_v52, %v1883_v9  ;;  %v1161_v9 = vpack.c.bf16 %v1108_v30, %v1107_v23  ;;  %v1966_v52 = vld [vmem:[#allocation2 + $0x150] sm:$0xff] }
 0x21f   :  { %v1298_v40 = vpop.f32.mrf.mxu3  ;;  %v1109_v23 = vld [vmem:[#allocation2 + $0x169] sm:$0xff]  ;;  %v1110_v30 = vld [vmem:[#allocation2 + $0x171] sm:$0xff] }
 0x220   :  { %v1455_v59 = vadd.f32 %v1298_v40, %v11028_v11  ;;  %9858 = vmatmul.msk.bf16.gmra.mxu1 %vm81_vm1, %v2019_v39  ;;  %v1965_v11 = vld [vmem:[#allocation2 + $0x148] sm:$0xff] }
 0x221   :  { %9827 = vmatmul.msk.bf16.gmra.mxu0 %vm81_vm1, %v11097_v20  ;;  %v1082_v50 = vpop.f32.mrf.mxu2  ;;  %v2020_v20 = vpack.c.bf16 %v1966_v52, %v1965_v11 }
 0x222   :  { %v11389_v28 = vadd.f32 %v1082_v50, %v814_v44  ;;  %v1885_v35 = vadd.f32 %v1728_v8, %v1455_v59 }
 0x225   :  { %v2155_v55 = vpop.f32.mrf.mxu1 }
 0x226   :  { %v1735_v12 = vpop.f32.mrf.mxu0  ;;  %v2314_v53 = vadd.f32 %v2155_v55, %v1884_v15 }
 0x227   :  { %v1300_v41 = vpop.f32.mrf.mxu3 }
 0x228   :  { %v1456_v46 = vadd.f32 %v1300_v41, %v11052_v25 }
 0x229   :  { %v1084_v4 = vpop.f32.mrf.mxu2 }
 0x22a   :  { %v11392_v39 = vadd.f32 %v1084_v4, %v816_v31  ;;  %v1886_v40 = vadd.f32 %v1730_v14, %v1456_v46 }
 0x22c   :  { %9794 = vmatmul.msk.bf16.gmra.mxu3 %vm81_vm1, %v1161_v9 }
 0x22d   :  { %v2158_v44 = vpop.f32.mrf.mxu1 }
 0x22e   :  { %v1738_v8 = vpop.f32.mrf.mxu0  ;;  %9891 = vmatmul.msk.bf16.gmra.mxu2 %vm81_vm1, %v1160_v33  ;;  %v2315_v59 = vadd.f32 %v2158_v44, %v1885_v35  ;;  %v1162_v35 = vpack.c.bf16 %v1110_v30, %v1109_v23 }
 0x22f   :  { %v1303_v50 = vpop.f32.mrf.mxu3 }
 0x230   :  { %v1457_v15 = vadd.f32 %v1303_v50, %v11063_v48  ;;  %9859 = vmatmul.msk.bf16.gmra.mxu1 %vm81_vm1, %v2020_v20  ;;  %v1112_v50 = vld [vmem:[#allocation2 + $0x191] sm:$0xff] }
 0x231   :  { %9828 = vmatmul.msk.bf16.gmra.mxu0 %vm81_vm1, %v11137_v10  ;;  %v2583_v25 = vpop.f32.mrf.mxu2 }
 0x232   :  { %v11400_v31 = vadd.f32 %v2583_v25, %v2313_v43  ;;  %v1887_v14 = vadd.f32 %v1733_v58, %v1457_v15 }
 0x235   :  { %v2160_v55 = vpop.f32.mrf.mxu1 }
 0x236   :  { %v1740_v41 = vpop.f32.mrf.mxu0  ;;  %v2316_v46 = vadd.f32 %v2160_v55, %v1886_v40  ;;  %v1111_v40 = vld [vmem:[#allocation2 + $0x189] sm:$0xff] }
 0x237   :  { %v1305_v4 = vpop.f32.mrf.mxu3  ;;  %v1163_v30 = vpack.c.bf16 %v1112_v50, %v1111_v40  ;;  %v1545_v40 = vld [vmem:[#allocation2 + $0x1e7] sm:$0xff]  ;;  %v1546_v50 = vld [vmem:[#allocation2 + $0x1ef] sm:$0xff] }
 0x238   :  { %v1458_v33 = vadd.f32 %v1305_v4, %v11087_v62 }
 0x239   :  { %v2585_v11 = vpop.f32.mrf.mxu2 }
 0x23a   :  { %v11403_v48 = vadd.f32 %v2585_v11, %v2314_v53  ;;  %v1888_v52 = vadd.f32 %v1735_v12, %v1458_v33  ;;  %v1113_v11 = vld [vmem:[#allocation2 + $0x1a9] sm:$0xff] }
 0x23c   :  { %9795 = vmatmul.msk.bf16.gmra.mxu3 %vm81_vm1, %v1162_v35 }
 0x23d   :  { %v2163_v10 = vpop.f32.mrf.mxu1 }
 0x23e   :  { %v1743_v20 = vpop.f32.mrf.mxu0  ;;  %9892 = vmatmul.msk.bf16.gmra.mxu2 %vm81_vm1, %v1161_v9  ;;  %v2317_v58 = vadd.f32 %v2163_v10, %v1887_v14 }
 0x23f   :  { %v1308_v43 = vpop.f32.mrf.mxu3 }
 0x240   :  { %v1459_v44 = vadd.f32 %v1308_v43, %v11100_v24  ;;  %9860 = vmatmul.msk.bf16.gmra.mxu1 %vm81_vm1, %v11095_v19 }
 0x241   :  { %9829 = vmatmul.msk.bf16.gmra.mxu0 %vm81_vm1, %v11177_v26  ;;  %v2588_v62 = vpop.f32.mrf.mxu2 }
 0x242   :  { %v11412_v53 = vadd.f32 %v2588_v62, %v2315_v59  ;;  %v1889_v12 = vadd.f32 %v1738_v8, %v1459_v44 }
 0x245   :  { %v2165_v15 = vpop.f32.mrf.mxu1 }
 0x246   :  { %v1745_v25 = vpop.f32.mrf.mxu0  ;;  %v2318_v23 = vadd.f32 %v2165_v15, %v1888_v52  ;;  %v1114_v52 = vld [vmem:[#allocation2 + $0x1b1] sm:$0xff] }
 0x247   :  { %v1310_v9 = vpop.f32.mrf.mxu3 }
 0x248   :  { %v1460_v14 = vadd.f32 %v1310_v9, %v11126_v42 }
 0x249   :  { %v2590_v24 = vpop.f32.mrf.mxu2 }
 0x24a   :  { %v11415_v55 = vadd.f32 %v2590_v24, %v2316_v46  ;;  %v1890_v19 = vadd.f32 %v1740_v41, %v1460_v14 }
 0x24c   :  { %9796 = vmatmul.msk.bf16.gmra.mxu3 %vm81_vm1, %v1163_v30 }
 0x24d   :  { %v2168_v26 = vpop.f32.mrf.mxu1 }
 0x24e   :  { %v1748_v4 = vpop.f32.mrf.mxu0  ;;  %9893 = vmatmul.msk.bf16.gmra.mxu2 %vm81_vm1, %v1162_v35  ;;  %v2319_v8 = vadd.f32 %v2168_v26, %v1889_v12  ;;  %v1164_v12 = vpack.c.bf16 %v1114_v52, %v1113_v11 }
 0x24f   :  { %v1313_v59 = vpop.f32.mrf.mxu3 }
 0x250   :  { %v1461_v33 = vadd.f32 %v1313_v59, %v11140_v18  ;;  %9861 = vmatmul.msk.bf16.gmra.mxu1 %vm81_vm1, %v11135_v7 }
 0x251   :  { %9830 = vmatmul.msk.bf16.gmra.mxu0 %vm81_vm1, %v11199_v37  ;;  %v2593_v42 = vpop.f32.mrf.mxu2  ;;  %v1595_v37 = vpack.c.bf16 %v1546_v50, %v1545_v40 }
 0x252   :  { %v11424_v46 = vadd.f32 %v2593_v42, %v2317_v58  ;;  %v1891_v41 = vadd.f32 %v1743_v20, %v1461_v33 }
 0x255   :  { %v2170_v10 = vpop.f32.mrf.mxu1 }
 0x256   :  { %v1750_v43 = vpop.f32.mrf.mxu0  ;;  %v2320_v44 = vadd.f32 %v2170_v10, %v1890_v19 }
 0x257   :  { %v1315_v35 = vpop.f32.mrf.mxu3 }
 0x258   :  { %v1462_v62 = vadd.f32 %v1315_v35, %v11166_v38 }
 0x259   :  { %v2595_v18 = vpop.f32.mrf.mxu2 }
 0x25a   :  { %v11427_v7 = vadd.f32 %v2595_v18, %v2318_v23  ;;  %v1892_v15 = vadd.f32 %v1745_v25, %v1462_v62  ;;  %v256_v25 = vld [vmem:[%s16540_s0 + $0xf0] sm:$0xff]  ;;  %v257_v23 = vld [vmem:[%s16540_s0 + $0xf8] sm:$0xff] }
 0x25b   :  { %321 = vst.msk [vmem:[#allocation2 + $0x208] sm:$0xff] %vm81_vm1, %v256_v25 }
 0x25c   :  { %9797 = vmatmul.msk.bf16.gmra.mxu3 %vm81_vm1, %v1164_v12  ;;  %322 = vst.msk [vmem:[#allocation2 + $0x210] sm:$0xff] %vm81_vm1, %v257_v23 }
 0x25d   :  { %v2173_v58 = vpop.f32.mrf.mxu1 }
 0x25e   :  { %v1753_v20 = vpop.f32.mrf.mxu0  ;;  %9894 = vmatmul.msk.bf16.gmra.mxu2 %vm81_vm1, %v1163_v30  ;;  %v2321_v9 = vadd.f32 %v2173_v58, %v1891_v41  ;;  %v1117_v58 = vld [vmem:[#allocation2 + $0x1e9] sm:$0xff] }
 0x25f   :  { %v1318_v14 = vpop.f32.mrf.mxu3 }
 0x260   :  { %v1463_v24 = vadd.f32 %v1318_v14, %v11180_v34  ;;  %9862 = vmatmul.msk.bf16.gmra.mxu1 %vm81_vm1, %v11175_v17  ;;  %v1115_v34 = vld [vmem:[#allocation2 + $0x1c9] sm:$0xff]  ;;  %v1116_v17 = vld [vmem:[#allocation2 + $0x1d1] sm:$0xff] }
 0x261   :  { %9831 = vmatmul.msk.bf16.gmra.mxu0 %vm81_vm1, %v1595_v37  ;;  %v2598_v38 = vpop.f32.mrf.mxu2  ;;  %v1165_v11 = vpack.c.bf16 %v1116_v17, %v1115_v34  ;;  %v1118_v14 = vld [vmem:[#allocation2 + $0x1f1] sm:$0xff] }
 0x262   :  { %v11441_v19 = vadd.f32 %v2598_v38, %v2319_v8  ;;  %v1893_v30 = vadd.f32 %v1748_v4, %v1463_v24  ;;  %v1547_v10 = vld [vmem:[#allocation2 + $0x207] sm:$0xff]  ;;  %v1550_v17 = vld [vmem:[#allocation2 + $0x26f] sm:$0xff] }
 0x263   :  { %v1548_v62 = vld [vmem:[#allocation2 + $0x20f] sm:$0xff] }
 0x264   :  { %v1596_v4 = vpack.c.bf16 %v1548_v62, %v1547_v10  ;;  %v1120_v62 = vld [vmem:[#allocation2 + $0x251] sm:$0xff] }
 0x265   :  { %v2175_v26 = vpop.f32.mrf.mxu1 }
 0x266   :  { %v1755_v59 = vpop.f32.mrf.mxu0  ;;  %v2322_v33 = vadd.f32 %v2175_v26, %v1892_v15 }
 0x267   :  { %v1320_v42 = vpop.f32.mrf.mxu3 }
 0x268   :  { %v1464_v41 = vadd.f32 %v1320_v42, %v11189_v54 }
 0x269   :  { %v2600_v52 = vpop.f32.mrf.mxu2 }
 0x26a   :  { %v11446_v35 = vadd.f32 %v2600_v52, %v2320_v44  ;;  %v1894_v8 = vadd.f32 %v1750_v43, %v1464_v41 }
 0x26c   :  { %9798 = vmatmul.msk.bf16.gmra.mxu3 %vm81_vm1, %v1165_v11 }
 0x26d   :  { %v2178_v18 = vpop.f32.mrf.mxu1 }
 0x26e   :  { %v1758_v40 = vpop.f32.mrf.mxu0  ;;  %9895 = vmatmul.msk.bf16.gmra.mxu2 %vm81_vm1, %v1164_v12  ;;  %v2323_v50 = vadd.f32 %v2178_v18, %v1893_v30  ;;  %v1166_v30 = vpack.c.bf16 %v1118_v14, %v1117_v58  ;;  %v1978_v58 = vld [vmem:[#allocation2 + $0x210] sm:$0xff]  ;;  %v1551_v14 = vld [vmem:[#allocation2 + $0x287] sm:$0xff] }
 0x26f   :  { %v1323_v37 = vpop.f32.mrf.mxu3 }
 0x270   :  { %v1465_v15 = vadd.f32 %v1323_v37, %v11202_v36  ;;  %9863 = vmatmul.msk.bf16.gmra.mxu1 %vm81_vm1, %v11197_v63  ;;  %v1549_v36 = vld [vmem:[#allocation2 + $0x267] sm:$0xff] }
 0x271   :  { %9832 = vmatmul.msk.bf16.gmra.mxu0 %vm81_vm1, %v1596_v4  ;;  %v2603_v54 = vpop.f32.mrf.mxu2 }
 0x272   :  { %v11454_v44 = vadd.f32 %v2603_v54, %v2321_v9  ;;  %v1895_v43 = vadd.f32 %v1753_v20, %v1465_v15  ;;  %v1597_v9 = vpack.c.bf16 %v1550_v17, %v1549_v36 }
 0x275   :  { %v2180_v24 = vpop.f32.mrf.mxu1 }
 0x276   :  { %v1760_v38 = vpop.f32.mrf.mxu0  ;;  %v2324_v25 = vadd.f32 %v2180_v24, %v1894_v8  ;;  %v1119_v8 = vld [vmem:[#allocation2 + $0x249] sm:$0xff] }
 0x277   :  { %v1325_v23 = vpop.f32.mrf.mxu3  ;;  %v1167_v54 = vpack.c.bf16 %v1120_v62, %v1119_v8  ;;  %v2407_v62 = vld [vmem:[#allocation2 + $0x209] sm:$0xff] }
 0x278   :  { %v1466_v12 = vadd.f32 %v1325_v23, %v11213_v16 }
 0x279   :  { %v2605_v34 = vpop.f32.mrf.mxu2 }
 0x27a   :  { %v11457_v26 = vadd.f32 %v2605_v34, %v2322_v33  ;;  %v1896_v63 = vadd.f32 %v1755_v59, %v1466_v12 }
 0x27c   :  { %9799 = vmatmul.msk.bf16.gmra.mxu3 %vm81_vm1, %v1166_v30 }
 0x27d   :  { %v2183_v42 = vpop.f32.mrf.mxu1 }
 0x27e   :  { %v1763_v20 = vpop.f32.mrf.mxu0  ;;  %9896 = vmatmul.msk.bf16.gmra.mxu2 %vm81_vm1, %v1165_v11  ;;  %v2325_v41 = vadd.f32 %v2183_v42, %v1895_v43  ;;  %v1977_v43 = vld [vmem:[#allocation2 + $0x208] sm:$0xff]  ;;  %v1122_v42 = vld [vmem:[#allocation2 + $0x271] sm:$0xff] }
 0x27f   :  { %v1328_v52 = vpop.f32.mrf.mxu3 }
 0x280   :  { %v1467_v10 = vadd.f32 %v1328_v52, %v11224_v61  ;;  %9864 = vmatmul.msk.bf16.gmra.mxu1 %vm81_vm1, %v11221_v21  ;;  %v1552_v21 = vld [vmem:[#allocation2 + $0x28f] sm:$0xff] }
 0x281   :  { %9833 = vmatmul.msk.bf16.gmra.mxu0 %vm81_vm1, %v1597_v9  ;;  %v2608_v16 = vpop.f32.mrf.mxu2  ;;  %v1121_v9 = vld [vmem:[#allocation2 + $0x269] sm:$0xff] }
 0x282   :  { %v11465_v33 = vadd.f32 %v2608_v16, %v2323_v50  ;;  %v1897_v59 = vadd.f32 %v1758_v40, %v1467_v10  ;;  %v2026_v40 = vpack.c.bf16 %v1978_v58, %v1977_v43  ;;  %v1598_v50 = vpack.c.bf16 %v1552_v21, %v1551_v14  ;;  %v1554_v43 = vld [vmem:[#allocation2 + $0x2af] sm:$0xff] }
 0x285   :  { %v2185_v4 = vpop.f32.mrf.mxu1 }
 0x286   :  { %v1765_v18 = vpop.f32.mrf.mxu0  ;;  %v2326_v37 = vadd.f32 %v2185_v4, %v1896_v63  ;;  %v1168_v4 = vpack.c.bf16 %v1122_v42, %v1121_v9 }
 0x287   :  { %v1330_v15 = vpop.f32.mrf.mxu3 }
 0x288   :  { %v1468_v11 = vadd.f32 %v1330_v15, %v11238_v32 }
 0x289   :  { %v2610_v61 = vpop.f32.mrf.mxu2 }
 0x28a   :  { %v11468_v24 = vadd.f32 %v2610_v61, %v2324_v25  ;;  %v1898_v23 = vadd.f32 %v1760_v38, %v1468_v11  ;;  %v1980_v11 = vld [vmem:[#allocation2 + $0x270] sm:$0xff] }
 0x28c   :  { %9800 = vmatmul.msk.bf16.gmra.mxu3 %vm81_vm1, %v1167_v54  ;;  %v1553_v54 = vld [vmem:[#allocation2 + $0x2a7] sm:$0xff] }
 0x28d   :  { %v2188_v12 = vpop.f32.mrf.mxu1  ;;  %v1599_v14 = vpack.c.bf16 %v1554_v43, %v1553_v54 }
 0x28e   :  { %v1768_v34 = vpop.f32.mrf.mxu0  ;;  %9897 = vmatmul.msk.bf16.gmra.mxu2 %vm81_vm1, %v1166_v30  ;;  %v2327_v36 = vadd.f32 %v2188_v12, %v1897_v59  ;;  %v2408_v30 = vld [vmem:[#allocation2 + $0x211] sm:$0xff] }
 0x28f   :  { %v1333_v17 = vpop.f32.mrf.mxu3 }
 0x290   :  { %v1469_v32 = vadd.f32 %v1333_v17, %v11257_v57  ;;  %9865 = vmatmul.msk.bf16.gmra.mxu1 %vm81_vm1, %v2026_v40  ;;  %v1979_v57 = vld [vmem:[#allocation2 + $0x268] sm:$0xff] }
 0x291   :  { %9834 = vmatmul.msk.bf16.gmra.mxu0 %vm81_vm1, %v1598_v50  ;;  %v2613_v63 = vpop.f32.mrf.mxu2  ;;  %v2027_v58 = vpack.c.bf16 %v1980_v11, %v1979_v57  ;;  %v1123_v17 = vld [vmem:[#allocation2 + $0x289] sm:$0xff] }
 0x292   :  { %v11475_v25 = vadd.f32 %v2613_v63, %v2325_v41  ;;  %v1899_v38 = vadd.f32 %v1763_v20, %v1469_v32  ;;  %v2456_v41 = vpack.c.bf16 %v2408_v30, %v2407_v62  ;;  %v1124_v32 = vld [vmem:[#allocation2 + $0x291] sm:$0xff]  ;;  %v1981_v62 = vld [vmem:[#allocation2 + $0x288] sm:$0xff] }
 0x293   :  { %v1556_v57 = vld [vmem:[#allocation2 + $0x2cf] sm:$0xff] }
 0x295   :  { %v2190_v52 = vpop.f32.mrf.mxu1 }
 0x296   :  { %v1770_v10 = vpop.f32.mrf.mxu0  ;;  %v2328_v16 = vadd.f32 %v2190_v52, %v1898_v23 }
 0x297   :  { %v1335_v8 = vpop.f32.mrf.mxu3 }
 0x298   :  { %v1470_v59 = vadd.f32 %v1335_v8, %v11265_v56 }
 0x299   :  { %v2615_v15 = vpop.f32.mrf.mxu2 }
 0x29a   :  { %v11478_v61 = vadd.f32 %v2615_v15, %v2326_v37  ;;  %v1900_v20 = vadd.f32 %v1765_v18, %v1470_v59  ;;  %v1555_v59 = vld [vmem:[#allocation2 + $0x2c7] sm:$0xff] }
 0x29c   :  { %9801 = vmatmul.msk.bf16.gmra.mxu3 %vm81_vm1, %v1168_v4 }
 0x29d   :  { %v2193_v21 = vpop.f32.mrf.mxu1 }
 0x29e   :  { %v1773_v23 = vpop.f32.mrf.mxu0  ;;  %9898 = vmatmul.msk.bf16.gmra.mxu2 %vm81_vm1, %v2456_v41  ;;  %v2329_v40 = vadd.f32 %v2193_v21, %v1899_v38  ;;  %v1169_v38 = vpack.c.bf16 %v1124_v32, %v1123_v17  ;;  %v1126_v21 = vld [vmem:[#allocation2 + $0x2b1] sm:$0xff]  ;;  %v1983_v32 = vld [vmem:[#allocation2 + $0x2a8] sm:$0xff] }
 0x29f   :  { %v1338_v56 = vpop.f32.mrf.mxu3 }
 0x2a0   :  { %v1471_v50 = vadd.f32 %v1338_v56, %v11272_v5  ;;  %9866 = vmatmul.msk.bf16.gmra.mxu1 %vm81_vm1, %v2027_v58  ;;  %v1982_v5 = vld [vmem:[#allocation2 + $0x290] sm:$0xff] }
 0x2a1   :  { %9835 = vmatmul.msk.bf16.gmra.mxu0 %vm81_vm1, %v1599_v14  ;;  %v2618_v37 = vpop.f32.mrf.mxu2  ;;  %v1125_v14 = vld [vmem:[#allocation2 + $0x2a9] sm:$0xff] }
 0x2a2   :  { %v11485_v12 = vadd.f32 %v2618_v37, %v2327_v36  ;;  %v1901_v18 = vadd.f32 %v1768_v34, %v1471_v50  ;;  %v2028_v34 = vpack.c.bf16 %v1982_v5, %v1981_v62  ;;  %v1600_v36 = vpack.c.bf16 %v1556_v57, %v1555_v59 }
 0x2a5   :  { %v2195_v63 = vpop.f32.mrf.mxu1 }
 0x2a6   :  { %v1775_v9 = vpop.f32.mrf.mxu0  ;;  %v2330_v42 = vadd.f32 %v2195_v63, %v1900_v20 }
 0x2a7   :  { %v1340_v52 = vpop.f32.mrf.mxu3 }
 0x2a8   :  { %v1472_v8 = vadd.f32 %v1340_v52, %v11281_v49  ;;  %v1557_v52 = vld [vmem:[#allocation2 + $0x2e7] sm:$0xff] }
 0x2a9   :  { %v2620_v30 = vpop.f32.mrf.mxu2 }
 0x2aa   :  { %v11488_v15 = vadd.f32 %v2620_v30, %v2328_v16  ;;  %v1902_v11 = vadd.f32 %v1770_v10, %v1472_v8  ;;  %v1558_v8 = vld [vmem:[#allocation2 + $0x2ef] sm:$0xff] }
 0x2ac   :  { %9802 = vmatmul.msk.bf16.gmra.mxu3 %vm81_vm1, %v1169_v38 }
 0x2ad   :  { %v2198_v54 = vpop.f32.mrf.mxu1 }
 0x2ae   :  { %v1778_v43 = vpop.f32.mrf.mxu0  ;;  %9899 = vmatmul.msk.bf16.gmra.mxu2 %vm81_vm1, %v1168_v4  ;;  %v2331_v41 = vadd.f32 %v2198_v54, %v1901_v18  ;;  %v1170_v18 = vpack.c.bf16 %v1126_v21, %v1125_v14  ;;  %v1128_v54 = vld [vmem:[#allocation2 + $0x2d1] sm:$0xff]  ;;  %v1985_v21 = vld [vmem:[#allocation2 + $0x2c8] sm:$0xff] }
 0x2af   :  { %v1343_v20 = vpop.f32.mrf.mxu3 }
 0x2b0   :  { %v1473_v49 = vadd.f32 %v1343_v20, %v11287_v13  ;;  %9867 = vmatmul.msk.bf16.gmra.mxu1 %vm81_vm1, %v2028_v34  ;;  %v1984_v13 = vld [vmem:[#allocation2 + $0x2b0] sm:$0xff] }
 0x2b1   :  { %9836 = vmatmul.msk.bf16.gmra.mxu0 %vm81_vm1, %v1600_v36  ;;  %v2623_v58 = vpop.f32.mrf.mxu2  ;;  %v1127_v36 = vld [vmem:[#allocation2 + $0x2c9] sm:$0xff] }
 0x2b2   :  { %v11495_v16 = vadd.f32 %v2623_v58, %v2329_v40  ;;  %v1903_v10 = vadd.f32 %v1773_v23, %v1473_v49  ;;  %v2029_v23 = vpack.c.bf16 %v1984_v13, %v1983_v32  ;;  %v1601_v40 = vpack.c.bf16 %v1558_v8, %v1557_v52 }
 0x2b5   :  { %v2200_v56 = vpop.f32.mrf.mxu1 }
 0x2b6   :  { %v1780_v50 = vpop.f32.mrf.mxu0  ;;  %v2332_v37 = vadd.f32 %v2200_v56, %v1902_v11 }
 0x2b7   :  { %v1345_v17 = vpop.f32.mrf.mxu3 }
 0x2b8   :  { %v1474_v4 = vadd.f32 %v1345_v17, %v11295_v60  ;;  %v1559_v17 = vld [vmem:[#allocation2 + $0x307] sm:$0xff] }
 0x2b9   :  { %v2625_v63 = vpop.f32.mrf.mxu2 }
 0x2ba   :  { %v11498_v62 = vadd.f32 %v2625_v63, %v2330_v42  ;;  %v1904_v30 = vadd.f32 %v1775_v9, %v1474_v4  ;;  %v1560_v4 = vld [vmem:[#allocation2 + $0x30f] sm:$0xff] }
 0x2bc   :  { %9803 = vmatmul.msk.bf16.gmra.mxu3 %vm81_vm1, %v1170_v18 }
 0x2bd   :  { %v2203_v5 = vpop.f32.mrf.mxu1 }
 0x2be   :  { %v1783_v59 = vpop.f32.mrf.mxu0  ;;  %9900 = vmatmul.msk.bf16.gmra.mxu2 %vm81_vm1, %v1169_v38  ;;  %v2333_v57 = vadd.f32 %v2203_v5, %v1903_v10  ;;  %v1171_v10 = vpack.c.bf16 %v1128_v54, %v1127_v36  ;;  %v1130_v5 = vld [vmem:[#allocation2 + $0x2f1] sm:$0xff]  ;;  %v1987_v54 = vld [vmem:[#allocation2 + $0x2e8] sm:$0xff] }
 0x2bf   :  { %v1348_v11 = vpop.f32.mrf.mxu3 }
 0x2c0   :  { %v1475_v60 = vadd.f32 %v1348_v11, %v11301_v29  ;;  %9868 = vmatmul.msk.bf16.gmra.mxu1 %vm81_vm1, %v2029_v23  ;;  %v1986_v29 = vld [vmem:[#allocation2 + $0x2d0] sm:$0xff] }
 0x2c1   :  { %9837 = vmatmul.msk.bf16.gmra.mxu0 %vm81_vm1, %v1601_v40  ;;  %v2628_v34 = vpop.f32.mrf.mxu2  ;;  %v1129_v40 = vld [vmem:[#allocation2 + $0x2e9] sm:$0xff] }
 0x2c2   :  { %v11505_v42 = vadd.f32 %v2628_v34, %v2331_v41  ;;  %v1905_v9 = vadd.f32 %v1778_v43, %v1475_v60  ;;  %v2030_v43 = vpack.c.bf16 %v1986_v29, %v1985_v21  ;;  %v1602_v41 = vpack.c.bf16 %v1560_v4, %v1559_v17 }
 0x2c5   :  { %v2205_v20 = vpop.f32.mrf.mxu1 }
 0x2c6   :  { %v1785_v49 = vpop.f32.mrf.mxu0  ;;  %v2334_v58 = vadd.f32 %v2205_v20, %v1904_v30 }
 0x2c7   :  { %v1350_v14 = vpop.f32.mrf.mxu3 }
 0x2c8   :  { %v1476_v38 = vadd.f32 %v1350_v14, %v11309_v6  ;;  %v1561_v14 = vld [vmem:[#allocation2 + $0x327] sm:$0xff] }
 0x2c9   :  { %v2630_v56 = vpop.f32.mrf.mxu2 }
 0x2ca   :  { %v11508_v32 = vadd.f32 %v2630_v56, %v2332_v37  ;;  %v1906_v63 = vadd.f32 %v1780_v50, %v1476_v38  ;;  %v1562_v38 = vld [vmem:[#allocation2 + $0x32f] sm:$0xff] }
 0x2cc   :  { %9804 = vmatmul.msk.bf16.gmra.mxu3 %vm81_vm1, %v1171_v10 }
 0x2cd   :  { %v2208_v13 = vpop.f32.mrf.mxu1 }
 0x2ce   :  { %v1788_v52 = vpop.f32.mrf.mxu0  ;;  %9901 = vmatmul.msk.bf16.gmra.mxu2 %vm81_vm1, %v1170_v18  ;;  %v2335_v8 = vadd.f32 %v2208_v13, %v1905_v9  ;;  %v1172_v9 = vpack.c.bf16 %v1130_v5, %v1129_v40  ;;  %v1132_v13 = vld [vmem:[#allocation2 + $0x311] sm:$0xff]  ;;  %v1989_v5 = vld [vmem:[#allocation2 + $0x308] sm:$0xff] }
 0x2cf   :  { %v1353_v30 = vpop.f32.mrf.mxu3 }
 0x2d0   :  { %v1477_v6 = vadd.f32 %v1353_v30, %v11315_v47  ;;  %9869 = vmatmul.msk.bf16.gmra.mxu1 %vm81_vm1, %v2030_v43  ;;  %v1988_v47 = vld [vmem:[#allocation2 + $0x2f0] sm:$0xff] }
 0x2d1   :  { %9838 = vmatmul.msk.bf16.gmra.mxu0 %vm81_vm1, %v1602_v41  ;;  %v2633_v23 = vpop.f32.mrf.mxu2  ;;  %v1131_v41 = vld [vmem:[#allocation2 + $0x309] sm:$0xff] }
 0x2d2   :  { %v11515_v37 = vadd.f32 %v2633_v23, %v2333_v57  ;;  %v1907_v50 = vadd.f32 %v1783_v59, %v1477_v6  ;;  %v2031_v59 = vpack.c.bf16 %v1988_v47, %v1987_v54  ;;  %v1603_v57 = vpack.c.bf16 %v1562_v38, %v1561_v14 }
 0x2d5   :  { %v2210_v11 = vpop.f32.mrf.mxu1 }
 0x2d6   :  { %v1790_v60 = vpop.f32.mrf.mxu0  ;;  %v2336_v34 = vadd.f32 %v2210_v11, %v1906_v63 }
 0x2d7   :  { %v1355_v36 = vpop.f32.mrf.mxu3 }
 0x2d8   :  { %v1478_v18 = vadd.f32 %v1355_v36, %v11323_v3  ;;  %v1563_v36 = vld [vmem:[#allocation2 + $0x347] sm:$0xff] }
 0x2d9   :  { %v2635_v20 = vpop.f32.mrf.mxu2 }
 0x2da   :  { %v11518_v21 = vadd.f32 %v2635_v20, %v2334_v58  ;;  %v1908_v56 = vadd.f32 %v1785_v49, %v1478_v18  ;;  %v1564_v18 = vld [vmem:[#allocation2 + $0x34f] sm:$0xff] }
 0x2dc   :  { %9805 = vmatmul.msk.bf16.gmra.mxu3 %vm81_vm1, %v1172_v9 }
 0x2dd   :  { %v2213_v29 = vpop.f32.mrf.mxu1 }
 0x2de   :  { %v1793_v17 = vpop.f32.mrf.mxu0  ;;  %9902 = vmatmul.msk.bf16.gmra.mxu2 %vm81_vm1, %v1171_v10  ;;  %v2337_v4 = vadd.f32 %v2213_v29, %v1907_v50  ;;  %v1173_v50 = vpack.c.bf16 %v1132_v13, %v1131_v41  ;;  %v1134_v29 = vld [vmem:[#allocation2 + $0x331] sm:$0xff]  ;;  %v1991_v13 = vld [vmem:[#allocation2 + $0x328] sm:$0xff] }
 0x2df   :  { %v1358_v63 = vpop.f32.mrf.mxu3 }
 0x2e0   :  { %v1479_v3 = vadd.f32 %v1358_v63, %v11329_v1  ;;  %9870 = vmatmul.msk.bf16.gmra.mxu1 %vm81_vm1, %v2031_v59  ;;  %v1990_v1 = vld [vmem:[#allocation2 + $0x310] sm:$0xff] }
 0x2e1   :  { %9839 = vmatmul.msk.bf16.gmra.mxu0 %vm81_vm1, %v1603_v57  ;;  %v2638_v43 = vpop.f32.mrf.mxu2  ;;  %v1133_v57 = vld [vmem:[#allocation2 + $0x329] sm:$0xff] }
 0x2e2   :  { %v11525_v58 = vadd.f32 %v2638_v43, %v2335_v8  ;;  %v1909_v49 = vadd.f32 %v1788_v52, %v1479_v3  ;;  %v2032_v52 = vpack.c.bf16 %v1990_v1, %v1989_v5  ;;  %v1604_v8 = vpack.c.bf16 %v1564_v18, %v1563_v36  ;;  %v16694_v18 = vld [vmem:[#allocation5_spill] sm:$0xff] }
 0x2e5   :  { %v2215_v30 = vpop.f32.mrf.mxu1 }
 0x2e6   :  { %v1795_v6 = vpop.f32.mrf.mxu0  ;;  %v2338_v23 = vadd.f32 %v2215_v30, %v1908_v56 }
 0x2e7   :  { %v1360_v40 = vpop.f32.mrf.mxu3 }
 0x2e8   :  { %v1480_v10 = vadd.f32 %v1360_v40, %v11337_v2  ;;  %v1565_v40 = vld [vmem:[#allocation2 + $0x367] sm:$0xff] }
 0x2e9   :  { %v2640_v11 = vpop.f32.mrf.mxu2 }
 0x2ea   :  { %v11528_v54 = vadd.f32 %v2640_v11, %v2336_v34  ;;  %v1910_v20 = vadd.f32 %v1790_v60, %v1480_v10  ;;  %v1566_v10 = vld [vmem:[#allocation2 + $0x36f] sm:$0xff] }
 0x2ec   :  { %9806 = vmatmul.msk.bf16.gmra.mxu3 %vm81_vm1, %v1173_v50 }
 0x2ed   :  { %v2218_v47 = vpop.f32.mrf.mxu1 }
 0x2ee   :  { %v1798_v14 = vpop.f32.mrf.mxu0  ;;  %9903 = vmatmul.msk.bf16.gmra.mxu2 %vm81_vm1, %v1172_v9  ;;  %v2339_v38 = vadd.f32 %v2218_v47, %v1909_v49  ;;  %v1174_v49 = vpack.c.bf16 %v1134_v29, %v1133_v57  ;;  %v16695_v29 = vld [vmem:[#allocation34_spill] sm:$0xff] }
 0x2ef   :  { %v1363_v56 = vpop.f32.mrf.mxu3 }
 0x2f0   :  { %v1481_v2 = vadd.f32 %v1363_v56, %v11343_v22  ;;  %9871 = vmatmul.msk.bf16.gmra.mxu1 %vm81_vm1, %v2032_v52  ;;  %v1992_v22 = vld [vmem:[#allocation2 + $0x330] sm:$0xff] }
 0x2f1   :  { %9840 = vmatmul.msk.bf16.gmra.mxu0 %vm81_vm1, %v1604_v8  ;;  %v2643_v59 = vpop.f32.mrf.mxu2  ;;  %v1135_v56 = vld [vmem:[#allocation2 + $0x349] sm:$0xff] }
 0x2f2   :  { %v11535_v34 = vadd.f32 %v2643_v59, %v2337_v4  ;;  %v1911_v60 = vadd.f32 %v1793_v17, %v1481_v2  ;;  %v2033_v17 = vpack.c.bf16 %v1992_v22, %v1991_v13  ;;  %v1605_v4 = vpack.c.bf16 %v1566_v10, %v1565_v40  ;;  %v1136_v2 = vld [vmem:[#allocation2 + $0x351] sm:$0xff]  ;;  %v1993_v13 = vld [vmem:[#allocation2 + $0x348] sm:$0xff] }
 0x2f3   :  { %v1994_v22 = vld [vmem:[#allocation2 + $0x350] sm:$0xff]  ;;  %v1567_v40 = vld [vmem:[#allocation2 + $0x387] sm:$0xff] }
 0x2f4   :  { %v1568_v10 = vld [vmem:[#allocation2 + $0x38f] sm:$0xff] }
 0x2f5   :  { %v2220_v63 = vpop.f32.mrf.mxu1 }
 0x2f6   :  { %v1800_v3 = vpop.f32.mrf.mxu0  ;;  %v2340_v43 = vadd.f32 %v2220_v63, %v1910_v20  ;;  %v1003_v20 = vadd.f32 %v16694_v18, %v11356_v45  ;;  %v16696_v63 = vld [vmem:[#allocation6_spill] sm:$0xff] }
 0x2f7   :  { %v1365_v41 = vpop.f32.mrf.mxu3  ;;  %v1005_v45 = vadd.f32 %v16696_v63, %v16695_v29  ;;  %v1138_v29 = vld [vmem:[#allocation2 + $0x371] sm:$0xff] }
 0x2f8   :  { %v1482_v9 = vadd.f32 %v1365_v41, %v11351_v27 }
 0x2f9   :  { %v2645_v30 = vpop.f32.mrf.mxu2 }
 0x2fa   :  { %v11538_v5 = vadd.f32 %v2645_v30, %v2338_v23  ;;  %v1912_v11 = vadd.f32 %v1795_v6, %v1482_v9  ;;  %v1175_v9 = vpack.c.bf16 %v1136_v2, %v1135_v56 }
 0x2fc   :  { %9807 = vmatmul.msk.bf16.gmra.mxu3 %vm81_vm1, %v1174_v49 }
 0x2fd   :  { %v2223_v1 = vpop.f32.mrf.mxu1 }
 0x2fe   :  { %v1803_v36 = vpop.f32.mrf.mxu0  ;;  %9904 = vmatmul.msk.bf16.gmra.mxu2 %vm81_vm1, %v1173_v50  ;;  %v2341_v27 = vadd.f32 %v2223_v1, %v1911_v60 }
 0x2ff   :  { %v1368_v52 = vpop.f32.mrf.mxu3 }
 0x300   :  { %v1483_v8 = vadd.f32 %v1368_v52, %v1003_v20  ;;  %9872 = vmatmul.msk.bf16.gmra.mxu1 %vm81_vm1, %v2033_v17  ;;  %v16697_v20 = vld [vmem:[#allocation36_spill] sm:$0xff]  ;;  %v16698_v52 = vld [vmem:[#allocation7_spill] sm:$0xff] }
 0x301   :  { %9841 = vmatmul.msk.bf16.gmra.mxu0 %vm81_vm1, %v1605_v4  ;;  %v2648_v23 = vpop.f32.mrf.mxu2  ;;  %v1606_v4 = vpack.c.bf16 %v1568_v10, %v1567_v40  ;;  %v1996_v10 = vld [vmem:[#allocation2 + $0x370] sm:$0xff] }
 0x302   :  { %v11546_v6 = vadd.f32 %v2648_v23, %v2339_v38  ;;  %v1913_v47 = vadd.f32 %v1798_v14, %v1483_v8  ;;  %v2034_v14 = vpack.c.bf16 %v1994_v22, %v1993_v13  ;;  %v1995_v22 = vld [vmem:[#allocation2 + $0x368] sm:$0xff] }
 0x305   :  { %v2225_v59 = vpop.f32.mrf.mxu1 }
 0x306   :  { %v1805_v57 = vpop.f32.mrf.mxu0  ;;  %v2342_v41 = vadd.f32 %v2225_v59, %v1912_v11  ;;  %v1008_v11 = vadd.f32 %v16698_v52, %v16697_v20  ;;  %v1137_v59 = vld [vmem:[#allocation2 + $0x369] sm:$0xff] }
 0x307   :  { %v1370_v50 = vpop.f32.mrf.mxu3 }
 0x308   :  { %v1484_v60 = vadd.f32 %v1370_v50, %v1005_v45  ;;  %v16699_v50 = vld [vmem:[#allocation8_spill] sm:$0xff] }
 0x309   :  { %v2650_v30 = vpop.f32.mrf.mxu2 }
 0x30a   :  { %v11550_v17 = vadd.f32 %v2650_v30, %v2340_v43  ;;  %v1914_v38 = vadd.f32 %v1800_v3, %v1484_v60  ;;  %v1010_v60 = vadd.f32 %v16699_v50, %v11378_v51  ;;  %v1176_v30 = vpack.c.bf16 %v1138_v29, %v1137_v59  ;;  %v1139_v59 = vld [vmem:[#allocation2 + $0x389] sm:$0xff]  ;;  %v1140_v29 = vld [vmem:[#allocation2 + $0x391] sm:$0xff] }
 0x30c   :  { %9808 = vmatmul.msk.bf16.gmra.mxu3 %vm81_vm1, %v1175_v9 }
 0x30d   :  { %v2228_v1 = vpop.f32.mrf.mxu1 }
 0x30e   :  { %v1808_v18 = vpop.f32.mrf.mxu0  ;;  %9905 = vmatmul.msk.bf16.gmra.mxu2 %vm81_vm1, %v1174_v49  ;;  %v2343_v8 = vadd.f32 %v2228_v1, %v1913_v47 }
 0x30f   :  { %v1373_v23 = vpop.f32.mrf.mxu3 }
 0x310   :  { %v1485_v56 = vadd.f32 %v1373_v23, %v1008_v11  ;;  %9873 = vmatmul.msk.bf16.gmra.mxu1 %vm81_vm1, %v2034_v14  ;;  %v1569_v14 = vld [vmem:[#allocation2 + $0x3a7] sm:$0xff] }
 0x311   :  { %9842 = vmatmul.msk.bf16.gmra.mxu0 %vm81_vm1, %v1606_v4  ;;  %v2653_v43 = vpop.f32.mrf.mxu2  ;;  %v1570_v4 = vld [vmem:[#allocation2 + $0x3af] sm:$0xff] }
 0x312   :  { %v11558_v3 = vadd.f32 %v2653_v43, %v2341_v27  ;;  %v1915_v2 = vadd.f32 %v1803_v36, %v1485_v56  ;;  %v2035_v36 = vpack.c.bf16 %v1996_v10, %v1995_v22  ;;  %v1607_v20 = vpack.c.bf16 %v1570_v4, %v1569_v14  ;;  %v16700_v23 = vld [vmem:[#allocation9_spill] sm:$0xff]  ;;  %v1998_v10 = vld [vmem:[#allocation2 + $0x390] sm:$0xff] }
 0x313   :  { %v1997_v22 = vld [vmem:[#allocation2 + $0x388] sm:$0xff] }
 0x314   :  { %v1571_v14 = vld [vmem:[#allocation2 + $0x3c7] sm:$0xff]  ;;  %v1572_v4 = vld [vmem:[#allocation2 + $0x3cf] sm:$0xff] }
 0x315   :  { %v2230_v63 = vpop.f32.mrf.mxu1 }
 0x316   :  { %v1810_v45 = vpop.f32.mrf.mxu0  ;;  %v2344_v13 = vadd.f32 %v2230_v63, %v1914_v38 }
 0x317   :  { %v1375_v49 = vpop.f32.mrf.mxu3 }
 0x318   :  { %v1486_v47 = vadd.f32 %v1375_v49, %v1010_v60 }
 0x319   :  { %v2655_v40 = vpop.f32.mrf.mxu2 }
 0x31a   :  { %v11562_v1 = vadd.f32 %v2655_v40, %v2342_v41  ;;  %v1916_v27 = vadd.f32 %v1805_v57, %v1486_v47  ;;  %v16701_v47 = vld [vmem:[#allocation10_spill] sm:$0xff] }
 0x31c   :  { %9809 = vmatmul.msk.bf16.gmra.mxu3 %vm81_vm1, %v1176_v30 }
 0x31d   :  { %v2233_v52 = vpop.f32.mrf.mxu1 }
 0x31e   :  { %v1813_v11 = vpop.f32.mrf.mxu0  ;;  %9906 = vmatmul.msk.bf16.gmra.mxu2 %vm81_vm1, %v1175_v9  ;;  %v2345_v51 = vadd.f32 %v2233_v52, %v1915_v2  ;;  %v1177_v2 = vpack.c.bf16 %v1140_v29, %v1139_v59  ;;  %v1141_v29 = vld [vmem:[#allocation2 + $0x3a9] sm:$0xff] }
 0x31f   :  { %v1378_v38 = vpop.f32.mrf.mxu3 }
 0x320   :  { %v1487_v56 = vadd.f32 %v1378_v38, %v16700_v23  ;;  %9874 = vmatmul.msk.bf16.gmra.mxu1 %vm81_vm1, %v2035_v36 }
 0x321   :  { %9843 = vmatmul.msk.bf16.gmra.mxu0 %vm81_vm1, %v1607_v20  ;;  %v2658_v43 = vpop.f32.mrf.mxu2 }
 0x322   :  { %v11569_v41 = vadd.f32 %v2658_v43, %v2343_v8  ;;  %v1917_v57 = vadd.f32 %v1808_v18, %v1487_v56  ;;  %v2036_v18 = vpack.c.bf16 %v1998_v10, %v1997_v22  ;;  %v1608_v8 = vpack.c.bf16 %v1572_v4, %v1571_v14  ;;  %v16702_v56 = vld [vmem:[#allocation11_spill] sm:$0xff]  ;;  %v1999_v10 = vld [vmem:[#allocation2 + $0x3a8] sm:$0xff]  ;;  %v2000_v4 = vld [vmem:[#allocation2 + $0x3b0] sm:$0xff] }
 0x325   :  { %v2235_v63 = vpop.f32.mrf.mxu1 }
 0x326   :  { %v1815_v50 = vpop.f32.mrf.mxu0  ;;  %v2346_v60 = vadd.f32 %v2235_v63, %v1916_v27  ;;  %v1142_v63 = vld [vmem:[#allocation2 + $0x3b1] sm:$0xff] }
 0x327   :  { %v1380_v49 = vpop.f32.mrf.mxu3 }
 0x328   :  { %v1488_v9 = vadd.f32 %v1380_v49, %v16701_v47 }
 0x329   :  { %v2660_v40 = vpop.f32.mrf.mxu2 }
 0x32a   :  { %v11572_v36 = vadd.f32 %v2660_v40, %v2344_v13  ;;  %v1918_v20 = vadd.f32 %v1810_v45, %v1488_v9  ;;  %v16703_v40 = vld [vmem:[#allocation12_spill] sm:$0xff] }
 0x32c   :  { %9810 = vmatmul.msk.bf16.gmra.mxu3 %vm81_vm1, %v1177_v2 }
 0x32d   :  { %v2238_v52 = vpop.f32.mrf.mxu1 }
 0x32e   :  { %v1818_v38 = vpop.f32.mrf.mxu0  ;;  %9907 = vmatmul.msk.bf16.gmra.mxu2 %vm81_vm1, %v1176_v30  ;;  %v2347_v27 = vadd.f32 %v2238_v52, %v1917_v57  ;;  %v1178_v57 = vpack.c.bf16 %v1142_v63, %v1141_v29  ;;  %v1573_v52 = vld [vmem:[#allocation2 + $0x3e7] sm:$0xff] }
 0x32f   :  { %v1383_v23 = vpop.f32.mrf.mxu3 }
 0x330   :  { %v1489_v43 = vadd.f32 %v1383_v23, %v16702_v56  ;;  %9875 = vmatmul.msk.bf16.gmra.mxu1 %vm81_vm1, %v2036_v18  ;;  %v1574_v18 = vld [vmem:[#allocation2 + $0x3ef] sm:$0xff] }
 0x331   :  { %9844 = vmatmul.msk.bf16.gmra.mxu0 %vm81_vm1, %v1608_v8  ;;  %v2663_v59 = vpop.f32.mrf.mxu2 }
 0x332   :  { %v11579_v13 = vadd.f32 %v2663_v59, %v2345_v51  ;;  %v1919_v45 = vadd.f32 %v1813_v11, %v1489_v43  ;;  %v2037_v11 = vpack.c.bf16 %v2000_v4, %v1999_v10  ;;  %v1609_v51 = vpack.c.bf16 %v1574_v18, %v1573_v52  ;;  %v16707_v52 = vld [vmem:[#allocation14_spill] sm:$0xff]  ;;  %v2001_v18 = vld [vmem:[#allocation2 + $0x3c8] sm:$0xff] }
 0x335   :  { %v2240_v49 = vpop.f32.mrf.mxu1 }
 0x336   :  { %v1820_v47 = vpop.f32.mrf.mxu0  ;;  %v2348_v9 = vadd.f32 %v2240_v49, %v1918_v20  ;;  %v16705_v49 = vld [vmem:[#allocation13_spill] sm:$0xff] }
 0x337   :  { %v1385_v22 = vpop.f32.mrf.mxu3 }
 0x338   :  { %v1490_v30 = vadd.f32 %v1385_v22, %v16703_v40  ;;  %v1143_v22 = vld [vmem:[#allocation2 + $0x3c9] sm:$0xff]  ;;  %v1144_v40 = vld [vmem:[#allocation2 + $0x3d1] sm:$0xff] }
 0x339   :  { %v2665_v14 = vpop.f32.mrf.mxu2 }
 0x33a   :  { %v11582_v23 = vadd.f32 %v2665_v14, %v2346_v60  ;;  %v1920_v8 = vadd.f32 %v1815_v50, %v1490_v30 }
 0x33c   :  { %16704 = vst [vmem:[#allocation5_spill] sm:$0xff] %v11582_v23  ;;  %9811 = vmatmul.msk.bf16.gmra.mxu3 %vm81_vm1, %v1178_v57 }
 0x33d   :  { %v2243_v56 = vpop.f32.mrf.mxu1 }
 0x33e   :  { %v1823_v43 = vpop.f32.mrf.mxu0  ;;  %9908 = vmatmul.msk.bf16.gmra.mxu2 %vm81_vm1, %v1177_v2  ;;  %v2349_v20 = vadd.f32 %v2243_v56, %v1919_v45  ;;  %v1179_v45 = vpack.c.bf16 %v1144_v40, %v1143_v22 }
 0x33f   :  { %v1388_v59 = vpop.f32.mrf.mxu3 }
 0x340   :  { %v1491_v29 = vadd.f32 %v1388_v59, %v16705_v49  ;;  %9876 = vmatmul.msk.bf16.gmra.mxu1 %vm81_vm1, %v2037_v11  ;;  %v2002_v59 = vld [vmem:[#allocation2 + $0x3d0] sm:$0xff]  ;;  %v1575_v49 = vld [vmem:[#allocation2 + $0x407] sm:$0xff] }
 0x341   :  { %9845 = vmatmul.msk.bf16.gmra.mxu0 %vm81_vm1, %v1609_v51  ;;  %v2668_v63 = vpop.f32.mrf.mxu2  ;;  %v1576_v11 = vld [vmem:[#allocation2 + $0x40f] sm:$0xff] }
 0x342   :  { %v11589_v60 = vadd.f32 %v2668_v63, %v2347_v27  ;;  %v1921_v50 = vadd.f32 %v1818_v38, %v1491_v29  ;;  %v2038_v38 = vpack.c.bf16 %v2002_v59, %v2001_v18  ;;  %v1610_v27 = vpack.c.bf16 %v1576_v11, %v1575_v49  ;;  %v16710_v11 = vld [vmem:[#allocation16_spill] sm:$0xff] }
 0x344   :  { %16706 = vst [vmem:[#allocation34_spill] sm:$0xff] %v11589_v60 }
 0x345   :  { %v2245_v30 = vpop.f32.mrf.mxu1 }
 0x346   :  { %v1825_v10 = vpop.f32.mrf.mxu0  ;;  %v2350_v14 = vadd.f32 %v2245_v30, %v1920_v8 }
 0x347   :  { %v1390_v4 = vpop.f32.mrf.mxu3 }
 0x348   :  { %v1492_v2 = vadd.f32 %v1390_v4, %v16707_v52  ;;  %v16709_v4 = vld [vmem:[#allocation15_spill] sm:$0xff]  ;;  %v1145_v52 = vld [vmem:[#allocation2 + $0x3e9] sm:$0xff] }
 0x349   :  { %v2670_v56 = vpop.f32.mrf.mxu2 }
 0x34a   :  { %v11592_v23 = vadd.f32 %v2670_v56, %v2348_v9  ;;  %v1922_v51 = vadd.f32 %v1820_v47, %v1492_v2  ;;  %v1146_v2 = vld [vmem:[#allocation2 + $0x3f1] sm:$0xff] }
 0x34c   :  { %16708 = vst [vmem:[#allocation6_spill] sm:$0xff] %v11592_v23  ;;  %9812 = vmatmul.msk.bf16.gmra.mxu3 %vm81_vm1, %v1179_v45 }
 0x34d   :  { %v2248_v29 = vpop.f32.mrf.mxu1 }
 0x34e   :  { %v1828_v63 = vpop.f32.mrf.mxu0  ;;  %9909 = vmatmul.msk.bf16.gmra.mxu2 %vm81_vm1, %v1178_v57  ;;  %v2351_v8 = vadd.f32 %v2248_v29, %v1921_v50  ;;  %v1180_v50 = vpack.c.bf16 %v1146_v2, %v1145_v52  ;;  %v2003_v29 = vld [vmem:[#allocation2 + $0x3e8] sm:$0xff] }
 0x34f   :  { %v1393_v30 = vpop.f32.mrf.mxu3 }
 0x350   :  { %v1493_v22 = vadd.f32 %v1393_v30, %v16709_v4  ;;  %9877 = vmatmul.msk.bf16.gmra.mxu1 %vm81_vm1, %v2038_v38  ;;  %v2004_v30 = vld [vmem:[#allocation2 + $0x3f0] sm:$0xff]  ;;  %v1577_v4 = vld [vmem:[#allocation2 + $0x427] sm:$0xff] }
 0x351   :  { %9846 = vmatmul.msk.bf16.gmra.mxu0 %vm81_vm1, %v1610_v27  ;;  %v2673_v40 = vpop.f32.mrf.mxu2  ;;  %v1578_v38 = vld [vmem:[#allocation2 + $0x42f] sm:$0xff] }
 0x352   :  { %v11599_v9 = vadd.f32 %v2673_v40, %v2349_v20  ;;  %v1923_v47 = vadd.f32 %v1823_v43, %v1493_v22  ;;  %v2039_v43 = vpack.c.bf16 %v2004_v30, %v2003_v29  ;;  %v1611_v20 = vpack.c.bf16 %v1578_v38, %v1577_v4  ;;  %v16715_v38 = vld [vmem:[#allocation18_spill] sm:$0xff] }
 0x355   :  { %v2250_v18 = vpop.f32.mrf.mxu1 }
 0x356   :  { %v1830_v56 = vpop.f32.mrf.mxu0  ;;  %v2352_v59 = vadd.f32 %v2250_v18, %v1922_v51 }
 0x357   :  { %v1395_v49 = vpop.f32.mrf.mxu3 }
 0x358   :  { %v1494_v57 = vadd.f32 %v1395_v49, %v16710_v11  ;;  %v16712_v49 = vld [vmem:[#allocation17_spill] sm:$0xff]  ;;  %v1148_v11 = vld [vmem:[#allocation2 + $0x411] sm:$0xff] }
 0x359   :  { %v2675_v23 = vpop.f32.mrf.mxu2 }
 0x35a   :  { %v11602_v60 = vadd.f32 %v2675_v23, %v2350_v14  ;;  %v1924_v27 = vadd.f32 %v1825_v10, %v1494_v57  ;;  %v288_v23 = vld [vmem:[%s16540_s0 + $0x1f0] sm:$0xff]  ;;  %v289_v10 = vld [vmem:[%s16540_s0 + $0x1f8] sm:$0xff] }
 0x35b   :  { %353 = vst.msk [vmem:[#allocation2 + $0x448] sm:$0xff] %vm81_vm1, %v288_v23 }
 0x35c   :  { %16711 = vst [vmem:[#allocation36_spill] sm:$0xff] %v11602_v60  ;;  %9813 = vmatmul.msk.bf16.gmra.mxu3 %vm81_vm1, %v1180_v50 }
 0x35d   :  { %v2253_v22 = vpop.f32.mrf.mxu1  ;;  %354 = vst.msk [vmem:[#allocation2 + $0x450] sm:$0xff] %vm81_vm1, %v289_v10 }
 0x35e   :  { %v1833_v40 = vpop.f32.mrf.mxu0  ;;  %9910 = vmatmul.msk.bf16.gmra.mxu2 %vm81_vm1, %v1179_v45  ;;  %v2353_v51 = vadd.f32 %v2253_v22, %v1923_v47  ;;  %v1147_v47 = vld [vmem:[#allocation2 + $0x409] sm:$0xff] }
 0x35f   :  { %v1398_v18 = vpop.f32.mrf.mxu3 }
 0x360   :  { %v1495_v52 = vadd.f32 %v1398_v18, %v16712_v49  ;;  %9878 = vmatmul.msk.bf16.gmra.mxu1 %vm81_vm1, %v2039_v43  ;;  %v2005_v18 = vld [vmem:[#allocation2 + $0x408] sm:$0xff]  ;;  %v2006_v49 = vld [vmem:[#allocation2 + $0x410] sm:$0xff] }
 0x361   :  { %9847 = vmatmul.msk.bf16.gmra.mxu0 %vm81_vm1, %v1611_v20  ;;  %v2678_v2 = vpop.f32.mrf.mxu2  ;;  %v1181_v20 = vpack.c.bf16 %v1148_v11, %v1147_v47  ;;  %v2040_v23 = vpack.c.bf16 %v2006_v49, %v2005_v18 }
 0x362   :  { %v11615_v14 = vadd.f32 %v2678_v2, %v2351_v8  ;;  %v1925_v45 = vadd.f32 %v1828_v63, %v1495_v52  ;;  %v1579_v8 = vld [vmem:[#allocation2 + $0x447] sm:$0xff] }
 0x364   :  { %16713 = vst [vmem:[#allocation7_spill] sm:$0xff] %v11615_v14  ;;  %v1580_v52 = vld [vmem:[#allocation2 + $0x44f] sm:$0xff] }
 0x365   :  { %v2255_v57 = vpop.f32.mrf.mxu1  ;;  %v1612_v10 = vpack.c.bf16 %v1580_v52, %v1579_v8  ;;  %v2007_v52 = vld [vmem:[#allocation2 + $0x428] sm:$0xff] }
 0x366   :  { %v1835_v29 = vpop.f32.mrf.mxu0  ;;  %v11619_v30 = vadd.f32 %v2255_v57, %v1924_v27 }
 0x367   :  { %v1400_v4 = vpop.f32.mrf.mxu3 }
 0x368   :  { %16714 = vst [vmem:[#allocation8_spill] sm:$0xff] %v11619_v30  ;;  %v1496_v43 = vadd.f32 %v1400_v4, %v16715_v38  ;;  %v16716_v4 = vld [vmem:[#allocation19_spill] sm:$0xff]  ;;  %v1149_v38 = vld [vmem:[#allocation2 + $0x429] sm:$0xff] }
 0x369   :  { %v2680_v22 = vpop.f32.mrf.mxu2 }
 0x36a   :  { %v11622_v2 = vadd.f32 %v2680_v22, %v2352_v59  ;;  %v1926_v63 = vadd.f32 %v1830_v56, %v1496_v43  ;;  %v1150_v43 = vld [vmem:[#allocation2 + $0x431] sm:$0xff] }
 0x36c   :  { %9814 = vmatmul.msk.bf16.gmra.mxu3 %vm81_vm1, %v1181_v20 }
 0x36d   :  { %v2258_v14 = vpop.f32.mrf.mxu1 }
 0x36e   :  { %v1838_v60 = vpop.f32.mrf.mxu0  ;;  %9911 = vmatmul.msk.bf16.gmra.mxu2 %vm81_vm1, %v1180_v50  ;;  %v2355_v27 = vadd.f32 %v2258_v14, %v1925_v45  ;;  %v16719_v50 = vld [vmem:[#allocation20_spill] sm:$0xff]  ;;  %v1182_v45 = vpack.c.bf16 %v1150_v43, %v1149_v38 }
 0x36f   :  { %v1403_v57 = vpop.f32.mrf.mxu3 }
 0x370   :  { %v1497_v47 = vadd.f32 %v1403_v57, %v16716_v4  ;;  %9879 = vmatmul.msk.bf16.gmra.mxu1 %vm81_vm1, %v2040_v23  ;;  %v2008_v23 = vld [vmem:[#allocation2 + $0x430] sm:$0xff]  ;;  %v3238_v4 = vld [vmem:[#allocation2 + $0x48] sm:$0xff] }
 0x371   :  { %9848 = vmatmul.msk.bf16.gmra.mxu0 %vm81_vm1, %v1612_v10  ;;  %v2683_v59 = vpop.f32.mrf.mxu2  ;;  %v3239_v10 = vld [vmem:[#allocation2 + $0x50] sm:$0xff] }
 0x372   :  { %v11629_v11 = vadd.f32 %v2683_v59, %v2353_v51  ;;  %v1927_v56 = vadd.f32 %v1833_v40, %v1497_v47  ;;  %v2041_v40 = vpack.c.bf16 %v2008_v23, %v2007_v52  ;;  %v3302_v51 = vpack.c.bf16 %v3239_v10, %v3238_v4 }
 0x374   :  { %16717 = vst [vmem:[#allocation9_spill] sm:$0xff] %v11629_v11 }
 0x375   :  { %v2260_v22 = vpop.f32.mrf.mxu1 }
 0x376   :  { %v1840_v18 = vpop.f32.mrf.mxu0  ;;  %v11631_v49 = vadd.f32 %v2260_v22, %v1926_v63 }
 0x377   :  { %v1405_v8 = vpop.f32.mrf.mxu3 }
 0x378   :  { %16718 = vst [vmem:[#allocation10_spill] sm:$0xff] %v11631_v49  ;;  %v1498_v14 = vadd.f32 %v1405_v8, %v16719_v50  ;;  %v16721_v49 = vld [vmem:[#allocation21_spill] sm:$0xff] }
 0x379   :  { %v11634_v57 = vpop.f32.mrf.mxu2  ;;  %v2808_v50 = vld [vmem:[#allocation2 + $0x47] sm:$0xff] }
 0x37a   :  { %16720 = vst [vmem:[#allocation11_spill] sm:$0xff] %v11634_v57  ;;  %v1928_v30 = vadd.f32 %v1835_v29, %v1498_v14  ;;  %v2809_v14 = vld [vmem:[#allocation2 + $0x4f] sm:$0xff] }
 0x37b   :  { %v2009_v57 = vld [vmem:[#allocation2 + $0x448] sm:$0xff] }
 0x37c   :  { %9815 = vmatmul.msk.bf16.gmra.mxu3 %vm81_vm1, %v1182_v45 }
 0x37d   :  { %v2263_v47 = vpop.f32.mrf.mxu1 }
 0x37e   :  { %v1843_v59 = vpop.f32.mrf.mxu0  ;;  %9912 = vmatmul.msk.bf16.gmra.mxu2 %vm81_vm1, %v1181_v20  ;;  %v2357_v63 = vadd.f32 %v2263_v47, %v1927_v56  ;;  %v16724_v20 = vld [vmem:[#allocation22_spill] sm:$0xff]  ;;  %v2872_v47 = vpack.c.bf16 %v2809_v14, %v2808_v50 }
 0x37f   :  { %v1408_v22 = vpop.f32.mrf.mxu3 }
 0x380   :  { %v1499_v8 = vadd.f32 %v1408_v22, %v16721_v49  ;;  %9880 = vmatmul.msk.bf16.gmra.mxu1 %vm81_vm1, %v2041_v40  ;;  %v2010_v40 = vld [vmem:[#allocation2 + $0x450] sm:$0xff]  ;;  %v3240_v22 = vld [vmem:[#allocation2 + $0x68] sm:$0xff] }
 0x381   :  { %9949 = vmatmul.msk.bf16.vlgmr.msrb.gmra.mxu0 %vm81_vm1, %v3302_v51  ;;  %v2688_v38 = vpop.f32.mrf.mxu2  ;;  %v3241_v51 = vld [vmem:[#allocation2 + $0x70] sm:$0xff] }
 0x382   :  { %v11641_v43 = vadd.f32 %v2688_v38, %v2355_v27  ;;  %v1929_v29 = vadd.f32 %v1838_v60, %v1499_v8  ;;  %v2042_v60 = vpack.c.bf16 %v2010_v40, %v2009_v57  ;;  %v3303_v27 = vpack.c.bf16 %v3241_v51, %v3240_v22  ;;  %v16729_v51 = vld [vmem:[#allocation24_spill] sm:$0xff] }
 0x384   :  { %16722 = vst [vmem:[#allocation12_spill] sm:$0xff] %v11641_v43 }
 0x385   :  { %v2265_v52 = vpop.f32.mrf.mxu1 }
 0x386   :  { %v1845_v23 = vpop.f32.mrf.mxu0  ;;  %v11643_v4 = vadd.f32 %v2265_v52, %v1928_v30 }
 0x387   :  { %v1410_v10 = vpop.f32.mrf.mxu3 }
 0x388   :  { %16723 = vst [vmem:[#allocation13_spill] sm:$0xff] %v11643_v4  ;;  %v1500_v56 = vadd.f32 %v1410_v10, %v16724_v20  ;;  %v16726_v4 = vld [vmem:[#allocation23_spill] sm:$0xff]  ;;  %v2810_v20 = vld [vmem:[#allocation2 + $0x67] sm:$0xff] }
 0x389   :  { %v11646_v49 = vpop.f32.mrf.mxu2 }
 0x38a   :  { %16725 = vst [vmem:[#allocation14_spill] sm:$0xff] %v11646_v49  ;;  %v1930_v11 = vadd.f32 %v1840_v18, %v1500_v56  ;;  %v2811_v56 = vld [vmem:[#allocation2 + $0x6f] sm:$0xff] }
 0x38b   :  { %v3242_v49 = vld [vmem:[#allocation2 + $0x88] sm:$0xff] }
 0x38c   :  { %9916 = vmatmul.msk.bf16.vlgmr.msra.gmra.mxu3 %vm81_vm1, %v2872_v47 }
 0x38d   :  { %v2268_v8 = vpop.f32.mrf.mxu1 }
 0x38e   :  { %v1848_v38 = vpop.f32.mrf.mxu0  ;;  %9913 = vmatmul.msk.bf16.gmra.mxu2 %vm81_vm1, %v1182_v45  ;;  %v2359_v30 = vadd.f32 %v2268_v8, %v1929_v29  ;;  %v2439_v45 = vld [vmem:[#allocation2 + $0x449] sm:$0xff]  ;;  %v2440_v29 = vld [vmem:[#allocation2 + $0x451] sm:$0xff] }
 0x38f   :  { %v1413_v52 = vpop.f32.mrf.mxu3 }
 0x390   :  { %v1501_v10 = vadd.f32 %v1413_v52, %v16726_v4  ;;  %9881 = vmatmul.msk.bf16.gmra.mxu1 %vm81_vm1, %v2042_v60  ;;  %v2873_v4 = vpack.c.bf16 %v2811_v56, %v2810_v20  ;;  %v3668_v52 = vld [vmem:[#allocation2 + $0x49] sm:$0xff] }
 0x391   :  { %9950 = vmatmul.msk.bf16.gmra.mxu0 %vm81_vm1, %v3303_v27  ;;  %v2693_v50 = vpop.f32.mrf.mxu2  ;;  %v3669_v27 = vld [vmem:[#allocation2 + $0x51] sm:$0xff] }
 0x392   :  { %v11653_v14 = vadd.f32 %v2693_v50, %v2357_v63  ;;  %v1931_v18 = vadd.f32 %v1843_v59, %v1501_v10  ;;  %v3243_v63 = vld [vmem:[#allocation2 + $0x90] sm:$0xff]  ;;  %v2472_v50 = vpack.c.bf16 %v2440_v29, %v2439_v45  ;;  %v3732_v10 = vpack.c.bf16 %v3669_v27, %v3668_v52  ;;  %v2812_v45 = vld [vmem:[#allocation2 + $0x87] sm:$0xff] }
 0x393   :  { %v2813_v29 = vld [vmem:[#allocation2 + $0x8f] sm:$0xff] }
 0x394   :  { %16727 = vst [vmem:[#allocation15_spill] sm:$0xff] %v11653_v14  ;;  %v3304_v14 = vpack.c.bf16 %v3243_v63, %v3242_v49  ;;  %v16733_v27 = vld [vmem:[#allocation26_spill] sm:$0xff]  ;;  %v2874_v63 = vpack.c.bf16 %v2813_v29, %v2812_v45 }
 0x395   :  { %v2270_v57 = vpop.f32.mrf.mxu1 }
 0x396   :  { %v1850_v47 = vpop.f32.mrf.mxu0  ;;  %v11655_v40 = vadd.f32 %v2270_v57, %v1930_v11 }
 0x397   :  { %v1415_v22 = vpop.f32.mrf.mxu3 }
 0x398   :  { %16728 = vst [vmem:[#allocation16_spill] sm:$0xff] %v11655_v40  ;;  %v1502_v8 = vadd.f32 %v1415_v22, %v16729_v51  ;;  %v16731_v22 = vld [vmem:[#allocation25_spill] sm:$0xff] }
 0x399   :  { %v11658_v60 = vpop.f32.mrf.mxu2 }
 0x39a   :  { %16730 = vst [vmem:[#allocation17_spill] sm:$0xff] %v11658_v60  ;;  %v1932_v59 = vadd.f32 %v1845_v23, %v1502_v8 }
 0x39c   :  { %9917 = vmatmul.msk.bf16.gmra.mxu3 %vm81_vm1, %v2873_v4 }
 0x39d   :  { %v2273_v11 = vpop.f32.mrf.mxu1 }
 0x39e   :  { %v1853_v57 = vpop.f32.mrf.mxu0  ;;  %9914 = vmatmul.msk.bf16.gmra.mxu2 %vm81_vm1, %v2472_v50  ;;  %v2361_v40 = vadd.f32 %v2273_v11, %v1931_v18  ;;  %v3670_v50 = vld [vmem:[#allocation2 + $0x69] sm:$0xff] }
 0x39f   :  { %v1418_v43 = vpop.f32.mrf.mxu3  ;;  %v3244_v11 = vld [vmem:[#allocation2 + $0xa8] sm:$0xff] }
 0x3a0   :  { %v1503_v20 = vadd.f32 %v1418_v43, %v16731_v22  ;;  %9982 = vmatmul.msk.bf16.vlgmr.msra.gmra.mxu1 %vm81_vm1, %v3732_v10  ;;  %v3671_v10 = vld [vmem:[#allocation2 + $0x71] sm:$0xff] }
 0x3a1   :  { %9951 = vmatmul.msk.bf16.gmra.mxu0 %vm81_vm1, %v3304_v14  ;;  %v2698_v56 = vpop.f32.mrf.mxu2  ;;  %v3245_v14 = vld [vmem:[#allocation2 + $0xb0] sm:$0xff] }
 0x3a2   :  { %v11665_v51 = vadd.f32 %v2698_v56, %v2359_v30  ;;  %v1933_v23 = vadd.f32 %v1848_v38, %v1503_v20  ;;  %v3733_v38 = vpack.c.bf16 %v3671_v10, %v3670_v50  ;;  %v3305_v30 = vpack.c.bf16 %v3245_v14, %v3244_v11  ;;  %v16738_v11 = vld [vmem:[#allocation28_spill] sm:$0xff] }
 0x3a5   :  { %v2275_v8 = vpop.f32.mrf.mxu1 }
 0x3a6   :  { %v1855_v49 = vpop.f32.mrf.mxu0  ;;  %v11667_v4 = vadd.f32 %v2275_v8, %v1932_v59  ;;  %v16735_v8 = vld [vmem:[#allocation27_spill] sm:$0xff] }
 0x3a7   :  { %v1420_v52 = vpop.f32.mrf.mxu3 }
 0x3a8   :  { %16732 = vst [vmem:[#allocation18_spill] sm:$0xff] %v11667_v4  ;;  %v1504_v18 = vadd.f32 %v1420_v52, %v16733_v27  ;;  %v2814_v27 = vld [vmem:[#allocation2 + $0xa7] sm:$0xff] }
 0x3a9   :  { %v11670_v43 = vpop.f32.mrf.mxu2 }
 0x3aa   :  { %16734 = vst [vmem:[#allocation19_spill] sm:$0xff] %v11670_v43  ;;  %v1934_v22 = vadd.f32 %v1850_v47, %v1504_v18  ;;  %v2815_v47 = vld [vmem:[#allocation2 + $0xaf] sm:$0xff] }
 0x3ab   :  { %v2875_v14 = vpack.c.bf16 %v2815_v47, %v2814_v27 }
 0x3ac   :  { %9918 = vmatmul.msk.bf16.gmra.mxu3 %vm81_vm1, %v2874_v63 }
 0x3ad   :  { %v2278_v20 = vpop.f32.mrf.mxu1 }
 0x3ae   :  { %v1858_v56 = vpop.f32.mrf.mxu0  ;;  %v2363_v60 = vadd.f32 %v2278_v20, %v1933_v23  ;;  %v3672_v20 = vld [vmem:[#allocation2 + $0x89] sm:$0xff] }
 0x3af   :  { %v1423_v59 = vpop.f32.mrf.mxu3 }
 0x3b0   :  { %v1505_v4 = vadd.f32 %v1423_v59, %v16735_v8  ;;  %9983 = vmatmul.msk.bf16.gmra.mxu1 %vm81_vm1, %v3733_v38  ;;  %v3673_v38 = vld [vmem:[#allocation2 + $0x91] sm:$0xff]  ;;  %v3246_v8 = vld [vmem:[#allocation2 + $0xc8] sm:$0xff] }
 0x3b1   :  { %9952 = vmatmul.msk.bf16.gmra.mxu0 %vm81_vm1, %v3305_v30  ;;  %v2703_v45 = vpop.f32.mrf.mxu2  ;;  %v3247_v30 = vld [vmem:[#allocation2 + $0xd0] sm:$0xff] }
 0x3b2   :  { %v11676_v29 = vadd.f32 %v2703_v45, %v2361_v40  ;;  %v1935_v52 = vadd.f32 %v1853_v57, %v1505_v4  ;;  %v3734_v40 = vpack.c.bf16 %v3673_v38, %v3672_v20  ;;  %v3306_v57 = vpack.c.bf16 %v3247_v30, %v3246_v8  ;;  %v16743_v8 = vld [vmem:[#allocation30_spill] sm:$0xff] }
 0x3b4   :  { %16736 = vst [vmem:[#allocation20_spill] sm:$0xff] %v11676_v29 }
 0x3b5   :  { %v2280_v18 = vpop.f32.mrf.mxu1 }
 0x3b6   :  { %v1860_v63 = vpop.f32.mrf.mxu0  ;;  %v11678_v50 = vadd.f32 %v2280_v18, %v1934_v22  ;;  %v16740_v18 = vld [vmem:[#allocation29_spill] sm:$0xff] }
 0x3b7   :  { %v1425_v10 = vpop.f32.mrf.mxu3 }
 0x3b8   :  { %16737 = vst [vmem:[#allocation21_spill] sm:$0xff] %v11678_v50  ;;  %v1506_v23 = vadd.f32 %v1425_v10, %v16738_v11  ;;  %v2816_v11 = vld [vmem:[#allocation2 + $0xc7] sm:$0xff] }
 0x3b9   :  { %v11681_v59 = vpop.f32.mrf.mxu2 }
 0x3ba   :  { %16739 = vst [vmem:[#allocation22_spill] sm:$0xff] %v11681_v59  ;;  %v1936_v43 = vadd.f32 %v1855_v49, %v1506_v23  ;;  %v2817_v49 = vld [vmem:[#allocation2 + $0xcf] sm:$0xff] }
 0x3bb   :  { %v2876_v30 = vpack.c.bf16 %v2817_v49, %v2816_v11 }
 0x3bc   :  { %9919 = vmatmul.msk.bf16.gmra.mxu3 %vm81_vm1, %v2875_v14 }
 0x3bd   :  { %v2283_v4 = vpop.f32.mrf.mxu1 }
 0x3be   :  { %v1863_v45 = vpop.f32.mrf.mxu0  ;;  %v2365_v29 = vadd.f32 %v2283_v4, %v1935_v52  ;;  %v3674_v4 = vld [vmem:[#allocation2 + $0xa9] sm:$0xff] }
 0x3bf   :  { %v1428_v22 = vpop.f32.mrf.mxu3 }
 0x3c0   :  { %v1507_v50 = vadd.f32 %v1428_v22, %v16740_v18  ;;  %9984 = vmatmul.msk.bf16.gmra.mxu1 %vm81_vm1, %v3734_v40  ;;  %v3675_v40 = vld [vmem:[#allocation2 + $0xb1] sm:$0xff]  ;;  %v3248_v18 = vld [vmem:[#allocation2 + $0xe8] sm:$0xff] }
 0x3c1   :  { %9953 = vmatmul.msk.bf16.gmra.mxu0 %vm81_vm1, %v3306_v57  ;;  %v2708_v27 = vpop.f32.mrf.mxu2  ;;  %v3249_v57 = vld [vmem:[#allocation2 + $0xf0] sm:$0xff] }
 0x3c2   :  { %v11687_v47 = vadd.f32 %v2708_v27, %v2363_v60  ;;  %v1937_v10 = vadd.f32 %v1858_v56, %v1507_v50  ;;  %v3735_v60 = vpack.c.bf16 %v3675_v40, %v3674_v4  ;;  %v3307_v56 = vpack.c.bf16 %v3249_v57, %v3248_v18 }
 0x3c4   :  { %16741 = vst [vmem:[#allocation23_spill] sm:$0xff] %v11687_v47 }
 0x3c5   :  { %v2285_v23 = vpop.f32.mrf.mxu1 }
 0x3c6   :  { %v1865_v14 = vpop.f32.mrf.mxu0  ;;  %v11689_v20 = vadd.f32 %v2285_v23, %v1936_v43  ;;  %v16746_v23 = vld [vmem:[#allocation31_spill] sm:$0xff] }
 0x3c7   :  { %v1430_v38 = vpop.f32.mrf.mxu3 }
 0x3c8   :  { %16742 = vst [vmem:[#allocation24_spill] sm:$0xff] %v11689_v20  ;;  %v1508_v52 = vadd.f32 %v1430_v38, %v16743_v8  ;;  %v2819_v8 = vld [vmem:[#allocation2 + $0xef] sm:$0xff] }
 0x3c9   :  { %v11692_v22 = vpop.f32.mrf.mxu2 }
 0x3ca   :  { %16744 = vst [vmem:[#allocation25_spill] sm:$0xff] %v11692_v22  ;;  %v1938_v59 = vadd.f32 %v1860_v63, %v1508_v52  ;;  %v2818_v63 = vld [vmem:[#allocation2 + $0xe7] sm:$0xff] }
 0x3cb   :  { %v2877_v57 = vpack.c.bf16 %v2819_v8, %v2818_v63  ;;  %v2820_v8 = vld [vmem:[#allocation2 + $0x107] sm:$0xff] }
 0x3cc   :  { %9920 = vmatmul.msk.bf16.gmra.mxu3 %vm81_vm1, %v2876_v30 }
 0x3cd   :  { %v2288_v50 = vpop.f32.mrf.mxu1 }
 0x3ce   :  { %v1868_v27 = vpop.f32.mrf.mxu0  ;;  %v11695_v47 = vadd.f32 %v2288_v50, %v1937_v10  ;;  %v16748_v10 = vld [vmem:[#allocation32_spill] sm:$0xff]  ;;  %v3676_v50 = vld [vmem:[#allocation2 + $0xc9] sm:$0xff] }
 0x3cf   :  { %v1433_v43 = vpop.f32.mrf.mxu3 }
 0x3d0   :  { %16745 = vst [vmem:[#allocation26_spill] sm:$0xff] %v11695_v47  ;;  %v1509_v20 = vadd.f32 %v1433_v43, %v16746_v23  ;;  %9985 = vmatmul.msk.bf16.gmra.mxu1 %vm81_vm1, %v3735_v60  ;;  %v3677_v43 = vld [vmem:[#allocation2 + $0xd1] sm:$0xff]  ;;  %v3250_v23 = vld [vmem:[#allocation2 + $0x108] sm:$0xff] }
 0x3d1   :  { %9954 = vmatmul.msk.bf16.gmra.mxu0 %vm81_vm1, %v3307_v56  ;;  %v2713_v11 = vpop.f32.mrf.mxu2  ;;  %v3251_v60 = vld [vmem:[#allocation2 + $0x110] sm:$0xff] }
 0x3d2   :  { %v11700_v49 = vadd.f32 %v2713_v11, %v2365_v29  ;;  %v1939_v38 = vadd.f32 %v1863_v45, %v1509_v20  ;;  %v3736_v29 = vpack.c.bf16 %v3677_v43, %v3676_v50  ;;  %v3308_v56 = vpack.c.bf16 %v3251_v60, %v3250_v23  ;;  %v16752_v50 = vld [vmem:[#allocation35_spill] sm:$0xff] }
 0x3d3   :  { %v3679_v60 = vld [vmem:[#allocation2 + $0xf1] sm:$0xff] }
 0x3d5   :  { %v2290_v52 = vpop.f32.mrf.mxu1 }
 0x3d6   :  { %v1870_v30 = vpop.f32.mrf.mxu0  ;;  %v11702_v4 = vadd.f32 %v2290_v52, %v1938_v59  ;;  %v16750_v59 = vld [vmem:[#allocation33_spill] sm:$0xff] }
 0x3d7   :  { %v1435_v40 = vpop.f32.mrf.mxu3 }
 0x3d8   :  { %16747 = vst [vmem:[#allocation27_spill] sm:$0xff] %v11702_v4  ;;  %v1510_v18 = vadd.f32 %v1435_v40, %v16748_v10  ;;  %v2821_v40 = vld [vmem:[#allocation2 + $0x10f] sm:$0xff] }
 0x3d9   :  { %v2878_v23 = vpack.c.bf16 %v2821_v40, %v2820_v8  ;;  %v2822_v40 = vld [vmem:[#allocation2 + $0x127] sm:$0xff] }
 0x3da   :  { %v1940_v47 = vadd.f32 %v1865_v14, %v1510_v18 }
 0x3dc   :  { %9921 = vmatmul.msk.bf16.gmra.mxu3 %vm81_vm1, %v2877_v57 }
 0x3dd   :  { %v2293_v45 = vpop.f32.mrf.mxu1 }
 0x3de   :  { %v1873_v20 = vpop.f32.mrf.mxu0  ;;  %v11706_v11 = vadd.f32 %v2293_v45, %v1939_v38  ;;  %v3678_v38 = vld [vmem:[#allocation2 + $0xe9] sm:$0xff] }
 0x3df   :  { %v1438_v22 = vpop.f32.mrf.mxu3  ;;  %v3252_v45 = vld [vmem:[#allocation2 + $0x128] sm:$0xff] }
 0x3e0   :  { %16749 = vst [vmem:[#allocation28_spill] sm:$0xff] %v11706_v11  ;;  %v1511_v52 = vadd.f32 %v1438_v22, %v16750_v59  ;;  %9986 = vmatmul.msk.bf16.gmra.mxu1 %vm81_vm1, %v3736_v29  ;;  %v3253_v11 = vld [vmem:[#allocation2 + $0x130] sm:$0xff]  ;;  %v3737_v29 = vpack.c.bf16 %v3679_v60, %v3678_v38 }
 0x3e1   :  { %9955 = vmatmul.msk.bf16.gmra.mxu0 %vm81_vm1, %v3308_v56  ;;  %v3309_v56 = vpack.c.bf16 %v3253_v11, %v3252_v45  ;;  %v3681_v60 = vld [vmem:[#allocation2 + $0x111] sm:$0xff]  ;;  %v3254_v45 = vld [vmem:[#allocation2 + $0x148] sm:$0xff] }
 0x3e2   :  { %v1941_v63 = vadd.f32 %v1868_v27, %v1511_v52 }
 0x3e5   :  { %v2295_v10 = vpop.f32.mrf.mxu1 }
 0x3e6   :  { %v1875_v14 = vpop.f32.mrf.mxu0  ;;  %v11711_v18 = vadd.f32 %v2295_v10, %v1940_v47  ;;  %v16754_v47 = vld [vmem:[#allocation37_spill] sm:$0xff] }
 0x3e7   :  { %v1440_v57 = vpop.f32.mrf.mxu3 }
 0x3e8   :  { %16751 = vst [vmem:[#allocation29_spill] sm:$0xff] %v11711_v18  ;;  %v1512_v43 = vadd.f32 %v1440_v57, %v16752_v50  ;;  %v2823_v57 = vld [vmem:[#allocation2 + $0x12f] sm:$0xff] }
 0x3e9   :  { %v2879_v38 = vpack.c.bf16 %v2823_v57, %v2822_v40  ;;  %v2824_v40 = vld [vmem:[#allocation2 + $0x147] sm:$0xff]  ;;  %v2825_v57 = vld [vmem:[#allocation2 + $0x14f] sm:$0xff] }
 0x3ea   :  { %v1942_v22 = vadd.f32 %v1870_v30, %v1512_v43 }
 0x3ec   :  { %9922 = vmatmul.msk.bf16.gmra.mxu3 %vm81_vm1, %v2878_v23 }
 0x3ed   :  { %v2298_v27 = vpop.f32.mrf.mxu1 }
 0x3ee   :  { %v1878_v59 = vpop.f32.mrf.mxu0  ;;  %v11715_v52 = vadd.f32 %v2298_v27, %v1941_v63  ;;  %v3680_v63 = vld [vmem:[#allocation2 + $0x109] sm:$0xff] }
 0x3ef   :  { %v1443_v4 = vpop.f32.mrf.mxu3  ;;  %v3255_v27 = vld [vmem:[#allocation2 + $0x150] sm:$0xff] }
 0x3f0   :  { %16753 = vst [vmem:[#allocation30_spill] sm:$0xff] %v11715_v52  ;;  %v1513_v10 = vadd.f32 %v1443_v4, %v16754_v47  ;;  %9987 = vmatmul.msk.bf16.gmra.mxu1 %vm81_vm1, %v3737_v29  ;;  %v3738_v29 = vpack.c.bf16 %v3681_v60, %v3680_v63  ;;  %v2880_v63 = vpack.c.bf16 %v2825_v57, %v2824_v40  ;;  %v3683_v60 = vld [vmem:[#allocation2 + $0x131] sm:$0xff] }
 0x3f1   :  { %9956 = vmatmul.msk.bf16.gmra.mxu0 %vm81_vm1, %v3309_v56  ;;  %v3310_v56 = vpack.c.bf16 %v3255_v27, %v3254_v45  ;;  %v3256_v45 = vld [vmem:[#allocation2 + $0x168] sm:$0xff]  ;;  %v3257_v27 = vld [vmem:[#allocation2 + $0x170] sm:$0xff] }
 0x3f2   :  { %v1943_v8 = vadd.f32 %v1873_v20, %v1513_v10 }
 0x3f5   :  { %v2300_v50 = vpop.f32.mrf.mxu1 }
 0x3f6   :  { %v1880_v30 = vpop.f32.mrf.mxu0  ;;  %v11720_v43 = vadd.f32 %v2300_v50, %v1942_v22 }
 0x3f7   :  { %v1445_v23 = vpop.f32.mrf.mxu3 }
 0x3f8   :  { %16755 = vst [vmem:[#allocation31_spill] sm:$0xff] %v11720_v43  ;;  %v1514_v11 = vadd.f32 %v1445_v23, %v11381_v0 }
 0x3fa   :  { %v1944_v4 = vadd.f32 %v1875_v14, %v1514_v11 }
 0x3fc   :  { %9923 = vmatmul.msk.bf16.gmra.mxu3 %vm81_vm1, %v2879_v38 }
 0x3fd   :  { %v2303_v20 = vpop.f32.mrf.mxu1 }
 0x3fe   :  { %v3444_v47 = vpop.f32.mrf.mxu0  ;;  %v11724_v10 = vadd.f32 %v2303_v20, %v1943_v8  ;;  %v3682_v8 = vld [vmem:[#allocation2 + $0x129] sm:$0xff] }
 0x3ff   :  { %v1448_v52 = vpop.f32.mrf.mxu3 }
 0x400   :  { %16756 = vst [vmem:[#allocation32_spill] sm:$0xff] %v11724_v10  ;;  %v1515_v22 = vadd.f32 %v1448_v52, %v11389_v28  ;;  %9988 = vmatmul.msk.bf16.gmra.mxu1 %vm81_vm1, %v3738_v29  ;;  %v16758_v52 = vmov 0.0  }
 0x401   :  { %9957 = vmatmul.msk.bf16.gmra.mxu0 %vm81_vm1, %v3310_v56  ;;  %4920 = vst.msk [vmem:[#allocation3 + $0x28] sm:$0xff] %vm4166_vm3, %v16758_v52 }
 0x402   :  { %v1945_v0 = vadd.f32 %v1878_v59, %v1515_v22  ;;  %v3739_v59 = vpack.c.bf16 %v3683_v60, %v3682_v8  ;;  %4915 = vst.msk [vmem:[#allocation3] sm:$0xff] %vm4166_vm3, %v16758_v52  ;;  %v3685_v8 = vld [vmem:[#allocation2 + $0x151] sm:$0xff]  ;;  %v3258_v60 = vld [vmem:[#allocation2 + $0x188] sm:$0xff] }
 0x403   :  { %4916 = vst.msk [vmem:[#allocation3 + $0x8] sm:$0xff] %vm4166_vm3, %v16758_v52 }
 0x404   :  { %4917 = vst.msk [vmem:[#allocation3 + $0x10] sm:$0xff] %vm4166_vm3, %v16758_v52 }
 0x405   :  { %v2305_v50 = vpop.f32.mrf.mxu1  ;;  %4918 = vst.msk [vmem:[#allocation3 + $0x18] sm:$0xff] %vm4166_vm3, %v16758_v52 }
 0x406   :  { %v3446_v14 = vpop.f32.mrf.mxu0  ;;  %v11729_v23 = vadd.f32 %v2305_v50, %v1944_v4  ;;  %v3311_v4 = vpack.c.bf16 %v3257_v27, %v3256_v45  ;;  %4919 = vst.msk [vmem:[#allocation3 + $0x20] sm:$0xff] %vm4166_vm3, %v16758_v52  ;;  %v3259_v45 = vld [vmem:[#allocation2 + $0x190] sm:$0xff] }
 0x407   :  { %v1450_v11 = vpop.f32.mrf.mxu3  ;;  %4921 = vst.msk [vmem:[#allocation3 + $0x30] sm:$0xff] %vm4166_vm3, %v16758_v52 }
 0x408   :  { %16757 = vst [vmem:[#allocation33_spill] sm:$0xff] %v11729_v23  ;;  %v1516_v38 = vadd.f32 %v1450_v11, %v11392_v39 }
 0x409   :  { %4922 = vst.msk [vmem:[#allocation3 + $0x38] sm:$0xff] %vm4166_vm3, %v16758_v52 }
 0x40a   :  { %v1946_v28 = vadd.f32 %v1880_v30, %v1516_v38  ;;  %4923 = vst.msk [vmem:[#allocation3 + $0x40] sm:$0xff] %vm4166_vm3, %v16758_v52 }
 0x40b   :  { %4924 = vst.msk [vmem:[#allocation3 + $0x48] sm:$0xff] %vm4166_vm3, %v16758_v52 }
 0x40c   :  { %9924 = vmatmul.msk.bf16.gmra.mxu3 %vm81_vm1, %v2880_v63  ;;  %4925 = vst.msk [vmem:[#allocation3 + $0x50] sm:$0xff] %vm4166_vm3, %v16758_v52  ;;  %v3684_v63 = vld [vmem:[#allocation2 + $0x149] sm:$0xff] }
 0x40d   :  { %v2308_v29 = vpop.f32.mrf.mxu1  ;;  %4926 = vst.msk [vmem:[#allocation3 + $0x58] sm:$0xff] %vm4166_vm3, %v16758_v52 }
 0x40e   :  { %v3449_v56 = vpop.f32.mrf.mxu0  ;;  %v11739_v39 = vadd.f32 %v2308_v29, %v1945_v0  ;;  %v2827_v0 = vld [vmem:[#allocation2 + $0x16f] sm:$0xff]  ;;  %4927 = vst.msk [vmem:[#allocation3 + $0x60] sm:$0xff] %vm4166_vm3, %v16758_v52 }
 0x40f   :  { %v3014_v30 = vpop.f32.mrf.mxu3  ;;  %4928 = vst.msk [vmem:[#allocation3 + $0x68] sm:$0xff] %vm4166_vm3, %v16758_v52 }
 0x410   :  { %16759 = vst [vmem:[#allocation35_spill] sm:$0xff] %v11739_v39  ;;  %v3174_v20 = vadd.f32 %v3014_v30, %v11400_v31  ;;  %9989 = vmatmul.msk.bf16.gmra.mxu1 %vm81_vm1, %v3739_v59  ;;  %v2826_v31 = vld [vmem:[#allocation2 + $0x167] sm:$0xff]  ;;  %v3293_v39 = vld [vmem:[#allocation2 + $0x3f0] sm:$0xff] }
 0x411   :  { %9958 = vmatmul.msk.bf16.gmra.mxu0 %vm81_vm1, %v3311_v4  ;;  %v2881_v38 = vpack.c.bf16 %v2827_v0, %v2826_v31  ;;  %4929 = vst.msk [vmem:[#allocation3 + $0x70] sm:$0xff] %vm4166_vm3, %v16758_v52 }
 0x412   :  { %v3604_v22 = vadd.f32 %v3444_v47, %v3174_v20  ;;  %4930 = vst.msk [vmem:[#allocation3 + $0x78] sm:$0xff] %vm4166_vm3, %v16758_v52 }
 0x413   :  { %4931 = vst.msk [vmem:[#allocation3 + $0x80] sm:$0xff] %vm4166_vm3, %v16758_v52 }
 0x414   :  { %4932 = vst.msk [vmem:[#allocation3 + $0x88] sm:$0xff] %vm4166_vm3, %v16758_v52 }
 0x415   :  { %v2310_v40 = vpop.f32.mrf.mxu1  ;;  %4933 = vst.msk [vmem:[#allocation3 + $0x90] sm:$0xff] %vm4166_vm3, %v16758_v52 }
 0x416   :  { %v3451_v57 = vpop.f32.mrf.mxu0  ;;  %v11760_v50 = vadd.f32 %v2310_v40, %v1946_v28  ;;  %v3312_v28 = vpack.c.bf16 %v3259_v45, %v3258_v60  ;;  %4934 = vst.msk [vmem:[#allocation3 + $0x98] sm:$0xff] %vm4166_vm3, %v16758_v52  ;;  %v3261_v60 = vld [vmem:[#allocation2 + $0x1b0] sm:$0xff] }
 0x417   :  { %v3016_v47 = vpop.f32.mrf.mxu3  ;;  %4935 = vst.msk [vmem:[#allocation3 + $0xa0] sm:$0xff] %vm4166_vm3, %v16758_v52 }
 0x418   :  { %16760 = vst [vmem:[#allocation37_spill] sm:$0xff] %v11760_v50  ;;  %v3175_v11 = vadd.f32 %v3016_v47, %v11403_v48  ;;  %v3740_v48 = vpack.c.bf16 %v3685_v8, %v3684_v63  ;;  %v3687_v63 = vld [vmem:[#allocation2 + $0x171] sm:$0xff]  ;;  %v3260_v8 = vld [vmem:[#allocation2 + $0x1a8] sm:$0xff] }
 0x419   :  { %4936 = vst.msk [vmem:[#allocation3 + $0xa8] sm:$0xff] %vm4166_vm3, %v16758_v52 }
 0x41a   :  { %v3605_v27 = vadd.f32 %v3446_v14, %v3175_v11  ;;  %4937 = vst.msk [vmem:[#allocation3 + $0xb0] sm:$0xff] %vm4166_vm3, %v16758_v52 }
 0x41b   :  { %4938 = vst.msk [vmem:[#allocation3 + $0xb8] sm:$0xff] %vm4166_vm3, %v16758_v52 }
 0x41c   :  { %9925 = vmatmul.msk.bf16.gmra.mxu3 %vm81_vm1, %v2881_v38  ;;  %4939 = vst.msk [vmem:[#allocation3 + $0xc0] sm:$0xff] %vm4166_vm3, %v16758_v52  ;;  %v3686_v38 = vld [vmem:[#allocation2 + $0x169] sm:$0xff] }
 0x41d   :  { %v3874_v59 = vpop.f32.mrf.mxu1  ;;  %4940 = vst.msk [vmem:[#allocation3 + $0xc8] sm:$0xff] %vm4166_vm3, %v16758_v52 }
 0x41e   :  { %v3454_v4 = vpop.f32.mrf.mxu0  ;;  %v11780_v29 = vadd.f32 %v3874_v59, %v3604_v22  ;;  %4941 = vst.msk [vmem:[#allocation3 + $0xd0] sm:$0xff] %vm4166_vm3, %v16758_v52  ;;  %v2829_v22 = vld [vmem:[#allocation2 + $0x18f] sm:$0xff] }
 0x41f   :  { %v3019_v14 = vpop.f32.mrf.mxu3  ;;  %4942 = vst.msk [vmem:[#allocation3 + $0xd8] sm:$0xff] %vm4166_vm3, %v16758_v52 }
 0x420   :  { %v3176_v30 = vadd.f32 %v3019_v14, %v11412_v53  ;;  %9990 = vmatmul.msk.bf16.gmra.mxu1 %vm81_vm1, %v3740_v48  ;;  %v2828_v53 = vld [vmem:[#allocation2 + $0x187] sm:$0xff]  ;;  %4943 = vst.msk [vmem:[#allocation3 + $0xe0] sm:$0xff] %vm4166_vm3, %v16758_v52 }
 0x421   :  { %9959 = vmatmul.msk.bf16.gmra.mxu0 %vm81_vm1, %v3312_v28  ;;  %4944 = vst.msk [vmem:[#allocation3 + $0xe8] sm:$0xff] %vm4166_vm3, %v16758_v52  ;;  %v2882_v11 = vpack.c.bf16 %v2829_v22, %v2828_v53 }
 0x422   :  { %v3606_v20 = vadd.f32 %v3449_v56, %v3176_v30  ;;  %4945 = vst.msk [vmem:[#allocation3 + $0xf0] sm:$0xff] %vm4166_vm3, %v16758_v52 }
 0x423   :  { %4946 = vst.msk [vmem:[#allocation3 + $0xf8] sm:$0xff] %vm4166_vm3, %v16758_v52 }
 0x424   :  { %4947 = vst.msk [vmem:[#allocation3 + $0x100] sm:$0xff] %vm4166_vm3, %v16758_v52 }
 0x425   :  { %v3876_v31 = vpop.f32.mrf.mxu1  ;;  %4948 = vst.msk [vmem:[#allocation3 + $0x108] sm:$0xff] %vm4166_vm3, %v16758_v52 }
 0x426   :  { %v3456_v0 = vpop.f32.mrf.mxu0  ;;  %v11803_v56 = vadd.f32 %v3876_v31, %v3605_v27  ;;  %v3313_v27 = vpack.c.bf16 %v3261_v60, %v3260_v8  ;;  %4949 = vst.msk [vmem:[#allocation3 + $0x110] sm:$0xff] %vm4166_vm3, %v16758_v52  ;;  %v3263_v8 = vld [vmem:[#allocation2 + $0x1d0] sm:$0xff] }
 0x427   :  { %v3021_v40 = vpop.f32.mrf.mxu3  ;;  %4950 = vst.msk [vmem:[#allocation3 + $0x118] sm:$0xff] %vm4166_vm3, %v16758_v52 }
 0x428   :  { %v3177_v47 = vadd.f32 %v3021_v40, %v11415_v55  ;;  %v3741_v55 = vpack.c.bf16 %v3687_v63, %v3686_v38  ;;  %4951 = vst.msk [vmem:[#allocation3 + $0x120] sm:$0xff] %vm4166_vm3, %v16758_v52  ;;  %v3689_v38 = vld [vmem:[#allocation2 + $0x191] sm:$0xff]  ;;  %v3262_v63 = vld [vmem:[#allocation2 + $0x1c8] sm:$0xff] }
 0x429   :  { %4952 = vst.msk [vmem:[#allocation3 + $0x128] sm:$0xff] %vm4166_vm3, %v16758_v52 }
 0x42a   :  { %v3607_v45 = vadd.f32 %v3451_v57, %v3177_v47  ;;  %4953 = vst.msk [vmem:[#allocation3 + $0x130] sm:$0xff] %vm4166_vm3, %v16758_v52 }
 0x42b   :  { %4954 = vst.msk [vmem:[#allocation3 + $0x138] sm:$0xff] %vm4166_vm3, %v16758_v52 }
 0x42c   :  { %9926 = vmatmul.msk.bf16.gmra.mxu3 %vm81_vm1, %v2882_v11  ;;  %4955 = vst.msk [vmem:[#allocation3 + $0x140] sm:$0xff] %vm4166_vm3, %v16758_v52  ;;  %v3688_v11 = vld [vmem:[#allocation2 + $0x189] sm:$0xff] }
 0x42d   :  { %v3879_v48 = vpop.f32.mrf.mxu1  ;;  %4956 = vst.msk [vmem:[#allocation3 + $0x148] sm:$0xff] %vm4166_vm3, %v16758_v52 }
 0x42e   :  { %v3459_v28 = vpop.f32.mrf.mxu0  ;;  %v11823_v59 = vadd.f32 %v3879_v48, %v3606_v20  ;;  %4957 = vst.msk [vmem:[#allocation3 + $0x150] sm:$0xff] %vm4166_vm3, %v16758_v52  ;;  %v2831_v20 = vld [vmem:[#allocation2 + $0x1af] sm:$0xff] }
 0x42f   :  { %v3024_v57 = vpop.f32.mrf.mxu3  ;;  %4958 = vst.msk [vmem:[#allocation3 + $0x158] sm:$0xff] %vm4166_vm3, %v16758_v52 }
 0x430   :  { %v3178_v14 = vadd.f32 %v3024_v57, %v11424_v46  ;;  %9991 = vmatmul.msk.bf16.gmra.mxu1 %vm81_vm1, %v3741_v55  ;;  %v2830_v46 = vld [vmem:[#allocation2 + $0x1a7] sm:$0xff]  ;;  %4959 = vst.msk [vmem:[#allocation3 + $0x160] sm:$0xff] %vm4166_vm3, %v16758_v52 }
 0x431   :  { %9960 = vmatmul.msk.bf16.gmra.mxu0 %vm81_vm1, %v3313_v27  ;;  %4960 = vst.msk [vmem:[#allocation3 + $0x168] sm:$0xff] %vm4166_vm3, %v16758_v52  ;;  %v2883_v47 = vpack.c.bf16 %v2831_v20, %v2830_v46 }
 0x432   :  { %v3608_v30 = vadd.f32 %v3454_v4, %v3178_v14  ;;  %4961 = vst.msk [vmem:[#allocation3 + $0x170] sm:$0xff] %vm4166_vm3, %v16758_v52 }
 0x433   :  { %4962 = vst.msk [vmem:[#allocation3 + $0x178] sm:$0xff] %vm4166_vm3, %v16758_v52 }
 0x434   :  { %4963 = vst.msk [vmem:[#allocation3 + $0x180] sm:$0xff] %vm4166_vm3, %v16758_v52 }
 0x435   :  { %v3881_v53 = vpop.f32.mrf.mxu1  ;;  %4964 = vst.msk [vmem:[#allocation3 + $0x188] sm:$0xff] %vm4166_vm3, %v16758_v52 }
 0x436   :  { %v3461_v22 = vpop.f32.mrf.mxu0  ;;  %v11844_v31 = vadd.f32 %v3881_v53, %v3607_v45  ;;  %v3314_v45 = vpack.c.bf16 %v3263_v8, %v3262_v63  ;;  %4965 = vst.msk [vmem:[#allocation3 + $0x190] sm:$0xff] %vm4166_vm3, %v16758_v52  ;;  %v3265_v63 = vld [vmem:[#allocation2 + $0x1f0] sm:$0xff] }
 0x437   :  { %v3026_v4 = vpop.f32.mrf.mxu3  ;;  %4966 = vst.msk [vmem:[#allocation3 + $0x198] sm:$0xff] %vm4166_vm3, %v16758_v52 }
 0x438   :  { %v3179_v40 = vadd.f32 %v3026_v4, %v11427_v7  ;;  %v3742_v7 = vpack.c.bf16 %v3689_v38, %v3688_v11  ;;  %4967 = vst.msk [vmem:[#allocation3 + $0x1a0] sm:$0xff] %vm4166_vm3, %v16758_v52  ;;  %v3691_v11 = vld [vmem:[#allocation2 + $0x1b1] sm:$0xff]  ;;  %v3264_v38 = vld [vmem:[#allocation2 + $0x1e8] sm:$0xff] }
 0x439   :  { %4968 = vst.msk [vmem:[#allocation3 + $0x1a8] sm:$0xff] %vm4166_vm3, %v16758_v52 }
 0x43a   :  { %v3609_v60 = vadd.f32 %v3456_v0, %v3179_v40  ;;  %4969 = vst.msk [vmem:[#allocation3 + $0x1b0] sm:$0xff] %vm4166_vm3, %v16758_v52 }
 0x43b   :  { %4970 = vst.msk [vmem:[#allocation3 + $0x1b8] sm:$0xff] %vm4166_vm3, %v16758_v52 }
 0x43c   :  { %9927 = vmatmul.msk.bf16.gmra.mxu3 %vm81_vm1, %v2883_v47  ;;  %4971 = vst.msk [vmem:[#allocation3 + $0x1c0] sm:$0xff] %vm4166_vm3, %v16758_v52  ;;  %v3690_v47 = vld [vmem:[#allocation2 + $0x1a9] sm:$0xff] }
 0x43d   :  { %v3884_v55 = vpop.f32.mrf.mxu1  ;;  %4972 = vst.msk [vmem:[#allocation3 + $0x1c8] sm:$0xff] %vm4166_vm3, %v16758_v52 }
 0x43e   :  { %v3464_v27 = vpop.f32.mrf.mxu0  ;;  %v11864_v48 = vadd.f32 %v3884_v55, %v3608_v30  ;;  %4973 = vst.msk [vmem:[#allocation3 + $0x1d0] sm:$0xff] %vm4166_vm3, %v16758_v52  ;;  %v2833_v30 = vld [vmem:[#allocation2 + $0x1cf] sm:$0xff] }
 0x43f   :  { %v3029_v0 = vpop.f32.mrf.mxu3  ;;  %4974 = vst.msk [vmem:[#allocation3 + $0x1d8] sm:$0xff] %vm4166_vm3, %v16758_v52 }
 0x440   :  { %v3180_v57 = vadd.f32 %v3029_v0, %v11441_v19  ;;  %9992 = vmatmul.msk.bf16.gmra.mxu1 %vm81_vm1, %v3742_v7  ;;  %v2832_v19 = vld [vmem:[#allocation2 + $0x1c7] sm:$0xff]  ;;  %4975 = vst.msk [vmem:[#allocation3 + $0x1e0] sm:$0xff] %vm4166_vm3, %v16758_v52 }
 0x441   :  { %9961 = vmatmul.msk.bf16.gmra.mxu0 %vm81_vm1, %v3314_v45  ;;  %4976 = vst.msk [vmem:[#allocation3 + $0x1e8] sm:$0xff] %vm4166_vm3, %v16758_v52  ;;  %v2884_v40 = vpack.c.bf16 %v2833_v30, %v2832_v19 }
 0x442   :  { %v3610_v14 = vadd.f32 %v3459_v28, %v3180_v57  ;;  %4977 = vst.msk [vmem:[#allocation3 + $0x1f0] sm:$0xff] %vm4166_vm3, %v16758_v52 }
 0x443   :  { %4978 = vst.msk [vmem:[#allocation3 + $0x1f8] sm:$0xff] %vm4166_vm3, %v16758_v52 }
 0x444   :  { %4979 = vst.msk [vmem:[#allocation3 + $0x200] sm:$0xff] %vm4166_vm3, %v16758_v52 }
 0x445   :  { %v3886_v46 = vpop.f32.mrf.mxu1  ;;  %4980 = vst.msk [vmem:[#allocation3 + $0x208] sm:$0xff] %vm4166_vm3, %v16758_v52 }
 0x446   :  { %v3466_v20 = vpop.f32.mrf.mxu0  ;;  %v11885_v53 = vadd.f32 %v3886_v46, %v3609_v60  ;;  %v3315_v60 = vpack.c.bf16 %v3265_v63, %v3264_v38  ;;  %4981 = vst.msk [vmem:[#allocation3 + $0x210] sm:$0xff] %vm4166_vm3, %v16758_v52  ;;  %v3267_v38 = vld [vmem:[#allocation2 + $0x210] sm:$0xff] }
 0x447   :  { %v3031_v28 = vpop.f32.mrf.mxu3  ;;  %4982 = vst.msk [vmem:[#allocation3 + $0x218] sm:$0xff] %vm4166_vm3, %v16758_v52 }
 0x448   :  { %v3181_v4 = vadd.f32 %v3031_v28, %v11446_v35  ;;  %v3743_v35 = vpack.c.bf16 %v3691_v11, %v3690_v47  ;;  %4983 = vst.msk [vmem:[#allocation3 + $0x220] sm:$0xff] %vm4166_vm3, %v16758_v52  ;;  %v3693_v47 = vld [vmem:[#allocation2 + $0x1d1] sm:$0xff]  ;;  %v3266_v11 = vld [vmem:[#allocation2 + $0x208] sm:$0xff] }
 0x449   :  { %4984 = vst.msk [vmem:[#allocation3 + $0x228] sm:$0xff] %vm4166_vm3, %v16758_v52 }
 0x44a   :  { %v3611_v8 = vadd.f32 %v3461_v22, %v3181_v4  ;;  %4985 = vst.msk [vmem:[#allocation3 + $0x230] sm:$0xff] %vm4166_vm3, %v16758_v52 }
 0x44b   :  { %4986 = vst.msk [vmem:[#allocation3 + $0x238] sm:$0xff] %vm4166_vm3, %v16758_v52 }
 0x44c   :  { %9928 = vmatmul.msk.bf16.gmra.mxu3 %vm81_vm1, %v2884_v40  ;;  %4987 = vst.msk [vmem:[#allocation3 + $0x240] sm:$0xff] %vm4166_vm3, %v16758_v52  ;;  %v3692_v40 = vld [vmem:[#allocation2 + $0x1c9] sm:$0xff] }
 0x44d   :  { %v3889_v7 = vpop.f32.mrf.mxu1  ;;  %4988 = vst.msk [vmem:[#allocation3 + $0x248] sm:$0xff] %vm4166_vm3, %v16758_v52 }
 0x44e   :  { %v3469_v45 = vpop.f32.mrf.mxu0  ;;  %v11905_v55 = vadd.f32 %v3889_v7, %v3610_v14  ;;  %4989 = vst.msk [vmem:[#allocation3 + $0x250] sm:$0xff] %vm4166_vm3, %v16758_v52  ;;  %v2835_v14 = vld [vmem:[#allocation2 + $0x1ef] sm:$0xff] }
 0x44f   :  { %v3034_v22 = vpop.f32.mrf.mxu3  ;;  %4990 = vst.msk [vmem:[#allocation3 + $0x258] sm:$0xff] %vm4166_vm3, %v16758_v52 }
 0x450   :  { %v3182_v0 = vadd.f32 %v3034_v22, %v11454_v44  ;;  %9993 = vmatmul.msk.bf16.gmra.mxu1 %vm81_vm1, %v3743_v35  ;;  %v2834_v44 = vld [vmem:[#allocation2 + $0x1e7] sm:$0xff]  ;;  %4991 = vst.msk [vmem:[#allocation3 + $0x260] sm:$0xff] %vm4166_vm3, %v16758_v52 }
 0x451   :  { %9962 = vmatmul.msk.bf16.gmra.mxu0 %vm81_vm1, %v3315_v60  ;;  %4992 = vst.msk [vmem:[#allocation3 + $0x268] sm:$0xff] %vm4166_vm3, %v16758_v52  ;;  %v2885_v4 = vpack.c.bf16 %v2835_v14, %v2834_v44 }
 0x452   :  { %v3612_v57 = vadd.f32 %v3464_v27, %v3182_v0  ;;  %4993 = vst.msk [vmem:[#allocation3 + $0x270] sm:$0xff] %vm4166_vm3, %v16758_v52 }
 0x453   :  { %4994 = vst.msk [vmem:[#allocation3 + $0x278] sm:$0xff] %vm4166_vm3, %v16758_v52 }
 0x454   :  { %4995 = vst.msk [vmem:[#allocation3 + $0x280] sm:$0xff] %vm4166_vm3, %v16758_v52 }
 0x455   :  { %v3891_v19 = vpop.f32.mrf.mxu1  ;;  %4996 = vst.msk [vmem:[#allocation3 + $0x288] sm:$0xff] %vm4166_vm3, %v16758_v52 }
 0x456   :  { %v3471_v30 = vpop.f32.mrf.mxu0  ;;  %v11926_v46 = vadd.f32 %v3891_v19, %v3611_v8  ;;  %v3316_v8 = vpack.c.bf16 %v3267_v38, %v3266_v11  ;;  %4997 = vst.msk [vmem:[#allocation3 + $0x290] sm:$0xff] %vm4166_vm3, %v16758_v52  ;;  %v3269_v11 = vld [vmem:[#allocation2 + $0x230] sm:$0xff] }
 0x457   :  { %v3036_v27 = vpop.f32.mrf.mxu3  ;;  %4998 = vst.msk [vmem:[#allocation3 + $0x298] sm:$0xff] %vm4166_vm3, %v16758_v52 }
 0x458   :  { %v3183_v28 = vadd.f32 %v3036_v27, %v11457_v26  ;;  %v3744_v26 = vpack.c.bf16 %v3693_v47, %v3692_v40  ;;  %4999 = vst.msk [vmem:[#allocation3 + $0x2a0] sm:$0xff] %vm4166_vm3, %v16758_v52  ;;  %v3695_v40 = vld [vmem:[#allocation2 + $0x1f1] sm:$0xff]  ;;  %v3268_v47 = vld [vmem:[#allocation2 + $0x228] sm:$0xff] }
 0x459   :  { %5000 = vst.msk [vmem:[#allocation3 + $0x2a8] sm:$0xff] %vm4166_vm3, %v16758_v52 }
 0x45a   :  { %v3613_v63 = vadd.f32 %v3466_v20, %v3183_v28  ;;  %5001 = vst.msk [vmem:[#allocation3 + $0x2b0] sm:$0xff] %vm4166_vm3, %v16758_v52 }
 0x45b   :  { %5002 = vst.msk [vmem:[#allocation3 + $0x2b8] sm:$0xff] %vm4166_vm3, %v16758_v52 }
 0x45c   :  { %9929 = vmatmul.msk.bf16.gmra.mxu3 %vm81_vm1, %v2885_v4  ;;  %5003 = vst.msk [vmem:[#allocation3 + $0x2c0] sm:$0xff] %vm4166_vm3, %v16758_v52  ;;  %v3694_v4 = vld [vmem:[#allocation2 + $0x1e9] sm:$0xff] }
 0x45d   :  { %v3894_v35 = vpop.f32.mrf.mxu1  ;;  %5004 = vst.msk [vmem:[#allocation3 + $0x2c8] sm:$0xff] %vm4166_vm3, %v16758_v52 }
 0x45e   :  { %v3474_v60 = vpop.f32.mrf.mxu0  ;;  %v11946_v7 = vadd.f32 %v3894_v35, %v3612_v57  ;;  %5005 = vst.msk [vmem:[#allocation3 + $0x2d0] sm:$0xff] %vm4166_vm3, %v16758_v52  ;;  %v2837_v57 = vld [vmem:[#allocation2 + $0x20f] sm:$0xff] }
 0x45f   :  { %v3039_v20 = vpop.f32.mrf.mxu3  ;;  %5006 = vst.msk [vmem:[#allocation3 + $0x2d8] sm:$0xff] %vm4166_vm3, %v16758_v52 }
 0x460   :  { %v3184_v22 = vadd.f32 %v3039_v20, %v11465_v33  ;;  %9994 = vmatmul.msk.bf16.gmra.mxu1 %vm81_vm1, %v3744_v26  ;;  %v2836_v33 = vld [vmem:[#allocation2 + $0x207] sm:$0xff]  ;;  %5007 = vst.msk [vmem:[#allocation3 + $0x2e0] sm:$0xff] %vm4166_vm3, %v16758_v52 }
 0x461   :  { %9963 = vmatmul.msk.bf16.gmra.mxu0 %vm81_vm1, %v3316_v8  ;;  %5008 = vst.msk [vmem:[#allocation3 + $0x2e8] sm:$0xff] %vm4166_vm3, %v16758_v52  ;;  %v2886_v28 = vpack.c.bf16 %v2837_v57, %v2836_v33 }
 0x462   :  { %v3614_v0 = vadd.f32 %v3469_v45, %v3184_v22  ;;  %5009 = vst.msk [vmem:[#allocation3 + $0x2f0] sm:$0xff] %vm4166_vm3, %v16758_v52 }
 0x463   :  { %5010 = vst.msk [vmem:[#allocation3 + $0x2f8] sm:$0xff] %vm4166_vm3, %v16758_v52 }
 0x464   :  { %5011 = vst.msk [vmem:[#allocation3 + $0x300] sm:$0xff] %vm4166_vm3, %v16758_v52 }
 0x465   :  { %v3896_v44 = vpop.f32.mrf.mxu1  ;;  %5012 = vst.msk [vmem:[#allocation3 + $0x308] sm:$0xff] %vm4166_vm3, %v16758_v52 }
 0x466   :  { %v3476_v14 = vpop.f32.mrf.mxu0  ;;  %v11967_v19 = vadd.f32 %v3896_v44, %v3613_v63  ;;  %v3317_v63 = vpack.c.bf16 %v3269_v11, %v3268_v47  ;;  %5013 = vst.msk [vmem:[#allocation3 + $0x310] sm:$0xff] %vm4166_vm3, %v16758_v52  ;;  %v3271_v47 = vld [vmem:[#allocation2 + $0x290] sm:$0xff] }
 0x467   :  { %v3041_v45 = vpop.f32.mrf.mxu3  ;;  %5014 = vst.msk [vmem:[#allocation3 + $0x318] sm:$0xff] %vm4166_vm3, %v16758_v52 }
 0x468   :  { %v3185_v27 = vadd.f32 %v3041_v45, %v11468_v24  ;;  %v3745_v24 = vpack.c.bf16 %v3695_v40, %v3694_v4  ;;  %5015 = vst.msk [vmem:[#allocation3 + $0x320] sm:$0xff] %vm4166_vm3, %v16758_v52  ;;  %v3697_v4 = vld [vmem:[#allocation2 + $0x211] sm:$0xff]  ;;  %v3270_v40 = vld [vmem:[#allocation2 + $0x288] sm:$0xff] }
 0x469   :  { %5016 = vst.msk [vmem:[#allocation3 + $0x328] sm:$0xff] %vm4166_vm3, %v16758_v52 }
 0x46a   :  { %v3615_v38 = vadd.f32 %v3471_v30, %v3185_v27  ;;  %5017 = vst.msk [vmem:[#allocation3 + $0x330] sm:$0xff] %vm4166_vm3, %v16758_v52 }
 0x46b   :  { %5018 = vst.msk [vmem:[#allocation3 + $0x338] sm:$0xff] %vm4166_vm3, %v16758_v52 }
 0x46c   :  { %9930 = vmatmul.msk.bf16.gmra.mxu3 %vm81_vm1, %v2886_v28  ;;  %5019 = vst.msk [vmem:[#allocation3 + $0x340] sm:$0xff] %vm4166_vm3, %v16758_v52  ;;  %v3696_v28 = vld [vmem:[#allocation2 + $0x209] sm:$0xff] }
 0x46d   :  { %v3899_v26 = vpop.f32.mrf.mxu1  ;;  %5020 = vst.msk [vmem:[#allocation3 + $0x348] sm:$0xff] %vm4166_vm3, %v16758_v52 }
 0x46e   :  { %v3479_v8 = vpop.f32.mrf.mxu0  ;;  %v11987_v35 = vadd.f32 %v3899_v26, %v3614_v0  ;;  %5021 = vst.msk [vmem:[#allocation3 + $0x350] sm:$0xff] %vm4166_vm3, %v16758_v52  ;;  %v2839_v0 = vld [vmem:[#allocation2 + $0x22f] sm:$0xff] }
 0x46f   :  { %v3044_v30 = vpop.f32.mrf.mxu3  ;;  %5022 = vst.msk [vmem:[#allocation3 + $0x358] sm:$0xff] %vm4166_vm3, %v16758_v52 }
 0x470   :  { %v3186_v20 = vadd.f32 %v3044_v30, %v11475_v25  ;;  %9995 = vmatmul.msk.bf16.gmra.mxu1 %vm81_vm1, %v3745_v24  ;;  %v2838_v25 = vld [vmem:[#allocation2 + $0x227] sm:$0xff]  ;;  %5023 = vst.msk [vmem:[#allocation3 + $0x360] sm:$0xff] %vm4166_vm3, %v16758_v52 }
 0x471   :  { %9964 = vmatmul.msk.bf16.gmra.mxu0 %vm81_vm1, %v3317_v63  ;;  %5024 = vst.msk [vmem:[#allocation3 + $0x368] sm:$0xff] %vm4166_vm3, %v16758_v52  ;;  %v2887_v27 = vpack.c.bf16 %v2839_v0, %v2838_v25 }
 0x472   :  { %v3616_v22 = vadd.f32 %v3474_v60, %v3186_v20  ;;  %5025 = vst.msk [vmem:[#allocation3 + $0x370] sm:$0xff] %vm4166_vm3, %v16758_v52 }
 0x473   :  { %5026 = vst.msk [vmem:[#allocation3 + $0x378] sm:$0xff] %vm4166_vm3, %v16758_v52 }
 0x474   :  { %5027 = vst.msk [vmem:[#allocation3 + $0x380] sm:$0xff] %vm4166_vm3, %v16758_v52 }
 0x475   :  { %v3901_v33 = vpop.f32.mrf.mxu1  ;;  %5028 = vst.msk [vmem:[#allocation3 + $0x388] sm:$0xff] %vm4166_vm3, %v16758_v52 }
 0x476   :  { %v3481_v57 = vpop.f32.mrf.mxu0  ;;  %v12008_v44 = vadd.f32 %v3901_v33, %v3615_v38  ;;  %v3318_v38 = vpack.c.bf16 %v3271_v47, %v3270_v40  ;;  %5029 = vst.msk [vmem:[#allocation3 + $0x390] sm:$0xff] %vm4166_vm3, %v16758_v52  ;;  %v3273_v40 = vld [vmem:[#allocation2 + $0x2b0] sm:$0xff] }
 0x477   :  { %v3046_v60 = vpop.f32.mrf.mxu3  ;;  %5030 = vst.msk [vmem:[#allocation3 + $0x398] sm:$0xff] %vm4166_vm3, %v16758_v52 }
 0x478   :  { %v3187_v45 = vadd.f32 %v3046_v60, %v11478_v61  ;;  %v3746_v61 = vpack.c.bf16 %v3697_v4, %v3696_v28  ;;  %5031 = vst.msk [vmem:[#allocation3 + $0x3a0] sm:$0xff] %vm4166_vm3, %v16758_v52  ;;  %v3699_v28 = vld [vmem:[#allocation2 + $0x231] sm:$0xff]  ;;  %v3272_v4 = vld [vmem:[#allocation2 + $0x2a8] sm:$0xff] }
 0x479   :  { %5032 = vst.msk [vmem:[#allocation3 + $0x3a8] sm:$0xff] %vm4166_vm3, %v16758_v52 }
 0x47a   :  { %v3617_v11 = vadd.f32 %v3476_v14, %v3187_v45  ;;  %5033 = vst.msk [vmem:[#allocation3 + $0x3b0] sm:$0xff] %vm4166_vm3, %v16758_v52 }
 0x47b   :  { %5034 = vst.msk [vmem:[#allocation3 + $0x3b8] sm:$0xff] %vm4166_vm3, %v16758_v52 }
 0x47c   :  { %9931 = vmatmul.msk.bf16.gmra.mxu3 %vm81_vm1, %v2887_v27  ;;  %5035 = vst.msk [vmem:[#allocation3 + $0x3c0] sm:$0xff] %vm4166_vm3, %v16758_v52  ;;  %v3698_v27 = vld [vmem:[#allocation2 + $0x229] sm:$0xff] }
 0x47d   :  { %v3904_v24 = vpop.f32.mrf.mxu1  ;;  %5036 = vst.msk [vmem:[#allocation3 + $0x3c8] sm:$0xff] %vm4166_vm3, %v16758_v52 }
 0x47e   :  { %v3484_v63 = vpop.f32.mrf.mxu0  ;;  %v12028_v26 = vadd.f32 %v3904_v24, %v3616_v22  ;;  %5037 = vst.msk [vmem:[#allocation3 + $0x3d0] sm:$0xff] %vm4166_vm3, %v16758_v52  ;;  %v2841_v22 = vld [vmem:[#allocation2 + $0x28f] sm:$0xff] }
 0x47f   :  { %v3049_v14 = vpop.f32.mrf.mxu3  ;;  %5038 = vst.msk [vmem:[#allocation3 + $0x3d8] sm:$0xff] %vm4166_vm3, %v16758_v52 }
 0x480   :  { %v3188_v30 = vadd.f32 %v3049_v14, %v11485_v12  ;;  %9996 = vmatmul.msk.bf16.gmra.mxu1 %vm81_vm1, %v3746_v61  ;;  %v2840_v12 = vld [vmem:[#allocation2 + $0x287] sm:$0xff]  ;;  %5039 = vst.msk [vmem:[#allocation3 + $0x3e0] sm:$0xff] %vm4166_vm3, %v16758_v52 }
 0x481   :  { %9965 = vmatmul.msk.bf16.gmra.mxu0 %vm81_vm1, %v3318_v38  ;;  %5040 = vst.msk [vmem:[#allocation3 + $0x3e8] sm:$0xff] %vm4166_vm3, %v16758_v52  ;;  %v2888_v45 = vpack.c.bf16 %v2841_v22, %v2840_v12 }
 0x482   :  { %v3618_v20 = vadd.f32 %v3479_v8, %v3188_v30  ;;  %5041 = vst.msk [vmem:[#allocation3 + $0x3f0] sm:$0xff] %vm4166_vm3, %v16758_v52 }
 0x483   :  { %5042 = vst.msk [vmem:[#allocation3 + $0x3f8] sm:$0xff] %vm4166_vm3, %v16758_v52 }
 0x484   :  { %5043 = vst.msk [vmem:[#allocation3 + $0x400] sm:$0xff] %vm4166_vm3, %v16758_v52 }
 0x485   :  { %v3906_v25 = vpop.f32.mrf.mxu1  ;;  %5044 = vst.msk [vmem:[#allocation3 + $0x408] sm:$0xff] %vm4166_vm3, %v16758_v52 }
 0x486   :  { %v3486_v0 = vpop.f32.mrf.mxu0  ;;  %v12049_v33 = vadd.f32 %v3906_v25, %v3617_v11  ;;  %v3319_v11 = vpack.c.bf16 %v3273_v40, %v3272_v4  ;;  %5045 = vst.msk [vmem:[#allocation3 + $0x410] sm:$0xff] %vm4166_vm3, %v16758_v52  ;;  %v3275_v4 = vld [vmem:[#allocation2 + $0x2d0] sm:$0xff] }
 0x487   :  { %v3051_v8 = vpop.f32.mrf.mxu3  ;;  %5046 = vst.msk [vmem:[#allocation3 + $0x418] sm:$0xff] %vm4166_vm3, %v16758_v52 }
 0x488   :  { %v3189_v60 = vadd.f32 %v3051_v8, %v11488_v15  ;;  %v3747_v15 = vpack.c.bf16 %v3699_v28, %v3698_v27  ;;  %5047 = vst.msk [vmem:[#allocation3 + $0x420] sm:$0xff] %vm4166_vm3, %v16758_v52  ;;  %v3701_v27 = vld [vmem:[#allocation2 + $0x291] sm:$0xff]  ;;  %v3274_v28 = vld [vmem:[#allocation2 + $0x2c8] sm:$0xff] }
 0x489   :  { %5048 = vst.msk [vmem:[#allocation3 + $0x428] sm:$0xff] %vm4166_vm3, %v16758_v52 }
 0x48a   :  { %v3619_v47 = vadd.f32 %v3481_v57, %v3189_v60  ;;  %5049 = vst.msk [vmem:[#allocation3 + $0x430] sm:$0xff] %vm4166_vm3, %v16758_v52 }
 0x48b   :  { %5050 = vst.msk [vmem:[#allocation3 + $0x438] sm:$0xff] %vm4166_vm3, %v16758_v52 }
 0x48c   :  { %9932 = vmatmul.msk.bf16.gmra.mxu3 %vm81_vm1, %v2888_v45  ;;  %5051 = vst.msk [vmem:[#allocation3 + $0x440] sm:$0xff] %vm4166_vm3, %v16758_v52  ;;  %v3700_v45 = vld [vmem:[#allocation2 + $0x289] sm:$0xff] }
 0x48d   :  { %v3909_v61 = vpop.f32.mrf.mxu1  ;;  %5052 = vst.msk [vmem:[#allocation3 + $0x448] sm:$0xff] %vm4166_vm3, %v16758_v52 }
 0x48e   :  { %v3489_v38 = vpop.f32.mrf.mxu0  ;;  %v12069_v24 = vadd.f32 %v3909_v61, %v3618_v20  ;;  %5053 = vst.msk [vmem:[#allocation3 + $0x450] sm:$0xff] %vm4166_vm3, %v16758_v52  ;;  %v2843_v20 = vld [vmem:[#allocation2 + $0x2af] sm:$0xff] }
 0x48f   :  { %v3054_v57 = vpop.f32.mrf.mxu3  ;;  %5054 = vst.msk [vmem:[#allocation3 + $0x458] sm:$0xff] %vm4166_vm3, %v16758_v52 }
 0x490   :  { %v3190_v14 = vadd.f32 %v3054_v57, %v11495_v16  ;;  %9997 = vmatmul.msk.bf16.gmra.mxu1 %vm81_vm1, %v3747_v15  ;;  %v2842_v16 = vld [vmem:[#allocation2 + $0x2a7] sm:$0xff]  ;;  %5055 = vst.msk [vmem:[#allocation3 + $0x460] sm:$0xff] %vm4166_vm3, %v16758_v52  ;;  %v3320_v15 = vpack.c.bf16 %v3275_v4, %v3274_v28  ;;  %v3277_v4 = vld [vmem:[#allocation2 + $0x2f0] sm:$0xff] }
 0x491   :  { %9966 = vmatmul.msk.bf16.gmra.mxu0 %vm81_vm1, %v3319_v11  ;;  %5056 = vst.msk [vmem:[#allocation3 + $0x468] sm:$0xff] %vm4166_vm3, %v16758_v52  ;;  %v2889_v60 = vpack.c.bf16 %v2843_v20, %v2842_v16  ;;  %v2844_v20 = vld [vmem:[#allocation2 + $0x2c7] sm:$0xff] }
 0x492   :  { %v3620_v30 = vadd.f32 %v3484_v63, %v3190_v14  ;;  %5057 = vst.msk [vmem:[#allocation3 + $0x470] sm:$0xff] %vm4166_vm3, %v16758_v52  ;;  %v3276_v28 = vld [vmem:[#allocation2 + $0x2e8] sm:$0xff] }
 0x493   :  { %5058 = vst.msk [vmem:[#allocation3 + $0x478] sm:$0xff] %vm4166_vm3, %v16758_v52 }
 0x495   :  { %v3911_v12 = vpop.f32.mrf.mxu1 }
 0x496   :  { %v3491_v22 = vpop.f32.mrf.mxu0  ;;  %v12090_v25 = vadd.f32 %v3911_v12, %v3619_v47  ;;  %v3748_v47 = vpack.c.bf16 %v3701_v27, %v3700_v45  ;;  %v2845_v12 = vld [vmem:[#allocation2 + $0x2cf] sm:$0xff] }
 0x497   :  { %v3056_v63 = vpop.f32.mrf.mxu3  ;;  %v2890_v45 = vpack.c.bf16 %v2845_v12, %v2844_v20  ;;  %v3703_v27 = vld [vmem:[#allocation2 + $0x2b1] sm:$0xff]  ;;  %v2846_v20 = vld [vmem:[#allocation2 + $0x2e7] sm:$0xff] }
 0x498   :  { %v3191_v8 = vadd.f32 %v3056_v63, %v11498_v62  ;;  %v2847_v12 = vld [vmem:[#allocation2 + $0x2ef] sm:$0xff] }
 0x49a   :  { %v3621_v40 = vadd.f32 %v3486_v0, %v3191_v8 }
 0x49c   :  { %9933 = vmatmul.msk.bf16.gmra.mxu3 %vm81_vm1, %v2889_v60 }
 0x49d   :  { %v3914_v11 = vpop.f32.mrf.mxu1 }
 0x49e   :  { %v3494_v61 = vpop.f32.mrf.mxu0  ;;  %v12102_v57 = vadd.f32 %v3914_v11, %v3620_v30  ;;  %v3702_v30 = vld [vmem:[#allocation2 + $0x2a9] sm:$0xff] }
 0x49f   :  { %v3059_v62 = vpop.f32.mrf.mxu3 }
 0x4a0   :  { %v3192_v14 = vadd.f32 %v3059_v62, %v11505_v42  ;;  %9998 = vmatmul.msk.bf16.gmra.mxu1 %vm81_vm1, %v3748_v47  ;;  %v3749_v47 = vpack.c.bf16 %v3703_v27, %v3702_v30  ;;  %v2891_v30 = vpack.c.bf16 %v2847_v12, %v2846_v20  ;;  %v3705_v27 = vld [vmem:[#allocation2 + $0x2d1] sm:$0xff]  ;;  %v2848_v20 = vld [vmem:[#allocation2 + $0x307] sm:$0xff] }
 0x4a1   :  { %9967 = vmatmul.msk.bf16.gmra.mxu0 %vm81_vm1, %v3320_v15  ;;  %v3321_v15 = vpack.c.bf16 %v3277_v4, %v3276_v28  ;;  %v3278_v28 = vld [vmem:[#allocation2 + $0x308] sm:$0xff]  ;;  %v3279_v4 = vld [vmem:[#allocation2 + $0x310] sm:$0xff] }
 0x4a2   :  { %v3622_v16 = vadd.f32 %v3489_v38, %v3192_v14  ;;  %v2849_v12 = vld [vmem:[#allocation2 + $0x30f] sm:$0xff] }
 0x4a5   :  { %v3916_v52 = vpop.f32.mrf.mxu1 }
 0x4a6   :  { %v3496_v0 = vpop.f32.mrf.mxu0  ;;  %v12107_v63 = vadd.f32 %v3916_v52, %v3621_v40 }
 0x4a7   :  { %v3061_v8 = vpop.f32.mrf.mxu3 }
 0x4a8   :  { %v3193_v60 = vadd.f32 %v3061_v8, %v11508_v32 }
 0x4aa   :  { %v3623_v42 = vadd.f32 %v3491_v22, %v3193_v60 }
 0x4ac   :  { %9934 = vmatmul.msk.bf16.gmra.mxu3 %vm81_vm1, %v2890_v45 }
 0x4ad   :  { %v3919_v38 = vpop.f32.mrf.mxu1 }
 0x4ae   :  { %v3499_v11 = vpop.f32.mrf.mxu0  ;;  %v12111_v62 = vadd.f32 %v3919_v38, %v3622_v16  ;;  %v3704_v16 = vld [vmem:[#allocation2 + $0x2c9] sm:$0xff] }
 0x4af   :  { %v3064_v14 = vpop.f32.mrf.mxu3 }
 0x4b0   :  { %v3194_v40 = vadd.f32 %v3064_v14, %v11515_v37  ;;  %9999 = vmatmul.msk.bf16.gmra.mxu1 %vm81_vm1, %v3749_v47  ;;  %v3750_v47 = vpack.c.bf16 %v3705_v27, %v3704_v16  ;;  %v3706_v16 = vld [vmem:[#allocation2 + $0x2e9] sm:$0xff]  ;;  %v3707_v27 = vld [vmem:[#allocation2 + $0x2f1] sm:$0xff] }
 0x4b1   :  { %9968 = vmatmul.msk.bf16.gmra.mxu0 %vm81_vm1, %v3321_v15  ;;  %v3322_v15 = vpack.c.bf16 %v3279_v4, %v3278_v28  ;;  %v3280_v28 = vld [vmem:[#allocation2 + $0x328] sm:$0xff]  ;;  %v3281_v4 = vld [vmem:[#allocation2 + $0x330] sm:$0xff] }
 0x4b2   :  { %v3624_v32 = vadd.f32 %v3494_v61, %v3194_v40 }
 0x4b5   :  { %v3921_v52 = vpop.f32.mrf.mxu1 }
 0x4b6   :  { %v3501_v22 = vpop.f32.mrf.mxu0  ;;  %v12116_v8 = vadd.f32 %v3921_v52, %v3623_v42 }
 0x4b7   :  { %v3066_v60 = vpop.f32.mrf.mxu3 }
 0x4b8   :  { %v3195_v45 = vadd.f32 %v3066_v60, %v11518_v21  ;;  %v10357_v21 = vld [vmem:[%s16545_s8 + $0x8] sm:$0xff] }
 0x4b9   :  { %5430 = vmatpush.bf16.msra.mxu2 %v10357_v21 }
 0x4ba   :  { %v3625_v37 = vadd.f32 %v3496_v0, %v3195_v45 }
 0x4bc   :  { %9935 = vmatmul.msk.bf16.gmra.mxu3 %vm81_vm1, %v2891_v30 }
 0x4bd   :  { %v3924_v61 = vpop.f32.mrf.mxu1 }
 0x4be   :  { %v3504_v38 = vpop.f32.mrf.mxu0  ;;  %v12120_v14 = vadd.f32 %v3924_v61, %v3624_v32 }
 0x4bf   :  { %v3069_v40 = vpop.f32.mrf.mxu3 }
 0x4c0   :  { %v3196_v42 = vadd.f32 %v3069_v40, %v11525_v58  ;;  %10000 = vmatmul.msk.bf16.gmra.mxu1 %vm81_vm1, %v3750_v47  ;;  %v2892_v58 = vpack.c.bf16 %v2849_v12, %v2848_v20  ;;  %v2850_v20 = vld [vmem:[#allocation2 + $0x327] sm:$0xff]  ;;  %v2851_v12 = vld [vmem:[#allocation2 + $0x32f] sm:$0xff] }
 0x4c1   :  { %9969 = vmatmul.msk.bf16.gmra.mxu0 %vm81_vm1, %v3322_v15  ;;  %v3751_v15 = vpack.c.bf16 %v3707_v27, %v3706_v16  ;;  %v2893_v16 = vpack.c.bf16 %v2851_v12, %v2850_v20  ;;  %v3709_v27 = vld [vmem:[#allocation2 + $0x311] sm:$0xff]  ;;  %v2852_v20 = vld [vmem:[#allocation2 + $0x347] sm:$0xff] }
 0x4c2   :  { %v3626_v0 = vadd.f32 %v3499_v11, %v3196_v42  ;;  %v3323_v11 = vpack.c.bf16 %v3281_v4, %v3280_v28  ;;  %v3282_v28 = vld [vmem:[#allocation2 + $0x348] sm:$0xff]  ;;  %v3283_v4 = vld [vmem:[#allocation2 + $0x350] sm:$0xff] }
 0x4c3   :  { %v2853_v12 = vld [vmem:[#allocation2 + $0x34f] sm:$0xff] }
 0x4c5   :  { %v3926_v52 = vpop.f32.mrf.mxu1 }
 0x4c6   :  { %v3506_v60 = vpop.f32.mrf.mxu0  ;;  %v12128_v45 = vadd.f32 %v3926_v52, %v3625_v37 }
 0x4c7   :  { %v3071_v32 = vpop.f32.mrf.mxu3 }
 0x4c8   :  { %v3197_v30 = vadd.f32 %v3071_v32, %v11528_v54 }
 0x4ca   :  { %v3627_v47 = vadd.f32 %v3501_v22, %v3197_v30 }
 0x4cc   :  { %9936 = vmatmul.msk.bf16.gmra.mxu3 %vm81_vm1, %v2892_v58 }
 0x4cd   :  { %v3929_v61 = vpop.f32.mrf.mxu1 }
 0x4ce   :  { %v3509_v40 = vpop.f32.mrf.mxu0  ;;  %v12132_v42 = vadd.f32 %v3929_v61, %v3626_v0  ;;  %v3708_v0 = vld [vmem:[#allocation2 + $0x309] sm:$0xff] }
 0x4cf   :  { %v3074_v21 = vpop.f32.mrf.mxu3 }
 0x4d0   :  { %v3198_v37 = vadd.f32 %v3074_v21, %v11535_v34  ;;  %10001 = vmatmul.msk.bf16.gmra.mxu1 %vm81_vm1, %v3751_v15  ;;  %v3752_v15 = vpack.c.bf16 %v3709_v27, %v3708_v0  ;;  %v2894_v0 = vpack.c.bf16 %v2853_v12, %v2852_v20  ;;  %v3711_v27 = vld [vmem:[#allocation2 + $0x331] sm:$0xff]  ;;  %v2854_v20 = vld [vmem:[#allocation2 + $0x367] sm:$0xff] }
 0x4d1   :  { %9970 = vmatmul.msk.bf16.gmra.mxu0 %vm81_vm1, %v3323_v11  ;;  %v3324_v11 = vpack.c.bf16 %v3283_v4, %v3282_v28  ;;  %v3284_v28 = vld [vmem:[#allocation2 + $0x368] sm:$0xff]  ;;  %v3285_v4 = vld [vmem:[#allocation2 + $0x370] sm:$0xff] }
 0x4d2   :  { %v3628_v54 = vadd.f32 %v3504_v38, %v3198_v37  ;;  %v2855_v12 = vld [vmem:[#allocation2 + $0x36f] sm:$0xff] }
 0x4d5   :  { %v3931_v52 = vpop.f32.mrf.mxu1 }
 0x4d6   :  { %v3511_v22 = vpop.f32.mrf.mxu0  ;;  %v12137_v32 = vadd.f32 %v3931_v52, %v3627_v47 }
 0x4d7   :  { %v3076_v30 = vpop.f32.mrf.mxu3 }
 0x4d8   :  { %v3199_v58 = vadd.f32 %v3076_v30, %v11538_v5 }
 0x4da   :  { %v3629_v34 = vadd.f32 %v3506_v60, %v3199_v58 }
 0x4dc   :  { %9937 = vmatmul.msk.bf16.gmra.mxu3 %vm81_vm1, %v2893_v16 }
 0x4dd   :  { %v3934_v38 = vpop.f32.mrf.mxu1 }
 0x4de   :  { %v3514_v61 = vpop.f32.mrf.mxu0  ;;  %v12141_v21 = vadd.f32 %v3934_v38, %v3628_v54  ;;  %v3710_v54 = vld [vmem:[#allocation2 + $0x329] sm:$0xff] }
 0x4df   :  { %v3079_v37 = vpop.f32.mrf.mxu3 }
 0x4e0   :  { %v3200_v47 = vadd.f32 %v3079_v37, %v11546_v6  ;;  %10002 = vmatmul.msk.bf16.gmra.mxu1 %vm81_vm1, %v3752_v15  ;;  %v3753_v15 = vpack.c.bf16 %v3711_v27, %v3710_v54  ;;  %v2895_v54 = vpack.c.bf16 %v2855_v12, %v2854_v20  ;;  %v3713_v27 = vld [vmem:[#allocation2 + $0x351] sm:$0xff]  ;;  %v2856_v20 = vld [vmem:[#allocation2 + $0x387] sm:$0xff] }
 0x4e1   :  { %9971 = vmatmul.msk.bf16.gmra.mxu0 %vm81_vm1, %v3324_v11  ;;  %v3325_v11 = vpack.c.bf16 %v3285_v4, %v3284_v28  ;;  %v3286_v28 = vld [vmem:[#allocation2 + $0x388] sm:$0xff]  ;;  %v3287_v4 = vld [vmem:[#allocation2 + $0x390] sm:$0xff] }
 0x4e2   :  { %v3630_v5 = vadd.f32 %v3509_v40, %v3200_v47  ;;  %v2857_v12 = vld [vmem:[#allocation2 + $0x38f] sm:$0xff] }
 0x4e5   :  { %v3936_v52 = vpop.f32.mrf.mxu1 }
 0x4e6   :  { %v3516_v60 = vpop.f32.mrf.mxu0  ;;  %v12146_v30 = vadd.f32 %v3936_v52, %v3629_v34 }
 0x4e7   :  { %v3081_v58 = vpop.f32.mrf.mxu3 }
 0x4e8   :  { %v3201_v16 = vadd.f32 %v3081_v58, %v11550_v17 }
 0x4ea   :  { %v3631_v6 = vadd.f32 %v3511_v22, %v3201_v16 }
 0x4ec   :  { %9938 = vmatmul.msk.bf16.gmra.mxu3 %vm81_vm1, %v2894_v0 }
 0x4ed   :  { %v3939_v40 = vpop.f32.mrf.mxu1 }
 0x4ee   :  { %v3519_v38 = vpop.f32.mrf.mxu0  ;;  %v12150_v37 = vadd.f32 %v3939_v40, %v3630_v5  ;;  %v3712_v5 = vld [vmem:[#allocation2 + $0x349] sm:$0xff] }
 0x4ef   :  { %v3084_v47 = vpop.f32.mrf.mxu3 }
 0x4f0   :  { %v3202_v34 = vadd.f32 %v3084_v47, %v11558_v3  ;;  %10003 = vmatmul.msk.bf16.gmra.mxu1 %vm81_vm1, %v3753_v15  ;;  %v3754_v15 = vpack.c.bf16 %v3713_v27, %v3712_v5  ;;  %v2896_v5 = vpack.c.bf16 %v2857_v12, %v2856_v20  ;;  %v3715_v27 = vld [vmem:[#allocation2 + $0x371] sm:$0xff]  ;;  %v2858_v20 = vld [vmem:[#allocation2 + $0x3a7] sm:$0xff] }
 0x4f1   :  { %9972 = vmatmul.msk.bf16.gmra.mxu0 %vm81_vm1, %v3325_v11  ;;  %v3326_v11 = vpack.c.bf16 %v3287_v4, %v3286_v28  ;;  %v3288_v28 = vld [vmem:[#allocation2 + $0x3a8] sm:$0xff]  ;;  %v3289_v4 = vld [vmem:[#allocation2 + $0x3b0] sm:$0xff] }
 0x4f2   :  { %v3632_v17 = vadd.f32 %v3514_v61, %v3202_v34  ;;  %v2859_v12 = vld [vmem:[#allocation2 + $0x3af] sm:$0xff] }
 0x4f5   :  { %v3941_v52 = vpop.f32.mrf.mxu1 }
 0x4f6   :  { %v3521_v22 = vpop.f32.mrf.mxu0  ;;  %v12155_v58 = vadd.f32 %v3941_v52, %v3631_v6 }
 0x4f7   :  { %v3086_v16 = vpop.f32.mrf.mxu3 }
 0x4f8   :  { %v3203_v0 = vadd.f32 %v3086_v16, %v11562_v1 }
 0x4fa   :  { %v3633_v3 = vadd.f32 %v3516_v60, %v3203_v0 }
 0x4fc   :  { %9939 = vmatmul.msk.bf16.gmra.mxu3 %vm81_vm1, %v2895_v54 }
 0x4fd   :  { %v3944_v61 = vpop.f32.mrf.mxu1 }
 0x4fe   :  { %v3524_v40 = vpop.f32.mrf.mxu0  ;;  %v12159_v47 = vadd.f32 %v3944_v61, %v3632_v17  ;;  %v3714_v17 = vld [vmem:[#allocation2 + $0x369] sm:$0xff] }
 0x4ff   :  { %v3089_v34 = vpop.f32.mrf.mxu3 }
 0x500   :  { %v3204_v6 = vadd.f32 %v3089_v34, %v11569_v41  ;;  %10004 = vmatmul.msk.bf16.gmra.mxu1 %vm81_vm1, %v3754_v15  ;;  %v3755_v15 = vpack.c.bf16 %v3715_v27, %v3714_v17  ;;  %v2897_v27 = vpack.c.bf16 %v2859_v12, %v2858_v20  ;;  %v2860_v12 = vld [vmem:[#allocation2 + $0x3c7] sm:$0xff] }
 0x501   :  { %9973 = vmatmul.msk.bf16.gmra.mxu0 %vm81_vm1, %v3326_v11  ;;  %v3327_v11 = vpack.c.bf16 %v3289_v4, %v3288_v28  ;;  %v3717_v28 = vld [vmem:[#allocation2 + $0x391] sm:$0xff]  ;;  %v3290_v4 = vld [vmem:[#allocation2 + $0x3c8] sm:$0xff] }
 0x502   :  { %v3634_v1 = vadd.f32 %v3519_v38, %v3204_v6 }
 0x505   :  { %v3946_v52 = vpop.f32.mrf.mxu1 }
 0x506   :  { %v3526_v60 = vpop.f32.mrf.mxu0  ;;  %v12164_v16 = vadd.f32 %v3946_v52, %v3633_v3 }
 0x507   :  { %v3091_v0 = vpop.f32.mrf.mxu3 }
 0x508   :  { %v3205_v54 = vadd.f32 %v3091_v0, %v11572_v36 }
 0x50a   :  { %v3635_v41 = vadd.f32 %v3521_v22, %v3205_v54 }
 0x50c   :  { %9940 = vmatmul.msk.bf16.gmra.mxu3 %vm81_vm1, %v2896_v5  ;;  %v16761_v5 = vld [vmem:[#allocation5_spill] sm:$0xff] }
 0x50d   :  { %v3949_v38 = vpop.f32.mrf.mxu1 }
 0x50e   :  { %v3529_v61 = vpop.f32.mrf.mxu0  ;;  %v12168_v34 = vadd.f32 %v3949_v38, %v3634_v1  ;;  %v3716_v1 = vld [vmem:[#allocation2 + $0x389] sm:$0xff] }
 0x50f   :  { %v3094_v6 = vpop.f32.mrf.mxu3  ;;  %v3291_v38 = vld [vmem:[#allocation2 + $0x3d0] sm:$0xff] }
 0x510   :  { %v3206_v3 = vadd.f32 %v3094_v6, %v11579_v13  ;;  %10005 = vmatmul.msk.bf16.gmra.mxu1 %vm81_vm1, %v3755_v15  ;;  %v3756_v15 = vpack.c.bf16 %v3717_v28, %v3716_v1  ;;  %v16763_v1 = vld [vmem:[#allocation6_spill] sm:$0xff] }
 0x511   :  { %9974 = vmatmul.msk.bf16.gmra.mxu0 %vm81_vm1, %v3327_v11  ;;  %v3328_v11 = vpack.c.bf16 %v3291_v38, %v3290_v4  ;;  %v3719_v38 = vld [vmem:[#allocation2 + $0x3b1] sm:$0xff] }
 0x512   :  { %v3636_v36 = vadd.f32 %v3524_v40, %v3206_v3 }
 0x515   :  { %v3951_v52 = vpop.f32.mrf.mxu1 }
 0x516   :  { %v3531_v22 = vpop.f32.mrf.mxu0  ;;  %v12173_v0 = vadd.f32 %v3951_v52, %v3635_v41  ;;  %v16762_v41 = vld [vmem:[#allocation34_spill] sm:$0xff] }
 0x517   :  { %v3096_v54 = vpop.f32.mrf.mxu3 }
 0x518   :  { %v3207_v17 = vadd.f32 %v3096_v54, %v16761_v5  ;;  %v2861_v54 = vld [vmem:[#allocation2 + $0x3cf] sm:$0xff] }
 0x519   :  { %v2898_v4 = vpack.c.bf16 %v2861_v54, %v2860_v12  ;;  %v2862_v54 = vld [vmem:[#allocation2 + $0x3e7] sm:$0xff] }
 0x51a   :  { %v3637_v13 = vadd.f32 %v3526_v60, %v3207_v17 }
 0x51c   :  { %9941 = vmatmul.msk.bf16.gmra.mxu3 %vm81_vm1, %v2897_v27 }
 0x51d   :  { %v3954_v40 = vpop.f32.mrf.mxu1 }
 0x51e   :  { %v3534_v6 = vpop.f32.mrf.mxu0  ;;  %v12177_v3 = vadd.f32 %v3954_v40, %v3636_v36  ;;  %v3718_v36 = vld [vmem:[#allocation2 + $0x3a9] sm:$0xff] }
 0x51f   :  { %v3099_v50 = vpop.f32.mrf.mxu3  ;;  %v3292_v40 = vld [vmem:[#allocation2 + $0x3e8] sm:$0xff] }
 0x520   :  { %v3208_v52 = vadd.f32 %v3099_v50, %v16762_v41  ;;  %10006 = vmatmul.msk.bf16.gmra.mxu1 %vm81_vm1, %v3756_v15  ;;  %v3757_v15 = vpack.c.bf16 %v3719_v38, %v3718_v36  ;;  %v3721_v38 = vld [vmem:[#allocation2 + $0x3d1] sm:$0xff] }
 0x521   :  { %9975 = vmatmul.msk.bf16.gmra.mxu0 %vm81_vm1, %v3328_v11  ;;  %v3329_v11 = vpack.c.bf16 %v3293_v39, %v3292_v40  ;;  %v16764_v39 = vld [vmem:[#allocation36_spill] sm:$0xff]  ;;  %v3294_v40 = vld [vmem:[#allocation2 + $0x408] sm:$0xff] }
 0x522   :  { %v3638_v20 = vadd.f32 %v3529_v61, %v3208_v52 }
 0x525   :  { %v3956_v5 = vpop.f32.mrf.mxu1 }
 0x526   :  { %v3536_v60 = vpop.f32.mrf.mxu0  ;;  %v12182_v17 = vadd.f32 %v3956_v5, %v3637_v13  ;;  %v2863_v5 = vld [vmem:[#allocation2 + $0x3ef] sm:$0xff] }
 0x527   :  { %v3101_v27 = vpop.f32.mrf.mxu3  ;;  %v2899_v36 = vpack.c.bf16 %v2863_v5, %v2862_v54  ;;  %v2864_v5 = vld [vmem:[#allocation2 + $0x407] sm:$0xff] }
 0x528   :  { %v3209_v28 = vadd.f32 %v3101_v27, %v16763_v1 }
 0x52a   :  { %v3639_v50 = vadd.f32 %v3531_v22, %v3209_v28 }
 0x52c   :  { %9942 = vmatmul.msk.bf16.gmra.mxu3 %vm81_vm1, %v2898_v4 }
 0x52d   :  { %v3959_v61 = vpop.f32.mrf.mxu1 }
 0x52e   :  { %v3539_v41 = vpop.f32.mrf.mxu0  ;;  %v12186_v52 = vadd.f32 %v3959_v61, %v3638_v20  ;;  %v3720_v20 = vld [vmem:[#allocation2 + $0x3c9] sm:$0xff] }
 0x52f   :  { %v3104_v23 = vpop.f32.mrf.mxu3  ;;  %v3295_v61 = vld [vmem:[#allocation2 + $0x410] sm:$0xff] }
 0x530   :  { %v3210_v13 = vadd.f32 %v3104_v23, %v11599_v9  ;;  %10007 = vmatmul.msk.bf16.gmra.mxu1 %vm81_vm1, %v3757_v15  ;;  %v3758_v23 = vpack.c.bf16 %v3721_v38, %v3720_v20  ;;  %v3330_v15 = vpack.c.bf16 %v3295_v61, %v3294_v40  ;;  %v3722_v38 = vld [vmem:[#allocation2 + $0x3e9] sm:$0xff]  ;;  %v3723_v40 = vld [vmem:[#allocation2 + $0x3f1] sm:$0xff] }
 0x531   :  { %9976 = vmatmul.msk.bf16.gmra.mxu0 %vm81_vm1, %v3329_v11  ;;  %v3296_v61 = vld [vmem:[#allocation2 + $0x428] sm:$0xff] }
 0x532   :  { %v3640_v12 = vadd.f32 %v3534_v6, %v3210_v13 }
 0x535   :  { %v3961_v27 = vpop.f32.mrf.mxu1 }
 0x536   :  { %v3541_v22 = vpop.f32.mrf.mxu0  ;;  %v12191_v1 = vadd.f32 %v3961_v27, %v3639_v50  ;;  %v16765_v50 = vld [vmem:[#allocation7_spill] sm:$0xff] }
 0x537   :  { %v3106_v28 = vpop.f32.mrf.mxu3 }
 0x538   :  { %v3211_v4 = vadd.f32 %v3106_v28, %v16764_v39  ;;  %v2865_v28 = vld [vmem:[#allocation2 + $0x40f] sm:$0xff] }
 0x53a   :  { %v3641_v9 = vadd.f32 %v3536_v60, %v3211_v4 }
 0x53c   :  { %9943 = vmatmul.msk.bf16.gmra.mxu3 %vm81_vm1, %v2899_v36 }
 0x53d   :  { %v3964_v6 = vpop.f32.mrf.mxu1 }
 0x53e   :  { %v3544_v11 = vpop.f32.mrf.mxu0  ;;  %v12195_v13 = vadd.f32 %v3964_v6, %v3640_v12  ;;  %v2900_v12 = vpack.c.bf16 %v2865_v28, %v2864_v5  ;;  %v2866_v5 = vld [vmem:[#allocation2 + $0x427] sm:$0xff]  ;;  %v2867_v28 = vld [vmem:[#allocation2 + $0x42f] sm:$0xff] }
 0x53f   :  { %v3109_v10 = vpop.f32.mrf.mxu3 }
 0x540   :  { %v3212_v27 = vadd.f32 %v3109_v10, %v16765_v50  ;;  %10008 = vmatmul.msk.bf16.gmra.mxu1 %vm81_vm1, %v3758_v23  ;;  %v3297_v10 = vld [vmem:[#allocation2 + $0x430] sm:$0xff]  ;;  %v3759_v23 = vpack.c.bf16 %v3723_v40, %v3722_v38  ;;  %v2901_v38 = vpack.c.bf16 %v2867_v28, %v2866_v5  ;;  %v2868_v5 = vld [vmem:[#allocation2 + $0x447] sm:$0xff] }
 0x541   :  { %9977 = vmatmul.msk.bf16.gmra.mxu0 %vm81_vm1, %v3330_v15  ;;  %v3725_v40 = vld [vmem:[#allocation2 + $0x411] sm:$0xff] }
 0x542   :  { %v3642_v54 = vadd.f32 %v3539_v41, %v3212_v27  ;;  %v3331_v41 = vpack.c.bf16 %v3297_v10, %v3296_v61  ;;  %v3298_v61 = vld [vmem:[#allocation2 + $0x448] sm:$0xff]  ;;  %v3299_v10 = vld [vmem:[#allocation2 + $0x450] sm:$0xff] }
 0x543   :  { %v2869_v28 = vld [vmem:[#allocation2 + $0x44f] sm:$0xff] }
 0x545   :  { %v3966_v39 = vpop.f32.mrf.mxu1 }
 0x546   :  { %v12200_v60 = vpop.f32.mrf.mxu0  ;;  %v12202_v4 = vadd.f32 %v3966_v39, %v3641_v9  ;;  %v16766_v9 = vld [vmem:[#allocation9_spill] sm:$0xff] }
 0x547   :  { %v3111_v36 = vpop.f32.mrf.mxu3 }
 0x548   :  { %v3213_v20 = vadd.f32 %v3111_v36, %v11622_v2 }
 0x54a   :  { %v3643_v6 = vadd.f32 %v3541_v22, %v3213_v20 }
 0x54c   :  { %9944 = vmatmul.msk.bf16.gmra.mxu3 %vm81_vm1, %v2900_v12 }
 0x54d   :  { %v3969_v15 = vpop.f32.mrf.mxu1 }
 0x54e   :  { %v3549_v50 = vpop.f32.mrf.mxu0  ;;  %v12206_v27 = vadd.f32 %v3969_v15, %v3642_v54  ;;  %v3724_v54 = vld [vmem:[#allocation2 + $0x409] sm:$0xff] }
 0x54f   :  { %v3114_v43 = vpop.f32.mrf.mxu3 }
 0x550   :  { %v3214_v39 = vadd.f32 %v3114_v43, %v16766_v9  ;;  %10009 = vmatmul.msk.bf16.gmra.mxu1 %vm81_vm1, %v3759_v23  ;;  %v3760_v43 = vpack.c.bf16 %v3725_v40, %v3724_v54  ;;  %v3332_v23 = vpack.c.bf16 %v3299_v10, %v3298_v61  ;;  %v2902_v54 = vpack.c.bf16 %v2869_v28, %v2868_v5  ;;  %v3726_v40 = vld [vmem:[#allocation2 + $0x429] sm:$0xff] }
 0x551   :  { %9978 = vmatmul.msk.bf16.gmra.mxu0 %vm81_vm1, %v3331_v41  ;;  %v3300_v61 = vld [vmem:[#allocation2 + $0x468] sm:$0xff]  ;;  %v3301_v10 = vld [vmem:[#allocation2 + $0x470] sm:$0xff] }
 0x552   :  { %v3644_v2 = vadd.f32 %v3544_v11, %v3214_v39  ;;  %v16769_v39 = vld [vmem:[#allocation12_spill] sm:$0xff] }
 0x553   :  { %v2870_v28 = vld [vmem:[#allocation2 + $0x467] sm:$0xff] }
 0x555   :  { %v3971_v36 = vpop.f32.mrf.mxu1 }
 0x556   :  { %v12211_v22 = vpop.f32.mrf.mxu0  ;;  %v12213_v20 = vadd.f32 %v3971_v36, %v3643_v6 }
 0x557   :  { %16767 = vst [vmem:[#allocation5_spill] sm:$0xff] %v12211_v22  ;;  %v12215_v12 = vpop.f32.mrf.mxu3 }
 0x55c   :  { %9945 = vmatmul.msk.bf16.gmra.mxu3 %vm81_vm1, %v2901_v38 }
 0x55d   :  { %v3974_v41 = vpop.f32.mrf.mxu1 }
 0x55e   :  { %v3554_v11 = vpop.f32.mrf.mxu0  ;;  %v12218_v15 = vadd.f32 %v3974_v41, %v3644_v2  ;;  %v3727_v2 = vld [vmem:[#allocation2 + $0x431] sm:$0xff] }
 0x55f   :  { %v3119_v9 = vpop.f32.mrf.mxu3  ;;  %v3761_v41 = vpack.c.bf16 %v3727_v2, %v3726_v40  ;;  %v3728_v2 = vld [vmem:[#allocation2 + $0x449] sm:$0xff] }
 0x560   :  { %16768 = vst [vmem:[#allocation34_spill] sm:$0xff] %v12218_v15  ;;  %v3216_v18 = vadd.f32 %v3119_v9, %v16769_v39  ;;  %10010 = vmatmul.msk.bf16.gmra.mxu1 %vm81_vm1, %v3760_v43  ;;  %v3333_v43 = vpack.c.bf16 %v3301_v10, %v3300_v61  ;;  %v16773_v39 = vld [vmem:[#allocation15_spill] sm:$0xff] }
 0x561   :  { %9979 = vmatmul.msk.bf16.gmra.mxu0 %vm81_vm1, %v3332_v23 }
 0x562   :  { %v3646_v6 = vadd.f32 %v3549_v50, %v3216_v18 }
 0x565   :  { %v12223_v36 = vpop.f32.mrf.mxu1 }
 0x566   :  { %16770 = vst [vmem:[#allocation6_spill] sm:$0xff] %v12223_v36  ;;  %v12225_v22 = vpop.f32.mrf.mxu0 }
 0x567   :  { %16771 = vst [vmem:[#allocation36_spill] sm:$0xff] %v12225_v22  ;;  %v12227_v38 = vpop.f32.mrf.mxu3  ;;  %v2871_v22 = vld [vmem:[#allocation2 + $0x46f] sm:$0xff] }
 0x568   :  { %16772 = vst [vmem:[#allocation7_spill] sm:$0xff] %v12227_v38  ;;  %v2903_v40 = vpack.c.bf16 %v2871_v22, %v2870_v28 }
 0x56c   :  { %9946 = vmatmul.msk.bf16.gmra.mxu3 %vm81_vm1, %v2902_v54 }
 0x56d   :  { %v3979_v9 = vpop.f32.mrf.mxu1 }
 0x56e   :  { %v3559_v23 = vpop.f32.mrf.mxu0  ;;  %v12230_v18 = vadd.f32 %v3979_v9, %v3646_v6  ;;  %v3729_v6 = vld [vmem:[#allocation2 + $0x451] sm:$0xff] }
 0x56f   :  { %v3124_v50 = vpop.f32.mrf.mxu3  ;;  %v3762_v61 = vpack.c.bf16 %v3729_v6, %v3728_v2  ;;  %v3731_v2 = vld [vmem:[#allocation2 + $0x471] sm:$0xff] }
 0x570   :  { %v3218_v15 = vadd.f32 %v3124_v50, %v16773_v39  ;;  %10011 = vmatmul.msk.bf16.gmra.mxu1 %vm81_vm1, %v3761_v41  ;;  %v12249_v50 = vld [vmem:[%s16542_s5] ss:$0 sm:$0xff] }
 0x571   :  { %9980 = vmatmul.msk.bf16.gmra.mxu0 %vm81_vm1, %v3333_v43  ;;  %v12257_v28 = vadd.f32 %v12249_v50, %v11803_v56 }
 0x572   :  { %v3648_v5 = vadd.f32 %v3554_v11, %v3218_v15 }
 0x573   :  { %16777 = vst [vmem:[#allocation38_spill] sm:$0xff] %v12257_v28  ;;  %v4168_v6 = vsel %vm4166_vm3, %v12257_v28, 0.0 }
 0x575   :  { %v12235_v36 = vpop.f32.mrf.mxu1 }
 0x576   :  { %v12237_v38 = vpop.f32.mrf.mxu0 }
 0x577   :  { %16774 = vst [vmem:[#allocation9_spill] sm:$0xff] %v12237_v38  ;;  %v12239_v54 = vpop.f32.mrf.mxu3 }
 0x57c   :  { %9947 = vmatmul.msk.bf16.gmra.mxu3 %vm81_vm1, %v2903_v40  ;;  %v3730_v40 = vld [vmem:[#allocation2 + $0x469] sm:$0xff] }
 0x57d   :  { %v3984_v10 = vpop.f32.mrf.mxu1 }
 0x57e   :  { %v3564_v9 = vpop.f32.mrf.mxu0  ;;  %v12242_v41 = vadd.f32 %v3984_v10, %v3648_v5  ;;  %v12281_v10 = vadd.f32 %v12249_v50, %v11864_v48  ;;  %v12295_v48 = vadd.f32 %v12249_v50, %v11905_v55  ;;  %v12309_v55 = vadd.f32 %v12249_v50, %v11946_v7 }
 0x57f   :  { %v3129_v43 = vpop.f32.mrf.mxu3  ;;  %v12325_v7 = vadd.f32 %v12249_v50, %v11987_v35 }
 0x580   :  { %16775 = vst [vmem:[#allocation12_spill] sm:$0xff] %v12242_v41  ;;  %v3220_v11 = vadd.f32 %v3129_v43, %v11665_v51  ;;  %10012 = vmatmul.msk.bf16.gmra.mxu1 %vm81_vm1, %v3762_v61  ;;  %v12263_v51 = vadd.f32 %v12249_v50, %v11780_v29  ;;  %v12273_v61 = vadd.f32 %v12249_v50, %v11844_v31 }
 0x581   :  { %v12287_v31 = vadd.f32 %v12249_v50, %v11885_v53 }
 0x582   :  { %v3650_v15 = vadd.f32 %v3559_v23, %v3220_v11  ;;  %16778 = vst [vmem:[#allocation39_spill] sm:$0xff] %v12263_v51  ;;  %v12267_v23 = vadd.f32 %v12249_v50, %v11823_v59  ;;  %v4167_v56 = vsel %vm4166_vm3, %v12263_v51, 0.0  ;;  %v3763_v59 = vpack.c.bf16 %v3731_v2, %v3730_v40  ;;  %v16780_v40 = vld [vmem:[#allocation20_spill] sm:$0xff] }
 0x583   :  { %v4169_v43 = vadd.f32 %v4168_v6, %v4167_v56  ;;  %v4172_v28 = vsel %vm4166_vm3, %v12273_v61, 0.0  ;;  %v4176_v53 = vsel %vm4166_vm3, %v12287_v31, 0.0  ;;  %16781 = vst [vmem:[#allocation20_spill] sm:$0xff] %v12325_v7 }
 0x584   :  { %16779 = vst [vmem:[#allocation40_spill] sm:$0xff] %v12267_v23  ;;  %v4170_v29 = vsel %vm4166_vm3, %v12267_v23, 0.0  ;;  %v4174_v23 = vsel %vm4166_vm3, %v12281_v10, 0.0 }
 0x585   :  { %v12251_v22 = vpop.f32.mrf.mxu1  ;;  %v4171_v51 = vadd.f32 %v4170_v29, %v4169_v43  ;;  %v4178_v43 = vsel %vm4166_vm3, %v12295_v48, 0.0 }
 0x586   :  { %v12253_v39 = vpop.f32.mrf.mxu0 }
 0x587   :  { %16776 = vst [vmem:[#allocation15_spill] sm:$0xff] %v12253_v39  ;;  %v12259_v5 = vpop.f32.mrf.mxu3  ;;  %v4173_v6 = vadd.f32 %v4172_v28, %v4171_v51  ;;  %v12317_v51 = vadd.f32 %v12249_v50, %v11967_v19  ;;  %v12333_v19 = vadd.f32 %v12249_v50, %v12008_v44 }
 0x589   :  { %v4175_v29 = vadd.f32 %v4174_v23, %v4173_v6  ;;  %v4182_v23 = vsel %vm4166_vm3, %v12309_v55, 0.0  ;;  %16782 = vst [vmem:[#allocation41_spill] sm:$0xff] %v12333_v19 }
 0x58d   :  { %v3989_v11 = vpop.f32.mrf.mxu1 }
 0x58e   :  { %v12289_v39 = vadd.f32 %v3989_v11, %v3650_v15  ;;  %v3569_v41 = vpop.f32.mrf.mxu0  ;;  %v12303_v15 = vadd.f32 %v12249_v50, %v11926_v46 }
 0x58f   :  { %v3134_v38 = vpop.f32.mrf.mxu3 }
 0x590   :  { %v3222_v2 = vadd.f32 %v3134_v38, %v16780_v40  ;;  %10013 = vmatmul.msk.bf16.gmra.mxu1 %vm81_vm1, %v3763_v59  ;;  %v4177_v38 = vadd.f32 %v4176_v53, %v4175_v29  ;;  %v4180_v28 = vsel %vm4166_vm3, %v12303_v15, 0.0  ;;  %v4186_v53 = vsel %vm4166_vm3, %v12325_v7, 0.0 }
 0x591   :  { %v12339_v29 = vadd.f32 %v12249_v50, %v12028_v26  ;;  %v12353_v26 = vadd.f32 %v12249_v50, %v12069_v24  ;;  %v12366_v24 = vadd.f32 %v12249_v50, %v12102_v57  ;;  %v12382_v57 = vadd.f32 %v12249_v50, %v12111_v62 }
 0x592   :  { %v3652_v56 = vadd.f32 %v3564_v9, %v3222_v2  ;;  %v4179_v46 = vadd.f32 %v4178_v43, %v4177_v38  ;;  %v4184_v2 = vsel %vm4166_vm3, %v12317_v51, 0.0  ;;  %v4188_v38 = vsel %vm4166_vm3, %v12333_v19, 0.0 }
 0x593   :  { %16783 = vst [vmem:[#allocation42_spill] sm:$0xff] %v12339_v29 }
 0x594   :  { %v4181_v59 = vadd.f32 %v4180_v28, %v4179_v46  ;;  %v12345_v28 = vadd.f32 %v12249_v50, %v12049_v33  ;;  %v12360_v33 = vadd.f32 %v12249_v50, %v12090_v25  ;;  %v12374_v25 = vadd.f32 %v12249_v50, %v12107_v63  ;;  %16787 = vst [vmem:[#allocation44_spill] sm:$0xff] %v12382_v57 }
 0x595   :  { %v12311_v11 = vpop.f32.mrf.mxu1  ;;  %v12390_v63 = vadd.f32 %v12249_v50, %v12116_v8 }
 0x596   :  { %v12327_v40 = vpop.f32.mrf.mxu0  ;;  %v4183_v6 = vadd.f32 %v4182_v23, %v4181_v59  ;;  %v4190_v59 = vsel %vm4166_vm3, %v12339_v29, 0.0  ;;  %v4192_v19 = vsel %vm4166_vm3, %v12345_v28, 0.0  ;;  %16786 = vst [vmem:[#allocation43_spill] sm:$0xff] %v12374_v25 }
 0x597   :  { %v12319_v9 = vpop.f32.mrf.mxu3  ;;  %16788 = vst [vmem:[#allocation45_spill] sm:$0xff] %v12390_v63 }
 0x598   :  { %v4185_v35 = vadd.f32 %v4184_v2, %v4183_v6  ;;  %v16784_v2 = vld [vmem:[#allocation23_spill] sm:$0xff] }
 0x599   :  { %16785 = vst [vmem:[#allocation23_spill] sm:$0xff] %v12366_v24 }
 0x59a   :  { %v4187_v44 = vadd.f32 %v4186_v53, %v4185_v35 }
 0x59c   :  { %v4189_v7 = vadd.f32 %v4188_v38, %v4187_v44  ;;  %v4196_v38 = vsel %vm4166_vm3, %v12360_v33, 0.0  ;;  %v4198_v44 = vsel %vm4166_vm3, %v12366_v24, 0.0 }
 0x59d   :  { %v3994_v43 = vpop.f32.mrf.mxu1 }
 0x59e   :  { %v12347_v46 = vadd.f32 %v3994_v43, %v3652_v56  ;;  %v4191_v53 = vadd.f32 %v4190_v59, %v4189_v7  ;;  %v3574_v35 = vpop.f32.mrf.mxu0  ;;  %v4194_v43 = vsel %vm4166_vm3, %v12353_v26, 0.0 }
 0x59f   :  { %v3139_v23 = vpop.f32.mrf.mxu3 }
 0x5a0   :  { %v3224_v6 = vadd.f32 %v3139_v23, %v16784_v2  ;;  %v4193_v29 = vadd.f32 %v4192_v19, %v4191_v53  ;;  %v12384_v19 = vpop.f32.mrf.mxu2  ;;  %v4200_v2 = vsel %vm4166_vm3, %v12374_v25, 0.0  ;;  %v12396_v53 = vadd.f32 %v12249_v50, %v12120_v14 }
 0x5a1   :  { %v12412_v14 = vadd.f32 %v12249_v50, %v12132_v42  ;;  %v12427_v42 = vadd.f32 %v12249_v50, %v12141_v21  ;;  %v12445_v21 = vadd.f32 %v12249_v50, %v12150_v37 }
 0x5a2   :  { %v3654_v56 = vadd.f32 %v3569_v41, %v3224_v6  ;;  %v4195_v41 = vadd.f32 %v4194_v43, %v4193_v29  ;;  %v4202_v6 = vsel %vm4166_vm3, %v12382_v57, 0.0  ;;  %16789 = vst [vmem:[#allocation46_spill] sm:$0xff] %v12396_v53  ;;  %v4206_v57 = vsel %vm4166_vm3, %v12396_v53, 0.0 }
 0x5a3   :  { %16791 = vst [vmem:[#allocation48_spill] sm:$0xff] %v12412_v14 }
 0x5a4   :  { %v4197_v59 = vadd.f32 %v4196_v38, %v4195_v41  ;;  %v4204_v38 = vsel %vm4166_vm3, %v12390_v63, 0.0  ;;  %v12404_v41 = vadd.f32 %v12249_v50, %v12128_v45  ;;  %v12419_v45 = vadd.f32 %v12249_v50, %v12137_v32  ;;  %16793 = vst [vmem:[#allocation50_spill] sm:$0xff] %v12427_v42 }
 0x5a5   :  { %v12368_v23 = vpop.f32.mrf.mxu1  ;;  %v12435_v32 = vadd.f32 %v12249_v50, %v12146_v30  ;;  %16795 = vst [vmem:[#allocation52_spill] sm:$0xff] %v12445_v21  ;;  %v12451_v30 = vadd.f32 %v12249_v50, %v12155_v58 }
 0x5a6   :  { %v4199_v29 = vadd.f32 %v4198_v44, %v4197_v59  ;;  %v12398_v24 = vpop.f32.mrf.mxu0  ;;  %16790 = vst [vmem:[#allocation47_spill] sm:$0xff] %v12404_v41  ;;  %v4208_v63 = vsel %vm4166_vm3, %v12404_v41, 0.0 }
 0x5a7   :  { %v12376_v7 = vpop.f32.mrf.mxu3  ;;  %16792 = vst [vmem:[#allocation49_spill] sm:$0xff] %v12419_v45 }
 0x5a8   :  { %v4201_v62 = vadd.f32 %v4200_v2, %v4199_v29  ;;  %16794 = vst [vmem:[#allocation51_spill] sm:$0xff] %v12435_v32 }
 0x5a9   :  { %16796 = vst [vmem:[#allocation53_spill] sm:$0xff] %v12451_v30 }
 0x5aa   :  { %v4203_v44 = vadd.f32 %v4202_v6, %v4201_v62  ;;  %v12421_v6 = vpop.f32.mrf.mxu2 }
 0x5ac   :  { %v4205_v29 = vadd.f32 %v4204_v38, %v4203_v44  ;;  %v4212_v44 = vsel %vm4166_vm3, %v12419_v45, 0.0 }
 0x5ad   :  { %v3999_v43 = vpop.f32.mrf.mxu1 }
 0x5ae   :  { %v12406_v8 = vadd.f32 %v3999_v43, %v3654_v56  ;;  %v4207_v62 = vadd.f32 %v4206_v57, %v4205_v29  ;;  %v4210_v43 = vsel %vm4166_vm3, %v12412_v14, 0.0  ;;  %v12439_v57 = vpop.f32.mrf.mxu0  ;;  %v4216_v29 = vsel %vm4166_vm3, %v12435_v32, 0.0  ;;  %v16813_v14 = vld [vmem:[#allocation13_spill] sm:$0xff] }
 0x5af   :  { %v3144_v59 = vpop.f32.mrf.mxu3 }
 0x5b0   :  { %v3226_v2 = vadd.f32 %v3144_v59, %v11700_v49  ;;  %v4209_v49 = vadd.f32 %v4208_v63, %v4207_v62 }
 0x5b2   :  { %v3656_v56 = vadd.f32 %v3574_v35, %v3226_v2  ;;  %v4211_v35 = vadd.f32 %v4210_v43, %v4209_v49  ;;  %v4214_v2 = vsel %vm4166_vm3, %v12427_v42, 0.0  ;;  %v4218_v43 = vsel %vm4166_vm3, %v12445_v21, 0.0  ;;  %v12459_v42 = vpop.f32.mrf.mxu2 }
 0x5b3   :  { %v12457_v49 = vadd.f32 %v12249_v50, %v12159_v47  ;;  %v12475_v21 = vadd.f32 %v12249_v50, %v12168_v34 }
 0x5b4   :  { %v4213_v63 = vadd.f32 %v4212_v44, %v4211_v35  ;;  %v4220_v44 = vsel %vm4166_vm3, %v12451_v30, 0.0  ;;  %v12465_v35 = vadd.f32 %v12249_v50, %v12164_v16  ;;  %v12483_v16 = vadd.f32 %v12249_v50, %v12173_v0 }
 0x5b5   :  { %v12429_v38 = vpop.f32.mrf.mxu1  ;;  %16797 = vst [vmem:[#allocation54_spill] sm:$0xff] %v12457_v49  ;;  %v4222_v47 = vsel %vm4166_vm3, %v12457_v49, 0.0 }
 0x5b6   :  { %v4215_v62 = vadd.f32 %v4214_v2, %v4213_v63  ;;  %16798 = vst [vmem:[#allocation55_spill] sm:$0xff] %v12465_v35  ;;  %v4224_v30 = vsel %vm4166_vm3, %v12465_v35, 0.0 }
 0x5b7   :  { %v12437_v59 = vpop.f32.mrf.mxu3  ;;  %16799 = vst [vmem:[#allocation56_spill] sm:$0xff] %v12475_v21 }
 0x5b8   :  { %v4217_v37 = vadd.f32 %v4216_v29, %v4215_v62  ;;  %v12477_v62 = vpop.f32.mrf.mxu0  ;;  %16800 = vst [vmem:[#allocation57_spill] sm:$0xff] %v12483_v16 }
 0x5ba   :  { %v4219_v2 = vadd.f32 %v4218_v43, %v4217_v37  ;;  %v12489_v43 = vadd.f32 %v12249_v50, %v12177_v3  ;;  %v12499_v0 = vpop.f32.mrf.mxu2  ;;  %v12507_v3 = vadd.f32 %v12249_v50, %v12186_v52  ;;  %v12523_v52 = vadd.f32 %v12249_v50, %v12195_v13 }
 0x5bc   :  { %v4221_v29 = vadd.f32 %v4220_v44, %v4219_v2  ;;  %16801 = vst [vmem:[#allocation58_spill] sm:$0xff] %v12489_v43  ;;  %v4228_v44 = vsel %vm4166_vm3, %v12483_v16, 0.0  ;;  %v12497_v2 = vadd.f32 %v12249_v50, %v12182_v17  ;;  %v12513_v17 = vadd.f32 %v12249_v50, %v12191_v1 }
 0x5bd   :  { %v4004_v45 = vpop.f32.mrf.mxu1  ;;  %16803 = vst [vmem:[#allocation60_spill] sm:$0xff] %v12507_v3  ;;  %v4238_v13 = vsel %vm4166_vm3, %v12523_v52, 0.0 }
 0x5be   :  { %v12467_v58 = vadd.f32 %v4004_v45, %v3656_v56  ;;  %v4223_v45 = vadd.f32 %v4222_v47, %v4221_v29  ;;  %v4226_v56 = vsel %vm4166_vm3, %v12475_v21, 0.0  ;;  %16802 = vst [vmem:[#allocation59_spill] sm:$0xff] %v12497_v2  ;;  %v4230_v21 = vsel %vm4166_vm3, %v12489_v43, 0.0 }
 0x5bf   :  { %v12469_v63 = vpop.f32.mrf.mxu3  ;;  %16804 = vst [vmem:[#allocation61_spill] sm:$0xff] %v12513_v17  ;;  %v4234_v43 = vsel %vm4166_vm3, %v12507_v3, 0.0  ;;  %v4236_v1 = vsel %vm4166_vm3, %v12513_v17, 0.0  ;;  %v16809_v3 = vld [vmem:[#allocation10_spill] sm:$0xff] }
 0x5c0   :  { %v4225_v34 = vadd.f32 %v4224_v30, %v4223_v45  ;;  %v4232_v45 = vsel %vm4166_vm3, %v12497_v2, 0.0  ;;  %v12515_v35 = vpop.f32.mrf.mxu0  ;;  %v16810_v2 = vld [vmem:[#allocation14_spill] sm:$0xff] }
 0x5c1   :  { %v2786_v32 = vadd.f32 %v16810_v2, %v16809_v3  ;;  %v16812_v3 = vld [vmem:[#allocation6_spill] sm:$0xff] }
 0x5c2   :  { %v4227_v47 = vadd.f32 %v4226_v56, %v4225_v34  ;;  %v16805_v56 = vld [vmem:[#allocation8_spill] sm:$0xff]  ;;  %v16806_v34 = vld [vmem:[#allocation11_spill] sm:$0xff]  ;;  %v12545_v17 = vpop.f32.mrf.mxu2 }
 0x5c3   :  { %v2784_v49 = vadd.f32 %v16806_v34, %v16805_v56  ;;  %16807 = vst [vmem:[#allocation8_spill] sm:$0xff] %v12523_v52 }
 0x5c4   :  { %v4229_v30 = vadd.f32 %v4228_v44, %v4227_v47 }
 0x5c5   :  { %v12491_v37 = vpop.f32.mrf.mxu1 }
 0x5c6   :  { %v4231_v16 = vadd.f32 %v4230_v21, %v4229_v30  ;;  %v12531_v21 = vadd.f32 %v12249_v50, %v12202_v4  ;;  %v3215_v30 = vadd.f32 %v12215_v12, %v2784_v49  ;;  %v12551_v49 = vadd.f32 %v12249_v50, %v12213_v20 }
 0x5c7   :  { %v12501_v29 = vpop.f32.mrf.mxu3 }
 0x5c8   :  { %v4233_v44 = vadd.f32 %v4232_v45, %v4231_v16  ;;  %16808 = vst [vmem:[#allocation11_spill] sm:$0xff] %v12531_v21  ;;  %v12542_v16 = vadd.f32 %v12249_v50, %v12206_v27  ;;  %v3645_v45 = vadd.f32 %v12200_v60, %v3215_v30  ;;  %v4240_v12 = vsel %vm4166_vm3, %v12531_v21, 0.0  ;;  %v16814_v27 = vld [vmem:[#allocation17_spill] sm:$0xff]  ;;  %v16815_v30 = vld [vmem:[#allocation34_spill] sm:$0xff]  ;;  %v12564_v20 = vpop.f32.mrf.mxu0 }
 0x5c9   :  { %v2788_v41 = vadd.f32 %v16814_v27, %v16813_v14  ;;  %v12583_v27 = vadd.f32 %v12249_v50, %v12230_v18 }
 0x5ca   :  { %v4235_v56 = vadd.f32 %v4234_v43, %v4233_v44  ;;  %v16811_v43 = vld [vmem:[#allocation7_spill] sm:$0xff]  ;;  %v4075_v44 = vadd.f32 %v16812_v3, %v3645_v45  ;;  %v4242_v60 = vsel %vm4166_vm3, %v12542_v16, 0.0  ;;  %v16819_v3 = vld [vmem:[#allocation16_spill] sm:$0xff] }
 0x5cb   :  { %v3217_v2 = vadd.f32 %v16811_v43, %v2786_v32  ;;  %v4244_v32 = vsel %vm4166_vm3, %v12551_v49, 0.0  ;;  %v3219_v14 = vadd.f32 %v12239_v54, %v2788_v41  ;;  %v4250_v18 = vsel %vm4166_vm3, %v12583_v27, 0.0 }
 0x5cc   :  { %v4237_v4 = vadd.f32 %v4236_v1, %v4235_v56  ;;  %v12561_v1 = vadd.f32 %v12249_v50, %v16815_v30  ;;  %v16817_v56 = vld [vmem:[#allocation5_spill] sm:$0xff]  ;;  %v16821_v30 = vld [vmem:[#allocation36_spill] sm:$0xff] }
 0x5cd   :  { %v12525_v47 = vpop.f32.mrf.mxu1  ;;  %v3647_v21 = vadd.f32 %v16817_v56, %v3217_v2  ;;  %v16820_v2 = vld [vmem:[#allocation19_spill] sm:$0xff] }
 0x5ce   :  { %v4239_v52 = vadd.f32 %v4238_v13, %v4237_v4  ;;  %16816 = vst [vmem:[#allocation10_spill] sm:$0xff] %v12561_v1  ;;  %v12571_v13 = vadd.f32 %v12249_v50, %v4075_v44  ;;  %v3649_v44 = vadd.f32 %v16821_v30, %v3219_v14  ;;  %v16825_v14 = vld [vmem:[#allocation12_spill] sm:$0xff] }
 0x5cf   :  { %v12534_v34 = vpop.f32.mrf.mxu3  ;;  %v4077_v45 = vadd.f32 %v12235_v36, %v3647_v21  ;;  %v2728_v21 = vpop.f32.mrf.mxu2 }
 0x5d0   :  { %v4241_v53 = vadd.f32 %v4240_v12, %v4239_v52  ;;  %16818 = vst [vmem:[#allocation14_spill] sm:$0xff] %v12571_v13  ;;  %v2790_v52 = vadd.f32 %v16820_v2, %v16819_v3  ;;  %v4246_v12 = vsel %vm4166_vm3, %v12561_v1, 0.0  ;;  %v4248_v54 = vsel %vm4166_vm3, %v12571_v13, 0.0  ;;  %v16823_v3 = vld [vmem:[#allocation18_spill] sm:$0xff] }
 0x5d1   :  { %v12589_v36 = vadd.f32 %v12249_v50, %v4077_v45  ;;  %v4079_v41 = vadd.f32 %v12251_v22, %v3649_v44  ;;  %v16824_v2 = vld [vmem:[#allocation22_spill] sm:$0xff] }
 0x5d2   :  { %v4243_v4 = vadd.f32 %v4242_v60, %v4241_v53  ;;  %v3221_v53 = vadd.f32 %v12259_v5, %v2790_v52  ;;  %v2792_v1 = vadd.f32 %v16824_v2, %v16823_v3  ;;  %v12611_v3 = vpop.f32.mrf.mxu0  ;;  %v16827_v2 = vld [vmem:[#allocation21_spill] sm:$0xff] }
 0x5d3   :  { %16822 = vst [vmem:[#allocation7_spill] sm:$0xff] %v12589_v36  ;;  %v4252_v22 = vsel %vm4166_vm3, %v12589_v36, 0.0  ;;  %v12607_v5 = vadd.f32 %v12249_v50, %v4079_v41  ;;  %v16829_v41 = vld [vmem:[#allocation15_spill] sm:$0xff] }
 0x5d4   :  { %v4245_v56 = vadd.f32 %v4244_v32, %v4243_v4  ;;  %v12599_v32 = vadd.f32 %v12249_v50, %v16825_v14  ;;  %v16826_v4 = vld [vmem:[#allocation9_spill] sm:$0xff]  ;;  %v3223_v52 = vadd.f32 %v12319_v9, %v2792_v1 }
 0x5d5   :  { %v12566_v25 = vpop.f32.mrf.mxu1  ;;  %v3651_v30 = vadd.f32 %v16826_v4, %v3221_v53  ;;  %v16828_v14 = vld [vmem:[#allocation25_spill] sm:$0xff] }
 0x5d6   :  { %v4247_v60 = vadd.f32 %v4246_v12, %v4245_v56  ;;  %v2794_v53 = vadd.f32 %v16828_v14, %v16827_v2  ;;  %v3653_v4 = vadd.f32 %v16829_v41, %v3223_v52 }
 0x5d7   :  { %v12575_v43 = vpop.f32.mrf.mxu3  ;;  %v4081_v12 = vadd.f32 %v12311_v11, %v3651_v30  ;;  %v4256_v11 = vsel %vm4166_vm3, %v12607_v5, 0.0  ;;  %v16830_v30 = vld [vmem:[#allocation24_spill] sm:$0xff] }
 0x5d8   :  { %v4249_v45 = vadd.f32 %v4248_v54, %v4247_v60  ;;  %v4254_v54 = vsel %vm4166_vm3, %v12599_v32, 0.0  ;;  %v12619_v60 = vadd.f32 %v12249_v50, %v12289_v39  ;;  %v3225_v1 = vadd.f32 %v12376_v7, %v2794_v53  ;;  %v16831_v53 = vld [vmem:[#allocation26_spill] sm:$0xff] }
 0x5d9   :  { %v12625_v9 = vadd.f32 %v12249_v50, %v4081_v12 }
 0x5da   :  { %v4251_v44 = vadd.f32 %v4250_v18, %v4249_v45  ;;  %v4083_v18 = vadd.f32 %v12368_v23, %v3653_v4  ;;  %v2796_v45 = vadd.f32 %v12384_v19, %v16830_v30  ;;  %v4258_v39 = vsel %vm4166_vm3, %v12619_v60, 0.0  ;;  %v16832_v4 = vld [vmem:[#allocation27_spill] sm:$0xff] }
 0x5db   :  { %v3655_v52 = vadd.f32 %v12327_v40, %v3225_v1  ;;  %v2797_v23 = vadd.f32 %v12421_v6, %v16831_v53  ;;  %v4260_v19 = vsel %vm4166_vm3, %v12625_v9, 0.0  ;;  %v12654_v6 = vadd.f32 %v12249_v50, %v12406_v8 }
 0x5dc   :  { %v4253_v36 = vadd.f32 %v4252_v22, %v4251_v44  ;;  %v12635_v22 = vadd.f32 %v12249_v50, %v12347_v46  ;;  %v2730_v44 = vpop.f32.mrf.mxu2  ;;  %v3227_v14 = vadd.f32 %v12437_v59, %v2796_v45 }
 0x5dd   :  { %v12602_v13 = vpop.f32.mrf.mxu1  ;;  %v3228_v1 = vadd.f32 %v12469_v63, %v2797_v23 }
 0x5de   :  { %v4255_v2 = vadd.f32 %v4254_v54, %v4253_v36  ;;  %v12644_v36 = vadd.f32 %v12249_v50, %v4083_v18  ;;  %v4085_v54 = vadd.f32 %v12429_v38, %v3655_v52  ;;  %v3657_v41 = vadd.f32 %v12398_v24, %v3227_v14  ;;  %v16833_v18 = vld [vmem:[#allocation28_spill] sm:$0xff]  ;;  %v3591_v24 = vpop.f32.mrf.mxu0  ;;  %v16834_v52 = vld [vmem:[#allocation29_spill] sm:$0xff] }
 0x5df   :  { %v3159_v56 = vpop.f32.mrf.mxu3  ;;  %v4262_v59 = vsel %vm4166_vm3, %v12635_v22, 0.0  ;;  %v2799_v30 = vadd.f32 %v12499_v0, %v16833_v18  ;;  %v3658_v8 = vadd.f32 %v12439_v57, %v3228_v1  ;;  %v2800_v63 = vadd.f32 %v12545_v17, %v16834_v52 }
 0x5e0   :  { %v4257_v12 = vadd.f32 %v4256_v11, %v4255_v2  ;;  %v2798_v11 = vadd.f32 %v12459_v42, %v16832_v4  ;;  %v4087_v45 = vadd.f32 %v12491_v37, %v3657_v41  ;;  %v4264_v2 = vsel %vm4166_vm3, %v12644_v36, 0.0  ;;  %v16836_v4 = vld [vmem:[#allocation31_spill] sm:$0xff] }
 0x5e1   :  { %v12663_v42 = vadd.f32 %v12249_v50, %v4085_v54  ;;  %v12671_v0 = vadd.f32 %v12249_v50, %v12467_v58  ;;  %v4266_v37 = vsel %vm4166_vm3, %v12654_v6, 0.0  ;;  %v3230_v14 = vadd.f32 %v12534_v34, %v2799_v30 }
 0x5e2   :  { %v4259_v46 = vadd.f32 %v4258_v39, %v4257_v12  ;;  %v3229_v39 = vadd.f32 %v12501_v29, %v2798_v11  ;;  %v4088_v23 = vadd.f32 %v12525_v47, %v3658_v8  ;;  %v16835_v29 = vld [vmem:[#allocation30_spill] sm:$0xff]  ;;  %v12680_v54 = vadd.f32 %v12249_v50, %v4087_v45 }
 0x5e3   :  { %v4268_v58 = vsel %vm4166_vm3, %v12663_v42, 0.0  ;;  %v3660_v41 = vadd.f32 %v12515_v35, %v3230_v14  ;;  %v16837_v14 = vld [vmem:[#allocation32_spill] sm:$0xff] }
 0x5e4   :  { %v4261_v38 = vadd.f32 %v4260_v19, %v4259_v46  ;;  %v3659_v53 = vadd.f32 %v12477_v62, %v3229_v39  ;;  %v2801_v19 = vadd.f32 %v2728_v21, %v16835_v29  ;;  %v3231_v46 = vadd.f32 %v12575_v43, %v2800_v63  ;;  %v2733_v11 = vpop.f32.mrf.mxu2 }
 0x5e5   :  { %v4016_v7 = vpop.f32.mrf.mxu1  ;;  %v2802_v62 = vadd.f32 %v2730_v44, %v16836_v4  ;;  %v4270_v21 = vsel %vm4166_vm3, %v12671_v0, 0.0  ;;  %v4090_v30 = vadd.f32 %v12602_v13, %v3660_v41  ;;  %v4272_v35 = vsel %vm4166_vm3, %v12680_v54, 0.0 }
 0x5e6   :  { %v4263_v12 = vadd.f32 %v4262_v59, %v4261_v38  ;;  %v4089_v34 = vadd.f32 %v12566_v25, %v3659_v53  ;;  %v12691_v59 = vadd.f32 %v12249_v50, %v4088_v23  ;;  %v3232_v1 = vadd.f32 %v3159_v56, %v2801_v19  ;;  %v3594_v8 = vpop.f32.mrf.mxu0 }
 0x5e7   :  { %v3161_v40 = vpop.f32.mrf.mxu3  ;;  %v3661_v18 = vadd.f32 %v12564_v20, %v3231_v46  ;;  %v12704_v20 = vadd.f32 %v12249_v50, %v4090_v30  ;;  %v2803_v53 = vadd.f32 %v2733_v11, %v16837_v14  ;;  %v16838_v30 = vld [vmem:[#allocation33_spill] sm:$0xff] }
 0x5e8   :  { %v4265_v57 = vadd.f32 %v4264_v2, %v4263_v12  ;;  %v12698_v44 = vadd.f32 %v12249_v50, %v4089_v34  ;;  %v3233_v38 = vadd.f32 %v3161_v40, %v2802_v62  ;;  %v3662_v45 = vadd.f32 %v12611_v3, %v3232_v1 }
 0x5e9   :  { %v4091_v2 = vadd.f32 %v4016_v7, %v3661_v18  ;;  %v4274_v56 = vsel %vm4166_vm3, %v12691_v59, 0.0  ;;  %v4278_v23 = vsel %vm4166_vm3, %v12704_v20, 0.0 }
 0x5ea   :  { %v4267_v47 = vadd.f32 %v4266_v37, %v4265_v57  ;;  %v3663_v13 = vadd.f32 %v3591_v24, %v3233_v38  ;;  %v4276_v37 = vsel %vm4166_vm3, %v12698_v44, 0.0 }
 0x5eb   :  { %v12709_v40 = vadd.f32 %v12249_v50, %v4091_v2 }
 0x5ec   :  { %v4269_v43 = vadd.f32 %v4268_v58, %v4267_v47  ;;  %v2735_v24 = vpop.f32.mrf.mxu2 }
 0x5ed   :  { %v4019_v17 = vpop.f32.mrf.mxu1 }
 0x5ee   :  { %v4271_v39 = vadd.f32 %v4270_v21, %v4269_v43  ;;  %v4092_v52 = vadd.f32 %v4019_v17, %v3662_v45  ;;  %v4280_v17 = vsel %vm4166_vm3, %v12709_v40, 0.0  ;;  %v3596_v11 = vpop.f32.mrf.mxu0  ;;  %v2804_v43 = vadd.f32 %v2735_v24, %v16838_v30 }
 0x5ef   :  { %v3164_v25 = vpop.f32.mrf.mxu3 }
 0x5f0   :  { %v4273_v63 = vadd.f32 %v4272_v35, %v4271_v39  ;;  %v12715_v29 = vadd.f32 %v12249_v50, %v4092_v52  ;;  %v3234_v57 = vadd.f32 %v3164_v25, %v2803_v53 }
 0x5f2   :  { %v4275_v7 = vadd.f32 %v4274_v56, %v4273_v63  ;;  %v3664_v34 = vadd.f32 %v3594_v8, %v3234_v57  ;;  %v4282_v4 = vsel %vm4166_vm3, %v12715_v29, 0.0 }
 0x5f4   :  { %v4277_v19 = vadd.f32 %v4276_v37, %v4275_v7  ;;  %v2738_v2 = vpop.f32.mrf.mxu2 }
 0x5f5   :  { %v4021_v12 = vpop.f32.mrf.mxu1 }
 0x5f6   :  { %v4093_v3 = vadd.f32 %v4021_v12, %v3663_v13  ;;  %v4279_v46 = vadd.f32 %v4278_v23, %v4277_v19  ;;  %v3599_v63 = vpop.f32.mrf.mxu0  ;;  %v16839_v12 = vld [vmem:[#allocation35_spill] sm:$0xff] }
 0x5f7   :  { %v3166_v41 = vpop.f32.mrf.mxu3  ;;  %v2805_v37 = vadd.f32 %v2738_v2, %v16839_v12 }
 0x5f8   :  { %v4161_v58 = vadd.f32 %v12249_v50, %v4093_v3  ;;  %v4281_v62 = vadd.f32 %v4280_v17, %v4279_v46  ;;  %v3235_v38 = vadd.f32 %v3166_v41, %v2804_v43  ;;  %v16840_v46 = vld [vmem:[#allocation37_spill] sm:$0xff]  ;;  %v10383_v43 = vmov 512.0  }
 0x5f9   :  { %10376 = vrcp.f32 %v10383_v43 }
 0x5fa   :  { %v4284_v21 = vsel %vm4166_vm3, %v4161_v58, 0.0  ;;  %v4283_v18 = vadd.f32 %v4282_v4, %v4281_v62  ;;  %v3665_v8 = vadd.f32 %v3596_v11, %v3235_v38 }
 0x5fc   :  { %v4285_v25 = vadd.f32 %v4284_v21, %v4283_v18  ;;  %v2740_v24 = vpop.f32.mrf.mxu2 }
 0x5fd   :  { %v4024_v47 = vpop.f32.mrf.mxu1  ;;  %v2806_v41 = vadd.f32 %v2740_v24, %v16840_v46 }
 0x5fe   :  { %v4094_v1 = vadd.f32 %v4024_v47, %v3664_v34  ;;  %v3601_v4 = vpop.f32.mrf.mxu0 }
 0x5ff   :  { %v3169_v56 = vpop.f32.mrf.mxu3  ;;  %v10377_v2 = vpop.eup %10376 }
 0x600   :  { %v4162_v35 = vadd.f32 %v12249_v50, %v4094_v1  ;;  %v3236_v7 = vadd.f32 %v3169_v56, %v2805_v37  ;;  %vm4305_vm4 = vweird.f32 %v10377_v2 }
 0x602   :  { %v4286_v45 = vsel %vm4166_vm3, %v4162_v35, 0.0  ;;  %v3666_v23 = vadd.f32 %v3599_v63, %v3236_v7 }
 0x603   :  { %v4287_v39 = vadd.f32 %v4286_v45, %v4285_v25 }
 0x605   :  { %v4026_v13 = vpop.f32.mrf.mxu1 }
 0x606   :  { %v4095_v52 = vadd.f32 %v4026_v13, %v3665_v8  ;;  %v4301_v8 = vmul.f32 512.0, %v10377_v2 }
 0x607   :  { %v3171_v17 = vpop.f32.mrf.mxu3 }
 0x608   :  { %v4163_v3 = vadd.f32 %v12249_v50, %v4095_v52  ;;  %v3237_v62 = vadd.f32 %v3171_v17, %v2806_v41  ;;  %v4302_v13 = vsub.f32 1.0, %v4301_v8  ;;  %v16846_v17 = vld [vmem:[#allocation39_spill] sm:$0xff]  ;;  %v16847_v41 = vld [vmem:[#allocation38_spill] sm:$0xff] }
 0x60a   :  { %v4288_v14 = vsel %vm4166_vm3, %v4163_v3, 0.0  ;;  %v3667_v21 = vadd.f32 %v3601_v4, %v3237_v62  ;;  %v4303_v63 = vmul.f32 %v10377_v2, %v4302_v13 }
 0x60b   :  { %v4289_v53 = vadd.f32 %v4288_v14, %v4287_v39 }
 0x60c   :  { %v4304_v37 = vadd.f32 %v10377_v2, %v4303_v63 }
 0x60d   :  { %v4029_v19 = vpop.f32.mrf.mxu1 }
 0x60e   :  { %v4096_v57 = vadd.f32 %v4029_v19, %v3666_v23  ;;  %v12734_v14 = vsel %vm4305_vm4, %v10377_v2, %v4304_v37  ;;  %v16849_v37 = vld [vmem:[#allocation20_spill] sm:$0xff] }
 0x60f   :  { %16841 = vst [vmem:[#allocation6_spill] sm:$0xff] %v12734_v14 }
 0x610   :  { %v4164_v34 = vadd.f32 %v12249_v50, %v4096_v57 }
 0x612   :  { %v4290_v11 = vsel %vm4166_vm3, %v4164_v34, 0.0 }
 0x613   :  { %v4291_v47 = vadd.f32 %v4290_v11, %v4289_v53 }
 0x615   :  { %v4031_v1 = vpop.f32.mrf.mxu1 }
 0x616   :  { %v4097_v18 = vadd.f32 %v4031_v1, %v3667_v21 }
 0x618   :  { %v4165_v30 = vadd.f32 %v12249_v50, %v4097_v18 }
 0x61a   :  { %v4292_v25 = vsel %vm4166_vm3, %v4165_v30, 0.0 }
 0x61b   :  { %v4293_v38 = vadd.f32 %v4292_v25, %v4291_v47 }
 0x61d   :  { %v4294_v45 = vrot.slane %v4293_v38, 4 }
 0x61f   :  { %v4295_v39 = vadd.f32 %v4294_v45, %v4293_v38 }
 0x621   :  { %v4296_v56 = vrot.slane %v4295_v39, 2 }
 0x623   :  { %v4297_v52 = vadd.f32 %v4296_v56, %v4295_v39 }
 0x625   :  { %v4298_v12 = vrot.slane %v4297_v52, 1 }
 0x627   :  { %v4299_v7 = vadd.f32 %v4298_v12, %v4297_v52 }
 0x629   :  { %v12737_v50 = vmul.f32 %v12734_v14, %v4299_v7 }
 0x62b   :  { %v12740_v53 = vsub.f32 %v4161_v58, %v12737_v50  ;;  %v12743_v23 = vsub.f32 %v4162_v35, %v12737_v50  ;;  %v12746_v24 = vsub.f32 %v4163_v3, %v12737_v50  ;;  %v12749_v19 = vsub.f32 %v4164_v34, %v12737_v50  ;;  %v16848_v35 = vld [vmem:[#allocation40_spill] sm:$0xff] }
 0x62c   :  { %v12752_v57 = vsub.f32 %v4165_v30, %v12737_v50  ;;  %v12756_v46 = vsub.f32 %v16846_v17, %v12737_v50  ;;  %v12760_v58 = vsub.f32 %v16847_v41, %v12737_v50  ;;  %v12764_v4 = vsub.f32 %v16848_v35, %v12737_v50  ;;  %v16850_v35 = vld [vmem:[#allocation41_spill] sm:$0xff] }
 0x62d   :  { %16842 = vst [vmem:[#allocation13_spill] sm:$0xff] %v12740_v53  ;;  %v12768_v3 = vsub.f32 %v12273_v61, %v12737_v50  ;;  %v12776_v11 = vsub.f32 %v12281_v10, %v12737_v50  ;;  %v12782_v21 = vsub.f32 %v12287_v31, %v12737_v50  ;;  %v12790_v43 = vsub.f32 %v12295_v48, %v12737_v50 }
 0x62e   :  { %16843 = vst [vmem:[#allocation17_spill] sm:$0xff] %v12743_v23  ;;  %v4372_v34 = vmul.f32 %v12756_v46, %v12756_v46  ;;  %v4373_v62 = vmul.f32 %v12760_v58, %v12760_v58  ;;  %v4374_v47 = vmul.f32 %v12764_v4, %v12764_v4  ;;  %v12797_v31 = vsub.f32 %v12303_v15, %v12737_v50 }
 0x62f   :  { %16844 = vst [vmem:[#allocation34_spill] sm:$0xff] %v12746_v24  ;;  %v4375_v61 = vmul.f32 %v12768_v3, %v12768_v3  ;;  %v4376_v10 = vmul.f32 %v12776_v11, %v12776_v11  ;;  %v4377_v45 = vmul.f32 %v12782_v21, %v12782_v21  ;;  %v12804_v48 = vsub.f32 %v12309_v55, %v12737_v50 }
 0x630   :  { %16845 = vst [vmem:[#allocation5_spill] sm:$0xff] %v12749_v19  ;;  %v4436_v1 = vsel %vm4166_vm3, %v4372_v34, 0.0  ;;  %v4437_v18 = vsel %vm4166_vm3, %v4373_v62, 0.0  ;;  %v4439_v25 = vsel %vm4166_vm3, %v4374_v47, 0.0  ;;  %v4378_v8 = vmul.f32 %v12790_v43, %v12790_v43 }
 0x631   :  { %v4438_v30 = vadd.f32 %v4437_v18, %v4436_v1  ;;  %v4441_v2 = vsel %vm4166_vm3, %v4375_v61, 0.0  ;;  %v4443_v56 = vsel %vm4166_vm3, %v4376_v10, 0.0  ;;  %v12811_v15 = vsub.f32 %v12317_v51, %v12737_v50  ;;  %v16851_v61 = vld [vmem:[#allocation42_spill] sm:$0xff] }
 0x632   :  { %v4379_v52 = vmul.f32 %v12797_v31, %v12797_v31  ;;  %v4445_v63 = vsel %vm4166_vm3, %v4377_v45, 0.0  ;;  %v12818_v55 = vsub.f32 %v16849_v37, %v12737_v50  ;;  %v4380_v7 = vmul.f32 %v12804_v48, %v12804_v48  ;;  %v16852_v37 = vld [vmem:[#allocation23_spill] sm:$0xff] }
 0x633   :  { %v4440_v38 = vadd.f32 %v4439_v25, %v4438_v30  ;;  %v4447_v17 = vsel %vm4166_vm3, %v4378_v8, 0.0  ;;  %v12825_v51 = vsub.f32 %v16850_v35, %v12737_v50  ;;  %v4381_v34 = vmul.f32 %v12811_v15, %v12811_v15  ;;  %v16853_v35 = vld [vmem:[#allocation43_spill] sm:$0xff] }
 0x634   :  { %v4449_v62 = vsel %vm4166_vm3, %v4379_v52, 0.0  ;;  %v12832_v1 = vsub.f32 %v16851_v61, %v12737_v50  ;;  %v4382_v18 = vmul.f32 %v12818_v55, %v12818_v55  ;;  %v4451_v30 = vsel %vm4166_vm3, %v4380_v7, 0.0  ;;  %v16854_v61 = vld [vmem:[#allocation44_spill] sm:$0xff] }
 0x635   :  { %v4442_v39 = vadd.f32 %v4441_v2, %v4440_v38  ;;  %v12839_v25 = vsub.f32 %v12345_v28, %v12737_v50  ;;  %v4383_v38 = vmul.f32 %v12825_v51, %v12825_v51  ;;  %v4453_v45 = vsel %vm4166_vm3, %v4381_v34, 0.0 }
 0x636   :  { %v4384_v8 = vmul.f32 %v12832_v1, %v12832_v1  ;;  %v12853_v28 = vsub.f32 %v12360_v33, %v12737_v50  ;;  %v12867_v33 = vsub.f32 %v16853_v35, %v12737_v50 }
 0x637   :  { %v4444_v13 = vadd.f32 %v4443_v56, %v4442_v39  ;;  %v12846_v39 = vsub.f32 %v12353_v26, %v12737_v50  ;;  %v4455_v56 = vsel %vm4166_vm3, %v4382_v18, 0.0  ;;  %v4385_v52 = vmul.f32 %v12839_v25, %v12839_v25 }
 0x638   :  { %v12860_v26 = vsub.f32 %v16852_v37, %v12737_v50  ;;  %v4387_v34 = vmul.f32 %v12853_v28, %v12853_v28  ;;  %v12874_v18 = vsub.f32 %v16854_v61, %v12737_v50 }
 0x639   :  { %v4446_v12 = vadd.f32 %v4445_v63, %v4444_v13  ;;  %v4457_v63 = vsel %vm4166_vm3, %v4383_v38, 0.0  ;;  %v4386_v7 = vmul.f32 %v12846_v39, %v12846_v39 }
 0x63b   :  { %v4448_v41 = vadd.f32 %v4447_v17, %v4446_v12  ;;  %v4459_v17 = vsel %vm4166_vm3, %v4384_v8, 0.0  ;;  %v4389_v8 = vmul.f32 %v12867_v33, %v12867_v33 }
 0x63d   :  { %v4450_v47 = vadd.f32 %v4449_v62, %v4448_v41  ;;  %v4461_v62 = vsel %vm4166_vm3, %v4385_v52, 0.0  ;;  %v16856_v52 = vld [vmem:[#allocation46_spill] sm:$0xff] }
 0x63f   :  { %v4452_v10 = vadd.f32 %v4451_v30, %v4450_v47  ;;  %v4388_v30 = vmul.f32 %v12860_v26, %v12860_v26 }
 0x641   :  { %v4454_v2 = vadd.f32 %v4453_v45, %v4452_v10  ;;  %v4463_v10 = vsel %vm4166_vm3, %v4386_v7, 0.0  ;;  %v16855_v45 = vld [vmem:[#allocation45_spill] sm:$0xff]  ;;  %v4467_v37 = vsel %vm4166_vm3, %v4388_v30, 0.0 }
 0x643   :  { %v4456_v13 = vadd.f32 %v4455_v56, %v4454_v2  ;;  %v12881_v2 = vsub.f32 %v16855_v45, %v12737_v50  ;;  %v4465_v56 = vsel %vm4166_vm3, %v4387_v34, 0.0  ;;  %v4469_v34 = vsel %vm4166_vm3, %v4389_v8, 0.0  ;;  %v16859_v45 = vld [vmem:[#allocation49_spill] sm:$0xff] }
 0x645   :  { %v4458_v12 = vadd.f32 %v4457_v63, %v4456_v13  ;;  %v12888_v63 = vsub.f32 %v16856_v52, %v12737_v50  ;;  %v4391_v35 = vmul.f32 %v12881_v2, %v12881_v2 }
 0x647   :  { %v4460_v41 = vadd.f32 %v4459_v17, %v4458_v12  ;;  %v4390_v12 = vmul.f32 %v12874_v18, %v12874_v18  ;;  %v16857_v17 = vld [vmem:[#allocation47_spill] sm:$0xff]  ;;  %v4473_v8 = vsel %vm4166_vm3, %v4391_v35, 0.0 }
 0x649   :  { %v4462_v47 = vadd.f32 %v4461_v62, %v4460_v41  ;;  %v12895_v41 = vsub.f32 %v16857_v17, %v12737_v50  ;;  %v4471_v30 = vsel %vm4166_vm3, %v4390_v12, 0.0 }
 0x64b   :  { %v4464_v38 = vadd.f32 %v4463_v10, %v4462_v47  ;;  %v16858_v47 = vld [vmem:[#allocation48_spill] sm:$0xff]  ;;  %v4392_v10 = vmul.f32 %v12888_v63, %v12888_v63 }
 0x64c   :  { %v12902_v61 = vsub.f32 %v16858_v47, %v12737_v50 }
 0x64d   :  { %v4466_v13 = vadd.f32 %v4465_v56, %v4464_v38  ;;  %v12909_v56 = vsub.f32 %v16859_v45, %v12737_v50  ;;  %v4475_v12 = vsel %vm4166_vm3, %v4392_v10, 0.0  ;;  %v16865_v45 = vld [vmem:[#allocation52_spill] sm:$0xff] }
 0x64e   :  { %v4394_v17 = vmul.f32 %v12902_v61, %v12902_v61 }
 0x64f   :  { %v4468_v7 = vadd.f32 %v4467_v37, %v4466_v13  ;;  %16860 = vst [vmem:[#allocation16_spill] sm:$0xff] %v12909_v56  ;;  %v4393_v13 = vmul.f32 %v12895_v41, %v12895_v41  ;;  %v16861_v37 = vld [vmem:[#allocation50_spill] sm:$0xff] }
 0x650   :  { %v4479_v10 = vsel %vm4166_vm3, %v4394_v17, 0.0 }
 0x651   :  { %v4470_v62 = vadd.f32 %v4469_v34, %v4468_v7  ;;  %v12916_v7 = vsub.f32 %v16861_v37, %v12737_v50  ;;  %v4477_v35 = vsel %vm4166_vm3, %v4393_v13, 0.0 }
 0x653   :  { %v4472_v38 = vadd.f32 %v4471_v30, %v4470_v62  ;;  %16862 = vst [vmem:[#allocation19_spill] sm:$0xff] %v12916_v7  ;;  %v16863_v62 = vld [vmem:[#allocation51_spill] sm:$0xff]  ;;  %v4395_v30 = vmul.f32 %v12909_v56, %v12909_v56  ;;  %v4396_v37 = vmul.f32 %v12916_v7, %v12916_v7 }
 0x654   :  { %v12923_v47 = vsub.f32 %v16863_v62, %v12737_v50 }
 0x655   :  { %v4474_v52 = vadd.f32 %v4473_v8, %v4472_v38  ;;  %v12930_v8 = vsub.f32 %v16865_v45, %v12737_v50  ;;  %v4481_v13 = vsel %vm4166_vm3, %v4395_v30, 0.0  ;;  %v4483_v17 = vsel %vm4166_vm3, %v4396_v37, 0.0 }
 0x656   :  { %16864 = vst [vmem:[#allocation36_spill] sm:$0xff] %v12923_v47  ;;  %v4397_v56 = vmul.f32 %v12923_v47, %v12923_v47 }
 0x657   :  { %v4476_v34 = vadd.f32 %v4475_v12, %v4474_v52  ;;  %16866 = vst [vmem:[#allocation18_spill] sm:$0xff] %v12930_v8  ;;  %v16867_v12 = vld [vmem:[#allocation53_spill] sm:$0xff]  ;;  %v4398_v7 = vmul.f32 %v12930_v8, %v12930_v8 }
 0x658   :  { %v12937_v62 = vsub.f32 %v16867_v12, %v12737_v50  ;;  %v4485_v30 = vsel %vm4166_vm3, %v4397_v56, 0.0 }
 0x659   :  { %v4478_v38 = vadd.f32 %v4477_v35, %v4476_v34  ;;  %v16869_v35 = vld [vmem:[#allocation54_spill] sm:$0xff]  ;;  %v4487_v37 = vsel %vm4166_vm3, %v4398_v7, 0.0 }
 0x65a   :  { %16868 = vst [vmem:[#allocation22_spill] sm:$0xff] %v12937_v62  ;;  %v12944_v45 = vsub.f32 %v16869_v35, %v12737_v50  ;;  %v4399_v47 = vmul.f32 %v12937_v62, %v12937_v62 }
 0x65b   :  { %v4480_v52 = vadd.f32 %v4479_v10, %v4478_v38  ;;  %v16871_v10 = vld [vmem:[#allocation55_spill] sm:$0xff] }
 0x65c   :  { %16870 = vst [vmem:[#allocation12_spill] sm:$0xff] %v12944_v45  ;;  %v12951_v12 = vsub.f32 %v16871_v10, %v12737_v50  ;;  %v4400_v8 = vmul.f32 %v12944_v45, %v12944_v45  ;;  %v4489_v56 = vsel %vm4166_vm3, %v4399_v47, 0.0 }
 0x65d   :  { %v4482_v34 = vadd.f32 %v4481_v13, %v4480_v52  ;;  %v16873_v13 = vld [vmem:[#allocation56_spill] sm:$0xff] }
 0x65e   :  { %16872 = vst [vmem:[#allocation9_spill] sm:$0xff] %v12951_v12  ;;  %v12958_v35 = vsub.f32 %v16873_v13, %v12737_v50  ;;  %v4401_v62 = vmul.f32 %v12951_v12, %v12951_v12  ;;  %v4491_v7 = vsel %vm4166_vm3, %v4400_v8, 0.0 }
 0x65f   :  { %v4484_v38 = vadd.f32 %v4483_v17, %v4482_v34  ;;  %v16875_v17 = vld [vmem:[#allocation57_spill] sm:$0xff] }
 0x660   :  { %16874 = vst [vmem:[#allocation21_spill] sm:$0xff] %v12958_v35  ;;  %v12965_v10 = vsub.f32 %v16875_v17, %v12737_v50  ;;  %v4402_v45 = vmul.f32 %v12958_v35, %v12958_v35  ;;  %v4493_v47 = vsel %vm4166_vm3, %v4401_v62, 0.0 }
 0x661   :  { %v4486_v52 = vadd.f32 %v4485_v30, %v4484_v38  ;;  %v16877_v30 = vld [vmem:[#allocation58_spill] sm:$0xff] }
 0x662   :  { %16876 = vst [vmem:[#allocation25_spill] sm:$0xff] %v12965_v10  ;;  %v12972_v13 = vsub.f32 %v16877_v30, %v12737_v50  ;;  %v4403_v12 = vmul.f32 %v12965_v10, %v12965_v10  ;;  %v4495_v8 = vsel %vm4166_vm3, %v4402_v45, 0.0 }
 0x663   :  { %v4488_v34 = vadd.f32 %v4487_v37, %v4486_v52  ;;  %v16879_v37 = vld [vmem:[#allocation59_spill] sm:$0xff] }
 0x664   :  { %16878 = vst [vmem:[#allocation15_spill] sm:$0xff] %v12972_v13  ;;  %v12979_v17 = vsub.f32 %v16879_v37, %v12737_v50  ;;  %v4404_v35 = vmul.f32 %v12972_v13, %v12972_v13  ;;  %v4497_v62 = vsel %vm4166_vm3, %v4403_v12, 0.0 }
 0x665   :  { %v4490_v38 = vadd.f32 %v4489_v56, %v4488_v34  ;;  %v16881_v56 = vld [vmem:[#allocation60_spill] sm:$0xff] }
 0x666   :  { %16880 = vst [vmem:[#allocation24_spill] sm:$0xff] %v12979_v17  ;;  %v12986_v30 = vsub.f32 %v16881_v56, %v12737_v50  ;;  %v4405_v10 = vmul.f32 %v12979_v17, %v12979_v17  ;;  %v4499_v45 = vsel %vm4166_vm3, %v4404_v35, 0.0 }
 0x667   :  { %v4492_v52 = vadd.f32 %v4491_v7, %v4490_v38  ;;  %v16882_v7 = vld [vmem:[#allocation61_spill] sm:$0xff] }
 0x668   :  { %v12993_v37 = vsub.f32 %v16882_v7, %v12737_v50  ;;  %v4406_v13 = vmul.f32 %v12986_v30, %v12986_v30  ;;  %v4501_v12 = vsel %vm4166_vm3, %v4405_v10, 0.0 }
 0x669   :  { %v4494_v34 = vadd.f32 %v4493_v47, %v4492_v52  ;;  %v16883_v47 = vld [vmem:[#allocation8_spill] sm:$0xff] }
 0x66a   :  { %v13000_v56 = vsub.f32 %v16883_v47, %v12737_v50  ;;  %v4407_v17 = vmul.f32 %v12993_v37, %v12993_v37  ;;  %v4503_v35 = vsel %vm4166_vm3, %v4406_v13, 0.0 }
 0x66b   :  { %v4496_v38 = vadd.f32 %v4495_v8, %v4494_v34  ;;  %v16885_v8 = vld [vmem:[#allocation11_spill] sm:$0xff] }
 0x66c   :  { %16884 = vst [vmem:[#allocation26_spill] sm:$0xff] %v13000_v56  ;;  %v13007_v7 = vsub.f32 %v16885_v8, %v12737_v50  ;;  %v4408_v47 = vmul.f32 %v13000_v56, %v13000_v56  ;;  %v4505_v10 = vsel %vm4166_vm3, %v4407_v17, 0.0 }
 0x66d   :  { %v4498_v52 = vadd.f32 %v4497_v62, %v4496_v38  ;;  %v13014_v62 = vsub.f32 %v12542_v16, %v12737_v50 }
 0x66e   :  { %16886 = vst [vmem:[#allocation27_spill] sm:$0xff] %v13007_v7  ;;  %v4409_v8 = vmul.f32 %v13007_v7, %v13007_v7  ;;  %v4507_v13 = vsel %vm4166_vm3, %v4408_v47, 0.0 }
 0x66f   :  { %v4500_v34 = vadd.f32 %v4499_v45, %v4498_v52  ;;  %v13021_v45 = vsub.f32 %v12551_v49, %v12737_v50  ;;  %v4410_v56 = vmul.f32 %v13014_v62, %v13014_v62 }
 0x670   :  { %v4509_v17 = vsel %vm4166_vm3, %v4409_v8, 0.0 }
 0x671   :  { %v4502_v38 = vadd.f32 %v4501_v12, %v4500_v34  ;;  %16887 = vst [vmem:[#allocation28_spill] sm:$0xff] %v13021_v45  ;;  %v16888_v12 = vld [vmem:[#allocation10_spill] sm:$0xff]  ;;  %v4411_v7 = vmul.f32 %v13021_v45, %v13021_v45  ;;  %v4511_v47 = vsel %vm4166_vm3, %v4410_v56, 0.0 }
 0x672   :  { %v13028_v16 = vsub.f32 %v16888_v12, %v12737_v50 }
 0x673   :  { %v4504_v52 = vadd.f32 %v4503_v35, %v4502_v38  ;;  %v16889_v35 = vld [vmem:[#allocation14_spill] sm:$0xff]  ;;  %v4513_v8 = vsel %vm4166_vm3, %v4411_v7, 0.0 }
 0x674   :  { %v13035_v49 = vsub.f32 %v16889_v35, %v12737_v50  ;;  %v4412_v12 = vmul.f32 %v13028_v16, %v13028_v16 }
 0x675   :  { %v4506_v34 = vadd.f32 %v4505_v10, %v4504_v52  ;;  %v13042_v10 = vsub.f32 %v12583_v27, %v12737_v50  ;;  %v13056_v27 = vsub.f32 %v12599_v32, %v12737_v50  ;;  %v13070_v32 = vsub.f32 %v12619_v60, %v12737_v50 }
 0x676   :  { %v4413_v45 = vmul.f32 %v13035_v49, %v13035_v49  ;;  %v4515_v56 = vsel %vm4166_vm3, %v4412_v12, 0.0  ;;  %v13084_v60 = vsub.f32 %v12635_v22, %v12737_v50  ;;  %v13098_v22 = vsub.f32 %v12654_v6, %v12737_v50 }
 0x677   :  { %v4508_v38 = vadd.f32 %v4507_v13, %v4506_v34  ;;  %v16890_v13 = vld [vmem:[#allocation7_spill] sm:$0xff]  ;;  %v13112_v6 = vsub.f32 %v12671_v0, %v12737_v50  ;;  %v13126_v0 = vsub.f32 %v12691_v59, %v12737_v50  ;;  %v13140_v59 = vsub.f32 %v12704_v20, %v12737_v50 }
 0x678   :  { %v13049_v35 = vsub.f32 %v16890_v13, %v12737_v50  ;;  %v4517_v7 = vsel %vm4166_vm3, %v4413_v45, 0.0  ;;  %v13154_v20 = vsub.f32 %v12715_v29, %v12737_v50  ;;  %v4431_v29 = vmul.f32 %v12740_v53, %v12740_v53 }
 0x679   :  { %v4510_v52 = vadd.f32 %v4509_v17, %v4508_v38  ;;  %v4414_v17 = vmul.f32 %v13042_v10, %v13042_v10  ;;  %16891 = vst [vmem:[#allocation29_spill] sm:$0xff] %v13126_v0 }
 0x67a   :  { %v4415_v13 = vmul.f32 %v13049_v35, %v13049_v35  ;;  %16892 = vst [vmem:[#allocation30_spill] sm:$0xff] %v13140_v59 }
 0x67b   :  { %v4512_v34 = vadd.f32 %v4511_v47, %v4510_v52  ;;  %v13063_v47 = vsub.f32 %v12607_v5, %v12737_v50  ;;  %v4519_v12 = vsel %vm4166_vm3, %v4414_v17, 0.0  ;;  %v13077_v5 = vsub.f32 %v12625_v9, %v12737_v50 }
 0x67c   :  { %v4521_v45 = vsel %vm4166_vm3, %v4415_v13, 0.0  ;;  %v13091_v9 = vsub.f32 %v12644_v36, %v12737_v50  ;;  %v13105_v36 = vsub.f32 %v12663_v42, %v12737_v50  ;;  %v13119_v42 = vsub.f32 %v12680_v54, %v12737_v50 }
 0x67d   :  { %v4514_v38 = vadd.f32 %v4513_v8, %v4512_v34  ;;  %v4416_v8 = vmul.f32 %v13056_v27, %v13056_v27  ;;  %v13133_v54 = vsub.f32 %v12698_v44, %v12737_v50  ;;  %v13147_v44 = vsub.f32 %v12709_v40, %v12737_v50 }
 0x67f   :  { %v4516_v52 = vadd.f32 %v4515_v56, %v4514_v38  ;;  %v4417_v56 = vmul.f32 %v13063_v47, %v13063_v47  ;;  %v4523_v17 = vsel %vm4166_vm3, %v4416_v8, 0.0  ;;  %v4429_v40 = vmul.f32 %v13147_v44, %v13147_v44 }
 0x681   :  { %v4518_v34 = vadd.f32 %v4517_v7, %v4516_v52  ;;  %v4418_v7 = vmul.f32 %v13070_v32, %v13070_v32  ;;  %v4525_v13 = vsel %vm4166_vm3, %v4417_v56, 0.0  ;;  %v4549_v50 = vsel %vm4166_vm3, %v4429_v40, 0.0 }
 0x682   :  { %v4435_v40 = vmul.f32 %v12752_v57, %v12752_v57 }
 0x683   :  { %v4520_v38 = vadd.f32 %v4519_v12, %v4518_v34  ;;  %v4419_v12 = vmul.f32 %v13077_v5, %v13077_v5  ;;  %v4527_v8 = vsel %vm4166_vm3, %v4418_v7, 0.0 }
 0x685   :  { %v4522_v52 = vadd.f32 %v4521_v45, %v4520_v38  ;;  %v4420_v45 = vmul.f32 %v13084_v60, %v13084_v60  ;;  %v4529_v56 = vsel %vm4166_vm3, %v4419_v12, 0.0 }
 0x687   :  { %v4524_v34 = vadd.f32 %v4523_v17, %v4522_v52  ;;  %v4421_v17 = vmul.f32 %v13091_v9, %v13091_v9  ;;  %v4531_v7 = vsel %vm4166_vm3, %v4420_v45, 0.0 }
 0x689   :  { %v4526_v38 = vadd.f32 %v4525_v13, %v4524_v34  ;;  %v4422_v13 = vmul.f32 %v13098_v22, %v13098_v22  ;;  %v4533_v12 = vsel %vm4166_vm3, %v4421_v17, 0.0 }
 0x68b   :  { %v4528_v52 = vadd.f32 %v4527_v8, %v4526_v38  ;;  %v4423_v8 = vmul.f32 %v13105_v36, %v13105_v36  ;;  %v4535_v45 = vsel %vm4166_vm3, %v4422_v13, 0.0 }
 0x68d   :  { %v4530_v34 = vadd.f32 %v4529_v56, %v4528_v52  ;;  %v4424_v56 = vmul.f32 %v13112_v6, %v13112_v6  ;;  %v4537_v17 = vsel %vm4166_vm3, %v4423_v8, 0.0 }
 0x68f   :  { %v4532_v38 = vadd.f32 %v4531_v7, %v4530_v34  ;;  %v4425_v7 = vmul.f32 %v13119_v42, %v13119_v42  ;;  %v4539_v13 = vsel %vm4166_vm3, %v4424_v56, 0.0 }
 0x691   :  { %v4534_v52 = vadd.f32 %v4533_v12, %v4532_v38  ;;  %v4426_v12 = vmul.f32 %v13126_v0, %v13126_v0  ;;  %v4541_v8 = vsel %vm4166_vm3, %v4425_v7, 0.0  ;;  %v4430_v7 = vmul.f32 %v13154_v20, %v13154_v20 }
 0x693   :  { %v4536_v34 = vadd.f32 %v4535_v45, %v4534_v52  ;;  %v4427_v45 = vmul.f32 %v13133_v54, %v13133_v54  ;;  %v4543_v56 = vsel %vm4166_vm3, %v4426_v12, 0.0  ;;  %v4432_v12 = vmul.f32 %v12743_v23, %v12743_v23 }
 0x695   :  { %v4538_v38 = vadd.f32 %v4537_v17, %v4536_v34  ;;  %v4428_v17 = vmul.f32 %v13140_v59, %v13140_v59 }
 0x697   :  { %v4540_v52 = vadd.f32 %v4539_v13, %v4538_v38  ;;  %v4545_v13 = vsel %vm4166_vm3, %v4427_v45, 0.0  ;;  %v4433_v45 = vmul.f32 %v12746_v24, %v12746_v24 }
 0x699   :  { %v4542_v34 = vadd.f32 %v4541_v8, %v4540_v52  ;;  %v4547_v52 = vsel %vm4166_vm3, %v4428_v17, 0.0  ;;  %v4555_v17 = vsel %vm4166_vm3, %v4432_v12, 0.0  ;;  %v10356_v12 = vld [vmem:[%s16545_s8] sm:$0xff] }
 0x69a   :  { %5701 = vmatpush.bf16.msrb.mxu3 %v10356_v12 }
 0x69b   :  { %v4544_v38 = vadd.f32 %v4543_v56, %v4542_v34  ;;  %v4551_v34 = vsel %vm4166_vm3, %v4430_v7, 0.0 }
 0x69d   :  { %v4546_v0 = vadd.f32 %v4545_v13, %v4544_v38  ;;  %v4553_v38 = vsel %vm4166_vm3, %v4431_v29, 0.0 }
 0x69f   :  { %v4548_v8 = vadd.f32 %v4547_v52, %v4546_v0  ;;  %v4434_v0 = vmul.f32 %v12749_v19, %v12749_v19 }
 0x6a1   :  { %v4550_v59 = vadd.f32 %v4549_v50, %v4548_v8  ;;  %v4557_v8 = vsel %vm4166_vm3, %v4433_v45, 0.0 }
 0x6a3   :  { %v4552_v56 = vadd.f32 %v4551_v34, %v4550_v59  ;;  %v4559_v59 = vsel %vm4166_vm3, %v4434_v0, 0.0  ;;  %v4561_v34 = vsel %vm4166_vm3, %v4435_v40, 0.0  ;;  %v10369_v0 = vld [vmem:[%s16541_s3] ss:$0 sm:$0xff] }
 0x6a5   :  { %v4554_v13 = vadd.f32 %v4553_v38, %v4552_v56 }
 0x6a7   :  { %v4556_v52 = vadd.f32 %v4555_v17, %v4554_v13 }
 0x6a9   :  { %v4558_v50 = vadd.f32 %v4557_v8, %v4556_v52 }
 0x6ab   :  { %v4560_v7 = vadd.f32 %v4559_v59, %v4558_v50 }
 0x6ad   :  { %v4562_v24 = vadd.f32 %v4561_v34, %v4560_v7 }
 0x6af   :  { %v4563_v29 = vrot.slane %v4562_v24, 4 }
 0x6b1   :  { %v4564_v56 = vadd.f32 %v4563_v29, %v4562_v24  ;;  %v16893_v24 = vld [vmem:[#allocation4_spill] sm:$0xff] }
 0x6b2   :  { %v78_v40 = vadd.f32 %v10369_v0, %v16893_v24 }
 0x6b3   :  { %v4565_v38 = vrot.slane %v4564_v56, 2 }
 0x6b4   :  { %v13195_v7 = vperm.slane %v78_v40, 0 }
 0x6b5   :  { %v4566_v23 = vadd.f32 %v4565_v38, %v4564_v56  ;;  %v13204_v56 = vld [vmem:[%s16544_s7] ss:$0 sm:$0xff] }
 0x6b6   :  { %16894 = vst [vmem:[#allocation31_spill] sm:$0xff] %v13195_v7 }
 0x6b7   :  { %v4567_v19 = vrot.slane %v4566_v23, 1  ;;  %16896 = vst [vmem:[#allocation33_spill] sm:$0xff] %v13204_v56 }
 0x6b9   :  { %v4568_v53 = vadd.f32 %v4567_v19, %v4566_v23  ;;  %v4782_v23 = vrot.slane %v78_v40, 1 }
 0x6bb   :  { %v4569_v13 = vmul.f32 %v4568_v53, %v12734_v14  ;;  %v13193_v53 = vld [vmem:[%s16543_s6] ss:$0 sm:$0xff]  ;;  %v13197_v34 = vperm.slane %v4782_v23, 0  ;;  %v16900_v23 = vld [vmem:[#allocation18_spill] sm:$0xff]  ;;  %v16905_v14 = vld [vmem:[#allocation25_spill] sm:$0xff] }
 0x6bd   :  { %v4570_v45 = vadd.f32 1e-05, %v4569_v13  ;;  %16895 = vst [vmem:[#allocation32_spill] sm:$0xff] %v13197_v34 }
 0x6bf   :  { %10378 = vrsqrt.f32 %v4570_v45  ;;  %vm4577_vm6 = vweird.f32 %v4570_v45 }
 0x6c5   :  { %v10379_v17 = vpop.eup %10378 }
 0x6c6   :  { %v4572_v52 = vmul.f32 %v10379_v17, %v4570_v45  ;;  %vm4578_vm5 = vweird.f32 %v10379_v17 }
 0x6c7   :  { %vm4579_vm7 = vmor %vm4577_vm6, %vm4578_vm5 }
 0x6c8   :  { %v4573_v8 = vmul.f32 %v10379_v17, %v4572_v52 }
 0x6ca   :  { %v4574_v50 = vmul.f32 0.5, %v4573_v8 }
 0x6cc   :  { %v4575_v19 = vsub.f32 1.5, %v4574_v50 }
 0x6ce   :  { %v4576_v59 = vmul.f32 %v10379_v17, %v4575_v19  ;;  %v16901_v19 = vld [vmem:[#allocation22_spill] sm:$0xff] }
 0x6d0   :  { %v13199_v29 = vsel %vm4579_vm7, %v10379_v17, %v4576_v59 }
 0x6d1   :  { %v4644_v38 = vmul.f32 %v13199_v29, %v12752_v57  ;;  %v13210_v12 = vmul.f32 %v13199_v29, %v12756_v46  ;;  %v13214_v13 = vmul.f32 %v13199_v29, %v12760_v58  ;;  %v13218_v45 = vmul.f32 %v13199_v29, %v12764_v4 }
 0x6d2   :  { %v13222_v0 = vmul.f32 %v13199_v29, %v12768_v3  ;;  %v13226_v17 = vmul.f32 %v13199_v29, %v12776_v11  ;;  %v13230_v57 = vmul.f32 %v13199_v29, %v12782_v21  ;;  %v13234_v46 = vmul.f32 %v13199_v29, %v12790_v43 }
 0x6d3   :  { %v4712_v58 = vmul.f32 %v13193_v53, %v4644_v38  ;;  %v13239_v4 = vmul.f32 %v13199_v29, %v12797_v31  ;;  %v13243_v3 = vmul.f32 %v13199_v29, %v12804_v48  ;;  %v13247_v11 = vmul.f32 %v13199_v29, %v12811_v15  ;;  %v16902_v38 = vld [vmem:[#allocation12_spill] sm:$0xff] }
 0x6d4   :  { %v13251_v21 = vmul.f32 %v13199_v29, %v12818_v55  ;;  %v13255_v43 = vmul.f32 %v13199_v29, %v12825_v51  ;;  %v13259_v31 = vmul.f32 %v13199_v29, %v12832_v1  ;;  %v13263_v48 = vmul.f32 %v13199_v29, %v12839_v25 }
 0x6d5   :  { %v4780_v52 = vadd.f32 %v13204_v56, %v4712_v58  ;;  %v13268_v15 = vmul.f32 %v13199_v29, %v12846_v39  ;;  %v13272_v55 = vmul.f32 %v13199_v29, %v12853_v28  ;;  %v13276_v51 = vmul.f32 %v13199_v29, %v12860_v26 }
 0x6d6   :  { %v13280_v1 = vmul.f32 %v13199_v29, %v12867_v33  ;;  %v13284_v25 = vmul.f32 %v13199_v29, %v12874_v18  ;;  %v13288_v39 = vmul.f32 %v13199_v29, %v12881_v2  ;;  %v13292_v28 = vmul.f32 %v13199_v29, %v12888_v63  ;;  %v16897_v18 = vld [vmem:[#allocation16_spill] sm:$0xff]  ;;  %v16898_v2 = vld [vmem:[#allocation19_spill] sm:$0xff] }
 0x6d7   :  { %v4850_v24 = vadd.f32 %v13197_v34, %v4780_v52  ;;  %v13297_v26 = vmul.f32 %v13199_v29, %v12895_v41  ;;  %v13301_v33 = vmul.f32 %v13199_v29, %v12902_v61  ;;  %v13305_v40 = vmul.f32 %v13199_v29, %v16897_v18  ;;  %v16899_v63 = vld [vmem:[#allocation36_spill] sm:$0xff]  ;;  %v16903_v52 = vld [vmem:[#allocation9_spill] sm:$0xff]  ;;  %v16906_v34 = vld [vmem:[#allocation15_spill] sm:$0xff] }
 0x6d8   :  { %v13309_v8 = vmul.f32 %v13199_v29, %v16898_v2  ;;  %v13313_v50 = vmul.f32 %v13199_v29, %v16899_v63  ;;  %v13317_v41 = vmul.f32 %v13199_v29, %v16900_v23  ;;  %v13321_v61 = vmul.f32 %v13199_v29, %v16901_v19  ;;  %v16904_v2 = vld [vmem:[#allocation21_spill] sm:$0xff] }
 0x6d9   :  { %v4914_v59 = vmax.f32 %v4850_v24, 0.0  ;;  %v13325_v58 = vmul.f32 %v13199_v29, %v16902_v38  ;;  %v13329_v18 = vmul.f32 %v13199_v29, %v16903_v52  ;;  %v13333_v63 = vmul.f32 %v13199_v29, %v16904_v2  ;;  %v16907_v24 = vld [vmem:[#allocation24_spill] sm:$0xff] }
 0x6da   :  { %v13337_v23 = vmul.f32 %v13199_v29, %v16905_v14  ;;  %v13341_v19 = vmul.f32 %v13199_v29, %v16906_v34  ;;  %v13345_v38 = vmul.f32 %v13199_v29, %v16907_v24  ;;  %v13349_v52 = vmul.f32 %v13199_v29, %v12986_v30  ;;  %v16909_v14 = vld [vmem:[#allocation26_spill] sm:$0xff]  ;;  %v16910_v34 = vld [vmem:[#allocation27_spill] sm:$0xff]  ;;  %v16911_v30 = vld [vmem:[#allocation28_spill] sm:$0xff] }
 0x6db   :  { %5123 = vst.msk [vmem:[#allocation3 + $0x450] sm:$0xff] %vm4166_vm3, %v4914_v59  ;;  %v13354_v2 = vmul.f32 %v13199_v29, %v12993_v37  ;;  %v13358_v7 = vmul.f32 %v13199_v29, %v16909_v14  ;;  %v13362_v56 = vmul.f32 %v13199_v29, %v16910_v34  ;;  %v13366_v24 = vmul.f32 %v13199_v29, %v13014_v62 }
 0x6dc   :  { %16908 = vst [vmem:[#allocation35_spill] sm:$0xff] %v13349_v52  ;;  %v13370_v52 = vmul.f32 %v13199_v29, %v16911_v30  ;;  %v13374_v37 = vmul.f32 %v13199_v29, %v13028_v16  ;;  %v13378_v59 = vmul.f32 %v13199_v29, %v13035_v49  ;;  %v13382_v14 = vmul.f32 %v13199_v29, %v13042_v10  ;;  %v16914_v30 = vld [vmem:[#allocation29_spill] sm:$0xff] }
 0x6dd   :  { %v13386_v62 = vmul.f32 %v13199_v29, %v13049_v35  ;;  %v13390_v34 = vmul.f32 %v13199_v29, %v13056_v27  ;;  %v13394_v16 = vmul.f32 %v13199_v29, %v13063_v47  ;;  %v13398_v49 = vmul.f32 %v13199_v29, %v13070_v32 }
 0x6de   :  { %v13402_v10 = vmul.f32 %v13199_v29, %v13077_v5  ;;  %v13406_v35 = vmul.f32 %v13199_v29, %v13084_v60  ;;  %v13410_v27 = vmul.f32 %v13199_v29, %v13091_v9  ;;  %v13414_v47 = vmul.f32 %v13199_v29, %v13098_v22 }
 0x6df   :  { %v13418_v32 = vmul.f32 %v13199_v29, %v13105_v36  ;;  %v13422_v5 = vmul.f32 %v13199_v29, %v13112_v6  ;;  %v13426_v60 = vmul.f32 %v13199_v29, %v13119_v42  ;;  %v13430_v9 = vmul.f32 %v13199_v29, %v16914_v30 }
 0x6e0   :  { %16912 = vst [vmem:[#allocation37_spill] sm:$0xff] %v13414_v47  ;;  %v13434_v22 = vmul.f32 %v13199_v29, %v13133_v54  ;;  %v16917_v47 = vld [vmem:[#allocation30_spill] sm:$0xff]  ;;  %v13442_v6 = vmul.f32 %v13199_v29, %v13147_v44  ;;  %v13446_v42 = vmul.f32 %v13199_v29, %v13154_v20  ;;  %v13466_v20 = vmul.f32 %v13193_v53, %v13210_v12 }
 0x6e1   :  { %16913 = vst [vmem:[#allocation39_spill] sm:$0xff] %v13426_v60  ;;  %v13438_v36 = vmul.f32 %v13199_v29, %v16917_v47  ;;  %v16919_v60 = vld [vmem:[#allocation13_spill] sm:$0xff]  ;;  %v13486_v12 = vmul.f32 %v13193_v53, %v13230_v57  ;;  %v13506_v57 = vmul.f32 %v13193_v53, %v13251_v21  ;;  %v13526_v21 = vmul.f32 %v13193_v53, %v13272_v55 }
 0x6e2   :  { %16915 = vst [vmem:[#allocation38_spill] sm:$0xff] %v13430_v9  ;;  %v13450_v30 = vmul.f32 %v13199_v29, %v16919_v60  ;;  %v16920_v9 = vld [vmem:[#allocation17_spill] sm:$0xff]  ;;  %v13470_v60 = vmul.f32 %v13193_v53, %v13214_v13  ;;  %v13490_v13 = vmul.f32 %v13193_v53, %v13234_v46  ;;  %v13510_v46 = vmul.f32 %v13193_v53, %v13255_v43 }
 0x6e3   :  { %16916 = vst [vmem:[#allocation40_spill] sm:$0xff] %v13434_v22  ;;  %v13454_v54 = vmul.f32 %v13199_v29, %v16920_v9  ;;  %v16921_v22 = vld [vmem:[#allocation34_spill] sm:$0xff]  ;;  %v13474_v9 = vmul.f32 %v13193_v53, %v13218_v45  ;;  %v13494_v45 = vmul.f32 %v13193_v53, %v13239_v4  ;;  %v13514_v4 = vmul.f32 %v13193_v53, %v13259_v31 }
 0x6e4   :  { %16918 = vst [vmem:[#allocation20_spill] sm:$0xff] %v13438_v36  ;;  %v13458_v47 = vmul.f32 %v13199_v29, %v16921_v22  ;;  %v16922_v36 = vld [vmem:[#allocation5_spill] sm:$0xff]  ;;  %v13478_v22 = vmul.f32 %v13193_v53, %v13222_v0  ;;  %v13498_v0 = vmul.f32 %v13193_v53, %v13243_v3  ;;  %v13518_v3 = vmul.f32 %v13193_v53, %v13263_v48 }
 0x6e5   :  { %v13462_v44 = vmul.f32 %v13199_v29, %v16922_v36  ;;  %v13482_v29 = vmul.f32 %v13193_v53, %v13226_v17  ;;  %v13502_v17 = vmul.f32 %v13193_v53, %v13247_v11  ;;  %v13522_v11 = vmul.f32 %v13193_v53, %v13268_v15  ;;  %v16923_v36 = vld [vmem:[#allocation35_spill] sm:$0xff] }
 0x6e6   :  { %v13530_v43 = vmul.f32 %v13193_v53, %v13276_v51  ;;  %v13534_v31 = vmul.f32 %v13193_v53, %v13280_v1  ;;  %v13538_v48 = vmul.f32 %v13193_v53, %v13284_v25  ;;  %v13542_v15 = vmul.f32 %v13193_v53, %v13288_v39 }
 0x6e7   :  { %v13546_v55 = vmul.f32 %v13193_v53, %v13292_v28  ;;  %v13550_v51 = vmul.f32 %v13193_v53, %v13297_v26  ;;  %v13554_v1 = vmul.f32 %v13193_v53, %v13301_v33  ;;  %v13558_v25 = vmul.f32 %v13193_v53, %v13305_v40 }
 0x6e8   :  { %v13562_v39 = vmul.f32 %v13193_v53, %v13309_v8  ;;  %v13566_v28 = vmul.f32 %v13193_v53, %v13313_v50  ;;  %v13570_v26 = vmul.f32 %v13193_v53, %v13317_v41  ;;  %v13574_v33 = vmul.f32 %v13193_v53, %v13321_v61 }
 0x6e9   :  { %v13578_v40 = vmul.f32 %v13193_v53, %v13325_v58  ;;  %v13582_v8 = vmul.f32 %v13193_v53, %v13329_v18  ;;  %v13586_v50 = vmul.f32 %v13193_v53, %v13333_v63  ;;  %v13590_v41 = vmul.f32 %v13193_v53, %v13337_v23 }
 0x6ea   :  { %v13594_v61 = vmul.f32 %v13193_v53, %v13341_v19  ;;  %v13598_v58 = vmul.f32 %v13193_v53, %v13345_v38  ;;  %v13602_v18 = vmul.f32 %v13193_v53, %v16923_v36  ;;  %v13606_v63 = vmul.f32 %v13193_v53, %v13354_v2 }
 0x6eb   :  { %v13610_v23 = vmul.f32 %v13193_v53, %v13358_v7  ;;  %v13614_v19 = vmul.f32 %v13193_v53, %v13362_v56  ;;  %v13618_v38 = vmul.f32 %v13193_v53, %v13366_v24  ;;  %v13622_v36 = vmul.f32 %v13193_v53, %v13370_v52 }
 0x6ec   :  { %v13626_v2 = vmul.f32 %v13193_v53, %v13374_v37  ;;  %v13630_v7 = vmul.f32 %v13193_v53, %v13378_v59  ;;  %v13634_v56 = vmul.f32 %v13193_v53, %v13382_v14  ;;  %v13638_v24 = vmul.f32 %v13193_v53, %v13386_v62 }
 0x6ed   :  { %v13642_v52 = vmul.f32 %v13193_v53, %v13390_v34  ;;  %v13646_v37 = vmul.f32 %v13193_v53, %v13394_v16  ;;  %v13650_v59 = vmul.f32 %v13193_v53, %v13398_v49  ;;  %v13654_v14 = vmul.f32 %v13193_v53, %v13402_v10 }
 0x6ee   :  { %v13658_v62 = vmul.f32 %v13193_v53, %v13406_v35  ;;  %v13662_v34 = vmul.f32 %v13193_v53, %v13410_v27  ;;  %v13670_v49 = vmul.f32 %v13193_v53, %v13418_v32  ;;  %v13674_v10 = vmul.f32 %v13193_v53, %v13422_v5 }
 0x6ef   :  { %16924 = vst [vmem:[#allocation41_spill] sm:$0xff] %v13642_v52  ;;  %v16928_v52 = vld [vmem:[#allocation37_spill] sm:$0xff]  ;;  %v13694_v5 = vmul.f32 %v13193_v53, %v13442_v6  ;;  %v13714_v6 = vmul.f32 %v13193_v53, %v13462_v44 }
 0x6f0   :  { %16925 = vst [vmem:[#allocation42_spill] sm:$0xff] %v13654_v14  ;;  %v13666_v16 = vmul.f32 %v13193_v53, %v16928_v52  ;;  %v16930_v14 = vld [vmem:[#allocation39_spill] sm:$0xff] }
 0x6f1   :  { %16926 = vst [vmem:[#allocation23_spill] sm:$0xff] %v13658_v62  ;;  %v13678_v35 = vmul.f32 %v13193_v53, %v16930_v14  ;;  %v16931_v62 = vld [vmem:[#allocation38_spill] sm:$0xff]  ;;  %v13698_v14 = vmul.f32 %v13193_v53, %v13446_v42 }
 0x6f2   :  { %16927 = vst [vmem:[#allocation43_spill] sm:$0xff] %v13662_v34  ;;  %v13682_v27 = vmul.f32 %v13193_v53, %v16931_v62  ;;  %v16932_v34 = vld [vmem:[#allocation40_spill] sm:$0xff]  ;;  %v13702_v62 = vmul.f32 %v13193_v53, %v13450_v30 }
 0x6f3   :  { %16929 = vst [vmem:[#allocation44_spill] sm:$0xff] %v13666_v16  ;;  %v13686_v52 = vmul.f32 %v13193_v53, %v16932_v34  ;;  %v16933_v16 = vld [vmem:[#allocation20_spill] sm:$0xff]  ;;  %v13706_v34 = vmul.f32 %v13193_v53, %v13454_v54 }
 0x6f4   :  { %v13690_v32 = vmul.f32 %v13193_v53, %v16933_v16  ;;  %16934 = vst [vmem:[#allocation45_spill] sm:$0xff] %v13694_v5  ;;  %v13710_v16 = vmul.f32 %v13193_v53, %v13458_v47  ;;  %v16935_v5 = vld [vmem:[#allocation33_spill] sm:$0xff] }
 0x6f5   :  { %v13718_v42 = vadd.f32 %v16935_v5, %v13466_v20  ;;  %v13722_v30 = vadd.f32 %v16935_v5, %v13470_v60  ;;  %v13726_v54 = vadd.f32 %v16935_v5, %v13474_v9  ;;  %v13730_v47 = vadd.f32 %v16935_v5, %v13478_v22 }
 0x6f6   :  { %v13734_v53 = vadd.f32 %v16935_v5, %v13482_v29  ;;  %v13738_v44 = vadd.f32 %v16935_v5, %v13486_v12  ;;  %v13742_v20 = vadd.f32 %v16935_v5, %v13490_v13  ;;  %v13746_v60 = vadd.f32 %v16935_v5, %v13494_v45 }
 0x6f7   :  { %v13750_v9 = vadd.f32 %v16935_v5, %v13498_v0  ;;  %v13754_v22 = vadd.f32 %v16935_v5, %v13502_v17  ;;  %v13758_v29 = vadd.f32 %v16935_v5, %v13506_v57  ;;  %v13762_v12 = vadd.f32 %v16935_v5, %v13510_v46 }
 0x6f8   :  { %v13766_v13 = vadd.f32 %v16935_v5, %v13514_v4  ;;  %v13770_v45 = vadd.f32 %v16935_v5, %v13518_v3  ;;  %v13774_v0 = vadd.f32 %v16935_v5, %v13522_v11  ;;  %v13778_v17 = vadd.f32 %v16935_v5, %v13526_v21 }
 0x6f9   :  { %v13782_v57 = vadd.f32 %v16935_v5, %v13530_v43  ;;  %v13786_v46 = vadd.f32 %v16935_v5, %v13534_v31  ;;  %v13790_v4 = vadd.f32 %v16935_v5, %v13538_v48  ;;  %v13794_v3 = vadd.f32 %v16935_v5, %v13542_v15 }
 0x6fa   :  { %v13798_v11 = vadd.f32 %v16935_v5, %v13546_v55  ;;  %v13802_v21 = vadd.f32 %v16935_v5, %v13550_v51  ;;  %v13806_v43 = vadd.f32 %v16935_v5, %v13554_v1  ;;  %v13810_v31 = vadd.f32 %v16935_v5, %v13558_v25 }
 0x6fb   :  { %v13814_v48 = vadd.f32 %v16935_v5, %v13562_v39  ;;  %v13818_v15 = vadd.f32 %v16935_v5, %v13566_v28  ;;  %v13822_v55 = vadd.f32 %v16935_v5, %v13570_v26  ;;  %v13826_v51 = vadd.f32 %v16935_v5, %v13574_v33 }
 0x6fc   :  { %v13830_v1 = vadd.f32 %v16935_v5, %v13578_v40  ;;  %v13834_v25 = vadd.f32 %v16935_v5, %v13582_v8  ;;  %v13838_v39 = vadd.f32 %v16935_v5, %v13586_v50  ;;  %v13842_v28 = vadd.f32 %v16935_v5, %v13590_v41 }
 0x6fd   :  { %v13846_v26 = vadd.f32 %v16935_v5, %v13594_v61  ;;  %v13850_v33 = vadd.f32 %v16935_v5, %v13598_v58  ;;  %v13854_v40 = vadd.f32 %v16935_v5, %v13602_v18  ;;  %v13858_v8 = vadd.f32 %v16935_v5, %v13606_v63 }
 0x6fe   :  { %v13862_v50 = vadd.f32 %v16935_v5, %v13610_v23  ;;  %v13866_v41 = vadd.f32 %v16935_v5, %v13614_v19  ;;  %v13870_v61 = vadd.f32 %v16935_v5, %v13618_v38  ;;  %v13874_v58 = vadd.f32 %v16935_v5, %v13622_v36  ;;  %v16939_v38 = vld [vmem:[#allocation41_spill] sm:$0xff] }
 0x6ff   :  { %v13878_v18 = vadd.f32 %v16935_v5, %v13626_v2  ;;  %v13882_v63 = vadd.f32 %v16935_v5, %v13630_v7  ;;  %v13886_v23 = vadd.f32 %v16935_v5, %v13634_v56  ;;  %v13890_v19 = vadd.f32 %v16935_v5, %v13638_v24 }
 0x700   :  { %v13894_v36 = vadd.f32 %v16935_v5, %v16939_v38  ;;  %v13898_v2 = vadd.f32 %v16935_v5, %v13646_v37  ;;  %v13902_v7 = vadd.f32 %v16935_v5, %v13650_v59  ;;  %v13922_v59 = vadd.f32 %v16935_v5, %v13670_v49 }
 0x701   :  { %16936 = vst [vmem:[#allocation46_spill] sm:$0xff] %v13882_v63  ;;  %v16941_v63 = vld [vmem:[#allocation42_spill] sm:$0xff]  ;;  %v13942_v49 = vadd.f32 %v16935_v5, %v13690_v32  ;;  %v13962_v32 = vadd.f32 %v16935_v5, %v13710_v16 }
 0x702   :  { %16937 = vst [vmem:[#allocation47_spill] sm:$0xff] %v13886_v23  ;;  %v13906_v56 = vadd.f32 %v16935_v5, %v16941_v63  ;;  %v16942_v23 = vld [vmem:[#allocation23_spill] sm:$0xff]  ;;  %v13926_v63 = vadd.f32 %v16935_v5, %v13674_v10 }
 0x703   :  { %16938 = vst [vmem:[#allocation48_spill] sm:$0xff] %v13890_v19  ;;  %v13910_v24 = vadd.f32 %v16935_v5, %v16942_v23  ;;  %v16943_v19 = vld [vmem:[#allocation43_spill] sm:$0xff]  ;;  %v13930_v23 = vadd.f32 %v16935_v5, %v13678_v35  ;;  %v13950_v35 = vadd.f32 %v16935_v5, %v13698_v14 }
 0x704   :  { %16940 = vst [vmem:[#allocation49_spill] sm:$0xff] %v13894_v36  ;;  %v13914_v38 = vadd.f32 %v16935_v5, %v16943_v19  ;;  %v16944_v36 = vld [vmem:[#allocation44_spill] sm:$0xff]  ;;  %v13934_v19 = vadd.f32 %v16935_v5, %v13682_v27  ;;  %v13954_v27 = vadd.f32 %v16935_v5, %v13702_v62 }
 0x705   :  { %v13918_v37 = vadd.f32 %v16935_v5, %v16944_v36  ;;  %16945 = vst [vmem:[#allocation50_spill] sm:$0xff] %v13922_v59  ;;  %v13938_v36 = vadd.f32 %v16935_v5, %v13686_v52  ;;  %v16946_v59 = vld [vmem:[#allocation45_spill] sm:$0xff]  ;;  %v13958_v52 = vadd.f32 %v16935_v5, %v13706_v34 }
 0x706   :  { %v13946_v10 = vadd.f32 %v16935_v5, %v16946_v59  ;;  %v13966_v59 = vadd.f32 %v16935_v5, %v13714_v6 }
 0x708   :  { %16947 = vst [vmem:[#allocation51_spill] sm:$0xff] %v13946_v10  ;;  %v16948_v10 = vld [vmem:[#allocation31_spill] sm:$0xff] }
 0x709   :  { %v13970_v14 = vadd.f32 %v16948_v10, %v13718_v42  ;;  %v13974_v62 = vadd.f32 %v16948_v10, %v13722_v30  ;;  %v13978_v34 = vadd.f32 %v16948_v10, %v13726_v54  ;;  %v13982_v16 = vadd.f32 %v16948_v10, %v13730_v47 }
 0x70a   :  { %v13986_v5 = vadd.f32 %v16948_v10, %v13734_v53  ;;  %v13990_v6 = vadd.f32 %v16948_v10, %v13738_v44  ;;  %v13994_v42 = vadd.f32 %v16948_v10, %v13742_v20  ;;  %v13998_v30 = vadd.f32 %v16948_v10, %v13746_v60 }
 0x70b   :  { %v14002_v54 = vadd.f32 %v16948_v10, %v13750_v9  ;;  %v14006_v47 = vadd.f32 %v16948_v10, %v13754_v22  ;;  %v14010_v53 = vadd.f32 %v16948_v10, %v13758_v29  ;;  %v14014_v44 = vadd.f32 %v16948_v10, %v13762_v12 }
 0x70c   :  { %v14018_v20 = vadd.f32 %v16948_v10, %v13766_v13  ;;  %v14022_v60 = vadd.f32 %v16948_v10, %v13770_v45  ;;  %v14026_v9 = vadd.f32 %v16948_v10, %v13774_v0  ;;  %v14030_v22 = vadd.f32 %v16948_v10, %v13778_v17 }
 0x70d   :  { %v14034_v29 = vadd.f32 %v16948_v10, %v13782_v57  ;;  %v14038_v12 = vadd.f32 %v16948_v10, %v13786_v46  ;;  %v14042_v13 = vadd.f32 %v16948_v10, %v13790_v4  ;;  %v14046_v45 = vadd.f32 %v16948_v10, %v13794_v3 }
 0x70e   :  { %v14050_v0 = vadd.f32 %v16948_v10, %v13798_v11  ;;  %v14054_v17 = vadd.f32 %v16948_v10, %v13802_v21  ;;  %v14058_v57 = vadd.f32 %v16948_v10, %v13806_v43  ;;  %v14062_v46 = vadd.f32 %v16948_v10, %v13810_v31 }
 0x70f   :  { %v14066_v4 = vadd.f32 %v16948_v10, %v13814_v48  ;;  %v14070_v3 = vadd.f32 %v16948_v10, %v13818_v15  ;;  %v14074_v11 = vadd.f32 %v16948_v10, %v13822_v55  ;;  %v14078_v21 = vadd.f32 %v16948_v10, %v13826_v51  ;;  %v16949_v55 = vld [vmem:[#allocation32_spill] sm:$0xff] }
 0x710   :  { %v14082_v43 = vadd.f32 %v16948_v10, %v13830_v1  ;;  %v14086_v31 = vadd.f32 %v16948_v10, %v13834_v25  ;;  %v14090_v48 = vadd.f32 %v16948_v10, %v13838_v39  ;;  %v14094_v15 = vadd.f32 %v16948_v10, %v13842_v28  ;;  %v16953_v10 = vld [vmem:[#allocation46_spill] sm:$0xff] }
 0x711   :  { %v14098_v51 = vadd.f32 %v16949_v55, %v13846_v26  ;;  %v14102_v1 = vadd.f32 %v16949_v55, %v13850_v33  ;;  %v14106_v25 = vadd.f32 %v16949_v55, %v13854_v40  ;;  %v14110_v39 = vadd.f32 %v16949_v55, %v13858_v8 }
 0x712   :  { %v14114_v28 = vadd.f32 %v16949_v55, %v13862_v50  ;;  %v14118_v26 = vadd.f32 %v16949_v55, %v13866_v41  ;;  %v14122_v33 = vadd.f32 %v16949_v55, %v13870_v61  ;;  %v14126_v40 = vadd.f32 %v16949_v55, %v13874_v58 }
 0x713   :  { %v14130_v8 = vadd.f32 %v16949_v55, %v13878_v18  ;;  %v14134_v50 = vadd.f32 %v16949_v55, %v16953_v10  ;;  %v14150_v18 = vadd.f32 %v16949_v55, %v13898_v2  ;;  %v14154_v10 = vadd.f32 %v16949_v55, %v13902_v7 }
 0x714   :  { %16950 = vst [vmem:[#allocation52_spill] sm:$0xff] %v14114_v28  ;;  %v16954_v28 = vld [vmem:[#allocation47_spill] sm:$0xff]  ;;  %v14170_v2 = vadd.f32 %v16949_v55, %v13918_v37  ;;  %v14190_v37 = vadd.f32 %v16949_v55, %v13938_v36  ;;  %v14210_v36 = vadd.f32 %v16949_v55, %v13958_v52  ;;  %v4856_v52 = vmax.f32 %v13990_v6, 0.0 }
 0x715   :  { %16951 = vst [vmem:[#allocation53_spill] sm:$0xff] %v14118_v26  ;;  %v14138_v41 = vadd.f32 %v16949_v55, %v16954_v28  ;;  %v16955_v26 = vld [vmem:[#allocation48_spill] sm:$0xff]  ;;  %v14158_v28 = vadd.f32 %v16949_v55, %v13906_v56  ;;  %v14178_v56 = vadd.f32 %v16949_v55, %v13926_v63  ;;  %v4864_v6 = vmax.f32 %v14022_v60, 0.0 }
 0x716   :  { %16952 = vst [vmem:[#allocation54_spill] sm:$0xff] %v14122_v33  ;;  %v14142_v61 = vadd.f32 %v16949_v55, %v16955_v26  ;;  %v16956_v33 = vld [vmem:[#allocation49_spill] sm:$0xff]  ;;  %v14162_v26 = vadd.f32 %v16949_v55, %v13910_v24  ;;  %v14182_v24 = vadd.f32 %v16949_v55, %v13930_v23  ;;  %v14202_v23 = vadd.f32 %v16949_v55, %v13950_v35 }
 0x717   :  { %v14146_v58 = vadd.f32 %v16949_v55, %v16956_v33  ;;  %16957 = vst [vmem:[#allocation55_spill] sm:$0xff] %v14150_v18  ;;  %v14166_v33 = vadd.f32 %v16949_v55, %v13914_v38  ;;  %v16958_v18 = vld [vmem:[#allocation50_spill] sm:$0xff]  ;;  %v14186_v38 = vadd.f32 %v16949_v55, %v13934_v19  ;;  %v14206_v19 = vadd.f32 %v16949_v55, %v13954_v27  ;;  %v5124_v60 = vld [vmem:[#allocation3 + $0x7] sm:$0xff] }
 0x718   :  { %v14174_v7 = vadd.f32 %v16949_v55, %v16958_v18  ;;  %v14194_v18 = vadd.f32 %v16949_v55, %v13942_v49  ;;  %16962 = vst [vmem:[#allocation58_spill] sm:$0xff] %v14202_v23  ;;  %v14214_v49 = vadd.f32 %v16949_v55, %v13962_v32  ;;  %v4852_v35 = vmax.f32 %v13974_v62, 0.0 }
 0x719   :  { %16963 = vst [vmem:[#allocation59_spill] sm:$0xff] %v14206_v19  ;;  %v4853_v23 = vmax.f32 %v13978_v34, 0.0  ;;  %v4854_v27 = vmax.f32 %v13982_v16, 0.0  ;;  %v4855_v19 = vmax.f32 %v13986_v5, 0.0  ;;  %v4857_v32 = vmax.f32 %v13994_v42, 0.0 }
 0x71a   :  { %16959 = vst [vmem:[#allocation56_spill] sm:$0xff] %v14174_v7  ;;  %v16960_v7 = vld [vmem:[#allocation51_spill] sm:$0xff]  ;;  %v4860_v62 = vmax.f32 %v14006_v47, 0.0  ;;  %v4861_v34 = vmax.f32 %v14010_v53, 0.0  ;;  %v4862_v16 = vmax.f32 %v14014_v44, 0.0  ;;  %v4863_v5 = vmax.f32 %v14018_v20, 0.0 }
 0x71b   :  { %v14198_v63 = vadd.f32 %v16949_v55, %v16960_v7  ;;  %v14218_v7 = vadd.f32 %v16949_v55, %v13966_v59  ;;  %5061 = vst.msk [vmem:[#allocation3 + $0x30] sm:$0xff] %vm4166_vm3, %v4852_v35  ;;  %v4858_v59 = vmax.f32 %v13998_v30, 0.0  ;;  %v4865_v42 = vmax.f32 %v14026_v9, 0.0  ;;  %v5222_v53 = vld [vmem:[#allocation3 + $0x8] sm:$0xff]  ;;  %v5223_v20 = vld [vmem:[#allocation3 + $0x10] sm:$0xff] }
 0x71c   :  { %5062 = vst.msk [vmem:[#allocation3 + $0x48] sm:$0xff] %vm4166_vm3, %v4853_v23  ;;  %v4866_v30 = vmax.f32 %v14030_v22, 0.0  ;;  %v4868_v47 = vmax.f32 %v14038_v12, 0.0  ;;  %v4869_v44 = vmax.f32 %v14042_v13, 0.0  ;;  %v5125_v9 = vld [vmem:[#allocation3 + $0xf] sm:$0xff]  ;;  %v4870_v22 = vmax.f32 %v14046_v45, 0.0 }
 0x71d   :  { %16961 = vst [vmem:[#allocation57_spill] sm:$0xff] %v14198_v63  ;;  %v4851_v63 = vmax.f32 %v13970_v14, 0.0  ;;  %v4859_v14 = vmax.f32 %v14002_v54, 0.0  ;;  %v4867_v54 = vmax.f32 %v14034_v29, 0.0  ;;  %v5286_v55 = vpack.c.bf16 %v5223_v20, %v5222_v53 }
 0x71e   :  { %5063 = vst.msk [vmem:[#allocation3 + $0x50] sm:$0xff] %vm4166_vm3, %v4854_v27  ;;  %v5188_v29 = vpack.c.bf16 %v5125_v9, %v5124_v60  ;;  %v4872_v12 = vmax.f32 %v14054_v17, 0.0  ;;  %v4873_v13 = vmax.f32 %v14058_v57, 0.0  ;;  %v4874_v45 = vmax.f32 %v14062_v46, 0.0  ;;  %v5863_v57 = vld [vmem:[#allocation3 + $0x9] sm:$0xff] }
 0x71f   :  { %5060 = vst.msk [vmem:[#allocation3 + $0x28] sm:$0xff] %vm4166_vm3, %v4851_v63  ;;  %v4871_v63 = vmax.f32 %v14050_v0, 0.0  ;;  %10020 = vmatmul.msk.bf16.vlgmr.msra.gmra.mxu2 %vm4166_vm3, %v5286_v55  ;;  %v10358_v0 = vld [vmem:[%s16545_s8 + $0x10] sm:$0xff]  ;;  %v4875_v17 = vmax.f32 %v14066_v4, 0.0  ;;  %v4876_v23 = vmax.f32 %v14070_v3, 0.0  ;;  %v4877_v35 = vmax.f32 %v14074_v11, 0.0 }
 0x720   :  { %5064 = vst.msk [vmem:[#allocation3 + $0x68] sm:$0xff] %vm4166_vm3, %v4855_v19  ;;  %10056 = vmatmul.msk.bf16.vlgmr.msrb.gmra.mxu3 %vm4166_vm3, %v5188_v29  ;;  %6071 = vmatpush.bf16.msra.mxu0 %v10358_v0  ;;  %v5864_v19 = vld [vmem:[#allocation3 + $0x11] sm:$0xff]  ;;  %v4878_v27 = vmax.f32 %v14078_v21, 0.0  ;;  %v4879_v4 = vmax.f32 %v14082_v43, 0.0  ;;  %v4880_v3 = vmax.f32 %v14086_v31, 0.0  ;;  %v4882_v11 = vmax.f32 %v14094_v15, 0.0 }
 0x721   :  { %5065 = vst.msk [vmem:[#allocation3 + $0x70] sm:$0xff] %vm4166_vm3, %v4856_v52  ;;  %v5927_v46 = vpack.c.bf16 %v5864_v19, %v5863_v57  ;;  %v4881_v52 = vmax.f32 %v14090_v48, 0.0  ;;  %v4883_v21 = vmax.f32 %v14098_v51, 0.0  ;;  %v4884_v43 = vmax.f32 %v14102_v1, 0.0  ;;  %v10360_v48 = vld [vmem:[%s16545_s8 + $0x20] sm:$0xff]  ;;  %v10359_v15 = vld [vmem:[%s16545_s8 + $0x18] sm:$0xff] }
 0x722   :  { %5066 = vst.msk [vmem:[#allocation3 + $0x88] sm:$0xff] %vm4166_vm3, %v4857_v32  ;;  %v4885_v31 = vmax.f32 %v14106_v25, 0.0  ;;  %v4886_v51 = vmax.f32 %v14110_v39, 0.0  ;;  %v5225_v1 = vld [vmem:[#allocation3 + $0x30] sm:$0xff]  ;;  %6939 = vmatpush.bf16.msrb.mxu2 %v10360_v48  ;;  %6505 = vmatpush.bf16.msrb.mxu1 %v10359_v15  ;;  %v4891_v53 = vmax.f32 %v14130_v8, 0.0  ;;  %v4892_v20 = vmax.f32 %v14134_v50, 0.0 }
 0x723   :  { %5067 = vst.msk [vmem:[#allocation3 + $0x90] sm:$0xff] %vm4166_vm3, %v4858_v59  ;;  %10094 = vmatmul.msk.bf16.vlgmr.msra.gmra.mxu0 %vm4166_vm3, %v5927_v46  ;;  %v16966_v39 = vld [vmem:[#allocation54_spill] sm:$0xff]  ;;  %v4893_v60 = vmax.f32 %v14138_v41, 0.0  ;;  %v4894_v9 = vmax.f32 %v14142_v61, 0.0  ;;  %v16967_v8 = vld [vmem:[#allocation55_spill] sm:$0xff]  ;;  %v4897_v50 = vmax.f32 %v14154_v10, 0.0 }
 0x724   :  { %5068 = vst.msk [vmem:[#allocation3 + $0xa8] sm:$0xff] %vm4166_vm3, %v4859_v14  ;;  %v4898_v41 = vmax.f32 %v14158_v28, 0.0  ;;  %v4899_v61 = vmax.f32 %v14162_v26, 0.0  ;;  %v4900_v55 = vmax.f32 %v14166_v33, 0.0  ;;  %v4901_v10 = vmax.f32 %v14170_v2, 0.0  ;;  %v16969_v57 = vld [vmem:[#allocation57_spill] sm:$0xff] }
 0x725   :  { %5069 = vst.msk [vmem:[#allocation3 + $0xb0] sm:$0xff] %vm4166_vm3, %v4860_v62  ;;  %v16964_v62 = vld [vmem:[#allocation52_spill] sm:$0xff]  ;;  %v5227_v29 = vld [vmem:[#allocation3 + $0x50] sm:$0xff]  ;;  %v4903_v26 = vmax.f32 %v14178_v56, 0.0  ;;  %v4904_v33 = vmax.f32 %v14182_v24, 0.0  ;;  %v4906_v2 = vmax.f32 %v14190_v37, 0.0 }
 0x726   :  { %5070 = vst.msk [vmem:[#allocation3 + $0xc8] sm:$0xff] %vm4166_vm3, %v4861_v34  ;;  %v5224_v32 = vld [vmem:[#allocation3 + $0x28] sm:$0xff]  ;;  %v4887_v25 = vmax.f32 %v16964_v62, 0.0  ;;  %v4907_v24 = vmax.f32 %v14194_v18, 0.0  ;;  %v16970_v19 = vld [vmem:[#allocation58_spill] sm:$0xff]  ;;  %v16971_v37 = vld [vmem:[#allocation59_spill] sm:$0xff] }
 0x727   :  { %5071 = vst.msk [vmem:[#allocation3 + $0xd0] sm:$0xff] %vm4166_vm3, %v4862_v16  ;;  %v5126_v59 = vld [vmem:[#allocation3 + $0x27] sm:$0xff]  ;;  %v5127_v14 = vld [vmem:[#allocation3 + $0x2f] sm:$0xff]  ;;  %v5287_v34 = vpack.c.bf16 %v5225_v1, %v5224_v32  ;;  %v4912_v18 = vmax.f32 %v14214_v49, 0.0 }
 0x728   :  { %5072 = vst.msk [vmem:[#allocation3 + $0xe8] sm:$0xff] %vm4166_vm3, %v4863_v5  ;;  %v5189_v16 = vpack.c.bf16 %v5127_v14, %v5126_v59  ;;  %v16965_v5 = vld [vmem:[#allocation53_spill] sm:$0xff] }
 0x729   :  { %5073 = vst.msk [vmem:[#allocation3 + $0xf0] sm:$0xff] %vm4166_vm3, %v4864_v6  ;;  %v4888_v6 = vmax.f32 %v16965_v5, 0.0  ;;  %v5867_v56 = vld [vmem:[#allocation3 + $0x49] sm:$0xff] }
 0x72a   :  { %5074 = vst.msk [vmem:[#allocation3 + $0x108] sm:$0xff] %vm4166_vm3, %v4865_v42  ;;  %v5865_v42 = vld [vmem:[#allocation3 + $0x29] sm:$0xff]  ;;  %10132 = vmatmul.msk.bf16.vlgmr.msrb.gmra.mxu1 %vm4166_vm3, %v5189_v16 }
 0x72b   :  { %5075 = vst.msk [vmem:[#allocation3 + $0x110] sm:$0xff] %vm4166_vm3, %v4866_v30  ;;  %v5866_v30 = vld [vmem:[#allocation3 + $0x31] sm:$0xff]  ;;  %v5230_v15 = vld [vmem:[#allocation3 + $0x88] sm:$0xff] }
 0x72c   :  { %5076 = vst.msk [vmem:[#allocation3 + $0x128] sm:$0xff] %vm4166_vm3, %v4867_v54  ;;  %v4889_v54 = vmax.f32 %v16966_v39, 0.0  ;;  %v5231_v32 = vld [vmem:[#allocation3 + $0x90] sm:$0xff] }
 0x72d   :  { %5077 = vst.msk [vmem:[#allocation3 + $0x130] sm:$0xff] %vm4166_vm3, %v4868_v47  ;;  %v4890_v47 = vmax.f32 %v14126_v40, 0.0  ;;  %v4895_v40 = vmax.f32 %v14146_v58, 0.0  ;;  %v5226_v58 = vld [vmem:[#allocation3 + $0x48] sm:$0xff]  ;;  %v5290_v59 = vpack.c.bf16 %v5231_v32, %v5230_v15  ;;  %v5233_v5 = vld [vmem:[#allocation3 + $0xb0] sm:$0xff] }
 0x72e   :  { %5078 = vst.msk [vmem:[#allocation3 + $0x148] sm:$0xff] %vm4166_vm3, %v4869_v44  ;;  %v5928_v44 = vpack.c.bf16 %v5866_v30, %v5865_v42  ;;  %v5133_v1 = vld [vmem:[#allocation3 + $0x8f] sm:$0xff] }
 0x72f   :  { %5079 = vst.msk [vmem:[#allocation3 + $0x150] sm:$0xff] %vm4166_vm3, %v4870_v22  ;;  %10021 = vmatmul.msk.bf16.gmra.mxu2 %vm4166_vm3, %v5287_v34  ;;  %v4896_v22 = vmax.f32 %v16967_v8, 0.0  ;;  %v5871_v62 = vld [vmem:[#allocation3 + $0x89] sm:$0xff] }
 0x730   :  { %5080 = vst.msk [vmem:[#allocation3 + $0x168] sm:$0xff] %vm4166_vm3, %v4871_v63  ;;  %10057 = vmatmul.msk.bf16.gmra.mxu3 %vm4166_vm3, %v5189_v16  ;;  %v5128_v63 = vld [vmem:[#allocation3 + $0x47] sm:$0xff]  ;;  %v5135_v42 = vld [vmem:[#allocation3 + $0xaf] sm:$0xff] }
 0x731   :  { %5081 = vst.msk [vmem:[#allocation3 + $0x170] sm:$0xff] %vm4166_vm3, %v4872_v12  ;;  %v5129_v12 = vld [vmem:[#allocation3 + $0x4f] sm:$0xff] }
 0x732   :  { %5082 = vst.msk [vmem:[#allocation3 + $0x188] sm:$0xff] %vm4166_vm3, %v4873_v13  ;;  %v16968_v13 = vld [vmem:[#allocation56_spill] sm:$0xff]  ;;  %v5190_v0 = vpack.c.bf16 %v5129_v12, %v5128_v63  ;;  %v5232_v16 = vld [vmem:[#allocation3 + $0xa8] sm:$0xff] }
 0x733   :  { %5083 = vst.msk [vmem:[#allocation3 + $0x190] sm:$0xff] %vm4166_vm3, %v4874_v45  ;;  %10095 = vmatmul.msk.bf16.gmra.mxu0 %vm4166_vm3, %v5928_v44  ;;  %v4902_v28 = vmax.f32 %v16968_v13, 0.0  ;;  %v5288_v45 = vpack.c.bf16 %v5227_v29, %v5226_v58  ;;  %v5291_v30 = vpack.c.bf16 %v5233_v5, %v5232_v16  ;;  %v5234_v44 = vld [vmem:[#allocation3 + $0xc8] sm:$0xff]  ;;  %v5237_v58 = vld [vmem:[#allocation3 + $0xf0] sm:$0xff] }
 0x734   :  { %5084 = vst.msk [vmem:[#allocation3 + $0x1a8] sm:$0xff] %vm4166_vm3, %v4875_v17  ;;  %v4905_v17 = vmax.f32 %v14186_v38, 0.0  ;;  %v4908_v38 = vmax.f32 %v16969_v57, 0.0  ;;  %v5139_v29 = vld [vmem:[#allocation3 + $0xef] sm:$0xff] }
 0x735   :  { %5085 = vst.msk [vmem:[#allocation3 + $0x1b0] sm:$0xff] %vm4166_vm3, %v4876_v23  ;;  %v5868_v23 = vld [vmem:[#allocation3 + $0x51] sm:$0xff]  ;;  %v5242_v16 = vld [vmem:[#allocation3 + $0x148] sm:$0xff] }
 0x736   :  { %5086 = vst.msk [vmem:[#allocation3 + $0x1c8] sm:$0xff] %vm4166_vm3, %v4877_v35  ;;  %v4909_v35 = vmax.f32 %v16970_v19, 0.0  ;;  %v5929_v46 = vpack.c.bf16 %v5868_v23, %v5867_v56  ;;  %v5878_v13 = vld [vmem:[#allocation3 + $0xf1] sm:$0xff]  ;;  %v5879_v56 = vld [vmem:[#allocation3 + $0x109] sm:$0xff] }
 0x737   :  { %5087 = vst.msk [vmem:[#allocation3 + $0x1d0] sm:$0xff] %vm4166_vm3, %v4878_v27  ;;  %v4910_v27 = vmax.f32 %v16971_v37, 0.0  ;;  %v5880_v23 = vld [vmem:[#allocation3 + $0x111] sm:$0xff] }
 0x738   :  { %5088 = vst.msk [vmem:[#allocation3 + $0x1e8] sm:$0xff] %vm4166_vm3, %v4879_v4  ;;  %v4911_v4 = vmax.f32 %v14210_v36, 0.0  ;;  %v5229_v36 = vld [vmem:[#allocation3 + $0x70] sm:$0xff] }
 0x739   :  { %5089 = vst.msk [vmem:[#allocation3 + $0x1f0] sm:$0xff] %vm4166_vm3, %v4880_v3  ;;  %v4913_v3 = vmax.f32 %v14218_v7, 0.0  ;;  %v5869_v7 = vld [vmem:[#allocation3 + $0x69] sm:$0xff]  ;;  %v5882_v15 = vld [vmem:[#allocation3 + $0x131] sm:$0xff] }
 0x73a   :  { %5090 = vst.msk [vmem:[#allocation3 + $0x208] sm:$0xff] %vm4166_vm3, %v4881_v52  ;;  %10133 = vmatmul.msk.bf16.gmra.mxu1 %vm4166_vm3, %v5190_v0  ;;  %v5228_v52 = vld [vmem:[#allocation3 + $0x68] sm:$0xff] }
 0x73b   :  { %5091 = vst.msk [vmem:[#allocation3 + $0x210] sm:$0xff] %vm4166_vm3, %v4882_v11  ;;  %v5130_v11 = vld [vmem:[#allocation3 + $0x67] sm:$0xff] }
 0x73c   :  { %5092 = vst.msk [vmem:[#allocation3 + $0x268] sm:$0xff] %vm4166_vm3, %v4883_v21  ;;  %v5131_v21 = vld [vmem:[#allocation3 + $0x6f] sm:$0xff] }
 0x73d   :  { %5093 = vst.msk [vmem:[#allocation3 + $0x270] sm:$0xff] %vm4166_vm3, %v4884_v43  ;;  %v5289_v43 = vpack.c.bf16 %v5229_v36, %v5228_v52  ;;  %v5191_v49 = vpack.c.bf16 %v5131_v21, %v5130_v11  ;;  %v5241_v52 = vld [vmem:[#allocation3 + $0x130] sm:$0xff]  ;;  %v5142_v36 = vld [vmem:[#allocation3 + $0x127] sm:$0xff] }
 0x73e   :  { %5094 = vst.msk [vmem:[#allocation3 + $0x288] sm:$0xff] %vm4166_vm3, %v4885_v31  ;;  %v5870_v31 = vld [vmem:[#allocation3 + $0x71] sm:$0xff] }
 0x73f   :  { %5095 = vst.msk [vmem:[#allocation3 + $0x290] sm:$0xff] %vm4166_vm3, %v4886_v51  ;;  %10022 = vmatmul.msk.bf16.gmra.mxu2 %vm4166_vm3, %v5288_v45  ;;  %v5930_v48 = vpack.c.bf16 %v5870_v31, %v5869_v7  ;;  %v5132_v51 = vld [vmem:[#allocation3 + $0x87] sm:$0xff]  ;;  %v5239_v45 = vld [vmem:[#allocation3 + $0x110] sm:$0xff] }
 0x740   :  { %5096 = vst.msk [vmem:[#allocation3 + $0x2a8] sm:$0xff] %vm4166_vm3, %v4887_v25  ;;  %10058 = vmatmul.msk.bf16.gmra.mxu3 %vm4166_vm3, %v5190_v0  ;;  %v5192_v14 = vpack.c.bf16 %v5133_v1, %v5132_v51  ;;  %v5872_v25 = vld [vmem:[#allocation3 + $0x91] sm:$0xff]  ;;  %v5140_v0 = vld [vmem:[#allocation3 + $0x107] sm:$0xff] }
 0x741   :  { %5097 = vst.msk [vmem:[#allocation3 + $0x2b0] sm:$0xff] %vm4166_vm3, %v4888_v6  ;;  %v5931_v34 = vpack.c.bf16 %v5872_v25, %v5871_v62  ;;  %v5134_v6 = vld [vmem:[#allocation3 + $0xa7] sm:$0xff]  ;;  %v5143_v11 = vld [vmem:[#allocation3 + $0x12f] sm:$0xff] }
 0x742   :  { %5098 = vst.msk [vmem:[#allocation3 + $0x2c8] sm:$0xff] %vm4166_vm3, %v4889_v54  ;;  %v5193_v39 = vpack.c.bf16 %v5135_v42, %v5134_v6  ;;  %v5873_v54 = vld [vmem:[#allocation3 + $0xa9] sm:$0xff]  ;;  %v5197_v7 = vpack.c.bf16 %v5143_v11, %v5142_v36 }
 0x743   :  { %5099 = vst.msk [vmem:[#allocation3 + $0x2d0] sm:$0xff] %vm4166_vm3, %v4890_v47  ;;  %10096 = vmatmul.msk.bf16.gmra.mxu0 %vm4166_vm3, %v5929_v46  ;;  %v5874_v47 = vld [vmem:[#allocation3 + $0xb1] sm:$0xff] }
 0x744   :  { %5100 = vst.msk [vmem:[#allocation3 + $0x2e8] sm:$0xff] %vm4166_vm3, %v4891_v53  ;;  %v5932_v53 = vpack.c.bf16 %v5874_v47, %v5873_v54  ;;  %v5243_v42 = vld [vmem:[#allocation3 + $0x150] sm:$0xff] }
 0x745   :  { %5101 = vst.msk [vmem:[#allocation3 + $0x2f0] sm:$0xff] %vm4166_vm3, %v4892_v20  ;;  %v5235_v20 = vld [vmem:[#allocation3 + $0xd0] sm:$0xff] }
 0x746   :  { %5102 = vst.msk [vmem:[#allocation3 + $0x308] sm:$0xff] %vm4166_vm3, %v4893_v60  ;;  %v5136_v60 = vld [vmem:[#allocation3 + $0xc7] sm:$0xff] }
 0x747   :  { %5103 = vst.msk [vmem:[#allocation3 + $0x310] sm:$0xff] %vm4166_vm3, %v4894_v9  ;;  %v5137_v9 = vld [vmem:[#allocation3 + $0xcf] sm:$0xff] }
 0x748   :  { %5104 = vst.msk [vmem:[#allocation3 + $0x328] sm:$0xff] %vm4166_vm3, %v4895_v40  ;;  %v5292_v40 = vpack.c.bf16 %v5235_v20, %v5234_v44  ;;  %v5194_v8 = vpack.c.bf16 %v5137_v9, %v5136_v60  ;;  %v5296_v44 = vpack.c.bf16 %v5243_v42, %v5242_v16 }
 0x749   :  { %5105 = vst.msk [vmem:[#allocation3 + $0x330] sm:$0xff] %vm4166_vm3, %v4896_v22  ;;  %v5875_v22 = vld [vmem:[#allocation3 + $0xc9] sm:$0xff] }
 0x74a   :  { %5106 = vst.msk [vmem:[#allocation3 + $0x348] sm:$0xff] %vm4166_vm3, %v4897_v50  ;;  %10134 = vmatmul.msk.bf16.gmra.mxu1 %vm4166_vm3, %v5191_v49  ;;  %v5876_v50 = vld [vmem:[#allocation3 + $0xd1] sm:$0xff] }
 0x74b   :  { %5107 = vst.msk [vmem:[#allocation3 + $0x350] sm:$0xff] %vm4166_vm3, %v4898_v41  ;;  %v5933_v41 = vpack.c.bf16 %v5876_v50, %v5875_v22 }
 0x74c   :  { %5108 = vst.msk [vmem:[#allocation3 + $0x368] sm:$0xff] %vm4166_vm3, %v4899_v61  ;;  %v5236_v61 = vld [vmem:[#allocation3 + $0xe8] sm:$0xff] }
 0x74d   :  { %5109 = vst.msk [vmem:[#allocation3 + $0x370] sm:$0xff] %vm4166_vm3, %v4900_v55  ;;  %v5138_v55 = vld [vmem:[#allocation3 + $0xe7] sm:$0xff]  ;;  %v5293_v63 = vpack.c.bf16 %v5237_v58, %v5236_v61 }
 0x74e   :  { %5110 = vst.msk [vmem:[#allocation3 + $0x388] sm:$0xff] %vm4166_vm3, %v4901_v10  ;;  %v5195_v12 = vpack.c.bf16 %v5139_v29, %v5138_v55  ;;  %v5877_v10 = vld [vmem:[#allocation3 + $0xe9] sm:$0xff] }
 0x74f   :  { %5111 = vst.msk [vmem:[#allocation3 + $0x390] sm:$0xff] %vm4166_vm3, %v4902_v28  ;;  %10023 = vmatmul.msk.bf16.gmra.mxu2 %vm4166_vm3, %v5289_v43  ;;  %v5934_v28 = vpack.c.bf16 %v5878_v13, %v5877_v10 }
 0x750   :  { %5112 = vst.msk [vmem:[#allocation3 + $0x3a8] sm:$0xff] %vm4166_vm3, %v4903_v26  ;;  %10059 = vmatmul.msk.bf16.gmra.mxu3 %vm4166_vm3, %v5191_v49  ;;  %v5238_v26 = vld [vmem:[#allocation3 + $0x108] sm:$0xff] }
 0x751   :  { %5113 = vst.msk [vmem:[#allocation3 + $0x3b0] sm:$0xff] %vm4166_vm3, %v4904_v33  ;;  %v5141_v33 = vld [vmem:[#allocation3 + $0x10f] sm:$0xff] }
 0x752   :  { %5114 = vst.msk [vmem:[#allocation3 + $0x3c8] sm:$0xff] %vm4166_vm3, %v4905_v17  ;;  %v5294_v17 = vpack.c.bf16 %v5239_v45, %v5238_v26  ;;  %v5146_v26 = vld [vmem:[#allocation3 + $0x167] sm:$0xff]  ;;  %v5147_v45 = vld [vmem:[#allocation3 + $0x16f] sm:$0xff] }
 0x753   :  { %5115 = vst.msk [vmem:[#allocation3 + $0x3d0] sm:$0xff] %vm4166_vm3, %v4906_v2  ;;  %10097 = vmatmul.msk.bf16.gmra.mxu0 %vm4166_vm3, %v5930_v48  ;;  %v5196_v2 = vpack.c.bf16 %v5141_v33, %v5140_v0  ;;  %v5881_v48 = vld [vmem:[#allocation3 + $0x129] sm:$0xff] }
 0x754   :  { %5116 = vst.msk [vmem:[#allocation3 + $0x3e8] sm:$0xff] %vm4166_vm3, %v4907_v24  ;;  %v5936_v1 = vpack.c.bf16 %v5882_v15, %v5881_v48 }
 0x755   :  { %5117 = vst.msk [vmem:[#allocation3 + $0x3f0] sm:$0xff] %vm4166_vm3, %v4908_v38 }
 0x756   :  { %5118 = vst.msk [vmem:[#allocation3 + $0x408] sm:$0xff] %vm4166_vm3, %v4909_v35  ;;  %v5935_v35 = vpack.c.bf16 %v5880_v23, %v5879_v56  ;;  %v5199_v56 = vpack.c.bf16 %v5147_v45, %v5146_v26 }
 0x757   :  { %5119 = vst.msk [vmem:[#allocation3 + $0x410] sm:$0xff] %vm4166_vm3, %v4910_v27 }
 0x758   :  { %5120 = vst.msk [vmem:[#allocation3 + $0x428] sm:$0xff] %vm4166_vm3, %v4911_v4  ;;  %v5240_v4 = vld [vmem:[#allocation3 + $0x128] sm:$0xff] }
 0x759   :  { %5121 = vst.msk [vmem:[#allocation3 + $0x430] sm:$0xff] %vm4166_vm3, %v4912_v18  ;;  %v5295_v49 = vpack.c.bf16 %v5241_v52, %v5240_v4  ;;  %v5246_v52 = vld [vmem:[#allocation3 + $0x188] sm:$0xff] }
 0x75a   :  { %5122 = vst.msk [vmem:[#allocation3 + $0x448] sm:$0xff] %vm4166_vm3, %v4913_v3  ;;  %10135 = vmatmul.msk.bf16.gmra.mxu1 %vm4166_vm3, %v5192_v14 }
 0x75f   :  { %10024 = vmatmul.msk.bf16.gmra.mxu2 %vm4166_vm3, %v5290_v59 }
 0x760   :  { %10060 = vmatmul.msk.bf16.gmra.mxu3 %vm4166_vm3, %v5192_v14 }
 0x763   :  { %10098 = vmatmul.msk.bf16.gmra.mxu0 %vm4166_vm3, %v5931_v34 }
 0x76a   :  { %10136 = vmatmul.msk.bf16.gmra.mxu1 %vm4166_vm3, %v5193_v39 }
 0x76f   :  { %10025 = vmatmul.msk.bf16.gmra.mxu2 %vm4166_vm3, %v5291_v30  ;;  %v5144_v30 = vld [vmem:[#allocation3 + $0x147] sm:$0xff] }
 0x770   :  { %10061 = vmatmul.msk.bf16.gmra.mxu3 %vm4166_vm3, %v5193_v39  ;;  %v5145_v39 = vld [vmem:[#allocation3 + $0x14f] sm:$0xff] }
 0x771   :  { %v5198_v20 = vpack.c.bf16 %v5145_v39, %v5144_v30 }
 0x773   :  { %10099 = vmatmul.msk.bf16.gmra.mxu0 %vm4166_vm3, %v5932_v53 }
 0x77a   :  { %10137 = vmatmul.msk.bf16.gmra.mxu1 %vm4166_vm3, %v5194_v8 }
 0x77f   :  { %10026 = vmatmul.msk.bf16.gmra.mxu2 %vm4166_vm3, %v5292_v40  ;;  %v5883_v40 = vld [vmem:[#allocation3 + $0x149] sm:$0xff] }
 0x780   :  { %10062 = vmatmul.msk.bf16.gmra.mxu3 %vm4166_vm3, %v5194_v8  ;;  %v5884_v8 = vld [vmem:[#allocation3 + $0x151] sm:$0xff] }
 0x783   :  { %10100 = vmatmul.msk.bf16.gmra.mxu0 %vm4166_vm3, %v5933_v41  ;;  %v5937_v41 = vpack.c.bf16 %v5884_v8, %v5883_v40  ;;  %v5151_v40 = vld [vmem:[#allocation3 + $0x1af] sm:$0xff] }
 0x78a   :  { %10138 = vmatmul.msk.bf16.gmra.mxu1 %vm4166_vm3, %v5195_v12 }
 0x78f   :  { %10027 = vmatmul.msk.bf16.gmra.mxu2 %vm4166_vm3, %v5293_v63 }
 0x790   :  { %10063 = vmatmul.msk.bf16.gmra.mxu3 %vm4166_vm3, %v5195_v12  ;;  %v5244_v12 = vld [vmem:[#allocation3 + $0x168] sm:$0xff] }
 0x793   :  { %10101 = vmatmul.msk.bf16.gmra.mxu0 %vm4166_vm3, %v5934_v28  ;;  %v5245_v28 = vld [vmem:[#allocation3 + $0x170] sm:$0xff] }
 0x79a   :  { %10139 = vmatmul.msk.bf16.gmra.mxu1 %vm4166_vm3, %v5196_v2 }
 0x79f   :  { %10028 = vmatmul.msk.bf16.gmra.mxu2 %vm4166_vm3, %v5294_v17 }
 0x7a0   :  { %10064 = vmatmul.msk.bf16.gmra.mxu3 %vm4166_vm3, %v5196_v2  ;;  %v6073_v19 = vpop.f32.mrf.mxu0  ;;  %v5297_v2 = vpack.c.bf16 %v5245_v28, %v5244_v12  ;;  %v5890_v12 = vld [vmem:[#allocation3 + $0x1b1] sm:$0xff] }
 0x7a2   :  { %v5432_v24 = vpop.f32.mrf.mxu2 }
 0x7a3   :  { %v5703_v57 = vpop.f32.mrf.mxu3  ;;  %10102 = vmatmul.msk.bf16.gmra.mxu0 %vm4166_vm3, %v5935_v35 }
 0x7a4   :  { %v5704_v38 = vadd.f32 %v5703_v57, %v5432_v24  ;;  %v5885_v57 = vld [vmem:[#allocation3 + $0x169] sm:$0xff] }
 0x7a6   :  { %v6233_v46 = vadd.f32 %v6073_v19, %v5704_v38  ;;  %v5886_v38 = vld [vmem:[#allocation3 + $0x171] sm:$0xff] }
 0x7a7   :  { %v6507_v43 = vpop.f32.mrf.mxu1 }
 0x7a8   :  { %v6075_v3 = vpop.f32.mrf.mxu0  ;;  %v14390_v31 = vadd.f32 %v6507_v43, %v6233_v46  ;;  %v5938_v46 = vpack.c.bf16 %v5886_v38, %v5885_v57  ;;  %v5148_v43 = vld [vmem:[#allocation3 + $0x187] sm:$0xff]  ;;  %v5251_v57 = vld [vmem:[#allocation3 + $0x1d0] sm:$0xff] }
 0x7a9   :  { %v5152_v38 = vld [vmem:[#allocation3 + $0x1c7] sm:$0xff] }
 0x7aa   :  { %v5434_v37 = vpop.f32.mrf.mxu2  ;;  %10140 = vmatmul.msk.bf16.gmra.mxu1 %vm4166_vm3, %v5197_v7 }
 0x7ab   :  { %v5705_v27 = vpop.f32.mrf.mxu3 }
 0x7ac   :  { %v5706_v18 = vadd.f32 %v5705_v27, %v5434_v37 }
 0x7ae   :  { %v6234_v21 = vadd.f32 %v6075_v3, %v5706_v18 }
 0x7af   :  { %10029 = vmatmul.msk.bf16.gmra.mxu2 %vm4166_vm3, %v5295_v49  ;;  %v6509_v62 = vpop.f32.mrf.mxu1  ;;  %v5149_v49 = vld [vmem:[#allocation3 + $0x18f] sm:$0xff] }
 0x7b0   :  { %10065 = vmatmul.msk.bf16.gmra.mxu3 %vm4166_vm3, %v5197_v7  ;;  %v6078_v32 = vpop.f32.mrf.mxu0  ;;  %v14396_v25 = vadd.f32 %v6509_v62, %v6234_v21  ;;  %v5247_v21 = vld [vmem:[#allocation3 + $0x190] sm:$0xff] }
 0x7b1   :  { %v5888_v62 = vld [vmem:[#allocation3 + $0x191] sm:$0xff] }
 0x7b2   :  { %v5437_v51 = vpop.f32.mrf.mxu2 }
 0x7b3   :  { %v5708_v59 = vpop.f32.mrf.mxu3  ;;  %10103 = vmatmul.msk.bf16.gmra.mxu0 %vm4166_vm3, %v5936_v1 }
 0x7b4   :  { %v5709_v14 = vadd.f32 %v5708_v59, %v5437_v51  ;;  %v5200_v51 = vpack.c.bf16 %v5149_v49, %v5148_v43 }
 0x7b6   :  { %v6235_v34 = vadd.f32 %v6078_v32, %v5709_v14  ;;  %v5298_v32 = vpack.c.bf16 %v5247_v21, %v5246_v52  ;;  %v5887_v14 = vld [vmem:[#allocation3 + $0x189] sm:$0xff] }
 0x7b7   :  { %v6512_v53 = vpop.f32.mrf.mxu1 }
 0x7b8   :  { %v6080_v5 = vpop.f32.mrf.mxu0  ;;  %v14398_v60 = vadd.f32 %v6512_v53, %v6235_v34 }
 0x7ba   :  { %v5439_v6 = vpop.f32.mrf.mxu2  ;;  %10141 = vmatmul.msk.bf16.gmra.mxu1 %vm4166_vm3, %v5198_v20 }
 0x7bb   :  { %v5710_v54 = vpop.f32.mrf.mxu3 }
 0x7bc   :  { %v5711_v47 = vadd.f32 %v5710_v54, %v5439_v6 }
 0x7be   :  { %v6236_v9 = vadd.f32 %v6080_v5, %v5711_v47  ;;  %v5939_v5 = vpack.c.bf16 %v5888_v62, %v5887_v14  ;;  %v5248_v47 = vld [vmem:[#allocation3 + $0x1a8] sm:$0xff] }
 0x7bf   :  { %10030 = vmatmul.msk.bf16.gmra.mxu2 %vm4166_vm3, %v5296_v44  ;;  %v6514_v55 = vpop.f32.mrf.mxu1 }
 0x7c0   :  { %10066 = vmatmul.msk.bf16.gmra.mxu3 %vm4166_vm3, %v5198_v20  ;;  %v6083_v22 = vpop.f32.mrf.mxu0  ;;  %v14404_v29 = vadd.f32 %v6514_v55, %v6236_v9  ;;  %v5249_v20 = vld [vmem:[#allocation3 + $0x1b0] sm:$0xff]  ;;  %v5150_v9 = vld [vmem:[#allocation3 + $0x1a7] sm:$0xff] }
 0x7c2   :  { %v5442_v50 = vpop.f32.mrf.mxu2 }
 0x7c3   :  { %v5713_v61 = vpop.f32.mrf.mxu3  ;;  %10104 = vmatmul.msk.bf16.gmra.mxu0 %vm4166_vm3, %v5937_v41  ;;  %v5299_v41 = vpack.c.bf16 %v5249_v20, %v5248_v47  ;;  %v5893_v20 = vld [vmem:[#allocation3 + $0x1e9] sm:$0xff] }
 0x7c4   :  { %v5714_v58 = vadd.f32 %v5713_v61, %v5442_v50  ;;  %v5201_v61 = vpack.c.bf16 %v5151_v40, %v5150_v9  ;;  %v5894_v9 = vld [vmem:[#allocation3 + $0x1f1] sm:$0xff] }
 0x7c6   :  { %v6237_v63 = vadd.f32 %v6083_v22, %v5714_v58 }
 0x7c7   :  { %v6517_v17 = vpop.f32.mrf.mxu1 }
 0x7c8   :  { %v6085_v10 = vpop.f32.mrf.mxu0  ;;  %v14406_v23 = vadd.f32 %v6517_v17, %v6237_v63  ;;  %v5889_v63 = vld [vmem:[#allocation3 + $0x1a9] sm:$0xff] }
 0x7c9   :  { %v5940_v28 = vpack.c.bf16 %v5890_v12, %v5889_v63  ;;  %v5254_v12 = vld [vmem:[#allocation3 + $0x248] sm:$0xff] }
 0x7ca   :  { %v5444_v13 = vpop.f32.mrf.mxu2  ;;  %10142 = vmatmul.msk.bf16.gmra.mxu1 %vm4166_vm3, %v5199_v56 }
 0x7cb   :  { %v5715_v0 = vpop.f32.mrf.mxu3 }
 0x7cc   :  { %v5716_v33 = vadd.f32 %v5715_v0, %v5444_v13 }
 0x7ce   :  { %v6238_v24 = vadd.f32 %v6085_v10, %v5716_v33 }
 0x7cf   :  { %10031 = vmatmul.msk.bf16.gmra.mxu2 %vm4166_vm3, %v5297_v2  ;;  %v6519_v4 = vpop.f32.mrf.mxu1  ;;  %v5250_v2 = vld [vmem:[#allocation3 + $0x1c8] sm:$0xff] }
 0x7d0   :  { %10067 = vmatmul.msk.bf16.gmra.mxu3 %vm4166_vm3, %v5199_v56  ;;  %v6088_v19 = vpop.f32.mrf.mxu0  ;;  %v14412_v18 = vadd.f32 %v6519_v4, %v6238_v24 }
 0x7d2   :  { %v5447_v35 = vpop.f32.mrf.mxu2 }
 0x7d3   :  { %v5718_v37 = vpop.f32.mrf.mxu3  ;;  %10105 = vmatmul.msk.bf16.gmra.mxu0 %vm4166_vm3, %v5938_v46 }
 0x7d4   :  { %v5719_v27 = vadd.f32 %v5718_v37, %v5447_v35 }
 0x7d6   :  { %v6239_v3 = vadd.f32 %v6088_v19, %v5719_v27  ;;  %v5153_v19 = vld [vmem:[#allocation3 + $0x1cf] sm:$0xff]  ;;  %v5300_v27 = vpack.c.bf16 %v5251_v57, %v5250_v2 }
 0x7d7   :  { %v6522_v15 = vpop.f32.mrf.mxu1  ;;  %v5202_v4 = vpack.c.bf16 %v5153_v19, %v5152_v38 }
 0x7d8   :  { %v6090_v36 = vpop.f32.mrf.mxu0  ;;  %v14414_v1 = vadd.f32 %v6522_v15, %v6239_v3 }
 0x7da   :  { %v5449_v11 = vpop.f32.mrf.mxu2  ;;  %10143 = vmatmul.msk.bf16.gmra.mxu1 %vm4166_vm3, %v5200_v51 }
 0x7db   :  { %v5720_v7 = vpop.f32.mrf.mxu3 }
 0x7dc   :  { %v5721_v48 = vadd.f32 %v5720_v7, %v5449_v11  ;;  %v5892_v11 = vld [vmem:[#allocation3 + $0x1d1] sm:$0xff] }
 0x7de   :  { %v6240_v59 = vadd.f32 %v6090_v36, %v5721_v48  ;;  %v5891_v36 = vld [vmem:[#allocation3 + $0x1c9] sm:$0xff] }
 0x7df   :  { %10032 = vmatmul.msk.bf16.gmra.mxu2 %vm4166_vm3, %v5298_v32  ;;  %v6524_v30 = vpop.f32.mrf.mxu1  ;;  %v5941_v49 = vpack.c.bf16 %v5892_v11, %v5891_v36 }
 0x7e0   :  { %10068 = vmatmul.msk.bf16.gmra.mxu3 %vm4166_vm3, %v5200_v51  ;;  %v6093_v34 = vpop.f32.mrf.mxu0  ;;  %v14420_v39 = vadd.f32 %v6524_v30, %v6240_v59  ;;  %v5252_v59 = vld [vmem:[#allocation3 + $0x1e8] sm:$0xff] }
 0x7e2   :  { %v5452_v16 = vpop.f32.mrf.mxu2 }
 0x7e3   :  { %v5723_v6 = vpop.f32.mrf.mxu3  ;;  %10106 = vmatmul.msk.bf16.gmra.mxu0 %vm4166_vm3, %v5939_v5  ;;  %v5155_v5 = vld [vmem:[#allocation3 + $0x1ef] sm:$0xff] }
 0x7e4   :  { %v5724_v42 = vadd.f32 %v5723_v6, %v5452_v16  ;;  %v5154_v16 = vld [vmem:[#allocation3 + $0x1e7] sm:$0xff] }
 0x7e5   :  { %v5203_v47 = vpack.c.bf16 %v5155_v5, %v5154_v16 }
 0x7e6   :  { %v6241_v54 = vadd.f32 %v6093_v34, %v5724_v42  ;;  %v5253_v34 = vld [vmem:[#allocation3 + $0x1f0] sm:$0xff] }
 0x7e7   :  { %v6527_v50 = vpop.f32.mrf.mxu1 }
 0x7e8   :  { %v6095_v53 = vpop.f32.mrf.mxu0  ;;  %v14422_v58 = vadd.f32 %v6527_v50, %v6241_v54  ;;  %v5301_v54 = vpack.c.bf16 %v5253_v34, %v5252_v59  ;;  %v5257_v59 = vld [vmem:[#allocation3 + $0x270] sm:$0xff] }
 0x7ea   :  { %v5454_v44 = vpop.f32.mrf.mxu2  ;;  %10144 = vmatmul.msk.bf16.gmra.mxu1 %vm4166_vm3, %v5201_v61 }
 0x7eb   :  { %v5725_v8 = vpop.f32.mrf.mxu3 }
 0x7ec   :  { %v5726_v22 = vadd.f32 %v5725_v8, %v5454_v44 }
 0x7ee   :  { %v6242_v55 = vadd.f32 %v6095_v53, %v5726_v22  ;;  %v5942_v22 = vpack.c.bf16 %v5894_v9, %v5893_v20 }
 0x7ef   :  { %10033 = vmatmul.msk.bf16.gmra.mxu2 %vm4166_vm3, %v5299_v41  ;;  %v6529_v0 = vpop.f32.mrf.mxu1 }
 0x7f0   :  { %10069 = vmatmul.msk.bf16.gmra.mxu3 %vm4166_vm3, %v5201_v61  ;;  %v6098_v10 = vpop.f32.mrf.mxu0  ;;  %v14428_v33 = vadd.f32 %v6529_v0, %v6242_v55 }
 0x7f2   :  { %v5457_v13 = vpop.f32.mrf.mxu2 }
 0x7f3   :  { %v5728_v26 = vpop.f32.mrf.mxu3  ;;  %10107 = vmatmul.msk.bf16.gmra.mxu0 %vm4166_vm3, %v5940_v28  ;;  %v5157_v28 = vld [vmem:[#allocation3 + $0x24f] sm:$0xff] }
 0x7f4   :  { %v5729_v45 = vadd.f32 %v5728_v26, %v5457_v13  ;;  %v5156_v13 = vld [vmem:[#allocation3 + $0x247] sm:$0xff] }
 0x7f5   :  { %v5204_v2 = vpack.c.bf16 %v5157_v28, %v5156_v13  ;;  %v5259_v13 = vld [vmem:[#allocation3 + $0x290] sm:$0xff]  ;;  %v5160_v28 = vld [vmem:[#allocation3 + $0x287] sm:$0xff] }
 0x7f6   :  { %v6243_v17 = vadd.f32 %v6098_v10, %v5729_v45  ;;  %v5255_v10 = vld [vmem:[#allocation3 + $0x250] sm:$0xff] }
 0x7f7   :  { %v6532_v37 = vpop.f32.mrf.mxu1 }
 0x7f8   :  { %v6100_v56 = vpop.f32.mrf.mxu0  ;;  %v14430_v3 = vadd.f32 %v6532_v37, %v6243_v17  ;;  %v5302_v17 = vpack.c.bf16 %v5255_v10, %v5254_v12 }
 0x7fa   :  { %v5459_v24 = vpop.f32.mrf.mxu2  ;;  %10145 = vmatmul.msk.bf16.gmra.mxu1 %vm4166_vm3, %v5202_v4 }
 0x7fb   :  { %v5730_v35 = vpop.f32.mrf.mxu3 }
 0x7fc   :  { %v5731_v46 = vadd.f32 %v5730_v35, %v5459_v24  ;;  %v6328_v24 = vld [vmem:[#allocation3 + $0x20f] sm:$0xff] }
 0x7fd   :  { %v5895_v35 = vld [vmem:[#allocation3 + $0x249] sm:$0xff] }
 0x7fe   :  { %v6244_v52 = vadd.f32 %v6100_v56, %v5731_v46  ;;  %v6327_v56 = vld [vmem:[#allocation3 + $0x207] sm:$0xff]  ;;  %v5896_v46 = vld [vmem:[#allocation3 + $0x251] sm:$0xff] }
 0x7ff   :  { %10034 = vmatmul.msk.bf16.gmra.mxu2 %vm4166_vm3, %v5300_v27  ;;  %v6534_v15 = vpop.f32.mrf.mxu1  ;;  %v6376_v37 = vpack.c.bf16 %v6328_v24, %v6327_v56 }
 0x800   :  { %10070 = vmatmul.msk.bf16.gmra.mxu3 %vm4166_vm3, %v5202_v4  ;;  %v6103_v21 = vpop.f32.mrf.mxu0  ;;  %v14436_v32 = vadd.f32 %v6534_v15, %v6244_v52  ;;  %v5943_v4 = vpack.c.bf16 %v5896_v46, %v5895_v35  ;;  %v5900_v35 = vld [vmem:[#allocation3 + $0x291] sm:$0xff] }
 0x802   :  { %v5462_v43 = vpop.f32.mrf.mxu2 }
 0x803   :  { %v5733_v7 = vpop.f32.mrf.mxu3  ;;  %10108 = vmatmul.msk.bf16.gmra.mxu0 %vm4166_vm3, %v5941_v49 }
 0x804   :  { %v5734_v48 = vadd.f32 %v5733_v7, %v5462_v43 }
 0x806   :  { %v6245_v51 = vadd.f32 %v6103_v21, %v5734_v48  ;;  %v5256_v48 = vld [vmem:[#allocation3 + $0x268] sm:$0xff] }
 0x807   :  { %v6537_v30 = vpop.f32.mrf.mxu1 }
 0x808   :  { %v6105_v14 = vpop.f32.mrf.mxu0  ;;  %v14438_v53 = vadd.f32 %v6537_v30, %v6245_v51 }
 0x80a   :  { %v5464_v62 = vpop.f32.mrf.mxu2  ;;  %10146 = vmatmul.msk.bf16.gmra.mxu1 %vm4166_vm3, %v5203_v47 }
 0x80b   :  { %v5735_v6 = vpop.f32.mrf.mxu3 }
 0x80c   :  { %v5736_v42 = vadd.f32 %v5735_v6, %v5464_v62  ;;  %v5159_v62 = vld [vmem:[#allocation3 + $0x26f] sm:$0xff]  ;;  %v5303_v6 = vpack.c.bf16 %v5257_v59, %v5256_v48 }
 0x80d   :  { %v5163_v59 = vld [vmem:[#allocation3 + $0x2af] sm:$0xff] }
 0x80e   :  { %v6246_v44 = vadd.f32 %v6105_v14, %v5736_v42  ;;  %v5158_v14 = vld [vmem:[#allocation3 + $0x267] sm:$0xff] }
 0x80f   :  { %10035 = vmatmul.msk.bf16.gmra.mxu2 %vm4166_vm3, %v5301_v54  ;;  %v6539_v61 = vpop.f32.mrf.mxu1  ;;  %v5205_v42 = vpack.c.bf16 %v5159_v62, %v5158_v14 }
 0x810   :  { %10071 = vmatmul.msk.bf16.gmra.mxu3 %vm4166_vm3, %v5203_v47  ;;  %v6108_v40 = vpop.f32.mrf.mxu0  ;;  %v14444_v55 = vadd.f32 %v6539_v61, %v6246_v44  ;;  %v5897_v47 = vld [vmem:[#allocation3 + $0x269] sm:$0xff]  ;;  %v5898_v44 = vld [vmem:[#allocation3 + $0x271] sm:$0xff] }
 0x812   :  { %v5467_v8 = vpop.f32.mrf.mxu2 }
 0x813   :  { %v5738_v50 = vpop.f32.mrf.mxu3  ;;  %10109 = vmatmul.msk.bf16.gmra.mxu0 %vm4166_vm3, %v5942_v22 }
 0x814   :  { %v5739_v41 = vadd.f32 %v5738_v50, %v5467_v8 }
 0x816   :  { %v6247_v63 = vadd.f32 %v6108_v40, %v5739_v41  ;;  %v5944_v40 = vpack.c.bf16 %v5898_v44, %v5897_v47  ;;  %v5902_v47 = vld [vmem:[#allocation3 + $0x2b1] sm:$0xff] }
 0x817   :  { %v6542_v38 = vpop.f32.mrf.mxu1 }
 0x818   :  { %v6110_v26 = vpop.f32.mrf.mxu0  ;;  %v14446_v19 = vadd.f32 %v6542_v38, %v6247_v63  ;;  %v5258_v63 = vld [vmem:[#allocation3 + $0x288] sm:$0xff] }
 0x819   :  { %v5899_v38 = vld [vmem:[#allocation3 + $0x289] sm:$0xff] }
 0x81a   :  { %v5469_v45 = vpop.f32.mrf.mxu2  ;;  %10147 = vmatmul.msk.bf16.gmra.mxu1 %vm4166_vm3, %v6376_v37 }
 0x81b   :  { %v5740_v0 = vpop.f32.mrf.mxu3 }
 0x81c   :  { %v5741_v57 = vadd.f32 %v5740_v0, %v5469_v45 }
 0x81e   :  { %v6248_v27 = vadd.f32 %v6110_v26, %v5741_v57  ;;  %v5161_v26 = vld [vmem:[#allocation3 + $0x28f] sm:$0xff] }
 0x81f   :  { %10036 = vmatmul.msk.bf16.gmra.mxu2 %vm4166_vm3, %v5302_v17  ;;  %v6544_v43 = vpop.f32.mrf.mxu1  ;;  %v5206_v56 = vpack.c.bf16 %v5161_v26, %v5160_v28  ;;  %v5164_v28 = vld [vmem:[#allocation3 + $0x2c7] sm:$0xff]  ;;  %v5165_v26 = vld [vmem:[#allocation3 + $0x2cf] sm:$0xff] }
 0x820   :  { %10072 = vmatmul.msk.bf16.gmra.mxu3 %vm4166_vm3, %v5204_v2  ;;  %v6113_v52 = vpop.f32.mrf.mxu0  ;;  %v14452_v49 = vadd.f32 %v6544_v43, %v6248_v27  ;;  %v5304_v2 = vpack.c.bf16 %v5259_v13, %v5258_v63  ;;  %v5945_v27 = vpack.c.bf16 %v5900_v35, %v5899_v38  ;;  %v5260_v43 = vld [vmem:[#allocation3 + $0x2a8] sm:$0xff]  ;;  %v5263_v13 = vld [vmem:[#allocation3 + $0x2d0] sm:$0xff] }
 0x821   :  { %v5262_v63 = vld [vmem:[#allocation3 + $0x2c8] sm:$0xff] }
 0x822   :  { %v5472_v36 = vpop.f32.mrf.mxu2  ;;  %v5903_v35 = vld [vmem:[#allocation3 + $0x2c9] sm:$0xff] }
 0x823   :  { %v5743_v11 = vpop.f32.mrf.mxu3  ;;  %10110 = vmatmul.msk.bf16.gmra.mxu0 %vm4166_vm3, %v5943_v4 }
 0x824   :  { %v5744_v21 = vadd.f32 %v5743_v11, %v5472_v36 }
 0x826   :  { %v6249_v7 = vadd.f32 %v6113_v52, %v5744_v21 }
 0x827   :  { %v6547_v5 = vpop.f32.mrf.mxu1 }
 0x828   :  { %v6115_v15 = vpop.f32.mrf.mxu0  ;;  %v14454_v30 = vadd.f32 %v6547_v5, %v6249_v7 }
 0x82a   :  { %v5474_v51 = vpop.f32.mrf.mxu2  ;;  %10148 = vmatmul.msk.bf16.gmra.mxu1 %vm4166_vm3, %v5205_v42 }
 0x82b   :  { %v5745_v34 = vpop.f32.mrf.mxu3 }
 0x82c   :  { %v5746_v16 = vadd.f32 %v5745_v34, %v5474_v51  ;;  %v5162_v51 = vld [vmem:[#allocation3 + $0x2a7] sm:$0xff] }
 0x82d   :  { %v5207_v5 = vpack.c.bf16 %v5163_v59, %v5162_v51  ;;  %v5265_v59 = vld [vmem:[#allocation3 + $0x2f0] sm:$0xff] }
 0x82e   :  { %v6250_v54 = vadd.f32 %v6115_v15, %v5746_v16  ;;  %v5261_v15 = vld [vmem:[#allocation3 + $0x2b0] sm:$0xff] }
 0x82f   :  { %10037 = vmatmul.msk.bf16.gmra.mxu2 %vm4166_vm3, %v5303_v6  ;;  %v6549_v50 = vpop.f32.mrf.mxu1  ;;  %v5305_v16 = vpack.c.bf16 %v5261_v15, %v5260_v43 }
 0x830   :  { %10073 = vmatmul.msk.bf16.gmra.mxu3 %vm4166_vm3, %v5205_v42  ;;  %v6118_v20 = vpop.f32.mrf.mxu0  ;;  %v14460_v41 = vadd.f32 %v6549_v50, %v6250_v54  ;;  %v5901_v54 = vld [vmem:[#allocation3 + $0x2a9] sm:$0xff] }
 0x832   :  { %v5477_v9 = vpop.f32.mrf.mxu2 }
 0x833   :  { %v5748_v8 = vpop.f32.mrf.mxu3  ;;  %10111 = vmatmul.msk.bf16.gmra.mxu0 %vm4166_vm3, %v5944_v40 }
 0x834   :  { %v5749_v22 = vadd.f32 %v5748_v8, %v5477_v9  ;;  %v5946_v9 = vpack.c.bf16 %v5902_v47, %v5901_v54 }
 0x836   :  { %v6251_v61 = vadd.f32 %v6118_v20, %v5749_v22 }
 0x837   :  { %v6552_v17 = vpop.f32.mrf.mxu1 }
 0x838   :  { %v6120_v12 = vpop.f32.mrf.mxu0  ;;  %v14462_v24 = vadd.f32 %v6552_v17, %v6251_v61 }
 0x83a   :  { %v5479_v10 = vpop.f32.mrf.mxu2  ;;  %10149 = vmatmul.msk.bf16.gmra.mxu1 %vm4166_vm3, %v5206_v56 }
 0x83b   :  { %v5750_v45 = vpop.f32.mrf.mxu3 }
 0x83c   :  { %v5751_v0 = vadd.f32 %v5750_v45, %v5479_v10 }
 0x83e   :  { %v6252_v57 = vadd.f32 %v6120_v12, %v5751_v0 }
 0x83f   :  { %10038 = vmatmul.msk.bf16.gmra.mxu2 %vm4166_vm3, %v5304_v2  ;;  %v6554_v36 = vpop.f32.mrf.mxu1  ;;  %v5306_v2 = vpack.c.bf16 %v5263_v13, %v5262_v63 }
 0x840   :  { %10074 = vmatmul.msk.bf16.gmra.mxu3 %vm4166_vm3, %v5206_v56  ;;  %v6123_v46 = vpop.f32.mrf.mxu0  ;;  %v14468_v11 = vadd.f32 %v6554_v36, %v6252_v57  ;;  %v5208_v56 = vpack.c.bf16 %v5165_v26, %v5164_v28  ;;  %v5266_v28 = vld [vmem:[#allocation3 + $0x308] sm:$0xff] }
 0x842   :  { %v5482_v37 = vpop.f32.mrf.mxu2 }
 0x843   :  { %v5753_v4 = vpop.f32.mrf.mxu3  ;;  %10112 = vmatmul.msk.bf16.gmra.mxu0 %vm4166_vm3, %v5945_v27 }
 0x844   :  { %v5754_v52 = vadd.f32 %v5753_v4, %v5482_v37 }
 0x846   :  { %v6253_v21 = vadd.f32 %v6123_v46, %v5754_v52  ;;  %v5904_v46 = vld [vmem:[#allocation3 + $0x2d1] sm:$0xff] }
 0x847   :  { %v6557_v34 = vpop.f32.mrf.mxu1  ;;  %v5947_v4 = vpack.c.bf16 %v5904_v46, %v5903_v35 }
 0x848   :  { %v6125_v7 = vpop.f32.mrf.mxu0  ;;  %v14470_v6 = vadd.f32 %v6557_v34, %v6253_v21 }
 0x84a   :  { %v5484_v48 = vpop.f32.mrf.mxu2  ;;  %10150 = vmatmul.msk.bf16.gmra.mxu1 %vm4166_vm3, %v5207_v5 }
 0x84b   :  { %v5755_v14 = vpop.f32.mrf.mxu3 }
 0x84c   :  { %v5756_v62 = vadd.f32 %v5755_v14, %v5484_v48  ;;  %v5264_v48 = vld [vmem:[#allocation3 + $0x2e8] sm:$0xff] }
 0x84d   :  { %v5166_v14 = vld [vmem:[#allocation3 + $0x2e7] sm:$0xff] }
 0x84e   :  { %v6254_v42 = vadd.f32 %v6125_v7, %v5756_v62  ;;  %v5167_v62 = vld [vmem:[#allocation3 + $0x2ef] sm:$0xff] }
 0x84f   :  { %10039 = vmatmul.msk.bf16.gmra.mxu2 %vm4166_vm3, %v5305_v16  ;;  %v6559_v22 = vpop.f32.mrf.mxu1  ;;  %v5209_v54 = vpack.c.bf16 %v5167_v62, %v5166_v14 }
 0x850   :  { %10075 = vmatmul.msk.bf16.gmra.mxu3 %vm4166_vm3, %v5207_v5  ;;  %v6128_v44 = vpop.f32.mrf.mxu0  ;;  %v14476_v50 = vadd.f32 %v6559_v22, %v6254_v42  ;;  %v5307_v42 = vpack.c.bf16 %v5265_v59, %v5264_v48 }
 0x852   :  { %v5487_v20 = vpop.f32.mrf.mxu2 }
 0x853   :  { %v5758_v40 = vpop.f32.mrf.mxu3  ;;  %10113 = vmatmul.msk.bf16.gmra.mxu0 %vm4166_vm3, %v5946_v9  ;;  %v5906_v9 = vld [vmem:[#allocation3 + $0x2f1] sm:$0xff] }
 0x854   :  { %v5759_v8 = vadd.f32 %v5758_v40, %v5487_v20  ;;  %v5905_v20 = vld [vmem:[#allocation3 + $0x2e9] sm:$0xff] }
 0x855   :  { %v5948_v22 = vpack.c.bf16 %v5906_v9, %v5905_v20 }
 0x856   :  { %v6255_v61 = vadd.f32 %v6128_v44, %v5759_v8 }
 0x857   :  { %v6562_v17 = vpop.f32.mrf.mxu1 }
 0x858   :  { %v6130_v12 = vpop.f32.mrf.mxu0  ;;  %v14478_v57 = vadd.f32 %v6562_v17, %v6255_v61  ;;  %v5168_v17 = vld [vmem:[#allocation3 + $0x307] sm:$0xff] }
 0x85a   :  { %v5489_v10 = vpop.f32.mrf.mxu2  ;;  %10151 = vmatmul.msk.bf16.gmra.mxu1 %vm4166_vm3, %v5208_v56 }
 0x85b   :  { %v5760_v45 = vpop.f32.mrf.mxu3 }
 0x85c   :  { %v5761_v0 = vadd.f32 %v5760_v45, %v5489_v10 }
 0x85e   :  { %v6256_v38 = vadd.f32 %v6130_v12, %v5761_v0  ;;  %v5267_v0 = vld [vmem:[#allocation3 + $0x310] sm:$0xff] }
 0x85f   :  { %10040 = vmatmul.msk.bf16.gmra.mxu2 %vm4166_vm3, %v5306_v2  ;;  %v6564_v21 = vpop.f32.mrf.mxu1  ;;  %v5169_v2 = vld [vmem:[#allocation3 + $0x30f] sm:$0xff]  ;;  %v5308_v46 = vpack.c.bf16 %v5267_v0, %v5266_v28 }
 0x860   :  { %10076 = vmatmul.msk.bf16.gmra.mxu3 %vm4166_vm3, %v5208_v56  ;;  %v6133_v37 = vpop.f32.mrf.mxu0  ;;  %v14484_v43 = vadd.f32 %v6564_v21, %v6256_v38 }
 0x862   :  { %v5492_v27 = vpop.f32.mrf.mxu2 }
 0x863   :  { %v5763_v52 = vpop.f32.mrf.mxu3  ;;  %10114 = vmatmul.msk.bf16.gmra.mxu0 %vm4166_vm3, %v5947_v4 }
 0x864   :  { %v5764_v36 = vadd.f32 %v5763_v52, %v5492_v27  ;;  %v5907_v52 = vld [vmem:[#allocation3 + $0x309] sm:$0xff] }
 0x866   :  { %v6257_v7 = vadd.f32 %v6133_v37, %v5764_v36  ;;  %v5210_v37 = vpack.c.bf16 %v5169_v2, %v5168_v17  ;;  %v5908_v36 = vld [vmem:[#allocation3 + $0x311] sm:$0xff] }
 0x867   :  { %v6567_v5 = vpop.f32.mrf.mxu1  ;;  %v5949_v48 = vpack.c.bf16 %v5908_v36, %v5907_v52  ;;  %v5172_v52 = vld [vmem:[#allocation3 + $0x347] sm:$0xff]  ;;  %v5173_v36 = vld [vmem:[#allocation3 + $0x34f] sm:$0xff] }
 0x868   :  { %v6135_v15 = vpop.f32.mrf.mxu0  ;;  %v14486_v47 = vadd.f32 %v6567_v5, %v6257_v7 }
 0x86a   :  { %v5494_v51 = vpop.f32.mrf.mxu2  ;;  %10152 = vmatmul.msk.bf16.gmra.mxu1 %vm4166_vm3, %v5209_v54 }
 0x86b   :  { %v5765_v34 = vpop.f32.mrf.mxu3 }
 0x86c   :  { %v5766_v16 = vadd.f32 %v5765_v34, %v5494_v51  ;;  %v5268_v34 = vld [vmem:[#allocation3 + $0x328] sm:$0xff] }
 0x86e   :  { %v6258_v44 = vadd.f32 %v6135_v15, %v5766_v16 }
 0x86f   :  { %10041 = vmatmul.msk.bf16.gmra.mxu2 %vm4166_vm3, %v5307_v42  ;;  %v6569_v12 = vpop.f32.mrf.mxu1  ;;  %v5269_v42 = vld [vmem:[#allocation3 + $0x330] sm:$0xff] }
 0x870   :  { %10077 = vmatmul.msk.bf16.gmra.mxu3 %vm4166_vm3, %v5209_v54  ;;  %v6138_v40 = vpop.f32.mrf.mxu0  ;;  %v14492_v10 = vadd.f32 %v6569_v12, %v6258_v44  ;;  %v5170_v54 = vld [vmem:[#allocation3 + $0x327] sm:$0xff]  ;;  %v5171_v44 = vld [vmem:[#allocation3 + $0x32f] sm:$0xff] }
 0x871   :  { %v5909_v12 = vld [vmem:[#allocation3 + $0x329] sm:$0xff] }
 0x872   :  { %v5497_v8 = vpop.f32.mrf.mxu2 }
 0x873   :  { %v5768_v61 = vpop.f32.mrf.mxu3  ;;  %10115 = vmatmul.msk.bf16.gmra.mxu0 %vm4166_vm3, %v5948_v22  ;;  %v5211_v22 = vpack.c.bf16 %v5171_v44, %v5170_v54 }
 0x874   :  { %v5769_v63 = vadd.f32 %v5768_v61, %v5497_v8  ;;  %v5309_v8 = vpack.c.bf16 %v5269_v42, %v5268_v34  ;;  %v5911_v34 = vld [vmem:[#allocation3 + $0x349] sm:$0xff] }
 0x876   :  { %v6259_v13 = vadd.f32 %v6138_v40, %v5769_v63 }
 0x877   :  { %v6572_v35 = vpop.f32.mrf.mxu1 }
 0x878   :  { %v6140_v26 = vpop.f32.mrf.mxu0  ;;  %v14494_v27 = vadd.f32 %v6572_v35, %v6259_v13  ;;  %v5910_v13 = vld [vmem:[#allocation3 + $0x331] sm:$0xff]  ;;  %v5270_v35 = vld [vmem:[#allocation3 + $0x348] sm:$0xff] }
 0x87a   :  { %v5499_v45 = vpop.f32.mrf.mxu2  ;;  %10153 = vmatmul.msk.bf16.gmra.mxu1 %vm4166_vm3, %v5210_v37 }
 0x87b   :  { %v5770_v56 = vpop.f32.mrf.mxu3 }
 0x87c   :  { %v5771_v38 = vadd.f32 %v5770_v56, %v5499_v45  ;;  %v5950_v45 = vpack.c.bf16 %v5910_v13, %v5909_v12  ;;  %v5273_v13 = vld [vmem:[#allocation3 + $0x370] sm:$0xff] }
 0x87e   :  { %v6260_v4 = vadd.f32 %v6140_v26, %v5771_v38 }
 0x87f   :  { %10042 = vmatmul.msk.bf16.gmra.mxu2 %vm4166_vm3, %v5308_v46  ;;  %v6574_v59 = vpop.f32.mrf.mxu1 }
 0x880   :  { %10078 = vmatmul.msk.bf16.gmra.mxu3 %vm4166_vm3, %v5210_v37  ;;  %v6143_v21 = vpop.f32.mrf.mxu0  ;;  %v14500_v14 = vadd.f32 %v6574_v59, %v6260_v4  ;;  %v5271_v4 = vld [vmem:[#allocation3 + $0x350] sm:$0xff] }
 0x882   :  { %v5502_v7 = vpop.f32.mrf.mxu2 }
 0x883   :  { %v5773_v15 = vpop.f32.mrf.mxu3  ;;  %10116 = vmatmul.msk.bf16.gmra.mxu0 %vm4166_vm3, %v5949_v48 }
 0x884   :  { %v5774_v51 = vadd.f32 %v5773_v15, %v5502_v7  ;;  %v5310_v15 = vpack.c.bf16 %v5271_v4, %v5270_v35  ;;  %v5914_v4 = vld [vmem:[#allocation3 + $0x371] sm:$0xff] }
 0x886   :  { %v6261_v62 = vadd.f32 %v6143_v21, %v5774_v51  ;;  %v5212_v51 = vpack.c.bf16 %v5173_v36, %v5172_v52 }
 0x887   :  { %v6577_v40 = vpop.f32.mrf.mxu1 }
 0x888   :  { %v6145_v16 = vpop.f32.mrf.mxu0  ;;  %v14502_v61 = vadd.f32 %v6577_v40, %v6261_v62 }
 0x88a   :  { %v5504_v5 = vpop.f32.mrf.mxu2  ;;  %10154 = vmatmul.msk.bf16.gmra.mxu1 %vm4166_vm3, %v5211_v22 }
 0x88b   :  { %v5775_v20 = vpop.f32.mrf.mxu3 }
 0x88c   :  { %v5776_v9 = vadd.f32 %v5775_v20, %v5504_v5 }
 0x88e   :  { %v6262_v63 = vadd.f32 %v6145_v16, %v5776_v9  ;;  %v5912_v16 = vld [vmem:[#allocation3 + $0x351] sm:$0xff] }
 0x88f   :  { %10043 = vmatmul.msk.bf16.gmra.mxu2 %vm4166_vm3, %v5309_v8  ;;  %v6579_v2 = vpop.f32.mrf.mxu1  ;;  %v5951_v54 = vpack.c.bf16 %v5912_v16, %v5911_v34  ;;  %v5274_v34 = vld [vmem:[#allocation3 + $0x388] sm:$0xff] }
 0x890   :  { %10079 = vmatmul.msk.bf16.gmra.mxu3 %vm4166_vm3, %v5211_v22  ;;  %v6148_v28 = vpop.f32.mrf.mxu0  ;;  %v14508_v56 = vadd.f32 %v6579_v2, %v6262_v63  ;;  %v5272_v22 = vld [vmem:[#allocation3 + $0x368] sm:$0xff] }
 0x891   :  { %v5311_v2 = vpack.c.bf16 %v5273_v13, %v5272_v22 }
 0x892   :  { %v5507_v26 = vpop.f32.mrf.mxu2 }
 0x893   :  { %v5778_v0 = vpop.f32.mrf.mxu3  ;;  %10117 = vmatmul.msk.bf16.gmra.mxu0 %vm4166_vm3, %v5950_v45 }
 0x894   :  { %v5779_v17 = vadd.f32 %v5778_v0, %v5507_v26  ;;  %v5175_v26 = vld [vmem:[#allocation3 + $0x36f] sm:$0xff] }
 0x896   :  { %v6263_v38 = vadd.f32 %v6148_v28, %v5779_v17  ;;  %v5174_v28 = vld [vmem:[#allocation3 + $0x367] sm:$0xff] }
 0x897   :  { %v6582_v48 = vpop.f32.mrf.mxu1 }
 0x898   :  { %v6150_v46 = vpop.f32.mrf.mxu0  ;;  %v14510_v59 = vadd.f32 %v6582_v48, %v6263_v38  ;;  %v5213_v38 = vpack.c.bf16 %v5175_v26, %v5174_v28  ;;  %v5915_v28 = vld [vmem:[#allocation3 + $0x389] sm:$0xff]  ;;  %v5916_v26 = vld [vmem:[#allocation3 + $0x391] sm:$0xff] }
 0x89a   :  { %v5509_v37 = vpop.f32.mrf.mxu2  ;;  %10155 = vmatmul.msk.bf16.gmra.mxu1 %vm4166_vm3, %v5212_v51 }
 0x89b   :  { %v5780_v21 = vpop.f32.mrf.mxu3 }
 0x89c   :  { %v5781_v7 = vadd.f32 %v5780_v21, %v5509_v37  ;;  %v5913_v37 = vld [vmem:[#allocation3 + $0x369] sm:$0xff] }
 0x89d   :  { %v5952_v21 = vpack.c.bf16 %v5914_v4, %v5913_v37 }
 0x89e   :  { %v6264_v62 = vadd.f32 %v6150_v46, %v5781_v7 }
 0x89f   :  { %10044 = vmatmul.msk.bf16.gmra.mxu2 %vm4166_vm3, %v5310_v15  ;;  %v6584_v9 = vpop.f32.mrf.mxu1 }
 0x8a0   :  { %10080 = vmatmul.msk.bf16.gmra.mxu3 %vm4166_vm3, %v5212_v51  ;;  %v6153_v5 = vpop.f32.mrf.mxu0  ;;  %v14516_v40 = vadd.f32 %v6584_v9, %v6264_v62 }
 0x8a2   :  { %v5512_v42 = vpop.f32.mrf.mxu2 }
 0x8a3   :  { %v5783_v44 = vpop.f32.mrf.mxu3  ;;  %10118 = vmatmul.msk.bf16.gmra.mxu0 %vm4166_vm3, %v5951_v54  ;;  %v5176_v54 = vld [vmem:[#allocation3 + $0x387] sm:$0xff] }
 0x8a4   :  { %v5784_v20 = vadd.f32 %v5783_v44, %v5512_v42  ;;  %v5275_v42 = vld [vmem:[#allocation3 + $0x390] sm:$0xff] }
 0x8a5   :  { %v5177_v44 = vld [vmem:[#allocation3 + $0x38f] sm:$0xff]  ;;  %v5312_v22 = vpack.c.bf16 %v5275_v42, %v5274_v34 }
 0x8a6   :  { %v6265_v8 = vadd.f32 %v6153_v5, %v5784_v20 }
 0x8a7   :  { %v6587_v17 = vpop.f32.mrf.mxu1 }
 0x8a8   :  { %v6155_v63 = vpop.f32.mrf.mxu0  ;;  %v14518_v35 = vadd.f32 %v6587_v17, %v6265_v8  ;;  %v5953_v17 = vpack.c.bf16 %v5916_v26, %v5915_v28 }
 0x8aa   :  { %v5514_v12 = vpop.f32.mrf.mxu2  ;;  %10156 = vmatmul.msk.bf16.gmra.mxu1 %vm4166_vm3, %v5213_v38 }
 0x8ab   :  { %v5785_v45 = vpop.f32.mrf.mxu3 }
 0x8ac   :  { %v5786_v0 = vadd.f32 %v5785_v45, %v5514_v12 }
 0x8ae   :  { %v6266_v46 = vadd.f32 %v6155_v63, %v5786_v0  ;;  %v5214_v63 = vpack.c.bf16 %v5177_v44, %v5176_v54 }
 0x8af   :  { %10045 = vmatmul.msk.bf16.gmra.mxu2 %vm4166_vm3, %v5311_v2  ;;  %v6589_v15 = vpop.f32.mrf.mxu1 }
 0x8b0   :  { %10081 = vmatmul.msk.bf16.gmra.mxu3 %vm4166_vm3, %v5213_v38  ;;  %v6158_v52 = vpop.f32.mrf.mxu0  ;;  %v14524_v51 = vadd.f32 %v6589_v15, %v6266_v46  ;;  %v5179_v15 = vld [vmem:[#allocation3 + $0x3af] sm:$0xff] }
 0x8b2   :  { %v5517_v36 = vpop.f32.mrf.mxu2 }
 0x8b3   :  { %v5788_v7 = vpop.f32.mrf.mxu3  ;;  %10119 = vmatmul.msk.bf16.gmra.mxu0 %vm4166_vm3, %v5952_v21 }
 0x8b4   :  { %v5789_v48 = vadd.f32 %v5788_v7, %v5517_v36  ;;  %v5277_v7 = vld [vmem:[#allocation3 + $0x3b0] sm:$0xff] }
 0x8b6   :  { %v6267_v62 = vadd.f32 %v6158_v52, %v5789_v48  ;;  %v5276_v52 = vld [vmem:[#allocation3 + $0x3a8] sm:$0xff] }
 0x8b7   :  { %v6592_v8 = vpop.f32.mrf.mxu1  ;;  %v5178_v48 = vld [vmem:[#allocation3 + $0x3a7] sm:$0xff] }
 0x8b8   :  { %v6160_v16 = vpop.f32.mrf.mxu0  ;;  %v14526_v12 = vadd.f32 %v6592_v8, %v6267_v62  ;;  %v5215_v42 = vpack.c.bf16 %v5179_v15, %v5178_v48 }
 0x8ba   :  { %v5519_v5 = vpop.f32.mrf.mxu2  ;;  %10157 = vmatmul.msk.bf16.gmra.mxu1 %vm4166_vm3, %v5214_v63 }
 0x8bb   :  { %v5790_v20 = vpop.f32.mrf.mxu3 }
 0x8bc   :  { %v5791_v9 = vadd.f32 %v5790_v20, %v5519_v5  ;;  %v5313_v5 = vpack.c.bf16 %v5277_v7, %v5276_v52  ;;  %v5917_v20 = vld [vmem:[#allocation3 + $0x3a9] sm:$0xff] }
 0x8bd   :  { %v5181_v52 = vld [vmem:[#allocation3 + $0x3cf] sm:$0xff] }
 0x8be   :  { %v6268_v13 = vadd.f32 %v6160_v16, %v5791_v9  ;;  %v5918_v9 = vld [vmem:[#allocation3 + $0x3b1] sm:$0xff] }
 0x8bf   :  { %10046 = vmatmul.msk.bf16.gmra.mxu2 %vm4166_vm3, %v5312_v22  ;;  %v6594_v46 = vpop.f32.mrf.mxu1 }
 0x8c0   :  { %10082 = vmatmul.msk.bf16.gmra.mxu3 %vm4166_vm3, %v5214_v63  ;;  %v6163_v45 = vpop.f32.mrf.mxu0  ;;  %v14532_v37 = vadd.f32 %v6594_v46, %v6268_v13  ;;  %v5954_v63 = vpack.c.bf16 %v5918_v9, %v5917_v20  ;;  %v5279_v46 = vld [vmem:[#allocation3 + $0x3d0] sm:$0xff] }
 0x8c2   :  { %v5522_v0 = vpop.f32.mrf.mxu2 }
 0x8c3   :  { %v5793_v2 = vpop.f32.mrf.mxu3  ;;  %10120 = vmatmul.msk.bf16.gmra.mxu0 %vm4166_vm3, %v5953_v17  ;;  %v5278_v17 = vld [vmem:[#allocation3 + $0x3c8] sm:$0xff] }
 0x8c4   :  { %v5794_v38 = vadd.f32 %v5793_v2, %v5522_v0  ;;  %v5314_v48 = vpack.c.bf16 %v5279_v46, %v5278_v17  ;;  %v5281_v17 = vld [vmem:[#allocation3 + $0x3f0] sm:$0xff] }
 0x8c6   :  { %v6269_v4 = vadd.f32 %v6163_v45, %v5794_v38 }
 0x8c7   :  { %v6597_v16 = vpop.f32.mrf.mxu1 }
 0x8c8   :  { %v6165_v36 = vpop.f32.mrf.mxu0  ;;  %v14534_v54 = vadd.f32 %v6597_v16, %v6269_v4  ;;  %v5180_v4 = vld [vmem:[#allocation3 + $0x3c7] sm:$0xff] }
 0x8c9   :  { %v5216_v15 = vpack.c.bf16 %v5181_v52, %v5180_v4  ;;  %v5919_v16 = vld [vmem:[#allocation3 + $0x3c9] sm:$0xff] }
 0x8ca   :  { %v5524_v21 = vpop.f32.mrf.mxu2  ;;  %10158 = vmatmul.msk.bf16.gmra.mxu1 %vm4166_vm3, %v5215_v42 }
 0x8cb   :  { %v5795_v62 = vpop.f32.mrf.mxu3 }
 0x8cc   :  { %v5796_v34 = vadd.f32 %v5795_v62, %v5524_v21 }
 0x8ce   :  { %v6270_v44 = vadd.f32 %v6165_v36, %v5796_v34 }
 0x8cf   :  { %10047 = vmatmul.msk.bf16.gmra.mxu2 %vm4166_vm3, %v5313_v5  ;;  %v6599_v26 = vpop.f32.mrf.mxu1  ;;  %v5920_v5 = vld [vmem:[#allocation3 + $0x3d1] sm:$0xff] }
 0x8d0   :  { %10083 = vmatmul.msk.bf16.gmra.mxu3 %vm4166_vm3, %v5215_v42  ;;  %v6168_v8 = vpop.f32.mrf.mxu0  ;;  %v14540_v45 = vadd.f32 %v6599_v26, %v6270_v44  ;;  %v5955_v20 = vpack.c.bf16 %v5920_v5, %v5919_v16 }
 0x8d2   :  { %v5527_v22 = vpop.f32.mrf.mxu2 }
 0x8d3   :  { %v5798_v13 = vpop.f32.mrf.mxu3  ;;  %10121 = vmatmul.msk.bf16.gmra.mxu0 %vm4166_vm3, %v5954_v63 }
 0x8d4   :  { %v5799_v28 = vadd.f32 %v5798_v13, %v5527_v22 }
 0x8d6   :  { %v6271_v0 = vadd.f32 %v6168_v8, %v5799_v28  ;;  %v5280_v28 = vld [vmem:[#allocation3 + $0x3e8] sm:$0xff] }
 0x8d7   :  { %v6602_v7 = vpop.f32.mrf.mxu1 }
 0x8d8   :  { %v6170_v2 = vpop.f32.mrf.mxu0  ;;  %v14542_v62 = vadd.f32 %v6602_v7, %v6271_v0 }
 0x8da   :  { %v5529_v38 = vpop.f32.mrf.mxu2  ;;  %10159 = vmatmul.msk.bf16.gmra.mxu1 %vm4166_vm3, %v5216_v15 }
 0x8db   :  { %v5800_v36 = vpop.f32.mrf.mxu3 }
 0x8dc   :  { %v5801_v21 = vadd.f32 %v5800_v36, %v5529_v38  ;;  %v5183_v38 = vld [vmem:[#allocation3 + $0x3ef] sm:$0xff]  ;;  %v5315_v36 = vpack.c.bf16 %v5281_v17, %v5280_v28  ;;  %v5184_v17 = vld [vmem:[#allocation3 + $0x407] sm:$0xff] }
 0x8dd   :  { %v5283_v28 = vld [vmem:[#allocation3 + $0x410] sm:$0xff] }
 0x8de   :  { %v6272_v34 = vadd.f32 %v6170_v2, %v5801_v21  ;;  %v5182_v2 = vld [vmem:[#allocation3 + $0x3e7] sm:$0xff] }
 0x8df   :  { %10048 = vmatmul.msk.bf16.gmra.mxu2 %vm4166_vm3, %v5314_v48  ;;  %v6604_v22 = vpop.f32.mrf.mxu1  ;;  %v5217_v21 = vpack.c.bf16 %v5183_v38, %v5182_v2  ;;  %v5185_v2 = vld [vmem:[#allocation3 + $0x40f] sm:$0xff] }
 0x8e0   :  { %10084 = vmatmul.msk.bf16.gmra.mxu3 %vm4166_vm3, %v5216_v15  ;;  %v6173_v42 = vpop.f32.mrf.mxu0  ;;  %v14548_v63 = vadd.f32 %v6604_v22, %v6272_v34  ;;  %v5921_v15 = vld [vmem:[#allocation3 + $0x3e9] sm:$0xff]  ;;  %v5922_v34 = vld [vmem:[#allocation3 + $0x3f1] sm:$0xff] }
 0x8e1   :  { %v10361_v38 = vld [vmem:[%s16545_s8 + $0x28] sm:$0xff] }
 0x8e2   :  { %v5532_v44 = vpop.f32.mrf.mxu2  ;;  %7373 = vmatpush.bf16.msra.mxu3 %v10361_v38 }
 0x8e3   :  { %v5803_v9 = vpop.f32.mrf.mxu3  ;;  %10122 = vmatmul.msk.bf16.gmra.mxu0 %vm4166_vm3, %v5955_v20 }
 0x8e4   :  { %v5804_v8 = vadd.f32 %v5803_v9, %v5532_v44 }
 0x8e6   :  { %v6273_v13 = vadd.f32 %v6173_v42, %v5804_v8  ;;  %v5956_v42 = vpack.c.bf16 %v5922_v34, %v5921_v15  ;;  %v5923_v34 = vld [vmem:[#allocation3 + $0x409] sm:$0xff] }
 0x8e7   :  { %v6607_v52 = vpop.f32.mrf.mxu1 }
 0x8e8   :  { %v6175_v26 = vpop.f32.mrf.mxu0  ;;  %v14550_v7 = vadd.f32 %v6607_v52, %v6273_v13  ;;  %v5282_v13 = vld [vmem:[#allocation3 + $0x408] sm:$0xff] }
 0x8ea   :  { %v5534_v0 = vpop.f32.mrf.mxu2  ;;  %10160 = vmatmul.msk.bf16.gmra.mxu1 %vm4166_vm3, %v5217_v21 }
 0x8eb   :  { %v5805_v46 = vpop.f32.mrf.mxu3 }
 0x8ec   :  { %v5806_v4 = vadd.f32 %v5805_v46, %v5534_v0 }
 0x8ee   :  { %v6274_v48 = vadd.f32 %v6175_v26, %v5806_v4 }
 0x8ef   :  { %10049 = vmatmul.msk.bf16.gmra.mxu2 %vm4166_vm3, %v5315_v36  ;;  %v6609_v9 = vpop.f32.mrf.mxu1  ;;  %v5316_v36 = vpack.c.bf16 %v5283_v28, %v5282_v13  ;;  %v10364_v28 = vld [vmem:[%s16545_s8 + $0x40] sm:$0xff] }
 0x8f0   :  { %10085 = vmatmul.msk.bf16.gmra.mxu3 %vm4166_vm3, %v5217_v21  ;;  %v6178_v16 = vpop.f32.mrf.mxu0  ;;  %v14556_v8 = vadd.f32 %v6609_v9, %v6274_v48  ;;  %v5218_v21 = vpack.c.bf16 %v5185_v2, %v5184_v17  ;;  %8676 = vmatpush.bf16.msra.mxu2 %v10364_v28  ;;  %v5284_v2 = vld [vmem:[#allocation3 + $0x428] sm:$0xff] }
 0x8f2   :  { %v5537_v5 = vpop.f32.mrf.mxu2  ;;  %16972 = vst [vmem:[#allocation60_spill] sm:$0xff] %v14556_v8 }
 0x8f3   :  { %v5808_v44 = vpop.f32.mrf.mxu3  ;;  %10123 = vmatmul.msk.bf16.gmra.mxu0 %vm4166_vm3, %v5956_v42 }
 0x8f4   :  { %v5809_v20 = vadd.f32 %v5808_v44, %v5537_v5  ;;  %v10362_v44 = vld [vmem:[%s16545_s8 + $0x30] sm:$0xff] }
 0x8f5   :  { %7808 = vmatpush.bf16.msrb.mxu0 %v10362_v44 }
 0x8f6   :  { %v6275_v22 = vadd.f32 %v6178_v16, %v5809_v20  ;;  %v5924_v16 = vld [vmem:[#allocation3 + $0x411] sm:$0xff] }
 0x8f7   :  { %v6612_v52 = vpop.f32.mrf.mxu1  ;;  %v5957_v20 = vpack.c.bf16 %v5924_v16, %v5923_v34 }
 0x8f8   :  { %v6180_v26 = vpop.f32.mrf.mxu0  ;;  %v14561_v15 = vadd.f32 %v6612_v52, %v6275_v22  ;;  %v5186_v52 = vld [vmem:[#allocation3 + $0x427] sm:$0xff] }
 0x8fa   :  { %v5539_v0 = vpop.f32.mrf.mxu2  ;;  %16973 = vst [vmem:[#allocation61_spill] sm:$0xff] %v14561_v15  ;;  %10161 = vmatmul.msk.bf16.gmra.mxu1 %vm4166_vm3, %v5218_v21 }
 0x8fb   :  { %v5810_v46 = vpop.f32.mrf.mxu3 }
 0x8fc   :  { %v5811_v4 = vadd.f32 %v5810_v46, %v5539_v0 }
 0x8fe   :  { %v6276_v48 = vadd.f32 %v6180_v26, %v5811_v4  ;;  %v10363_v26 = vld [vmem:[%s16545_s8 + $0x38] sm:$0xff]  ;;  %v5285_v4 = vld [vmem:[#allocation3 + $0x430] sm:$0xff] }
 0x8ff   :  { %10050 = vmatmul.msk.bf16.gmra.mxu2 %vm4166_vm3, %v5316_v36  ;;  %v6614_v22 = vpop.f32.mrf.mxu1  ;;  %8242 = vmatpush.bf16.msra.mxu1 %v10363_v26  ;;  %v5187_v36 = vld [vmem:[#allocation3 + $0x42f] sm:$0xff] }
 0x900   :  { %10086 = vmatmul.msk.bf16.gmra.mxu3 %vm4166_vm3, %v5218_v21  ;;  %v6183_v5 = vpop.f32.mrf.mxu0  ;;  %v14576_v0 = vadd.f32 %v6614_v22, %v6276_v48  ;;  %v5219_v44 = vpack.c.bf16 %v5187_v36, %v5186_v52  ;;  %v5925_v48 = vld [vmem:[#allocation3 + $0x429] sm:$0xff] }
 0x901   :  { %v6732_v36 = vld [vmem:[#allocation3 + $0x30] sm:$0xff] }
 0x902   :  { %v5542_v42 = vpop.f32.mrf.mxu2  ;;  %16974 = vst [vmem:[#allocation8_spill] sm:$0xff] %v14576_v0 }
 0x903   :  { %v5813_v9 = vpop.f32.mrf.mxu3  ;;  %10124 = vmatmul.msk.bf16.gmra.mxu0 %vm4166_vm3, %v5957_v20 }
 0x904   :  { %v5814_v13 = vadd.f32 %v5813_v9, %v5542_v42  ;;  %v5317_v42 = vpack.c.bf16 %v5285_v4, %v5284_v2 }
 0x906   :  { %v6277_v17 = vadd.f32 %v6183_v5, %v5814_v13  ;;  %v5926_v5 = vld [vmem:[#allocation3 + $0x431] sm:$0xff] }
 0x907   :  { %v6617_v16 = vpop.f32.mrf.mxu1  ;;  %v5958_v28 = vpack.c.bf16 %v5926_v5, %v5925_v48 }
 0x908   :  { %v6185_v38 = vpop.f32.mrf.mxu0  ;;  %v14578_v20 = vadd.f32 %v6617_v16, %v6277_v17 }
 0x90a   :  { %v5544_v46 = vpop.f32.mrf.mxu2  ;;  %16975 = vst [vmem:[#allocation11_spill] sm:$0xff] %v14578_v20  ;;  %10162 = vmatmul.msk.bf16.gmra.mxu1 %vm4166_vm3, %v5219_v44 }
 0x90b   :  { %v5815_v21 = vpop.f32.mrf.mxu3 }
 0x90c   :  { %v5816_v34 = vadd.f32 %v5815_v21, %v5544_v46  ;;  %v7165_v21 = vld [vmem:[#allocation3 + $0x29] sm:$0xff] }
 0x90e   :  { %v6278_v9 = vadd.f32 %v6185_v38, %v5816_v34  ;;  %v6731_v38 = vld [vmem:[#allocation3 + $0x28] sm:$0xff]  ;;  %v7166_v34 = vld [vmem:[#allocation3 + $0x31] sm:$0xff] }
 0x90f   :  { %10051 = vmatmul.msk.bf16.gmra.mxu2 %vm4166_vm3, %v5317_v42  ;;  %v6619_v2 = vpop.f32.mrf.mxu1  ;;  %v6359_v42 = vld [vmem:[#allocation3 + $0x447] sm:$0xff]  ;;  %v6795_v48 = vpack.c.bf16 %v6732_v36, %v6731_v38  ;;  %v7229_v5 = vpack.c.bf16 %v7166_v34, %v7165_v21  ;;  %v6734_v21 = vld [vmem:[#allocation3 + $0x50] sm:$0xff] }
 0x910   :  { %10087 = vmatmul.msk.bf16.gmra.mxu3 %vm4166_vm3, %v5219_v44  ;;  %v6188_v13 = vpop.f32.mrf.mxu0  ;;  %v14584_v46 = vadd.f32 %v6619_v2, %v6278_v9  ;;  %v6360_v44 = vld [vmem:[#allocation3 + $0x44f] sm:$0xff] }
 0x911   :  { %v7601_v9 = vld [vmem:[#allocation3 + $0x4f] sm:$0xff] }
 0x912   :  { %v5547_v22 = vpop.f32.mrf.mxu2  ;;  %16976 = vst [vmem:[#allocation10_spill] sm:$0xff] %v14584_v46  ;;  %v7167_v34 = vld [vmem:[#allocation3 + $0x49] sm:$0xff] }
 0x913   :  { %v5818_v26 = vpop.f32.mrf.mxu3  ;;  %10125 = vmatmul.msk.bf16.gmra.mxu0 %vm4166_vm3, %v5958_v28  ;;  %v6392_v28 = vpack.c.bf16 %v6360_v44, %v6359_v42 }
 0x914   :  { %v5819_v0 = vadd.f32 %v5818_v26, %v5547_v22 }
 0x916   :  { %v6279_v17 = vadd.f32 %v6188_v13, %v5819_v0  ;;  %v7600_v0 = vld [vmem:[#allocation3 + $0x47] sm:$0xff] }
 0x917   :  { %v6622_v15 = vpop.f32.mrf.mxu1  ;;  %v7664_v46 = vpack.c.bf16 %v7601_v9, %v7600_v0 }
 0x918   :  { %v6190_v4 = vpop.f32.mrf.mxu0  ;;  %v14586_v22 = vadd.f32 %v6622_v15, %v6279_v17 }
 0x91a   :  { %v5549_v52 = vpop.f32.mrf.mxu2  ;;  %10163 = vmatmul.msk.bf16.gmra.mxu1 %vm4166_vm3, %v6392_v28 }
 0x91b   :  { %v5820_v16 = vpop.f32.mrf.mxu3 }
 0x91c   :  { %v5821_v20 = vadd.f32 %v5820_v16, %v5549_v52  ;;  %v7168_v16 = vld [vmem:[#allocation3 + $0x51] sm:$0xff] }
 0x91d   :  { %v7230_v28 = vpack.c.bf16 %v7168_v16, %v7167_v34  ;;  %v6736_v16 = vld [vmem:[#allocation3 + $0x70] sm:$0xff] }
 0x91e   :  { %v6280_v26 = vadd.f32 %v6190_v4, %v5821_v20  ;;  %v6733_v20 = vld [vmem:[#allocation3 + $0x48] sm:$0xff] }
 0x91f   :  { %10170 = vmatmul.msk.bf16.vlgmr.msrb.gmra.mxu2 %vm4166_vm3, %v6795_v48  ;;  %v6624_v38 = vpop.f32.mrf.mxu1 }
 0x920   :  { %10208 = vmatmul.msk.bf16.vlgmr.msra.gmra.mxu3 %vm4166_vm3, %v7229_v5  ;;  %v6193_v13 = vpop.f32.mrf.mxu0  ;;  %v14592_v15 = vadd.f32 %v6624_v38, %v6280_v26  ;;  %v6796_v5 = vpack.c.bf16 %v6734_v21, %v6733_v20  ;;  %v7603_v26 = vld [vmem:[#allocation3 + $0x6f] sm:$0xff] }
 0x922   :  { %v5552_v2 = vpop.f32.mrf.mxu2  ;;  %16977 = vst [vmem:[#allocation14_spill] sm:$0xff] %v14592_v15 }
 0x923   :  { %v5823_v8 = vpop.f32.mrf.mxu3  ;;  %10246 = vmatmul.msk.bf16.vlgmr.msrb.gmra.mxu0 %vm4166_vm3, %v7664_v46  ;;  %v7602_v46 = vld [vmem:[#allocation3 + $0x67] sm:$0xff] }
 0x924   :  { %v5824_v52 = vadd.f32 %v5823_v8, %v5552_v2  ;;  %v7665_v2 = vpack.c.bf16 %v7603_v26, %v7602_v46 }
 0x926   :  { %v6281_v17 = vadd.f32 %v6193_v13, %v5824_v52 }
 0x927   :  { %v6627_v48 = vpop.f32.mrf.mxu1 }
 0x928   :  { %v6195_v4 = vpop.f32.mrf.mxu0  ;;  %v14594_v0 = vadd.f32 %v6627_v48, %v6281_v17 }
 0x92a   :  { %v5554_v36 = vpop.f32.mrf.mxu2  ;;  %16978 = vst [vmem:[#allocation7_spill] sm:$0xff] %v14594_v0  ;;  %10284 = vmatmul.msk.bf16.vlgmr.msra.gmra.mxu1 %vm4166_vm3, %v6796_v5 }
 0x92b   :  { %v5825_v42 = vpop.f32.mrf.mxu3 }
 0x92c   :  { %v5826_v44 = vadd.f32 %v5825_v42, %v5554_v36  ;;  %v7169_v42 = vld [vmem:[#allocation3 + $0x69] sm:$0xff] }
 0x92e   :  { %v6282_v8 = vadd.f32 %v6195_v4, %v5826_v44  ;;  %v6735_v4 = vld [vmem:[#allocation3 + $0x68] sm:$0xff]  ;;  %v7170_v44 = vld [vmem:[#allocation3 + $0x71] sm:$0xff] }
 0x92f   :  { %10171 = vmatmul.msk.bf16.gmra.mxu2 %vm4166_vm3, %v6796_v5  ;;  %v6629_v20 = vpop.f32.mrf.mxu1  ;;  %v6797_v0 = vpack.c.bf16 %v6736_v16, %v6735_v4  ;;  %v7231_v15 = vpack.c.bf16 %v7170_v44, %v7169_v42  ;;  %v6738_v44 = vld [vmem:[#allocation3 + $0x90] sm:$0xff] }
 0x930   :  { %10209 = vmatmul.msk.bf16.gmra.mxu3 %vm4166_vm3, %v7230_v28  ;;  %v6198_v9 = vpop.f32.mrf.mxu0  ;;  %v14600_v36 = vadd.f32 %v6629_v20, %v6282_v8  ;;  %v7604_v8 = vld [vmem:[#allocation3 + $0x87] sm:$0xff] }
 0x932   :  { %v5557_v13 = vpop.f32.mrf.mxu2  ;;  %16979 = vst [vmem:[#allocation4_spill] sm:$0xff] %v14600_v36 }
 0x933   :  { %v5828_v52 = vpop.f32.mrf.mxu3  ;;  %10247 = vmatmul.msk.bf16.gmra.mxu0 %vm4166_vm3, %v7665_v2 }
 0x934   :  { %v5829_v38 = vadd.f32 %v5828_v52, %v5557_v13 }
 0x936   :  { %v6283_v17 = vadd.f32 %v6198_v9, %v5829_v38  ;;  %v7605_v9 = vld [vmem:[#allocation3 + $0x8f] sm:$0xff] }
 0x937   :  { %v6632_v5 = vpop.f32.mrf.mxu1  ;;  %v7666_v52 = vpack.c.bf16 %v7605_v9, %v7604_v8 }
 0x938   :  { %v6200_v21 = vpop.f32.mrf.mxu0  ;;  %v14602_v46 = vadd.f32 %v6632_v5, %v6283_v17 }
 0x93a   :  { %v5559_v34 = vpop.f32.mrf.mxu2  ;;  %16980 = vst [vmem:[#allocation16_spill] sm:$0xff] %v14602_v46  ;;  %10285 = vmatmul.msk.bf16.gmra.mxu1 %vm4166_vm3, %v6797_v0 }
 0x93b   :  { %v5830_v48 = vpop.f32.mrf.mxu3 }
 0x93c   :  { %v5831_v28 = vadd.f32 %v5830_v48, %v5559_v34  ;;  %v7172_v48 = vld [vmem:[#allocation3 + $0x91] sm:$0xff] }
 0x93e   :  { %v6284_v26 = vadd.f32 %v6200_v21, %v5831_v28  ;;  %v6737_v21 = vld [vmem:[#allocation3 + $0x88] sm:$0xff] }
 0x93f   :  { %10172 = vmatmul.msk.bf16.gmra.mxu2 %vm4166_vm3, %v6797_v0  ;;  %v6634_v4 = vpop.f32.mrf.mxu1  ;;  %v6798_v46 = vpack.c.bf16 %v6738_v44, %v6737_v21 }
 0x940   :  { %10210 = vmatmul.msk.bf16.gmra.mxu3 %vm4166_vm3, %v7231_v15  ;;  %v6203_v13 = vpop.f32.mrf.mxu0  ;;  %v14608_v34 = vadd.f32 %v6634_v4, %v6284_v26  ;;  %v7171_v15 = vld [vmem:[#allocation3 + $0x89] sm:$0xff] }
 0x941   :  { %v7232_v36 = vpack.c.bf16 %v7172_v48, %v7171_v15  ;;  %v7606_v26 = vld [vmem:[#allocation3 + $0xa7] sm:$0xff]  ;;  %v6740_v48 = vld [vmem:[#allocation3 + $0xb0] sm:$0xff] }
 0x942   :  { %v5562_v2 = vpop.f32.mrf.mxu2  ;;  %16981 = vst [vmem:[#allocation19_spill] sm:$0xff] %v14608_v34 }
 0x943   :  { %v5833_v38 = vpop.f32.mrf.mxu3  ;;  %10248 = vmatmul.msk.bf16.gmra.mxu0 %vm4166_vm3, %v7666_v52 }
 0x944   :  { %v5834_v20 = vadd.f32 %v5833_v38, %v5562_v2 }
 0x946   :  { %v6285_v17 = vadd.f32 %v6203_v13, %v5834_v20  ;;  %v7607_v13 = vld [vmem:[#allocation3 + $0xaf] sm:$0xff] }
 0x947   :  { %v6637_v0 = vpop.f32.mrf.mxu1  ;;  %v7667_v38 = vpack.c.bf16 %v7607_v13, %v7606_v26 }
 0x948   :  { %v6205_v16 = vpop.f32.mrf.mxu0  ;;  %v14610_v8 = vadd.f32 %v6637_v0, %v6285_v17 }
 0x94a   :  { %v5564_v42 = vpop.f32.mrf.mxu2  ;;  %16982 = vst [vmem:[#allocation36_spill] sm:$0xff] %v14610_v8  ;;  %10286 = vmatmul.msk.bf16.gmra.mxu1 %vm4166_vm3, %v6798_v46 }
 0x94b   :  { %v5835_v28 = vpop.f32.mrf.mxu3 }
 0x94c   :  { %v5836_v5 = vadd.f32 %v5835_v28, %v5564_v42  ;;  %v7174_v28 = vld [vmem:[#allocation3 + $0xb1] sm:$0xff] }
 0x94e   :  { %v6286_v9 = vadd.f32 %v6205_v16, %v5836_v5  ;;  %v6739_v16 = vld [vmem:[#allocation3 + $0xa8] sm:$0xff] }
 0x94f   :  { %10173 = vmatmul.msk.bf16.gmra.mxu2 %vm4166_vm3, %v6798_v46  ;;  %v6639_v21 = vpop.f32.mrf.mxu1  ;;  %v6799_v8 = vpack.c.bf16 %v6740_v48, %v6739_v16 }
 0x950   :  { %10211 = vmatmul.msk.bf16.gmra.mxu3 %vm4166_vm3, %v7232_v36  ;;  %v6208_v2 = vpop.f32.mrf.mxu0  ;;  %v14616_v42 = vadd.f32 %v6639_v21, %v6286_v9  ;;  %v7173_v36 = vld [vmem:[#allocation3 + $0xa9] sm:$0xff] }
 0x951   :  { %v7233_v34 = vpack.c.bf16 %v7174_v28, %v7173_v36  ;;  %v7608_v9 = vld [vmem:[#allocation3 + $0xc7] sm:$0xff]  ;;  %v6742_v28 = vld [vmem:[#allocation3 + $0xd0] sm:$0xff] }
 0x952   :  { %v5567_v52 = vpop.f32.mrf.mxu2  ;;  %16983 = vst [vmem:[#allocation18_spill] sm:$0xff] %v14616_v42 }
 0x953   :  { %v5838_v20 = vpop.f32.mrf.mxu3  ;;  %10249 = vmatmul.msk.bf16.gmra.mxu0 %vm4166_vm3, %v7667_v38 }
 0x954   :  { %v5839_v4 = vadd.f32 %v5838_v20, %v5567_v52 }
 0x956   :  { %v6287_v17 = vadd.f32 %v6208_v2, %v5839_v4  ;;  %v7609_v2 = vld [vmem:[#allocation3 + $0xcf] sm:$0xff] }
 0x957   :  { %v6642_v46 = vpop.f32.mrf.mxu1  ;;  %v7668_v20 = vpack.c.bf16 %v7609_v2, %v7608_v9 }
 0x958   :  { %v6210_v44 = vpop.f32.mrf.mxu0  ;;  %v14618_v26 = vadd.f32 %v6642_v46, %v6287_v17 }
 0x95a   :  { %v5569_v15 = vpop.f32.mrf.mxu2  ;;  %16984 = vst [vmem:[#allocation22_spill] sm:$0xff] %v14618_v26  ;;  %10287 = vmatmul.msk.bf16.gmra.mxu1 %vm4166_vm3, %v6799_v8 }
 0x95b   :  { %v5840_v5 = vpop.f32.mrf.mxu3 }
 0x95c   :  { %v5841_v0 = vadd.f32 %v5840_v5, %v5569_v15  ;;  %v7176_v5 = vld [vmem:[#allocation3 + $0xd1] sm:$0xff] }
 0x95e   :  { %v6288_v13 = vadd.f32 %v6210_v44, %v5841_v0  ;;  %v6741_v44 = vld [vmem:[#allocation3 + $0xc8] sm:$0xff] }
 0x95f   :  { %10174 = vmatmul.msk.bf16.gmra.mxu2 %vm4166_vm3, %v6799_v8  ;;  %v6644_v16 = vpop.f32.mrf.mxu1  ;;  %v6800_v26 = vpack.c.bf16 %v6742_v28, %v6741_v44 }
 0x960   :  { %10212 = vmatmul.msk.bf16.gmra.mxu3 %vm4166_vm3, %v7233_v34  ;;  %v6213_v52 = vpop.f32.mrf.mxu0  ;;  %v14624_v15 = vadd.f32 %v6644_v16, %v6288_v13  ;;  %v7175_v34 = vld [vmem:[#allocation3 + $0xc9] sm:$0xff] }
 0x961   :  { %v7234_v42 = vpack.c.bf16 %v7176_v5, %v7175_v34  ;;  %v7610_v13 = vld [vmem:[#allocation3 + $0xe7] sm:$0xff]  ;;  %v6744_v5 = vld [vmem:[#allocation3 + $0xf0] sm:$0xff] }
 0x962   :  { %v5572_v38 = vpop.f32.mrf.mxu2  ;;  %16985 = vst [vmem:[#allocation12_spill] sm:$0xff] %v14624_v15 }
 0x963   :  { %v5843_v4 = vpop.f32.mrf.mxu3  ;;  %10250 = vmatmul.msk.bf16.gmra.mxu0 %vm4166_vm3, %v7668_v20 }
 0x964   :  { %v5844_v21 = vadd.f32 %v5843_v4, %v5572_v38 }
 0x966   :  { %v6289_v17 = vadd.f32 %v6213_v52, %v5844_v21  ;;  %v7611_v52 = vld [vmem:[#allocation3 + $0xef] sm:$0xff] }
 0x967   :  { %v6647_v8 = vpop.f32.mrf.mxu1  ;;  %v7669_v4 = vpack.c.bf16 %v7611_v52, %v7610_v13 }
 0x968   :  { %v6215_v48 = vpop.f32.mrf.mxu0  ;;  %v14626_v9 = vadd.f32 %v6647_v8, %v6289_v17 }
 0x96a   :  { %v5574_v36 = vpop.f32.mrf.mxu2  ;;  %16986 = vst [vmem:[#allocation9_spill] sm:$0xff] %v14626_v9  ;;  %10288 = vmatmul.msk.bf16.gmra.mxu1 %vm4166_vm3, %v6800_v26 }
 0x96b   :  { %v5845_v0 = vpop.f32.mrf.mxu3 }
 0x96c   :  { %v5846_v46 = vadd.f32 %v5845_v0, %v5574_v36  ;;  %v7178_v0 = vld [vmem:[#allocation3 + $0xf1] sm:$0xff] }
 0x96e   :  { %v6290_v2 = vadd.f32 %v6215_v48, %v5846_v46  ;;  %v6743_v48 = vld [vmem:[#allocation3 + $0xe8] sm:$0xff] }
 0x96f   :  { %10175 = vmatmul.msk.bf16.gmra.mxu2 %vm4166_vm3, %v6800_v26  ;;  %v6649_v44 = vpop.f32.mrf.mxu1  ;;  %v6801_v9 = vpack.c.bf16 %v6744_v5, %v6743_v48 }
 0x970   :  { %10213 = vmatmul.msk.bf16.gmra.mxu3 %vm4166_vm3, %v7234_v42  ;;  %v6218_v38 = vpop.f32.mrf.mxu0  ;;  %v14632_v36 = vadd.f32 %v6649_v44, %v6290_v2  ;;  %v7177_v42 = vld [vmem:[#allocation3 + $0xe9] sm:$0xff] }
 0x971   :  { %v7235_v15 = vpack.c.bf16 %v7178_v0, %v7177_v42  ;;  %v7612_v2 = vld [vmem:[#allocation3 + $0x107] sm:$0xff]  ;;  %v6746_v0 = vld [vmem:[#allocation3 + $0x110] sm:$0xff] }
 0x972   :  { %v5577_v20 = vpop.f32.mrf.mxu2  ;;  %16987 = vst [vmem:[#allocation21_spill] sm:$0xff] %v14632_v36 }
 0x973   :  { %v5848_v21 = vpop.f32.mrf.mxu3  ;;  %10251 = vmatmul.msk.bf16.gmra.mxu0 %vm4166_vm3, %v7669_v4 }
 0x974   :  { %v5849_v16 = vadd.f32 %v5848_v21, %v5577_v20 }
 0x976   :  { %v6291_v17 = vadd.f32 %v6218_v38, %v5849_v16  ;;  %v7613_v38 = vld [vmem:[#allocation3 + $0x10f] sm:$0xff] }
 0x977   :  { %v6652_v26 = vpop.f32.mrf.mxu1  ;;  %v7670_v21 = vpack.c.bf16 %v7613_v38, %v7612_v2 }
 0x978   :  { %v6220_v28 = vpop.f32.mrf.mxu0  ;;  %v14634_v13 = vadd.f32 %v6652_v26, %v6291_v17 }
 0x97a   :  { %v5579_v34 = vpop.f32.mrf.mxu2  ;;  %16988 = vst [vmem:[#allocation25_spill] sm:$0xff] %v14634_v13  ;;  %10289 = vmatmul.msk.bf16.gmra.mxu1 %vm4166_vm3, %v6801_v9 }
 0x97b   :  { %v5850_v46 = vpop.f32.mrf.mxu3 }
 0x97c   :  { %v5851_v8 = vadd.f32 %v5850_v46, %v5579_v34  ;;  %v7180_v46 = vld [vmem:[#allocation3 + $0x111] sm:$0xff] }
 0x97e   :  { %v6292_v52 = vadd.f32 %v6220_v28, %v5851_v8  ;;  %v6745_v28 = vld [vmem:[#allocation3 + $0x108] sm:$0xff] }
 0x97f   :  { %10176 = vmatmul.msk.bf16.gmra.mxu2 %vm4166_vm3, %v6801_v9  ;;  %v6654_v48 = vpop.f32.mrf.mxu1  ;;  %v6802_v13 = vpack.c.bf16 %v6746_v0, %v6745_v28 }
 0x980   :  { %10214 = vmatmul.msk.bf16.gmra.mxu3 %vm4166_vm3, %v7235_v15  ;;  %v6223_v20 = vpop.f32.mrf.mxu0  ;;  %v14640_v34 = vadd.f32 %v6654_v48, %v6292_v52  ;;  %v7179_v15 = vld [vmem:[#allocation3 + $0x109] sm:$0xff] }
 0x981   :  { %v7236_v36 = vpack.c.bf16 %v7180_v46, %v7179_v15  ;;  %v7614_v52 = vld [vmem:[#allocation3 + $0x127] sm:$0xff]  ;;  %v6748_v46 = vld [vmem:[#allocation3 + $0x130] sm:$0xff] }
 0x982   :  { %v5582_v4 = vpop.f32.mrf.mxu2  ;;  %16989 = vst [vmem:[#allocation15_spill] sm:$0xff] %v14640_v34 }
 0x983   :  { %v5853_v16 = vpop.f32.mrf.mxu3  ;;  %10252 = vmatmul.msk.bf16.gmra.mxu0 %vm4166_vm3, %v7670_v21 }
 0x984   :  { %v5854_v44 = vadd.f32 %v5853_v16, %v5582_v4 }
 0x986   :  { %v6293_v17 = vadd.f32 %v6223_v20, %v5854_v44  ;;  %v7615_v20 = vld [vmem:[#allocation3 + $0x12f] sm:$0xff] }
 0x987   :  { %v6657_v9 = vpop.f32.mrf.mxu1  ;;  %v7671_v16 = vpack.c.bf16 %v7615_v20, %v7614_v52 }
 0x988   :  { %v6225_v5 = vpop.f32.mrf.mxu0  ;;  %v14642_v2 = vadd.f32 %v6657_v9, %v6293_v17 }
 0x98a   :  { %v5584_v42 = vpop.f32.mrf.mxu2  ;;  %16990 = vst [vmem:[#allocation24_spill] sm:$0xff] %v14642_v2  ;;  %10290 = vmatmul.msk.bf16.gmra.mxu1 %vm4166_vm3, %v6802_v13 }
 0x98b   :  { %v5855_v8 = vpop.f32.mrf.mxu3 }
 0x98c   :  { %v5856_v26 = vadd.f32 %v5855_v8, %v5584_v42  ;;  %v7182_v8 = vld [vmem:[#allocation3 + $0x131] sm:$0xff] }
 0x98e   :  { %v6294_v38 = vadd.f32 %v6225_v5, %v5856_v26  ;;  %v6747_v5 = vld [vmem:[#allocation3 + $0x128] sm:$0xff] }
 0x98f   :  { %10177 = vmatmul.msk.bf16.gmra.mxu2 %vm4166_vm3, %v6802_v13  ;;  %v6659_v28 = vpop.f32.mrf.mxu1  ;;  %v6803_v2 = vpack.c.bf16 %v6748_v46, %v6747_v5  ;;  %v6749_v46 = vld [vmem:[#allocation3 + $0x148] sm:$0xff] }
 0x990   :  { %10215 = vmatmul.msk.bf16.gmra.mxu3 %vm4166_vm3, %v7236_v36  ;;  %v6228_v4 = vpop.f32.mrf.mxu0  ;;  %v14648_v42 = vadd.f32 %v6659_v28, %v6294_v38  ;;  %v7181_v36 = vld [vmem:[#allocation3 + $0x129] sm:$0xff] }
 0x991   :  { %v7237_v34 = vpack.c.bf16 %v7182_v8, %v7181_v36  ;;  %v7616_v38 = vld [vmem:[#allocation3 + $0x147] sm:$0xff]  ;;  %v6750_v8 = vld [vmem:[#allocation3 + $0x150] sm:$0xff] }
 0x992   :  { %v5587_v21 = vpop.f32.mrf.mxu2 }
 0x993   :  { %v5858_v44 = vpop.f32.mrf.mxu3  ;;  %10253 = vmatmul.msk.bf16.gmra.mxu0 %vm4166_vm3, %v7671_v16 }
 0x994   :  { %v5859_v48 = vadd.f32 %v5858_v44, %v5587_v21 }
 0x996   :  { %v6295_v17 = vadd.f32 %v6228_v4, %v5859_v48  ;;  %v7617_v4 = vld [vmem:[#allocation3 + $0x14f] sm:$0xff] }
 0x997   :  { %v6662_v13 = vpop.f32.mrf.mxu1  ;;  %v7672_v44 = vpack.c.bf16 %v7617_v4, %v7616_v38 }
 0x998   :  { %v6230_v0 = vpop.f32.mrf.mxu0  ;;  %v14650_v52 = vadd.f32 %v6662_v13, %v6295_v17 }
 0x99a   :  { %v5589_v15 = vpop.f32.mrf.mxu2  ;;  %16991 = vst [vmem:[#allocation26_spill] sm:$0xff] %v14650_v52  ;;  %10291 = vmatmul.msk.bf16.gmra.mxu1 %vm4166_vm3, %v6803_v2 }
 0x99b   :  { %v5860_v26 = vpop.f32.mrf.mxu3 }
 0x99c   :  { %v5861_v9 = vadd.f32 %v5860_v26, %v5589_v15  ;;  %v7183_v26 = vld [vmem:[#allocation3 + $0x149] sm:$0xff] }
 0x99e   :  { %v6296_v20 = vadd.f32 %v6230_v0, %v5861_v9  ;;  %v7184_v9 = vld [vmem:[#allocation3 + $0x151] sm:$0xff] }
 0x99f   :  { %10178 = vmatmul.msk.bf16.gmra.mxu2 %vm4166_vm3, %v6803_v2  ;;  %v6664_v17 = vpop.f32.mrf.mxu1 }
 0x9a0   :  { %10216 = vmatmul.msk.bf16.gmra.mxu3 %vm4166_vm3, %v7237_v34  ;;  %v7810_v21 = vpop.f32.mrf.mxu0  ;;  %v14657_v15 = vadd.f32 %v6664_v17, %v6296_v20 }
 0x9a2   :  { %v6941_v16 = vpop.f32.mrf.mxu2 }
 0x9a3   :  { %v7101_v48 = vadd.f32 %v6941_v16, %v14390_v31  ;;  %v7375_v28 = vpop.f32.mrf.mxu3  ;;  %10254 = vmatmul.msk.bf16.gmra.mxu0 %vm4166_vm3, %v7672_v44  ;;  %v6804_v31 = vpack.c.bf16 %v6750_v8, %v6749_v46  ;;  %v7238_v16 = vpack.c.bf16 %v7184_v9, %v7183_v26  ;;  %v7619_v44 = vld [vmem:[#allocation3 + $0x16f] sm:$0xff] }
 0x9a4   :  { %v6751_v26 = vld [vmem:[#allocation3 + $0x168] sm:$0xff] }
 0x9a5   :  { %v7535_v5 = vadd.f32 %v7375_v28, %v7101_v48 }
 0x9a7   :  { %v7970_v0 = vadd.f32 %v7810_v21, %v7535_v5  ;;  %v8244_v4 = vpop.f32.mrf.mxu1  ;;  %v7618_v21 = vld [vmem:[#allocation3 + $0x167] sm:$0xff] }
 0x9a8   :  { %v7812_v36 = vpop.f32.mrf.mxu0  ;;  %v7673_v5 = vpack.c.bf16 %v7619_v44, %v7618_v21 }
 0x9a9   :  { %v14660_v52 = vadd.f32 %v8244_v4, %v7970_v0 }
 0x9aa   :  { %v6943_v34 = vpop.f32.mrf.mxu2  ;;  %10292 = vmatmul.msk.bf16.gmra.mxu1 %vm4166_vm3, %v6804_v31 }
 0x9ab   :  { %v7102_v2 = vadd.f32 %v6943_v34, %v14396_v25  ;;  %v7377_v13 = vpop.f32.mrf.mxu3 }
 0x9ad   :  { %v7536_v38 = vadd.f32 %v7377_v13, %v7102_v2  ;;  %v6752_v2 = vld [vmem:[#allocation3 + $0x170] sm:$0xff] }
 0x9ae   :  { %v7185_v13 = vld [vmem:[#allocation3 + $0x169] sm:$0xff] }
 0x9af   :  { %10179 = vmatmul.msk.bf16.gmra.mxu2 %vm4166_vm3, %v6804_v31  ;;  %v7971_v20 = vadd.f32 %v7812_v36, %v7536_v38  ;;  %v8246_v0 = vpop.f32.mrf.mxu1  ;;  %v7186_v38 = vld [vmem:[#allocation3 + $0x171] sm:$0xff] }
 0x9b0   :  { %10217 = vmatmul.msk.bf16.gmra.mxu3 %vm4166_vm3, %v7238_v16  ;;  %v7815_v48 = vpop.f32.mrf.mxu0  ;;  %v7239_v44 = vpack.c.bf16 %v7186_v38, %v7185_v13  ;;  %v6753_v13 = vld [vmem:[#allocation3 + $0x188] sm:$0xff] }
 0x9b1   :  { %v14667_v34 = vadd.f32 %v8246_v0, %v7971_v20 }
 0x9b2   :  { %v6946_v28 = vpop.f32.mrf.mxu2 }
 0x9b3   :  { %v7103_v25 = vadd.f32 %v6946_v28, %v14398_v60  ;;  %v7380_v17 = vpop.f32.mrf.mxu3  ;;  %10255 = vmatmul.msk.bf16.gmra.mxu0 %vm4166_vm3, %v7673_v5  ;;  %v6805_v60 = vpack.c.bf16 %v6752_v2, %v6751_v26  ;;  %v7621_v5 = vld [vmem:[#allocation3 + $0x18f] sm:$0xff] }
 0x9b5   :  { %v7537_v46 = vadd.f32 %v7380_v17, %v7103_v25 }
 0x9b7   :  { %v7972_v8 = vadd.f32 %v7815_v48, %v7537_v46  ;;  %v8249_v21 = vpop.f32.mrf.mxu1  ;;  %v7620_v48 = vld [vmem:[#allocation3 + $0x187] sm:$0xff] }
 0x9b8   :  { %v7817_v9 = vpop.f32.mrf.mxu0  ;;  %v7674_v46 = vpack.c.bf16 %v7621_v5, %v7620_v48 }
 0x9b9   :  { %v14670_v28 = vadd.f32 %v8249_v21, %v7972_v8 }
 0x9ba   :  { %v6948_v36 = vpop.f32.mrf.mxu2  ;;  %10293 = vmatmul.msk.bf16.gmra.mxu1 %vm4166_vm3, %v6805_v60 }
 0x9bb   :  { %v7104_v4 = vadd.f32 %v6948_v36, %v14404_v29  ;;  %v7382_v31 = vpop.f32.mrf.mxu3 }
 0x9bd   :  { %v7538_v16 = vadd.f32 %v7382_v31, %v7104_v4  ;;  %v6754_v4 = vld [vmem:[#allocation3 + $0x190] sm:$0xff] }
 0x9be   :  { %v7187_v31 = vld [vmem:[#allocation3 + $0x189] sm:$0xff] }
 0x9bf   :  { %10180 = vmatmul.msk.bf16.gmra.mxu2 %vm4166_vm3, %v6805_v60  ;;  %v7973_v20 = vadd.f32 %v7817_v9, %v7538_v16  ;;  %v8251_v8 = vpop.f32.mrf.mxu1  ;;  %v7188_v16 = vld [vmem:[#allocation3 + $0x191] sm:$0xff] }
 0x9c0   :  { %10218 = vmatmul.msk.bf16.gmra.mxu3 %vm4166_vm3, %v7239_v44  ;;  %v7820_v25 = vpop.f32.mrf.mxu0  ;;  %v7240_v5 = vpack.c.bf16 %v7188_v16, %v7187_v31  ;;  %v6755_v31 = vld [vmem:[#allocation3 + $0x1a8] sm:$0xff] }
 0x9c1   :  { %v14677_v36 = vadd.f32 %v8251_v8, %v7973_v20 }
 0x9c2   :  { %v6951_v17 = vpop.f32.mrf.mxu2 }
 0x9c3   :  { %v7105_v29 = vadd.f32 %v6951_v17, %v14406_v23  ;;  %v7385_v0 = vpop.f32.mrf.mxu3  ;;  %10256 = vmatmul.msk.bf16.gmra.mxu0 %vm4166_vm3, %v7674_v46  ;;  %v6806_v23 = vpack.c.bf16 %v6754_v4, %v6753_v13  ;;  %v7623_v46 = vld [vmem:[#allocation3 + $0x1af] sm:$0xff] }
 0x9c5   :  { %v7539_v26 = vadd.f32 %v7385_v0, %v7105_v29 }
 0x9c7   :  { %v7974_v2 = vadd.f32 %v7820_v25, %v7539_v26  ;;  %v8254_v48 = vpop.f32.mrf.mxu1  ;;  %v7622_v25 = vld [vmem:[#allocation3 + $0x1a7] sm:$0xff] }
 0x9c8   :  { %v7822_v38 = vpop.f32.mrf.mxu0  ;;  %v7675_v26 = vpack.c.bf16 %v7623_v46, %v7622_v25 }
 0x9c9   :  { %v14680_v17 = vadd.f32 %v8254_v48, %v7974_v2 }
 0x9ca   :  { %v6953_v9 = vpop.f32.mrf.mxu2  ;;  %10294 = vmatmul.msk.bf16.gmra.mxu1 %vm4166_vm3, %v6806_v23 }
 0x9cb   :  { %v7106_v21 = vadd.f32 %v6953_v9, %v14412_v18  ;;  %v7387_v60 = vpop.f32.mrf.mxu3 }
 0x9cd   :  { %v7540_v44 = vadd.f32 %v7387_v60, %v7106_v21  ;;  %v6756_v21 = vld [vmem:[#allocation3 + $0x1b0] sm:$0xff] }
 0x9ce   :  { %v7189_v60 = vld [vmem:[#allocation3 + $0x1a9] sm:$0xff] }
 0x9cf   :  { %10181 = vmatmul.msk.bf16.gmra.mxu2 %vm4166_vm3, %v6806_v23  ;;  %v7975_v20 = vadd.f32 %v7822_v38, %v7540_v44  ;;  %v8256_v2 = vpop.f32.mrf.mxu1  ;;  %v7190_v44 = vld [vmem:[#allocation3 + $0x1b1] sm:$0xff] }
 0x9d0   :  { %10219 = vmatmul.msk.bf16.gmra.mxu3 %vm4166_vm3, %v7240_v5  ;;  %v7825_v29 = vpop.f32.mrf.mxu0  ;;  %v7241_v46 = vpack.c.bf16 %v7190_v44, %v7189_v60  ;;  %v6757_v60 = vld [vmem:[#allocation3 + $0x1c8] sm:$0xff] }
 0x9d1   :  { %v14687_v9 = vadd.f32 %v8256_v2, %v7975_v20 }
 0x9d2   :  { %v6956_v0 = vpop.f32.mrf.mxu2 }
 0x9d3   :  { %v7107_v18 = vadd.f32 %v6956_v0, %v14414_v1  ;;  %v7390_v8 = vpop.f32.mrf.mxu3  ;;  %10257 = vmatmul.msk.bf16.gmra.mxu0 %vm4166_vm3, %v7675_v26  ;;  %v6807_v1 = vpack.c.bf16 %v6756_v21, %v6755_v31  ;;  %v7625_v26 = vld [vmem:[#allocation3 + $0x1cf] sm:$0xff] }
 0x9d5   :  { %v7541_v13 = vadd.f32 %v7390_v8, %v7107_v18 }
 0x9d7   :  { %v7976_v4 = vadd.f32 %v7825_v29, %v7541_v13  ;;  %v8259_v25 = vpop.f32.mrf.mxu1  ;;  %v7624_v29 = vld [vmem:[#allocation3 + $0x1c7] sm:$0xff] }
 0x9d8   :  { %v7827_v16 = vpop.f32.mrf.mxu0  ;;  %v7676_v13 = vpack.c.bf16 %v7625_v26, %v7624_v29 }
 0x9d9   :  { %v14690_v0 = vadd.f32 %v8259_v25, %v7976_v4 }
 0x9da   :  { %v6958_v38 = vpop.f32.mrf.mxu2  ;;  %10295 = vmatmul.msk.bf16.gmra.mxu1 %vm4166_vm3, %v6807_v1 }
 0x9db   :  { %v7108_v48 = vadd.f32 %v6958_v38, %v14420_v39  ;;  %v7392_v23 = vpop.f32.mrf.mxu3 }
 0x9dd   :  { %v7542_v5 = vadd.f32 %v7392_v23, %v7108_v48  ;;  %v6758_v48 = vld [vmem:[#allocation3 + $0x1d0] sm:$0xff] }
 0x9de   :  { %v7191_v23 = vld [vmem:[#allocation3 + $0x1c9] sm:$0xff] }
 0x9df   :  { %10182 = vmatmul.msk.bf16.gmra.mxu2 %vm4166_vm3, %v6807_v1  ;;  %v7977_v20 = vadd.f32 %v7827_v16, %v7542_v5  ;;  %v8261_v4 = vpop.f32.mrf.mxu1  ;;  %v7192_v5 = vld [vmem:[#allocation3 + $0x1d1] sm:$0xff] }
 0x9e0   :  { %10220 = vmatmul.msk.bf16.gmra.mxu3 %vm4166_vm3, %v7241_v46  ;;  %v7830_v18 = vpop.f32.mrf.mxu0  ;;  %v7242_v26 = vpack.c.bf16 %v7192_v5, %v7191_v23  ;;  %v6759_v23 = vld [vmem:[#allocation3 + $0x1e8] sm:$0xff] }
 0x9e1   :  { %v14697_v38 = vadd.f32 %v8261_v4, %v7977_v20 }
 0x9e2   :  { %v6961_v8 = vpop.f32.mrf.mxu2 }
 0x9e3   :  { %v7109_v39 = vadd.f32 %v6961_v8, %v14422_v58  ;;  %v7395_v2 = vpop.f32.mrf.mxu3  ;;  %10258 = vmatmul.msk.bf16.gmra.mxu0 %vm4166_vm3, %v7676_v13  ;;  %v6808_v58 = vpack.c.bf16 %v6758_v48, %v6757_v60  ;;  %v7627_v13 = vld [vmem:[#allocation3 + $0x1ef] sm:$0xff] }
 0x9e5   :  { %v7543_v31 = vadd.f32 %v7395_v2, %v7109_v39 }
 0x9e7   :  { %v7978_v21 = vadd.f32 %v7830_v18, %v7543_v31  ;;  %v8264_v29 = vpop.f32.mrf.mxu1  ;;  %v7626_v18 = vld [vmem:[#allocation3 + $0x1e7] sm:$0xff] }
 0x9e8   :  { %v7832_v44 = vpop.f32.mrf.mxu0  ;;  %v7677_v31 = vpack.c.bf16 %v7627_v13, %v7626_v18 }
 0x9e9   :  { %v14700_v8 = vadd.f32 %v8264_v29, %v7978_v21 }
 0x9ea   :  { %v6963_v16 = vpop.f32.mrf.mxu2  ;;  %10296 = vmatmul.msk.bf16.gmra.mxu1 %vm4166_vm3, %v6808_v58 }
 0x9eb   :  { %v7110_v25 = vadd.f32 %v6963_v16, %v14428_v33  ;;  %v7397_v1 = vpop.f32.mrf.mxu3 }
 0x9ed   :  { %v7544_v46 = vadd.f32 %v7397_v1, %v7110_v25  ;;  %v6760_v25 = vld [vmem:[#allocation3 + $0x1f0] sm:$0xff] }
 0x9ee   :  { %v7193_v1 = vld [vmem:[#allocation3 + $0x1e9] sm:$0xff] }
 0x9ef   :  { %10183 = vmatmul.msk.bf16.gmra.mxu2 %vm4166_vm3, %v6808_v58  ;;  %v7979_v20 = vadd.f32 %v7832_v44, %v7544_v46  ;;  %v8266_v21 = vpop.f32.mrf.mxu1  ;;  %v7194_v46 = vld [vmem:[#allocation3 + $0x1f1] sm:$0xff] }
 0x9f0   :  { %10221 = vmatmul.msk.bf16.gmra.mxu3 %vm4166_vm3, %v7242_v26  ;;  %v7835_v39 = vpop.f32.mrf.mxu0  ;;  %v7243_v13 = vpack.c.bf16 %v7194_v46, %v7193_v1  ;;  %v6761_v1 = vld [vmem:[#allocation3 + $0x208] sm:$0xff] }
 0x9f1   :  { %v14707_v16 = vadd.f32 %v8266_v21, %v7979_v20 }
 0x9f2   :  { %v6966_v2 = vpop.f32.mrf.mxu2 }
 0x9f3   :  { %v7111_v33 = vadd.f32 %v6966_v2, %v14430_v3  ;;  %v7400_v4 = vpop.f32.mrf.mxu3  ;;  %10259 = vmatmul.msk.bf16.gmra.mxu0 %vm4166_vm3, %v7677_v31  ;;  %v6809_v3 = vpack.c.bf16 %v6760_v25, %v6759_v23  ;;  %v7629_v31 = vld [vmem:[#allocation3 + $0x20f] sm:$0xff] }
 0x9f5   :  { %v7545_v60 = vadd.f32 %v7400_v4, %v7111_v33 }
 0x9f7   :  { %v7980_v48 = vadd.f32 %v7835_v39, %v7545_v60  ;;  %v8269_v18 = vpop.f32.mrf.mxu1  ;;  %v7628_v39 = vld [vmem:[#allocation3 + $0x207] sm:$0xff] }
 0x9f8   :  { %v7837_v5 = vpop.f32.mrf.mxu0  ;;  %v7678_v60 = vpack.c.bf16 %v7629_v31, %v7628_v39 }
 0x9f9   :  { %v14710_v2 = vadd.f32 %v8269_v18, %v7980_v48 }
 0x9fa   :  { %v6968_v44 = vpop.f32.mrf.mxu2  ;;  %10297 = vmatmul.msk.bf16.gmra.mxu1 %vm4166_vm3, %v6809_v3 }
 0x9fb   :  { %v7112_v29 = vadd.f32 %v6968_v44, %v14436_v32  ;;  %v7402_v58 = vpop.f32.mrf.mxu3 }
 0x9fd   :  { %v7546_v26 = vadd.f32 %v7402_v58, %v7112_v29  ;;  %v6762_v29 = vld [vmem:[#allocation3 + $0x210] sm:$0xff] }
 0x9fe   :  { %v7195_v58 = vld [vmem:[#allocation3 + $0x209] sm:$0xff] }
 0x9ff   :  { %10184 = vmatmul.msk.bf16.gmra.mxu2 %vm4166_vm3, %v6809_v3  ;;  %v7981_v20 = vadd.f32 %v7837_v5, %v7546_v26  ;;  %v8271_v48 = vpop.f32.mrf.mxu1  ;;  %v7196_v26 = vld [vmem:[#allocation3 + $0x211] sm:$0xff] }
 0xa00   :  { %10222 = vmatmul.msk.bf16.gmra.mxu3 %vm4166_vm3, %v7243_v13  ;;  %v7840_v33 = vpop.f32.mrf.mxu0  ;;  %v7244_v31 = vpack.c.bf16 %v7196_v26, %v7195_v58  ;;  %v6763_v58 = vld [vmem:[#allocation3 + $0x268] sm:$0xff] }
 0xa01   :  { %v14717_v44 = vadd.f32 %v8271_v48, %v7981_v20  ;;  %v8064_v26 = vld [vmem:[#allocation3 + $0x228] sm:$0xff] }
 0xa02   :  { %v6971_v4 = vpop.f32.mrf.mxu2 }
 0xa03   :  { %v7113_v32 = vadd.f32 %v6971_v4, %v14438_v53  ;;  %v7405_v21 = vpop.f32.mrf.mxu3  ;;  %10260 = vmatmul.msk.bf16.gmra.mxu0 %vm4166_vm3, %v7678_v60  ;;  %v6810_v53 = vpack.c.bf16 %v6762_v29, %v6761_v1  ;;  %v7630_v60 = vld [vmem:[#allocation3 + $0x227] sm:$0xff] }
 0xa05   :  { %v7547_v23 = vadd.f32 %v7405_v21, %v7113_v32  ;;  %v7631_v32 = vld [vmem:[#allocation3 + $0x22f] sm:$0xff] }
 0xa07   :  { %v7982_v25 = vadd.f32 %v7840_v33, %v7547_v23  ;;  %v8274_v39 = vpop.f32.mrf.mxu1  ;;  %v7679_v33 = vpack.c.bf16 %v7631_v32, %v7630_v60 }
 0xa08   :  { %v7842_v46 = vpop.f32.mrf.mxu0 }
 0xa09   :  { %v14720_v4 = vadd.f32 %v8274_v39, %v7982_v25  ;;  %v7197_v39 = vld [vmem:[#allocation3 + $0x269] sm:$0xff] }
 0xa0a   :  { %v6973_v5 = vpop.f32.mrf.mxu2  ;;  %10298 = vmatmul.msk.bf16.gmra.mxu1 %vm4166_vm3, %v6810_v53 }
 0xa0b   :  { %v7114_v18 = vadd.f32 %v6973_v5, %v14444_v55  ;;  %v7407_v3 = vpop.f32.mrf.mxu3 }
 0xa0d   :  { %v7548_v13 = vadd.f32 %v7407_v3, %v7114_v18  ;;  %v8065_v18 = vld [vmem:[#allocation3 + $0x230] sm:$0xff] }
 0xa0f   :  { %10185 = vmatmul.msk.bf16.gmra.mxu2 %vm4166_vm3, %v6810_v53  ;;  %v7983_v20 = vadd.f32 %v7842_v46, %v7548_v13  ;;  %v8276_v25 = vpop.f32.mrf.mxu1  ;;  %v6764_v13 = vld [vmem:[#allocation3 + $0x270] sm:$0xff] }
 0xa10   :  { %10223 = vmatmul.msk.bf16.gmra.mxu3 %vm4166_vm3, %v7244_v31  ;;  %v7845_v21 = vpop.f32.mrf.mxu0  ;;  %v7198_v53 = vld [vmem:[#allocation3 + $0x271] sm:$0xff] }
 0xa11   :  { %v14727_v5 = vadd.f32 %v8276_v25, %v7983_v20 }
 0xa12   :  { %v6976_v23 = vpop.f32.mrf.mxu2 }
 0xa13   :  { %v7115_v55 = vadd.f32 %v6976_v23, %v14446_v19  ;;  %v7410_v48 = vpop.f32.mrf.mxu3  ;;  %10261 = vmatmul.msk.bf16.gmra.mxu0 %vm4166_vm3, %v7679_v33  ;;  %16992 = vst [vmem:[#allocation27_spill] sm:$0xff] %v14727_v5  ;;  %v8113_v19 = vpack.c.bf16 %v8065_v18, %v8064_v26  ;;  %v6811_v33 = vpack.c.bf16 %v6764_v13, %v6763_v58 }
 0xa15   :  { %v7549_v1 = vadd.f32 %v7410_v48, %v7115_v55  ;;  %v7245_v55 = vpack.c.bf16 %v7198_v53, %v7197_v39  ;;  %v6765_v39 = vld [vmem:[#allocation3 + $0x288] sm:$0xff] }
 0xa17   :  { %v7984_v29 = vadd.f32 %v7845_v21, %v7549_v1  ;;  %v8279_v23 = vpop.f32.mrf.mxu1  ;;  %v7632_v21 = vld [vmem:[#allocation3 + $0x287] sm:$0xff]  ;;  %v7633_v1 = vld [vmem:[#allocation3 + $0x28f] sm:$0xff] }
 0xa18   :  { %v7847_v3 = vpop.f32.mrf.mxu0 }
 0xa19   :  { %v14730_v48 = vadd.f32 %v8279_v23, %v7984_v29 }
 0xa1a   :  { %v6978_v46 = vpop.f32.mrf.mxu2  ;;  %10299 = vmatmul.msk.bf16.gmra.mxu1 %vm4166_vm3, %v8113_v19 }
 0xa1b   :  { %v7116_v31 = vadd.f32 %v6978_v46, %v14452_v49  ;;  %v7412_v60 = vpop.f32.mrf.mxu3  ;;  %v7680_v49 = vpack.c.bf16 %v7633_v1, %v7632_v21  ;;  %v7634_v1 = vld [vmem:[#allocation3 + $0x2a7] sm:$0xff] }
 0xa1d   :  { %v7550_v32 = vadd.f32 %v7412_v60, %v7116_v31  ;;  %v6766_v31 = vld [vmem:[#allocation3 + $0x290] sm:$0xff] }
 0xa1e   :  { %v7199_v60 = vld [vmem:[#allocation3 + $0x289] sm:$0xff] }
 0xa1f   :  { %10186 = vmatmul.msk.bf16.gmra.mxu2 %vm4166_vm3, %v6811_v33  ;;  %v7985_v20 = vadd.f32 %v7847_v3, %v7550_v32  ;;  %v8281_v29 = vpop.f32.mrf.mxu1  ;;  %v7200_v32 = vld [vmem:[#allocation3 + $0x291] sm:$0xff] }
 0xa20   :  { %10224 = vmatmul.msk.bf16.gmra.mxu3 %vm4166_vm3, %v7245_v55  ;;  %v7850_v25 = vpop.f32.mrf.mxu0 }
 0xa21   :  { %v14737_v46 = vadd.f32 %v8281_v29, %v7985_v20 }
 0xa22   :  { %v6981_v5 = vpop.f32.mrf.mxu2 }
 0xa23   :  { %v7117_v26 = vadd.f32 %v6981_v5, %v14454_v30  ;;  %v7415_v18 = vpop.f32.mrf.mxu3  ;;  %10262 = vmatmul.msk.bf16.gmra.mxu0 %vm4166_vm3, %v7680_v49  ;;  %v6812_v30 = vpack.c.bf16 %v6766_v31, %v6765_v39  ;;  %v7246_v5 = vpack.c.bf16 %v7200_v32, %v7199_v60  ;;  %v6767_v31 = vld [vmem:[#allocation3 + $0x2a8] sm:$0xff]  ;;  %v6768_v32 = vld [vmem:[#allocation3 + $0x2b0] sm:$0xff] }
 0xa25   :  { %v7551_v58 = vadd.f32 %v7415_v18, %v7117_v26 }
 0xa27   :  { %v7986_v13 = vadd.f32 %v7850_v25, %v7551_v58  ;;  %v8284_v55 = vpop.f32.mrf.mxu1  ;;  %v7635_v25 = vld [vmem:[#allocation3 + $0x2af] sm:$0xff] }
 0xa28   :  { %v7852_v53 = vpop.f32.mrf.mxu0  ;;  %v7681_v18 = vpack.c.bf16 %v7635_v25, %v7634_v1 }
 0xa29   :  { %v14740_v21 = vadd.f32 %v8284_v55, %v7986_v13 }
 0xa2a   :  { %v6983_v3 = vpop.f32.mrf.mxu2  ;;  %10300 = vmatmul.msk.bf16.gmra.mxu1 %vm4166_vm3, %v6812_v30 }
 0xa2b   :  { %v7118_v19 = vadd.f32 %v6983_v3, %v14460_v41  ;;  %v7417_v23 = vpop.f32.mrf.mxu3 }
 0xa2d   :  { %v7552_v33 = vadd.f32 %v7417_v23, %v7118_v19  ;;  %v7201_v19 = vld [vmem:[#allocation3 + $0x2a9] sm:$0xff]  ;;  %v7202_v23 = vld [vmem:[#allocation3 + $0x2b1] sm:$0xff] }
 0xa2e   :  { %v7247_v1 = vpack.c.bf16 %v7202_v23, %v7201_v19  ;;  %v6770_v23 = vld [vmem:[#allocation3 + $0x2d0] sm:$0xff] }
 0xa2f   :  { %10187 = vmatmul.msk.bf16.gmra.mxu2 %vm4166_vm3, %v6812_v30  ;;  %v7987_v20 = vadd.f32 %v7852_v53, %v7552_v33  ;;  %v8286_v13 = vpop.f32.mrf.mxu1 }
 0xa30   :  { %10225 = vmatmul.msk.bf16.gmra.mxu3 %vm4166_vm3, %v7246_v5  ;;  %v7855_v49 = vpop.f32.mrf.mxu0 }
 0xa31   :  { %v14747_v39 = vadd.f32 %v8286_v13, %v7987_v20 }
 0xa32   :  { %v6986_v26 = vpop.f32.mrf.mxu2 }
 0xa33   :  { %v7119_v41 = vadd.f32 %v6986_v26, %v14462_v24  ;;  %v7420_v58 = vpop.f32.mrf.mxu3  ;;  %10263 = vmatmul.msk.bf16.gmra.mxu0 %vm4166_vm3, %v7681_v18  ;;  %v6813_v24 = vpack.c.bf16 %v6768_v32, %v6767_v31  ;;  %v7637_v26 = vld [vmem:[#allocation3 + $0x2cf] sm:$0xff] }
 0xa34   :  { %v6769_v32 = vld [vmem:[#allocation3 + $0x2c8] sm:$0xff] }
 0xa35   :  { %v7553_v29 = vadd.f32 %v7420_v58, %v7119_v41 }
 0xa37   :  { %v7988_v3 = vadd.f32 %v7855_v49, %v7553_v29  ;;  %v8289_v5 = vpop.f32.mrf.mxu1  ;;  %v7636_v49 = vld [vmem:[#allocation3 + $0x2c7] sm:$0xff] }
 0xa38   :  { %v7857_v60 = vpop.f32.mrf.mxu0  ;;  %v7682_v58 = vpack.c.bf16 %v7637_v26, %v7636_v49 }
 0xa39   :  { %v14750_v25 = vadd.f32 %v8289_v5, %v7988_v3 }
 0xa3a   :  { %v6988_v53 = vpop.f32.mrf.mxu2  ;;  %10301 = vmatmul.msk.bf16.gmra.mxu1 %vm4166_vm3, %v6813_v24 }
 0xa3b   :  { %v7120_v33 = vadd.f32 %v6988_v53, %v14468_v11  ;;  %v7422_v55 = vpop.f32.mrf.mxu3 }
 0xa3d   :  { %v7554_v30 = vadd.f32 %v7422_v55, %v7120_v33  ;;  %v7203_v33 = vld [vmem:[#allocation3 + $0x2c9] sm:$0xff]  ;;  %v7204_v55 = vld [vmem:[#allocation3 + $0x2d1] sm:$0xff] }
 0xa3e   :  { %v7248_v49 = vpack.c.bf16 %v7204_v55, %v7203_v33  ;;  %v6772_v55 = vld [vmem:[#allocation3 + $0x2f0] sm:$0xff] }
 0xa3f   :  { %10188 = vmatmul.msk.bf16.gmra.mxu2 %vm4166_vm3, %v6813_v24  ;;  %v7989_v20 = vadd.f32 %v7857_v60, %v7554_v30  ;;  %v8291_v3 = vpop.f32.mrf.mxu1 }
 0xa40   :  { %10226 = vmatmul.msk.bf16.gmra.mxu3 %vm4166_vm3, %v7247_v1  ;;  %v7860_v18 = vpop.f32.mrf.mxu0 }
 0xa41   :  { %v14757_v31 = vadd.f32 %v8291_v3, %v7989_v20 }
 0xa42   :  { %v6991_v41 = vpop.f32.mrf.mxu2 }
 0xa43   :  { %v7121_v11 = vadd.f32 %v6991_v41, %v14470_v6  ;;  %v7425_v29 = vpop.f32.mrf.mxu3  ;;  %10264 = vmatmul.msk.bf16.gmra.mxu0 %vm4166_vm3, %v7682_v58  ;;  %v6814_v6 = vpack.c.bf16 %v6770_v23, %v6769_v32  ;;  %v7639_v41 = vld [vmem:[#allocation3 + $0x2ef] sm:$0xff] }
 0xa44   :  { %v6771_v23 = vld [vmem:[#allocation3 + $0x2e8] sm:$0xff] }
 0xa45   :  { %v7555_v13 = vadd.f32 %v7425_v29, %v7121_v11 }
 0xa47   :  { %v7990_v53 = vadd.f32 %v7860_v18, %v7555_v13  ;;  %v8294_v1 = vpop.f32.mrf.mxu1  ;;  %v7638_v18 = vld [vmem:[#allocation3 + $0x2e7] sm:$0xff] }
 0xa48   :  { %v7862_v19 = vpop.f32.mrf.mxu0  ;;  %v7683_v29 = vpack.c.bf16 %v7639_v41, %v7638_v18 }
 0xa49   :  { %v14760_v26 = vadd.f32 %v8294_v1, %v7990_v53 }
 0xa4a   :  { %v6993_v60 = vpop.f32.mrf.mxu2  ;;  %10302 = vmatmul.msk.bf16.gmra.mxu1 %vm4166_vm3, %v6814_v6 }
 0xa4b   :  { %v7122_v30 = vadd.f32 %v6993_v60, %v14476_v50  ;;  %v7427_v5 = vpop.f32.mrf.mxu3 }
 0xa4d   :  { %v7556_v24 = vadd.f32 %v7427_v5, %v7122_v30  ;;  %v7205_v30 = vld [vmem:[#allocation3 + $0x2e9] sm:$0xff]  ;;  %v7206_v5 = vld [vmem:[#allocation3 + $0x2f1] sm:$0xff] }
 0xa4e   :  { %v7249_v18 = vpack.c.bf16 %v7206_v5, %v7205_v30  ;;  %v6774_v5 = vld [vmem:[#allocation3 + $0x310] sm:$0xff] }
 0xa4f   :  { %10189 = vmatmul.msk.bf16.gmra.mxu2 %vm4166_vm3, %v6814_v6  ;;  %v7991_v20 = vadd.f32 %v7862_v19, %v7556_v24  ;;  %v8296_v53 = vpop.f32.mrf.mxu1 }
 0xa50   :  { %10227 = vmatmul.msk.bf16.gmra.mxu3 %vm4166_vm3, %v7248_v49  ;;  %v7865_v58 = vpop.f32.mrf.mxu0 }
 0xa51   :  { %v14767_v32 = vadd.f32 %v8296_v53, %v7991_v20 }
 0xa52   :  { %v6996_v11 = vpop.f32.mrf.mxu2 }
 0xa53   :  { %v7123_v50 = vadd.f32 %v6996_v11, %v14478_v57  ;;  %v7430_v13 = vpop.f32.mrf.mxu3  ;;  %10265 = vmatmul.msk.bf16.gmra.mxu0 %vm4166_vm3, %v7683_v29  ;;  %v6815_v57 = vpack.c.bf16 %v6772_v55, %v6771_v23  ;;  %v7641_v11 = vld [vmem:[#allocation3 + $0x30f] sm:$0xff] }
 0xa54   :  { %v6773_v55 = vld [vmem:[#allocation3 + $0x308] sm:$0xff] }
 0xa55   :  { %v7557_v3 = vadd.f32 %v7430_v13, %v7123_v50 }
 0xa57   :  { %v7992_v60 = vadd.f32 %v7865_v58, %v7557_v3  ;;  %v8299_v49 = vpop.f32.mrf.mxu1  ;;  %v7640_v58 = vld [vmem:[#allocation3 + $0x307] sm:$0xff] }
 0xa58   :  { %v7867_v33 = vpop.f32.mrf.mxu0  ;;  %v7684_v13 = vpack.c.bf16 %v7641_v11, %v7640_v58 }
 0xa59   :  { %v14770_v41 = vadd.f32 %v8299_v49, %v7992_v60 }
 0xa5a   :  { %v6998_v19 = vpop.f32.mrf.mxu2  ;;  %10303 = vmatmul.msk.bf16.gmra.mxu1 %vm4166_vm3, %v6815_v57 }
 0xa5b   :  { %v7124_v24 = vadd.f32 %v6998_v19, %v14484_v43  ;;  %v7432_v1 = vpop.f32.mrf.mxu3 }
 0xa5d   :  { %v7558_v6 = vadd.f32 %v7432_v1, %v7124_v24  ;;  %v7207_v24 = vld [vmem:[#allocation3 + $0x309] sm:$0xff]  ;;  %v7208_v1 = vld [vmem:[#allocation3 + $0x311] sm:$0xff] }
 0xa5e   :  { %v7250_v58 = vpack.c.bf16 %v7208_v1, %v7207_v24  ;;  %v6776_v1 = vld [vmem:[#allocation3 + $0x330] sm:$0xff] }
 0xa5f   :  { %10190 = vmatmul.msk.bf16.gmra.mxu2 %vm4166_vm3, %v6815_v57  ;;  %v7993_v20 = vadd.f32 %v7867_v33, %v7558_v6  ;;  %v8301_v60 = vpop.f32.mrf.mxu1 }
 0xa60   :  { %10228 = vmatmul.msk.bf16.gmra.mxu3 %vm4166_vm3, %v7249_v18  ;;  %v7870_v29 = vpop.f32.mrf.mxu0 }
 0xa61   :  { %v14777_v23 = vadd.f32 %v8301_v60, %v7993_v20 }
 0xa62   :  { %v7001_v50 = vpop.f32.mrf.mxu2 }
 0xa63   :  { %v7125_v43 = vadd.f32 %v7001_v50, %v14486_v47  ;;  %v7435_v3 = vpop.f32.mrf.mxu3  ;;  %10266 = vmatmul.msk.bf16.gmra.mxu0 %vm4166_vm3, %v7684_v13  ;;  %v6816_v47 = vpack.c.bf16 %v6774_v5, %v6773_v55  ;;  %v7643_v50 = vld [vmem:[#allocation3 + $0x32f] sm:$0xff] }
 0xa64   :  { %v6775_v5 = vld [vmem:[#allocation3 + $0x328] sm:$0xff] }
 0xa65   :  { %v7559_v53 = vadd.f32 %v7435_v3, %v7125_v43 }
 0xa67   :  { %v7994_v19 = vadd.f32 %v7870_v29, %v7559_v53  ;;  %v8304_v18 = vpop.f32.mrf.mxu1  ;;  %v7642_v29 = vld [vmem:[#allocation3 + $0x327] sm:$0xff] }
 0xa68   :  { %v7872_v30 = vpop.f32.mrf.mxu0  ;;  %v7685_v3 = vpack.c.bf16 %v7643_v50, %v7642_v29 }
 0xa69   :  { %v14780_v11 = vadd.f32 %v8304_v18, %v7994_v19 }
 0xa6a   :  { %v7003_v33 = vpop.f32.mrf.mxu2  ;;  %10304 = vmatmul.msk.bf16.gmra.mxu1 %vm4166_vm3, %v6816_v47 }
 0xa6b   :  { %v7126_v6 = vadd.f32 %v7003_v33, %v14492_v10  ;;  %v7437_v49 = vpop.f32.mrf.mxu3 }
 0xa6d   :  { %v7560_v57 = vadd.f32 %v7437_v49, %v7126_v6  ;;  %v7209_v6 = vld [vmem:[#allocation3 + $0x329] sm:$0xff]  ;;  %v7210_v49 = vld [vmem:[#allocation3 + $0x331] sm:$0xff] }
 0xa6e   :  { %v7251_v29 = vpack.c.bf16 %v7210_v49, %v7209_v6  ;;  %v6778_v49 = vld [vmem:[#allocation3 + $0x350] sm:$0xff] }
 0xa6f   :  { %10191 = vmatmul.msk.bf16.gmra.mxu2 %vm4166_vm3, %v6816_v47  ;;  %v7995_v20 = vadd.f32 %v7872_v30, %v7560_v57  ;;  %v8306_v19 = vpop.f32.mrf.mxu1 }
 0xa70   :  { %10229 = vmatmul.msk.bf16.gmra.mxu3 %vm4166_vm3, %v7250_v58  ;;  %v7875_v13 = vpop.f32.mrf.mxu0 }
 0xa71   :  { %v14787_v55 = vadd.f32 %v8306_v19, %v7995_v20 }
 0xa72   :  { %v7006_v43 = vpop.f32.mrf.mxu2 }
 0xa73   :  { %v7127_v10 = vadd.f32 %v7006_v43, %v14494_v27  ;;  %v7440_v53 = vpop.f32.mrf.mxu3  ;;  %10267 = vmatmul.msk.bf16.gmra.mxu0 %vm4166_vm3, %v7685_v3  ;;  %v6817_v27 = vpack.c.bf16 %v6776_v1, %v6775_v5  ;;  %v7645_v43 = vld [vmem:[#allocation3 + $0x34f] sm:$0xff] }
 0xa74   :  { %v6777_v1 = vld [vmem:[#allocation3 + $0x348] sm:$0xff] }
 0xa75   :  { %v7561_v60 = vadd.f32 %v7440_v53, %v7127_v10 }
 0xa77   :  { %v7996_v33 = vadd.f32 %v7875_v13, %v7561_v60  ;;  %v8309_v58 = vpop.f32.mrf.mxu1  ;;  %v7644_v13 = vld [vmem:[#allocation3 + $0x347] sm:$0xff] }
 0xa78   :  { %v7877_v24 = vpop.f32.mrf.mxu0  ;;  %v7686_v53 = vpack.c.bf16 %v7645_v43, %v7644_v13 }
 0xa79   :  { %v14790_v50 = vadd.f32 %v8309_v58, %v7996_v33 }
 0xa7a   :  { %v7008_v30 = vpop.f32.mrf.mxu2  ;;  %10305 = vmatmul.msk.bf16.gmra.mxu1 %vm4166_vm3, %v6817_v27 }
 0xa7b   :  { %v7128_v57 = vadd.f32 %v7008_v30, %v14500_v14  ;;  %v7442_v18 = vpop.f32.mrf.mxu3 }
 0xa7d   :  { %v7562_v47 = vadd.f32 %v7442_v18, %v7128_v57  ;;  %v7211_v57 = vld [vmem:[#allocation3 + $0x349] sm:$0xff]  ;;  %v7212_v18 = vld [vmem:[#allocation3 + $0x351] sm:$0xff] }
 0xa7e   :  { %v7252_v13 = vpack.c.bf16 %v7212_v18, %v7211_v57  ;;  %v6780_v18 = vld [vmem:[#allocation3 + $0x370] sm:$0xff] }
 0xa7f   :  { %10192 = vmatmul.msk.bf16.gmra.mxu2 %vm4166_vm3, %v6817_v27  ;;  %v7997_v20 = vadd.f32 %v7877_v24, %v7562_v47  ;;  %v8311_v33 = vpop.f32.mrf.mxu1 }
 0xa80   :  { %10230 = vmatmul.msk.bf16.gmra.mxu3 %vm4166_vm3, %v7251_v29  ;;  %v7880_v3 = vpop.f32.mrf.mxu0 }
 0xa81   :  { %v14797_v5 = vadd.f32 %v8311_v33, %v7997_v20 }
 0xa82   :  { %v7011_v10 = vpop.f32.mrf.mxu2 }
 0xa83   :  { %v7129_v14 = vadd.f32 %v7011_v10, %v14502_v61  ;;  %v7445_v60 = vpop.f32.mrf.mxu3  ;;  %10268 = vmatmul.msk.bf16.gmra.mxu0 %vm4166_vm3, %v7686_v53  ;;  %v6818_v61 = vpack.c.bf16 %v6778_v49, %v6777_v1  ;;  %v7647_v10 = vld [vmem:[#allocation3 + $0x36f] sm:$0xff] }
 0xa84   :  { %v6779_v49 = vld [vmem:[#allocation3 + $0x368] sm:$0xff] }
 0xa85   :  { %v7563_v19 = vadd.f32 %v7445_v60, %v7129_v14 }
 0xa87   :  { %v7998_v30 = vadd.f32 %v7880_v3, %v7563_v19  ;;  %v8314_v29 = vpop.f32.mrf.mxu1  ;;  %v7646_v3 = vld [vmem:[#allocation3 + $0x367] sm:$0xff] }
 0xa88   :  { %v7882_v6 = vpop.f32.mrf.mxu0  ;;  %v7687_v60 = vpack.c.bf16 %v7647_v10, %v7646_v3 }
 0xa89   :  { %v14800_v43 = vadd.f32 %v8314_v29, %v7998_v30 }
 0xa8a   :  { %v7013_v24 = vpop.f32.mrf.mxu2  ;;  %10306 = vmatmul.msk.bf16.gmra.mxu1 %vm4166_vm3, %v6818_v61 }
 0xa8b   :  { %v7130_v47 = vadd.f32 %v7013_v24, %v14508_v56  ;;  %v7447_v58 = vpop.f32.mrf.mxu3 }
 0xa8d   :  { %v7564_v27 = vadd.f32 %v7447_v58, %v7130_v47  ;;  %v7213_v47 = vld [vmem:[#allocation3 + $0x369] sm:$0xff]  ;;  %v7214_v58 = vld [vmem:[#allocation3 + $0x371] sm:$0xff] }
 0xa8e   :  { %v7253_v3 = vpack.c.bf16 %v7214_v58, %v7213_v47  ;;  %v6782_v58 = vld [vmem:[#allocation3 + $0x390] sm:$0xff] }
 0xa8f   :  { %10193 = vmatmul.msk.bf16.gmra.mxu2 %vm4166_vm3, %v6818_v61  ;;  %v7999_v20 = vadd.f32 %v7882_v6, %v7564_v27  ;;  %v8316_v30 = vpop.f32.mrf.mxu1 }
 0xa90   :  { %10231 = vmatmul.msk.bf16.gmra.mxu3 %vm4166_vm3, %v7252_v13  ;;  %v7885_v53 = vpop.f32.mrf.mxu0 }
 0xa91   :  { %v14807_v1 = vadd.f32 %v8316_v30, %v7999_v20 }
 0xa92   :  { %v7016_v14 = vpop.f32.mrf.mxu2 }
 0xa93   :  { %v7131_v56 = vadd.f32 %v7016_v14, %v14510_v59  ;;  %v7450_v19 = vpop.f32.mrf.mxu3  ;;  %10269 = vmatmul.msk.bf16.gmra.mxu0 %vm4166_vm3, %v7687_v60  ;;  %v6819_v59 = vpack.c.bf16 %v6780_v18, %v6779_v49  ;;  %v7649_v14 = vld [vmem:[#allocation3 + $0x38f] sm:$0xff] }
 0xa94   :  { %v6781_v18 = vld [vmem:[#allocation3 + $0x388] sm:$0xff] }
 0xa95   :  { %v7565_v33 = vadd.f32 %v7450_v19, %v7131_v56 }
 0xa97   :  { %v8000_v24 = vadd.f32 %v7885_v53, %v7565_v33  ;;  %v8319_v13 = vpop.f32.mrf.mxu1  ;;  %v7648_v53 = vld [vmem:[#allocation3 + $0x387] sm:$0xff] }
 0xa98   :  { %v7887_v57 = vpop.f32.mrf.mxu0  ;;  %v7688_v19 = vpack.c.bf16 %v7649_v14, %v7648_v53 }
 0xa99   :  { %v14810_v10 = vadd.f32 %v8319_v13, %v8000_v24 }
 0xa9a   :  { %v7018_v6 = vpop.f32.mrf.mxu2  ;;  %10307 = vmatmul.msk.bf16.gmra.mxu1 %vm4166_vm3, %v6819_v59 }
 0xa9b   :  { %v7132_v27 = vadd.f32 %v7018_v6, %v14516_v40  ;;  %v7452_v29 = vpop.f32.mrf.mxu3 }
 0xa9d   :  { %v7566_v61 = vadd.f32 %v7452_v29, %v7132_v27  ;;  %v7215_v27 = vld [vmem:[#allocation3 + $0x389] sm:$0xff]  ;;  %v7216_v29 = vld [vmem:[#allocation3 + $0x391] sm:$0xff] }
 0xa9e   :  { %v7254_v53 = vpack.c.bf16 %v7216_v29, %v7215_v27  ;;  %v6784_v29 = vld [vmem:[#allocation3 + $0x3b0] sm:$0xff] }
 0xa9f   :  { %10194 = vmatmul.msk.bf16.gmra.mxu2 %vm4166_vm3, %v6819_v59  ;;  %v8001_v20 = vadd.f32 %v7887_v57, %v7566_v61  ;;  %v8321_v24 = vpop.f32.mrf.mxu1 }
 0xaa0   :  { %10232 = vmatmul.msk.bf16.gmra.mxu3 %vm4166_vm3, %v7253_v3  ;;  %v7890_v60 = vpop.f32.mrf.mxu0 }
 0xaa1   :  { %v14817_v49 = vadd.f32 %v8321_v24, %v8001_v20 }
 0xaa2   :  { %v7021_v56 = vpop.f32.mrf.mxu2 }
 0xaa3   :  { %v7133_v40 = vadd.f32 %v7021_v56, %v14518_v35  ;;  %v7455_v33 = vpop.f32.mrf.mxu3  ;;  %10270 = vmatmul.msk.bf16.gmra.mxu0 %vm4166_vm3, %v7688_v19  ;;  %v6820_v35 = vpack.c.bf16 %v6782_v58, %v6781_v18  ;;  %v7651_v56 = vld [vmem:[#allocation3 + $0x3af] sm:$0xff] }
 0xaa4   :  { %v6783_v58 = vld [vmem:[#allocation3 + $0x3a8] sm:$0xff] }
 0xaa5   :  { %v7567_v30 = vadd.f32 %v7455_v33, %v7133_v40 }
 0xaa7   :  { %v8002_v6 = vadd.f32 %v7890_v60, %v7567_v30  ;;  %v8324_v3 = vpop.f32.mrf.mxu1  ;;  %v7650_v60 = vld [vmem:[#allocation3 + $0x3a7] sm:$0xff] }
 0xaa8   :  { %v7892_v47 = vpop.f32.mrf.mxu0  ;;  %v7689_v33 = vpack.c.bf16 %v7651_v56, %v7650_v60 }
 0xaa9   :  { %v14820_v14 = vadd.f32 %v8324_v3, %v8002_v6 }
 0xaaa   :  { %v7023_v57 = vpop.f32.mrf.mxu2  ;;  %10308 = vmatmul.msk.bf16.gmra.mxu1 %vm4166_vm3, %v6820_v35 }
 0xaab   :  { %v7134_v61 = vadd.f32 %v7023_v57, %v14524_v51  ;;  %v7457_v13 = vpop.f32.mrf.mxu3 }
 0xaad   :  { %v7568_v59 = vadd.f32 %v7457_v13, %v7134_v61  ;;  %v7217_v61 = vld [vmem:[#allocation3 + $0x3a9] sm:$0xff]  ;;  %v7218_v13 = vld [vmem:[#allocation3 + $0x3b1] sm:$0xff] }
 0xaae   :  { %v7255_v60 = vpack.c.bf16 %v7218_v13, %v7217_v61  ;;  %v6786_v13 = vld [vmem:[#allocation3 + $0x3d0] sm:$0xff] }
 0xaaf   :  { %10195 = vmatmul.msk.bf16.gmra.mxu2 %vm4166_vm3, %v6820_v35  ;;  %v8003_v20 = vadd.f32 %v7892_v47, %v7568_v59  ;;  %v8326_v6 = vpop.f32.mrf.mxu1 }
 0xab0   :  { %10233 = vmatmul.msk.bf16.gmra.mxu3 %vm4166_vm3, %v7254_v53  ;;  %v7895_v19 = vpop.f32.mrf.mxu0 }
 0xab1   :  { %v14827_v18 = vadd.f32 %v8326_v6, %v8003_v20 }
 0xab2   :  { %v7026_v40 = vpop.f32.mrf.mxu2 }
 0xab3   :  { %v7135_v51 = vadd.f32 %v7026_v40, %v14526_v12  ;;  %v7460_v30 = vpop.f32.mrf.mxu3  ;;  %10271 = vmatmul.msk.bf16.gmra.mxu0 %vm4166_vm3, %v7689_v33  ;;  %v6821_v12 = vpack.c.bf16 %v6784_v29, %v6783_v58  ;;  %v7653_v40 = vld [vmem:[#allocation3 + $0x3cf] sm:$0xff] }
 0xab4   :  { %v6785_v29 = vld [vmem:[#allocation3 + $0x3c8] sm:$0xff] }
 0xab5   :  { %v7569_v24 = vadd.f32 %v7460_v30, %v7135_v51 }
 0xab7   :  { %v8004_v57 = vadd.f32 %v7895_v19, %v7569_v24  ;;  %v8329_v53 = vpop.f32.mrf.mxu1  ;;  %v7652_v19 = vld [vmem:[#allocation3 + $0x3c7] sm:$0xff] }
 0xab8   :  { %v7897_v27 = vpop.f32.mrf.mxu0  ;;  %v7690_v30 = vpack.c.bf16 %v7653_v40, %v7652_v19 }
 0xab9   :  { %v14830_v56 = vadd.f32 %v8329_v53, %v8004_v57 }
 0xaba   :  { %v7028_v47 = vpop.f32.mrf.mxu2  ;;  %10309 = vmatmul.msk.bf16.gmra.mxu1 %vm4166_vm3, %v6821_v12 }
 0xabb   :  { %v7136_v59 = vadd.f32 %v7028_v47, %v14532_v37  ;;  %v7462_v3 = vpop.f32.mrf.mxu3 }
 0xabd   :  { %v7570_v35 = vadd.f32 %v7462_v3, %v7136_v59  ;;  %v7219_v59 = vld [vmem:[#allocation3 + $0x3c9] sm:$0xff]  ;;  %v7220_v3 = vld [vmem:[#allocation3 + $0x3d1] sm:$0xff] }
 0xabe   :  { %v7256_v19 = vpack.c.bf16 %v7220_v3, %v7219_v59  ;;  %v6788_v3 = vld [vmem:[#allocation3 + $0x3f0] sm:$0xff] }
 0xabf   :  { %10196 = vmatmul.msk.bf16.gmra.mxu2 %vm4166_vm3, %v6821_v12  ;;  %v8005_v20 = vadd.f32 %v7897_v27, %v7570_v35  ;;  %v8331_v57 = vpop.f32.mrf.mxu1 }
 0xac0   :  { %10234 = vmatmul.msk.bf16.gmra.mxu3 %vm4166_vm3, %v7255_v60  ;;  %v7900_v33 = vpop.f32.mrf.mxu0 }
 0xac1   :  { %v14837_v58 = vadd.f32 %v8331_v57, %v8005_v20 }
 0xac2   :  { %v7031_v51 = vpop.f32.mrf.mxu2 }
 0xac3   :  { %v7137_v37 = vadd.f32 %v7031_v51, %v14534_v54  ;;  %v7465_v24 = vpop.f32.mrf.mxu3  ;;  %10272 = vmatmul.msk.bf16.gmra.mxu0 %vm4166_vm3, %v7690_v30  ;;  %v6822_v54 = vpack.c.bf16 %v6786_v13, %v6785_v29  ;;  %v7655_v51 = vld [vmem:[#allocation3 + $0x3ef] sm:$0xff] }
 0xac4   :  { %v6787_v13 = vld [vmem:[#allocation3 + $0x3e8] sm:$0xff] }
 0xac5   :  { %v7571_v6 = vadd.f32 %v7465_v24, %v7137_v37 }
 0xac7   :  { %v8006_v47 = vadd.f32 %v7900_v33, %v7571_v6  ;;  %v8334_v60 = vpop.f32.mrf.mxu1  ;;  %v7654_v33 = vld [vmem:[#allocation3 + $0x3e7] sm:$0xff] }
 0xac8   :  { %v7902_v61 = vpop.f32.mrf.mxu0  ;;  %v7691_v24 = vpack.c.bf16 %v7655_v51, %v7654_v33 }
 0xac9   :  { %v14840_v40 = vadd.f32 %v8334_v60, %v8006_v47 }
 0xaca   :  { %v7033_v27 = vpop.f32.mrf.mxu2  ;;  %10310 = vmatmul.msk.bf16.gmra.mxu1 %vm4166_vm3, %v6822_v54 }
 0xacb   :  { %v7138_v35 = vadd.f32 %v7033_v27, %v14540_v45  ;;  %v7467_v53 = vpop.f32.mrf.mxu3 }
 0xacd   :  { %v7572_v12 = vadd.f32 %v7467_v53, %v7138_v35  ;;  %v7221_v35 = vld [vmem:[#allocation3 + $0x3e9] sm:$0xff]  ;;  %v7222_v53 = vld [vmem:[#allocation3 + $0x3f1] sm:$0xff] }
 0xace   :  { %v7257_v33 = vpack.c.bf16 %v7222_v53, %v7221_v35  ;;  %v6790_v53 = vld [vmem:[#allocation3 + $0x410] sm:$0xff] }
 0xacf   :  { %10197 = vmatmul.msk.bf16.gmra.mxu2 %vm4166_vm3, %v6822_v54  ;;  %v8007_v20 = vadd.f32 %v7902_v61, %v7572_v12  ;;  %v8336_v47 = vpop.f32.mrf.mxu1 }
 0xad0   :  { %10235 = vmatmul.msk.bf16.gmra.mxu3 %vm4166_vm3, %v7256_v19  ;;  %v7905_v30 = vpop.f32.mrf.mxu0 }
 0xad1   :  { %v14847_v29 = vadd.f32 %v8336_v47, %v8007_v20 }
 0xad2   :  { %v7036_v37 = vpop.f32.mrf.mxu2 }
 0xad3   :  { %v7139_v45 = vadd.f32 %v7036_v37, %v14542_v62  ;;  %v7470_v6 = vpop.f32.mrf.mxu3  ;;  %10273 = vmatmul.msk.bf16.gmra.mxu0 %vm4166_vm3, %v7691_v24  ;;  %v6823_v62 = vpack.c.bf16 %v6788_v3, %v6787_v13  ;;  %v7657_v37 = vld [vmem:[#allocation3 + $0x40f] sm:$0xff] }
 0xad4   :  { %v6789_v3 = vld [vmem:[#allocation3 + $0x408] sm:$0xff] }
 0xad5   :  { %v7573_v57 = vadd.f32 %v7470_v6, %v7139_v45 }
 0xad7   :  { %v8008_v27 = vadd.f32 %v7905_v30, %v7573_v57  ;;  %v8339_v19 = vpop.f32.mrf.mxu1  ;;  %v7656_v30 = vld [vmem:[#allocation3 + $0x407] sm:$0xff] }
 0xad8   :  { %v7907_v59 = vpop.f32.mrf.mxu0  ;;  %v7692_v6 = vpack.c.bf16 %v7657_v37, %v7656_v30 }
 0xad9   :  { %v14850_v51 = vadd.f32 %v8339_v19, %v8008_v27 }
 0xada   :  { %v7038_v61 = vpop.f32.mrf.mxu2  ;;  %10311 = vmatmul.msk.bf16.gmra.mxu1 %vm4166_vm3, %v6823_v62 }
 0xadb   :  { %v7140_v12 = vadd.f32 %v7038_v61, %v14548_v63  ;;  %v7472_v60 = vpop.f32.mrf.mxu3 }
 0xadd   :  { %v7574_v54 = vadd.f32 %v7472_v60, %v7140_v12  ;;  %v7223_v12 = vld [vmem:[#allocation3 + $0x409] sm:$0xff]  ;;  %v7224_v60 = vld [vmem:[#allocation3 + $0x411] sm:$0xff] }
 0xade   :  { %v7258_v37 = vpack.c.bf16 %v7224_v60, %v7223_v12  ;;  %v6791_v60 = vld [vmem:[#allocation3 + $0x428] sm:$0xff] }
 0xadf   :  { %10198 = vmatmul.msk.bf16.gmra.mxu2 %vm4166_vm3, %v6823_v62  ;;  %v8009_v20 = vadd.f32 %v7907_v59, %v7574_v54  ;;  %v8341_v27 = vpop.f32.mrf.mxu1  ;;  %v16994_v54 = vld [vmem:[#allocation60_spill] sm:$0xff] }
 0xae0   :  { %10236 = vmatmul.msk.bf16.gmra.mxu3 %vm4166_vm3, %v7257_v33  ;;  %v7910_v24 = vpop.f32.mrf.mxu0 }
 0xae1   :  { %v14857_v13 = vadd.f32 %v8341_v27, %v8009_v20  ;;  %v16996_v27 = vld [vmem:[#allocation61_spill] sm:$0xff] }
 0xae2   :  { %v7041_v45 = vpop.f32.mrf.mxu2 }
 0xae3   :  { %v7141_v63 = vadd.f32 %v7041_v45, %v14550_v7  ;;  %v7475_v57 = vpop.f32.mrf.mxu3  ;;  %10274 = vmatmul.msk.bf16.gmra.mxu0 %vm4166_vm3, %v7692_v6  ;;  %16993 = vst [vmem:[#allocation28_spill] sm:$0xff] %v14857_v13  ;;  %v6824_v7 = vpack.c.bf16 %v6790_v53, %v6789_v3  ;;  %v7659_v6 = vld [vmem:[#allocation3 + $0x42f] sm:$0xff] }
 0xae5   :  { %v7575_v47 = vadd.f32 %v7475_v57, %v7141_v63 }
 0xae7   :  { %v8010_v61 = vadd.f32 %v7910_v24, %v7575_v47  ;;  %v8344_v30 = vpop.f32.mrf.mxu1  ;;  %v7658_v24 = vld [vmem:[#allocation3 + $0x427] sm:$0xff] }
 0xae8   :  { %v7912_v35 = vpop.f32.mrf.mxu0  ;;  %v7693_v47 = vpack.c.bf16 %v7659_v6, %v7658_v24 }
 0xae9   :  { %v14860_v45 = vadd.f32 %v8344_v30, %v8010_v61  ;;  %v7226_v30 = vld [vmem:[#allocation3 + $0x431] sm:$0xff] }
 0xaea   :  { %v7043_v59 = vpop.f32.mrf.mxu2  ;;  %10312 = vmatmul.msk.bf16.gmra.mxu1 %vm4166_vm3, %v6824_v7 }
 0xaeb   :  { %v7142_v19 = vadd.f32 %v7043_v59, %v16994_v54  ;;  %v7477_v62 = vpop.f32.mrf.mxu3  ;;  %16995 = vst [vmem:[#allocation29_spill] sm:$0xff] %v14860_v45 }
 0xaed   :  { %v7576_v33 = vadd.f32 %v7477_v62, %v7142_v19  ;;  %v6792_v62 = vld [vmem:[#allocation3 + $0x430] sm:$0xff] }
 0xaef   :  { %10199 = vmatmul.msk.bf16.gmra.mxu2 %vm4166_vm3, %v6824_v7  ;;  %v8011_v20 = vadd.f32 %v7912_v35, %v7576_v33  ;;  %v8346_v61 = vpop.f32.mrf.mxu1  ;;  %v7225_v33 = vld [vmem:[#allocation3 + $0x429] sm:$0xff]  ;;  %v16997_v7 = vld [vmem:[#allocation8_spill] sm:$0xff] }
 0xaf0   :  { %10237 = vmatmul.msk.bf16.gmra.mxu3 %vm4166_vm3, %v7258_v37  ;;  %v7915_v63 = vpop.f32.mrf.mxu0 }
 0xaf1   :  { %v14867_v53 = vadd.f32 %v8346_v61, %v8011_v20  ;;  %v16999_v61 = vld [vmem:[#allocation11_spill] sm:$0xff] }
 0xaf2   :  { %v7046_v57 = vpop.f32.mrf.mxu2 }
 0xaf3   :  { %v7143_v59 = vadd.f32 %v7046_v57, %v16996_v27  ;;  %v7480_v54 = vpop.f32.mrf.mxu3  ;;  %10275 = vmatmul.msk.bf16.gmra.mxu0 %vm4166_vm3, %v7693_v47  ;;  %v6825_v57 = vpack.c.bf16 %v6792_v62, %v6791_v60  ;;  %v7259_v27 = vpack.c.bf16 %v7226_v30, %v7225_v33  ;;  %v7661_v47 = vld [vmem:[#allocation3 + $0x44f] sm:$0xff] }
 0xaf4   :  { %v6793_v30 = vld [vmem:[#allocation3 + $0x448] sm:$0xff] }
 0xaf5   :  { %v7577_v3 = vadd.f32 %v7480_v54, %v7143_v59 }
 0xaf7   :  { %v8012_v12 = vadd.f32 %v7915_v63, %v7577_v3  ;;  %v8349_v6 = vpop.f32.mrf.mxu1  ;;  %v7660_v63 = vld [vmem:[#allocation3 + $0x447] sm:$0xff] }
 0xaf8   :  { %v7917_v19 = vpop.f32.mrf.mxu0  ;;  %v7694_v3 = vpack.c.bf16 %v7661_v47, %v7660_v63 }
 0xaf9   :  { %v14870_v13 = vadd.f32 %v8349_v6, %v8012_v12  ;;  %v7228_v6 = vld [vmem:[#allocation3 + $0x451] sm:$0xff] }
 0xafa   :  { %v7048_v35 = vpop.f32.mrf.mxu2  ;;  %10313 = vmatmul.msk.bf16.gmra.mxu1 %vm4166_vm3, %v6825_v57 }
 0xafb   :  { %v7144_v37 = vadd.f32 %v7048_v35, %v16997_v7  ;;  %v7482_v45 = vpop.f32.mrf.mxu3  ;;  %16998 = vst [vmem:[#allocation30_spill] sm:$0xff] %v14870_v13 }
 0xafd   :  { %v7578_v24 = vadd.f32 %v7482_v45, %v7144_v37  ;;  %v6794_v37 = vld [vmem:[#allocation3 + $0x450] sm:$0xff] }
 0xaff   :  { %10200 = vmatmul.msk.bf16.gmra.mxu2 %vm4166_vm3, %v6825_v57  ;;  %v8013_v20 = vadd.f32 %v7917_v19, %v7578_v24  ;;  %v8351_v12 = vpop.f32.mrf.mxu1  ;;  %v7227_v24 = vld [vmem:[#allocation3 + $0x449] sm:$0xff] }
 0xb00   :  { %10238 = vmatmul.msk.bf16.gmra.mxu3 %vm4166_vm3, %v7259_v27  ;;  %v7920_v59 = vpop.f32.mrf.mxu0  ;;  %v17001_v57 = vld [vmem:[#allocation10_spill] sm:$0xff] }
 0xb01   :  { %v14877_v62 = vadd.f32 %v8351_v12, %v8013_v20  ;;  %v7663_v20 = vld [vmem:[#allocation3 + $0x46f] sm:$0xff] }
 0xb02   :  { %v7051_v54 = vpop.f32.mrf.mxu2 }
 0xb03   :  { %v7145_v35 = vadd.f32 %v7051_v54, %v16999_v61  ;;  %v7485_v45 = vpop.f32.mrf.mxu3  ;;  %10276 = vmatmul.msk.bf16.gmra.mxu0 %vm4166_vm3, %v7694_v3  ;;  %17000 = vst [vmem:[#allocation13_spill] sm:$0xff] %v14877_v62  ;;  %v6826_v54 = vpack.c.bf16 %v6794_v37, %v6793_v30  ;;  %v14880_v61 = vpack.c.bf16 %v7228_v6, %v7227_v24  ;;  %v8096_v6 = vld [vmem:[#allocation3 + $0x468] sm:$0xff] }
 0xb05   :  { %v7579_v60 = vadd.f32 %v7485_v45, %v7145_v35  ;;  %17002 = vst [vmem:[#allocation17_spill] sm:$0xff] %v14880_v61  ;;  %v7662_v35 = vld [vmem:[#allocation3 + $0x467] sm:$0xff] }
 0xb06   :  { %v7695_v45 = vpack.c.bf16 %v7663_v20, %v7662_v35 }
 0xb07   :  { %v8014_v33 = vadd.f32 %v7920_v59, %v7579_v60  ;;  %v8354_v47 = vpop.f32.mrf.mxu1 }
 0xb08   :  { %v7922_v7 = vpop.f32.mrf.mxu0 }
 0xb09   :  { %v14882_v3 = vadd.f32 %v8354_v47, %v8014_v33 }
 0xb0a   :  { %v7053_v19 = vpop.f32.mrf.mxu2  ;;  %10314 = vmatmul.msk.bf16.gmra.mxu1 %vm4166_vm3, %v6826_v54 }
 0xb0b   :  { %v7146_v27 = vadd.f32 %v7053_v19, %v17001_v57  ;;  %v7487_v13 = vpop.f32.mrf.mxu3  ;;  %17003 = vst [vmem:[#allocation34_spill] sm:$0xff] %v14882_v3  ;;  %v8097_v57 = vld [vmem:[#allocation3 + $0x470] sm:$0xff] }
 0xb0c   :  { %v8129_v3 = vpack.c.bf16 %v8097_v57, %v8096_v6 }
 0xb0d   :  { %v7580_v63 = vadd.f32 %v7487_v13, %v7146_v27 }
 0xb0f   :  { %10201 = vmatmul.msk.bf16.gmra.mxu2 %vm4166_vm3, %v6826_v54  ;;  %v8015_v59 = vadd.f32 %v7922_v7, %v7580_v63  ;;  %v8356_v37 = vpop.f32.mrf.mxu1  ;;  %v8468_v7 = vld [vmem:[#allocation3 + $0x49] sm:$0xff]  ;;  %v8469_v63 = vld [vmem:[#allocation3 + $0x51] sm:$0xff] }
 0xb10   :  { %10239 = vmatmul.msk.bf16.gmra.mxu3 %vm4166_vm3, %v14880_v61  ;;  %v7925_v60 = vpop.f32.mrf.mxu0  ;;  %v17005_v54 = vld [vmem:[#allocation14_spill] sm:$0xff] }
 0xb11   :  { %v14890_v33 = vadd.f32 %v8356_v37, %v8015_v59 }
 0xb12   :  { %v7056_v12 = vpop.f32.mrf.mxu2 }
 0xb13   :  { %v7147_v13 = vadd.f32 %v7056_v12, %v14586_v22  ;;  %v7490_v30 = vpop.f32.mrf.mxu3  ;;  %10277 = vmatmul.msk.bf16.gmra.mxu0 %vm4166_vm3, %v7695_v45  ;;  %17004 = vst [vmem:[#allocation5_spill] sm:$0xff] %v14890_v33  ;;  %v8532_v12 = vpack.c.bf16 %v8469_v63, %v8468_v7  ;;  %v8470_v7 = vld [vmem:[#allocation3 + $0x69] sm:$0xff]  ;;  %v17008_v63 = vld [vmem:[#allocation4_spill] sm:$0xff] }
 0xb15   :  { %v7581_v19 = vadd.f32 %v7490_v30, %v7147_v13  ;;  %v17006_v30 = vld [vmem:[#allocation7_spill] sm:$0xff] }
 0xb17   :  { %v8016_v24 = vadd.f32 %v7925_v60, %v7581_v19  ;;  %v8359_v22 = vpop.f32.mrf.mxu1 }
 0xb18   :  { %v7927_v27 = vpop.f32.mrf.mxu0 }
 0xb19   :  { %v14893_v13 = vadd.f32 %v8359_v22, %v8016_v24  ;;  %v8471_v24 = vld [vmem:[#allocation3 + $0x71] sm:$0xff] }
 0xb1a   :  { %v7058_v47 = vpop.f32.mrf.mxu2  ;;  %10315 = vmatmul.msk.bf16.gmra.mxu1 %vm4166_vm3, %v8129_v3  ;;  %v8533_v3 = vpack.c.bf16 %v8471_v24, %v8470_v7 }
 0xb1b   :  { %v7148_v35 = vadd.f32 %v7058_v47, %v17005_v54  ;;  %v7492_v20 = vpop.f32.mrf.mxu3 }
 0xb1d   :  { %v7582_v61 = vadd.f32 %v7492_v20, %v7148_v35 }
 0xb1f   :  { %10322 = vmatmul.msk.bf16.vlgmr.msra.gmra.mxu2 %vm4166_vm3, %v8532_v12  ;;  %v8017_v59 = vadd.f32 %v7927_v27, %v7582_v61  ;;  %v8361_v62 = vpop.f32.mrf.mxu1 }
 0xb20   :  { %v7930_v45 = vpop.f32.mrf.mxu0 }
 0xb21   :  { %v14898_v47 = vadd.f32 %v8361_v62, %v8017_v59  ;;  %v17010_v62 = vld [vmem:[#allocation16_spill] sm:$0xff] }
 0xb22   :  { %v7061_v60 = vpop.f32.mrf.mxu2 }
 0xb23   :  { %v7149_v19 = vadd.f32 %v7061_v60, %v17006_v30  ;;  %v7495_v37 = vpop.f32.mrf.mxu3  ;;  %17007 = vst [vmem:[#allocation35_spill] sm:$0xff] %v14898_v47 }
 0xb25   :  { %v7583_v33 = vadd.f32 %v7495_v37, %v7149_v19 }
 0xb27   :  { %v8018_v6 = vadd.f32 %v7930_v45, %v7583_v33  ;;  %v8364_v27 = vpop.f32.mrf.mxu1 }
 0xb28   :  { %v7932_v57 = vpop.f32.mrf.mxu0 }
 0xb29   :  { %v14901_v22 = vadd.f32 %v8364_v27, %v8018_v6 }
 0xb2a   :  { %v7063_v54 = vpop.f32.mrf.mxu2 }
 0xb2b   :  { %v7150_v35 = vadd.f32 %v7063_v54, %v17008_v63  ;;  %v7497_v20 = vpop.f32.mrf.mxu3  ;;  %17009 = vst [vmem:[#allocation37_spill] sm:$0xff] %v14901_v22  ;;  %v8472_v63 = vld [vmem:[#allocation3 + $0x89] sm:$0xff] }
 0xb2c   :  { %v8474_v22 = vld [vmem:[#allocation3 + $0xa9] sm:$0xff] }
 0xb2d   :  { %v7584_v61 = vadd.f32 %v7497_v20, %v7150_v35  ;;  %v8473_v35 = vld [vmem:[#allocation3 + $0x91] sm:$0xff] }
 0xb2e   :  { %v17012_v20 = vld [vmem:[#allocation19_spill] sm:$0xff] }
 0xb2f   :  { %10323 = vmatmul.msk.bf16.gmra.mxu2 %vm4166_vm3, %v8533_v3  ;;  %v8019_v12 = vadd.f32 %v7932_v57, %v7584_v61  ;;  %v8366_v19 = vpop.f32.mrf.mxu1  ;;  %v8534_v57 = vpack.c.bf16 %v8473_v35, %v8472_v63 }
 0xb30   :  { %v7935_v60 = vpop.f32.mrf.mxu0 }
 0xb31   :  { %v14905_v37 = vadd.f32 %v8366_v19, %v8019_v12 }
 0xb32   :  { %v7066_v30 = vpop.f32.mrf.mxu2 }
 0xb33   :  { %v7151_v59 = vadd.f32 %v7066_v30, %v17010_v62  ;;  %v7500_v33 = vpop.f32.mrf.mxu3  ;;  %17011 = vst [vmem:[#allocation39_spill] sm:$0xff] %v14905_v37 }
 0xb35   :  { %v7585_v45 = vadd.f32 %v7500_v33, %v7151_v59  ;;  %v17013_v59 = vld [vmem:[#allocation36_spill] sm:$0xff] }
 0xb37   :  { %v8020_v47 = vadd.f32 %v7935_v60, %v7585_v45  ;;  %v8369_v3 = vpop.f32.mrf.mxu1 }
 0xb38   :  { %v7937_v24 = vpop.f32.mrf.mxu0 }
 0xb39   :  { %v14908_v61 = vadd.f32 %v8369_v3, %v8020_v47 }
 0xb3a   :  { %v7068_v54 = vpop.f32.mrf.mxu2 }
 0xb3b   :  { %v7152_v7 = vadd.f32 %v7068_v54, %v17012_v20  ;;  %v7502_v6 = vpop.f32.mrf.mxu3 }
 0xb3d   :  { %v7586_v27 = vadd.f32 %v7502_v6, %v7152_v7  ;;  %v8475_v7 = vld [vmem:[#allocation3 + $0xb1] sm:$0xff] }
 0xb3e   :  { %v17014_v6 = vld [vmem:[#allocation18_spill] sm:$0xff]  ;;  %v8535_v35 = vpack.c.bf16 %v8475_v7, %v8474_v22 }
 0xb3f   :  { %10324 = vmatmul.msk.bf16.gmra.mxu2 %vm4166_vm3, %v8534_v57  ;;  %v8021_v30 = vadd.f32 %v7937_v24, %v7586_v27  ;;  %v8371_v45 = vpop.f32.mrf.mxu1  ;;  %v17015_v27 = vld [vmem:[#allocation22_spill] sm:$0xff] }
 0xb40   :  { %v7940_v19 = vpop.f32.mrf.mxu0  ;;  %v8479_v7 = vld [vmem:[#allocation3 + $0xf1] sm:$0xff] }
 0xb41   :  { %v14912_v37 = vadd.f32 %v8371_v45, %v8021_v30  ;;  %v8476_v30 = vld [vmem:[#allocation3 + $0xc9] sm:$0xff] }
 0xb42   :  { %v7071_v62 = vpop.f32.mrf.mxu2 }
 0xb43   :  { %v7153_v12 = vadd.f32 %v7071_v62, %v17013_v59  ;;  %v7505_v33 = vpop.f32.mrf.mxu3  ;;  %v8477_v59 = vld [vmem:[#allocation3 + $0xd1] sm:$0xff] }
 0xb45   :  { %v7587_v60 = vadd.f32 %v7505_v33, %v7153_v12  ;;  %v17016_v12 = vld [vmem:[#allocation12_spill] sm:$0xff] }
 0xb47   :  { %v8022_v54 = vadd.f32 %v7940_v19, %v7587_v60  ;;  %v8374_v47 = vpop.f32.mrf.mxu1  ;;  %v8536_v60 = vpack.c.bf16 %v8477_v59, %v8476_v30  ;;  %v17018_v19 = vld [vmem:[#allocation9_spill] sm:$0xff] }
 0xb48   :  { %v8480_v59 = vld [vmem:[#allocation3 + $0x109] sm:$0xff] }
 0xb49   :  { %v14917_v3 = vadd.f32 %v8374_v47, %v8022_v54 }
 0xb4a   :  { %v7073_v20 = vpop.f32.mrf.mxu2 }
 0xb4b   :  { %v14915_v63 = vadd.f32 %v7073_v20, %v17014_v6  ;;  %v8478_v20 = vld [vmem:[#allocation3 + $0xe9] sm:$0xff] }
 0xb4c   :  { %v17020_v6 = vld [vmem:[#allocation21_spill] sm:$0xff] }
 0xb4f   :  { %10325 = vmatmul.msk.bf16.gmra.mxu2 %vm4166_vm3, %v8535_v35  ;;  %v8537_v35 = vpack.c.bf16 %v8479_v7, %v8478_v20  ;;  %v8482_v7 = vld [vmem:[#allocation3 + $0x129] sm:$0xff] }
 0xb52   :  { %v7076_v24 = vpop.f32.mrf.mxu2 }
 0xb53   :  { %v14921_v57 = vadd.f32 %v7076_v24, %v17015_v27  ;;  %v17021_v27 = vld [vmem:[#allocation25_spill] sm:$0xff] }
 0xb5a   :  { %v7078_v62 = vpop.f32.mrf.mxu2 }
 0xb5b   :  { %v14924_v33 = vadd.f32 %v7078_v62, %v17016_v12  ;;  %v8481_v12 = vld [vmem:[#allocation3 + $0x111] sm:$0xff] }
 0xb5d   :  { %17017 = vst [vmem:[#allocation38_spill] sm:$0xff] %v14924_v33 }
 0xb5f   :  { %10326 = vmatmul.msk.bf16.gmra.mxu2 %vm4166_vm3, %v8536_v60  ;;  %v17023_v60 = vld [vmem:[#allocation15_spill] sm:$0xff] }
 0xb62   :  { %v7081_v45 = vpop.f32.mrf.mxu2 }
 0xb63   :  { %v14928_v22 = vadd.f32 %v7081_v45, %v17018_v19  ;;  %v8538_v45 = vpack.c.bf16 %v8481_v12, %v8480_v59  ;;  %v8484_v12 = vld [vmem:[#allocation3 + $0x149] sm:$0xff] }
 0xb65   :  { %17019 = vst [vmem:[#allocation40_spill] sm:$0xff] %v14928_v22  ;;  %v17025_v22 = vld [vmem:[#allocation24_spill] sm:$0xff] }
 0xb6a   :  { %v7083_v54 = vpop.f32.mrf.mxu2 }
 0xb6b   :  { %v14931_v47 = vadd.f32 %v7083_v54, %v17020_v6  ;;  %v8483_v6 = vld [vmem:[#allocation3 + $0x131] sm:$0xff] }
 0xb6f   :  { %10327 = vmatmul.msk.bf16.gmra.mxu2 %vm4166_vm3, %v8537_v35 }
 0xb72   :  { %v7086_v24 = vpop.f32.mrf.mxu2 }
 0xb73   :  { %v14935_v62 = vadd.f32 %v7086_v24, %v17021_v27  ;;  %v8539_v24 = vpack.c.bf16 %v8483_v6, %v8482_v7  ;;  %v8486_v7 = vld [vmem:[#allocation3 + $0x169] sm:$0xff]  ;;  %v8487_v6 = vld [vmem:[#allocation3 + $0x171] sm:$0xff] }
 0xb75   :  { %17022 = vst [vmem:[#allocation20_spill] sm:$0xff] %v14935_v62  ;;  %v17028_v62 = vld [vmem:[#allocation26_spill] sm:$0xff] }
 0xb7a   :  { %v7088_v30 = vpop.f32.mrf.mxu2 }
 0xb7b   :  { %v14938_v33 = vadd.f32 %v7088_v30, %v17023_v60  ;;  %v8485_v60 = vld [vmem:[#allocation3 + $0x151] sm:$0xff] }
 0xb7d   :  { %17024 = vst [vmem:[#allocation33_spill] sm:$0xff] %v14938_v33 }
 0xb7f   :  { %10328 = vmatmul.msk.bf16.gmra.mxu2 %vm4166_vm3, %v8538_v45 }
 0xb82   :  { %v7091_v19 = vpop.f32.mrf.mxu2 }
 0xb83   :  { %v14942_v54 = vadd.f32 %v7091_v19, %v17025_v22  ;;  %v8540_v22 = vpack.c.bf16 %v8485_v60, %v8484_v12  ;;  %v8488_v12 = vld [vmem:[#allocation3 + $0x189] sm:$0xff]  ;;  %v8489_v60 = vld [vmem:[#allocation3 + $0x191] sm:$0xff] }
 0xb85   :  { %17026 = vst [vmem:[#allocation41_spill] sm:$0xff] %v14942_v54  ;;  %v17034_v54 = vld [vmem:[#allocation30_spill] sm:$0xff] }
 0xb8a   :  { %v7093_v20 = vpop.f32.mrf.mxu2 }
 0xb8b   :  { %v14945_v35 = vadd.f32 %v7093_v20, %v14648_v42 }
 0xb8d   :  { %17027 = vst [vmem:[#allocation42_spill] sm:$0xff] %v14945_v35  ;;  %v17033_v35 = vld [vmem:[#allocation29_spill] sm:$0xff] }
 0xb8f   :  { %10329 = vmatmul.msk.bf16.gmra.mxu2 %vm4166_vm3, %v8539_v24 }
 0xb92   :  { %v7096_v27 = vpop.f32.mrf.mxu2 }
 0xb93   :  { %v14949_v30 = vadd.f32 %v7096_v27, %v17028_v62  ;;  %v8541_v62 = vpack.c.bf16 %v8487_v6, %v8486_v7  ;;  %v8490_v7 = vld [vmem:[#allocation3 + $0x1a9] sm:$0xff]  ;;  %v8491_v6 = vld [vmem:[#allocation3 + $0x1b1] sm:$0xff] }
 0xb95   :  { %17029 = vst [vmem:[#allocation23_spill] sm:$0xff] %v14949_v30 }
 0xb9a   :  { %v7098_v59 = vpop.f32.mrf.mxu2 }
 0xb9b   :  { %v14952_v45 = vadd.f32 %v7098_v59, %v14657_v15 }
 0xb9d   :  { %17030 = vst [vmem:[#allocation43_spill] sm:$0xff] %v14952_v45 }
 0xb9f   :  { %10330 = vmatmul.msk.bf16.gmra.mxu2 %vm4166_vm3, %v8540_v22 }
 0xba2   :  { %v8678_v19 = vpop.f32.mrf.mxu2 }
 0xba3   :  { %v14956_v42 = vadd.f32 %v8678_v19, %v14660_v52  ;;  %v8542_v52 = vpack.c.bf16 %v8489_v60, %v8488_v12  ;;  %v8492_v12 = vld [vmem:[#allocation3 + $0x1c9] sm:$0xff]  ;;  %v8493_v60 = vld [vmem:[#allocation3 + $0x1d1] sm:$0xff] }
 0xbaa   :  { %v8680_v20 = vpop.f32.mrf.mxu2 }
 0xbab   :  { %v14959_v24 = vadd.f32 %v8680_v20, %v14667_v34 }
 0xbaf   :  { %10331 = vmatmul.msk.bf16.gmra.mxu2 %vm4166_vm3, %v8541_v62 }
 0xbb2   :  { %v8683_v27 = vpop.f32.mrf.mxu2 }
 0xbb3   :  { %v14963_v15 = vadd.f32 %v8683_v27, %v14670_v28  ;;  %v8543_v28 = vpack.c.bf16 %v8491_v6, %v8490_v7  ;;  %v8494_v7 = vld [vmem:[#allocation3 + $0x1e9] sm:$0xff]  ;;  %v8495_v6 = vld [vmem:[#allocation3 + $0x1f1] sm:$0xff] }
 0xbba   :  { %v8685_v59 = vpop.f32.mrf.mxu2 }
 0xbbb   :  { %v14966_v22 = vadd.f32 %v8685_v59, %v14677_v36 }
 0xbbf   :  { %10332 = vmatmul.msk.bf16.gmra.mxu2 %vm4166_vm3, %v8542_v52 }
 0xbc2   :  { %v8688_v19 = vpop.f32.mrf.mxu2 }
 0xbc3   :  { %v14970_v34 = vadd.f32 %v8688_v19, %v14680_v17  ;;  %v8544_v17 = vpack.c.bf16 %v8493_v60, %v8492_v12  ;;  %v8496_v12 = vld [vmem:[#allocation3 + $0x209] sm:$0xff]  ;;  %v8497_v60 = vld [vmem:[#allocation3 + $0x211] sm:$0xff] }
 0xbca   :  { %v8690_v20 = vpop.f32.mrf.mxu2 }
 0xbcb   :  { %v14973_v62 = vadd.f32 %v8690_v20, %v14687_v9 }
 0xbcf   :  { %10333 = vmatmul.msk.bf16.gmra.mxu2 %vm4166_vm3, %v8543_v28 }
 0xbd2   :  { %v8693_v27 = vpop.f32.mrf.mxu2 }
 0xbd3   :  { %v14977_v36 = vadd.f32 %v8693_v27, %v14690_v0  ;;  %v8545_v0 = vpack.c.bf16 %v8495_v6, %v8494_v7  ;;  %v8499_v7 = vld [vmem:[#allocation3 + $0x231] sm:$0xff] }
 0xbda   :  { %v8695_v59 = vpop.f32.mrf.mxu2 }
 0xbdb   :  { %v14980_v52 = vadd.f32 %v8695_v59, %v14697_v38 }
 0xbdf   :  { %10334 = vmatmul.msk.bf16.gmra.mxu2 %vm4166_vm3, %v8544_v17 }
 0xbe2   :  { %v8698_v19 = vpop.f32.mrf.mxu2 }
 0xbe3   :  { %v14984_v9 = vadd.f32 %v8698_v19, %v14700_v8  ;;  %v8546_v8 = vpack.c.bf16 %v8497_v60, %v8496_v12  ;;  %v8500_v12 = vld [vmem:[#allocation3 + $0x289] sm:$0xff]  ;;  %v8501_v60 = vld [vmem:[#allocation3 + $0x291] sm:$0xff] }
 0xbea   :  { %v8700_v20 = vpop.f32.mrf.mxu2 }
 0xbeb   :  { %v14987_v28 = vadd.f32 %v8700_v20, %v14707_v16  ;;  %v8498_v20 = vld [vmem:[#allocation3 + $0x229] sm:$0xff] }
 0xbef   :  { %10335 = vmatmul.msk.bf16.gmra.mxu2 %vm4166_vm3, %v8545_v0  ;;  %v17031_v0 = vld [vmem:[#allocation27_spill] sm:$0xff] }
 0xbf2   :  { %v8703_v27 = vpop.f32.mrf.mxu2 }
 0xbf3   :  { %v14991_v38 = vadd.f32 %v8703_v27, %v14710_v2  ;;  %v8547_v2 = vpack.c.bf16 %v8499_v7, %v8498_v20  ;;  %v8502_v7 = vld [vmem:[#allocation3 + $0x2a9] sm:$0xff] }
 0xbfa   :  { %v8705_v59 = vpop.f32.mrf.mxu2 }
 0xbfb   :  { %v14994_v17 = vadd.f32 %v8705_v59, %v14717_v44 }
 0xbff   :  { %10336 = vmatmul.msk.bf16.gmra.mxu2 %vm4166_vm3, %v8546_v8 }
 0xc02   :  { %v8708_v19 = vpop.f32.mrf.mxu2 }
 0xc03   :  { %v14998_v16 = vadd.f32 %v8708_v19, %v14720_v4  ;;  %v8548_v4 = vpack.c.bf16 %v8501_v60, %v8500_v12  ;;  %v8504_v12 = vld [vmem:[#allocation3 + $0x2c9] sm:$0xff]  ;;  %v8505_v60 = vld [vmem:[#allocation3 + $0x2d1] sm:$0xff] }
 0xc0a   :  { %v8710_v6 = vpop.f32.mrf.mxu2 }
 0xc0b   :  { %v15001_v45 = vadd.f32 %v8710_v6, %v17031_v0  ;;  %v8503_v0 = vld [vmem:[#allocation3 + $0x2b1] sm:$0xff] }
 0xc0f   :  { %10337 = vmatmul.msk.bf16.gmra.mxu2 %vm4166_vm3, %v8547_v2 }
 0xc12   :  { %v8713_v27 = vpop.f32.mrf.mxu2 }
 0xc13   :  { %v15005_v44 = vadd.f32 %v8713_v27, %v14730_v48  ;;  %v8549_v48 = vpack.c.bf16 %v8503_v0, %v8502_v7  ;;  %v8506_v7 = vld [vmem:[#allocation3 + $0x2e9] sm:$0xff]  ;;  %v8507_v0 = vld [vmem:[#allocation3 + $0x2f1] sm:$0xff] }
 0xc1a   :  { %v8715_v59 = vpop.f32.mrf.mxu2 }
 0xc1b   :  { %v15008_v8 = vadd.f32 %v8715_v59, %v14737_v46 }
 0xc1f   :  { %10338 = vmatmul.msk.bf16.gmra.mxu2 %vm4166_vm3, %v8548_v4 }
 0xc22   :  { %v8718_v19 = vpop.f32.mrf.mxu2 }
 0xc23   :  { %v15012_v6 = vadd.f32 %v8718_v19, %v14740_v21  ;;  %v8550_v21 = vpack.c.bf16 %v8505_v60, %v8504_v12  ;;  %v8508_v12 = vld [vmem:[#allocation3 + $0x309] sm:$0xff]  ;;  %v8509_v60 = vld [vmem:[#allocation3 + $0x311] sm:$0xff] }
 0xc2a   :  { %v8720_v20 = vpop.f32.mrf.mxu2 }
 0xc2b   :  { %v15015_v2 = vadd.f32 %v8720_v20, %v14747_v39 }
 0xc2f   :  { %10339 = vmatmul.msk.bf16.gmra.mxu2 %vm4166_vm3, %v8549_v48 }
 0xc32   :  { %v8723_v27 = vpop.f32.mrf.mxu2 }
 0xc33   :  { %v15019_v46 = vadd.f32 %v8723_v27, %v14750_v25  ;;  %v8551_v25 = vpack.c.bf16 %v8507_v0, %v8506_v7  ;;  %v8510_v7 = vld [vmem:[#allocation3 + $0x329] sm:$0xff]  ;;  %v8511_v0 = vld [vmem:[#allocation3 + $0x331] sm:$0xff] }
 0xc3a   :  { %v8725_v59 = vpop.f32.mrf.mxu2 }
 0xc3b   :  { %v15022_v4 = vadd.f32 %v8725_v59, %v14757_v31 }
 0xc3f   :  { %10340 = vmatmul.msk.bf16.gmra.mxu2 %vm4166_vm3, %v8550_v21 }
 0xc42   :  { %v8728_v19 = vpop.f32.mrf.mxu2 }
 0xc43   :  { %v15026_v39 = vadd.f32 %v8728_v19, %v14760_v26  ;;  %v8552_v26 = vpack.c.bf16 %v8509_v60, %v8508_v12  ;;  %v8512_v12 = vld [vmem:[#allocation3 + $0x349] sm:$0xff]  ;;  %v8513_v60 = vld [vmem:[#allocation3 + $0x351] sm:$0xff] }
 0xc4a   :  { %v8730_v20 = vpop.f32.mrf.mxu2 }
 0xc4b   :  { %v15029_v48 = vadd.f32 %v8730_v20, %v14767_v32 }
 0xc4f   :  { %10341 = vmatmul.msk.bf16.gmra.mxu2 %vm4166_vm3, %v8551_v25 }
 0xc52   :  { %v8733_v27 = vpop.f32.mrf.mxu2 }
 0xc53   :  { %v15033_v31 = vadd.f32 %v8733_v27, %v14770_v41  ;;  %v8553_v41 = vpack.c.bf16 %v8511_v0, %v8510_v7  ;;  %v8514_v7 = vld [vmem:[#allocation3 + $0x369] sm:$0xff]  ;;  %v8515_v0 = vld [vmem:[#allocation3 + $0x371] sm:$0xff] }
 0xc5a   :  { %v8735_v59 = vpop.f32.mrf.mxu2 }
 0xc5b   :  { %v15036_v21 = vadd.f32 %v8735_v59, %v14777_v23 }
 0xc5f   :  { %10342 = vmatmul.msk.bf16.gmra.mxu2 %vm4166_vm3, %v8552_v26 }
 0xc62   :  { %v8738_v19 = vpop.f32.mrf.mxu2 }
 0xc63   :  { %v15040_v32 = vadd.f32 %v8738_v19, %v14780_v11  ;;  %v8554_v11 = vpack.c.bf16 %v8513_v60, %v8512_v12  ;;  %v8516_v12 = vld [vmem:[#allocation3 + $0x389] sm:$0xff]  ;;  %v8517_v60 = vld [vmem:[#allocation3 + $0x391] sm:$0xff] }
 0xc6a   :  { %v8740_v20 = vpop.f32.mrf.mxu2 }
 0xc6b   :  { %v15043_v25 = vadd.f32 %v8740_v20, %v14787_v55 }
 0xc6f   :  { %10343 = vmatmul.msk.bf16.gmra.mxu2 %vm4166_vm3, %v8553_v41 }
 0xc72   :  { %v8743_v27 = vpop.f32.mrf.mxu2 }
 0xc73   :  { %v15047_v23 = vadd.f32 %v8743_v27, %v14790_v50  ;;  %v8555_v50 = vpack.c.bf16 %v8515_v0, %v8514_v7  ;;  %v8518_v7 = vld [vmem:[#allocation3 + $0x3a9] sm:$0xff]  ;;  %v8519_v0 = vld [vmem:[#allocation3 + $0x3b1] sm:$0xff] }
 0xc7a   :  { %v8745_v59 = vpop.f32.mrf.mxu2 }
 0xc7b   :  { %v15050_v26 = vadd.f32 %v8745_v59, %v14797_v5 }
 0xc7f   :  { %10344 = vmatmul.msk.bf16.gmra.mxu2 %vm4166_vm3, %v8554_v11 }
 0xc82   :  { %v8748_v19 = vpop.f32.mrf.mxu2 }
 0xc83   :  { %v15054_v55 = vadd.f32 %v8748_v19, %v14800_v43  ;;  %v8556_v43 = vpack.c.bf16 %v8517_v60, %v8516_v12  ;;  %v8520_v12 = vld [vmem:[#allocation3 + $0x3c9] sm:$0xff]  ;;  %v8521_v60 = vld [vmem:[#allocation3 + $0x3d1] sm:$0xff] }
 0xc8a   :  { %v8750_v20 = vpop.f32.mrf.mxu2 }
 0xc8b   :  { %v15057_v41 = vadd.f32 %v8750_v20, %v14807_v1 }
 0xc8f   :  { %10345 = vmatmul.msk.bf16.gmra.mxu2 %vm4166_vm3, %v8555_v50 }
 0xc92   :  { %v8753_v27 = vpop.f32.mrf.mxu2 }
 0xc93   :  { %v15061_v5 = vadd.f32 %v8753_v27, %v14810_v10  ;;  %v8557_v10 = vpack.c.bf16 %v8519_v0, %v8518_v7  ;;  %v8522_v7 = vld [vmem:[#allocation3 + $0x3e9] sm:$0xff]  ;;  %v8523_v0 = vld [vmem:[#allocation3 + $0x3f1] sm:$0xff] }
 0xc9a   :  { %v8755_v59 = vpop.f32.mrf.mxu2 }
 0xc9b   :  { %v15064_v11 = vadd.f32 %v8755_v59, %v14817_v49 }
 0xc9f   :  { %10346 = vmatmul.msk.bf16.gmra.mxu2 %vm4166_vm3, %v8556_v43 }
 0xca2   :  { %v8758_v19 = vpop.f32.mrf.mxu2 }
 0xca3   :  { %v15068_v1 = vadd.f32 %v8758_v19, %v14820_v14  ;;  %v8558_v14 = vpack.c.bf16 %v8521_v60, %v8520_v12  ;;  %v8524_v12 = vld [vmem:[#allocation3 + $0x409] sm:$0xff]  ;;  %v8525_v60 = vld [vmem:[#allocation3 + $0x411] sm:$0xff] }
 0xcaa   :  { %v8760_v20 = vpop.f32.mrf.mxu2 }
 0xcab   :  { %v15071_v50 = vadd.f32 %v8760_v20, %v14827_v18 }
 0xcaf   :  { %10347 = vmatmul.msk.bf16.gmra.mxu2 %vm4166_vm3, %v8557_v10 }
 0xcb2   :  { %v8763_v27 = vpop.f32.mrf.mxu2 }
 0xcb3   :  { %v15075_v49 = vadd.f32 %v8763_v27, %v14830_v56  ;;  %v8559_v56 = vpack.c.bf16 %v8523_v0, %v8522_v7  ;;  %v8526_v7 = vld [vmem:[#allocation3 + $0x429] sm:$0xff]  ;;  %v8527_v0 = vld [vmem:[#allocation3 + $0x431] sm:$0xff] }
 0xcba   :  { %v8765_v59 = vpop.f32.mrf.mxu2 }
 0xcbb   :  { %v15078_v43 = vadd.f32 %v8765_v59, %v14837_v58 }
 0xcbf   :  { %10348 = vmatmul.msk.bf16.gmra.mxu2 %vm4166_vm3, %v8558_v14  ;;  %v17032_v14 = vld [vmem:[#allocation28_spill] sm:$0xff] }
 0xcc2   :  { %v8768_v19 = vpop.f32.mrf.mxu2 }
 0xcc3   :  { %v15082_v18 = vadd.f32 %v8768_v19, %v14840_v40  ;;  %v8560_v40 = vpack.c.bf16 %v8525_v60, %v8524_v12  ;;  %v17035_v60 = vld [vmem:[#allocation13_spill] sm:$0xff] }
 0xcca   :  { %v8770_v20 = vpop.f32.mrf.mxu2 }
 0xccb   :  { %v15085_v10 = vadd.f32 %v8770_v20, %v14847_v29 }
 0xccf   :  { %10349 = vmatmul.msk.bf16.gmra.mxu2 %vm4166_vm3, %v8559_v56 }
 0xcd2   :  { %v8773_v27 = vpop.f32.mrf.mxu2 }
 0xcd3   :  { %v15089_v58 = vadd.f32 %v8773_v27, %v14850_v51  ;;  %v8561_v51 = vpack.c.bf16 %v8527_v0, %v8526_v7  ;;  %v15116_v7 = vld [vmem:[%s16546_s9] ss:$0 sm:$0xff] }
 0xcd4   :  { %v15120_v0 = vadd.f32 %v15116_v7, %v14959_v24 }
 0xcda   :  { %v8775_v59 = vpop.f32.mrf.mxu2 }
 0xcdb   :  { %v15092_v30 = vadd.f32 %v8775_v59, %v17032_v14 }
 0xcdf   :  { %10350 = vmatmul.msk.bf16.gmra.mxu2 %vm4166_vm3, %v8560_v40  ;;  %v17036_v40 = vld [vmem:[#allocation17_spill] sm:$0xff] }
 0xce2   :  { %v8778_v19 = vpop.f32.mrf.mxu2 }
 0xce3   :  { %v15096_v29 = vadd.f32 %v8778_v19, %v17033_v35  ;;  %v17037_v19 = vld [vmem:[#allocation34_spill] sm:$0xff] }
 0xcea   :  { %v8780_v20 = vpop.f32.mrf.mxu2 }
 0xceb   :  { %v15099_v56 = vadd.f32 %v8780_v20, %v14867_v53  ;;  %v8530_v53 = vld [vmem:[#allocation3 + $0x469] sm:$0xff]  ;;  %v8531_v20 = vld [vmem:[#allocation3 + $0x471] sm:$0xff] }
 0xcef   :  { %10351 = vmatmul.msk.bf16.gmra.mxu2 %vm4166_vm3, %v8561_v51  ;;  %v17038_v51 = vld [vmem:[#allocation5_spill] sm:$0xff] }
 0xcf2   :  { %v8783_v27 = vpop.f32.mrf.mxu2 }
 0xcf3   :  { %v15103_v59 = vadd.f32 %v8783_v27, %v17034_v54 }
 0xcfa   :  { %v8785_v12 = vpop.f32.mrf.mxu2 }
 0xcfb   :  { %v15106_v14 = vadd.f32 %v8785_v12, %v17035_v60  ;;  %v8563_v12 = vpack.c.bf16 %v8531_v20, %v8530_v53  ;;  %v15127_v60 = vadd.f32 %v15116_v7, %v14956_v42  ;;  %v15146_v53 = vadd.f32 %v15116_v7, %v14970_v34 }
 0xcfc   :  { %v15161_v34 = vadd.f32 %v15116_v7, %v14977_v36 }
 0xcfd   :  { %v8970_v24 = vsel %vm4166_vm3, %v15127_v60, 0.0 }
 0xcff   :  { %10352 = vmatmul.msk.bf16.gmra.mxu2 %vm4166_vm3, %v17036_v40  ;;  %v15131_v40 = vadd.f32 %v15116_v7, %v14963_v15 }
 0xd01   :  { %17039 = vst [vmem:[#allocation44_spill] sm:$0xff] %v15131_v40  ;;  %v8973_v42 = vsel %vm4166_vm3, %v15131_v40, 0.0  ;;  %v8977_v40 = vsel %vm4166_vm3, %v15146_v53, 0.0 }
 0xd02   :  { %v8788_v35 = vpop.f32.mrf.mxu2 }
 0xd03   :  { %v15111_v33 = vadd.f32 %v8788_v35, %v17037_v19  ;;  %v8971_v35 = vsel %vm4166_vm3, %v15120_v0, 0.0  ;;  %v15137_v19 = vadd.f32 %v15116_v7, %v14966_v22  ;;  %v15152_v22 = vadd.f32 %v15116_v7, %v14973_v62 }
 0xd04   :  { %v8972_v15 = vadd.f32 %v8971_v35, %v8970_v24 }
 0xd05   :  { %17040 = vst [vmem:[#allocation45_spill] sm:$0xff] %v15137_v19  ;;  %v8979_v24 = vsel %vm4166_vm3, %v15152_v22, 0.0 }
 0xd0a   :  { %v8790_v54 = vpop.f32.mrf.mxu2 }
 0xd0b   :  { %v15123_v27 = vadd.f32 %v8790_v54, %v17038_v51  ;;  %v8975_v54 = vsel %vm4166_vm3, %v15137_v19, 0.0  ;;  %v15167_v19 = vadd.f32 %v15116_v7, %v14980_v52 }
 0xd0d   :  { %17041 = vst [vmem:[#allocation31_spill] sm:$0xff] %v15167_v19  ;;  %v8983_v36 = vsel %vm4166_vm3, %v15167_v19, 0.0  ;;  %v15194_v19 = vadd.f32 %v15116_v7, %v14994_v17 }
 0xd0f   :  { %10353 = vmatmul.msk.bf16.gmra.mxu2 %vm4166_vm3, %v8563_v12  ;;  %v8974_v12 = vadd.f32 %v8973_v42, %v8972_v15  ;;  %v15173_v42 = vadd.f32 %v15116_v7, %v14984_v9  ;;  %v15188_v9 = vadd.f32 %v15116_v7, %v14991_v38  ;;  %17043 = vst [vmem:[#allocation32_spill] sm:$0xff] %v15194_v19  ;;  %v8991_v38 = vsel %vm4166_vm3, %v15194_v19, 0.0 }
 0xd10   :  { %v15221_v19 = vadd.f32 %v15116_v7, %v15008_v8 }
 0xd11   :  { %v8976_v35 = vadd.f32 %v8975_v54, %v8974_v12  ;;  %v15179_v54 = vadd.f32 %v15116_v7, %v14987_v28  ;;  %v17042_v12 = vld [vmem:[#allocation35_spill] sm:$0xff] }
 0xd12   :  { %v8793_v20 = vpop.f32.mrf.mxu2  ;;  %17045 = vst [vmem:[#allocation46_spill] sm:$0xff] %v15221_v19 }
 0xd13   :  { %v15155_v51 = vadd.f32 %v8793_v20, %v14893_v13  ;;  %v8978_v62 = vadd.f32 %v8977_v40, %v8976_v35  ;;  %v8981_v13 = vsel %vm4166_vm3, %v15161_v34, 0.0  ;;  %v8985_v35 = vsel %vm4166_vm3, %v15173_v42, 0.0 }
 0xd15   :  { %v8980_v15 = vadd.f32 %v8979_v24, %v8978_v62  ;;  %v8987_v62 = vsel %vm4166_vm3, %v15179_v54, 0.0 }
 0xd17   :  { %v8982_v40 = vadd.f32 %v8981_v13, %v8980_v15  ;;  %v15200_v13 = vadd.f32 %v15116_v7, %v14998_v16  ;;  %v15215_v16 = vadd.f32 %v15116_v7, %v15005_v44  ;;  %v8999_v44 = vsel %vm4166_vm3, %v15221_v19, 0.0 }
 0xd19   :  { %v8984_v24 = vadd.f32 %v8983_v36, %v8982_v40  ;;  %v15206_v36 = vadd.f32 %v15116_v7, %v15001_v45  ;;  %v17044_v40 = vld [vmem:[#allocation37_spill] sm:$0xff] }
 0xd1a   :  { %v8795_v20 = vpop.f32.mrf.mxu2 }
 0xd1b   :  { %v15182_v52 = vadd.f32 %v8795_v20, %v17042_v12  ;;  %v8986_v28 = vadd.f32 %v8985_v35, %v8984_v24  ;;  %v8989_v20 = vsel %vm4166_vm3, %v15188_v9, 0.0  ;;  %v8993_v24 = vsel %vm4166_vm3, %v15200_v13, 0.0 }
 0xd1d   :  { %v8988_v15 = vadd.f32 %v8987_v62, %v8986_v28  ;;  %v8995_v28 = vsel %vm4166_vm3, %v15206_v36, 0.0 }
 0xd1f   :  { %v8990_v35 = vadd.f32 %v8989_v20, %v8988_v15  ;;  %v15227_v20 = vadd.f32 %v15116_v7, %v15012_v6  ;;  %v15242_v6 = vadd.f32 %v15116_v7, %v15019_v46  ;;  %v15258_v46 = vadd.f32 %v15116_v7, %v15026_v39 }
 0xd20   :  { %v15275_v39 = vadd.f32 %v15116_v7, %v15033_v31 }
 0xd21   :  { %v8992_v62 = vadd.f32 %v8991_v38, %v8990_v35  ;;  %v15233_v38 = vadd.f32 %v15116_v7, %v15015_v2  ;;  %v17047_v35 = vld [vmem:[#allocation39_spill] sm:$0xff]  ;;  %17048 = vst [vmem:[#allocation48_spill] sm:$0xff] %v15242_v6  ;;  %v15250_v2 = vadd.f32 %v15116_v7, %v15022_v4  ;;  %v15266_v4 = vadd.f32 %v15116_v7, %v15029_v48 }
 0xd22   :  { %v8798_v12 = vpop.f32.mrf.mxu2  ;;  %17050 = vst [vmem:[#allocation50_spill] sm:$0xff] %v15275_v39 }
 0xd23   :  { %v15209_v17 = vadd.f32 %v8798_v12, %v17044_v40  ;;  %v8994_v45 = vadd.f32 %v8993_v24, %v8992_v62  ;;  %v8997_v12 = vsel %vm4166_vm3, %v15215_v16, 0.0  ;;  %17046 = vst [vmem:[#allocation47_spill] sm:$0xff] %v15233_v38  ;;  %v9001_v62 = vsel %vm4166_vm3, %v15227_v20, 0.0 }
 0xd24   :  { %v9003_v19 = vsel %vm4166_vm3, %v15233_v38, 0.0  ;;  %17049 = vst [vmem:[#allocation49_spill] sm:$0xff] %v15250_v2  ;;  %v9007_v38 = vsel %vm4166_vm3, %v15250_v2, 0.0  ;;  %v15281_v2 = vadd.f32 %v15116_v7, %v15036_v21  ;;  %v15297_v21 = vadd.f32 %v15116_v7, %v15043_v25 }
 0xd25   :  { %v8996_v15 = vadd.f32 %v8995_v28, %v8994_v45  ;;  %v15244_v28 = vpop.f32.mrf.mxu3  ;;  %v15314_v25 = vadd.f32 %v15116_v7, %v15050_v26 }
 0xd26   :  { %17051 = vst [vmem:[#allocation51_spill] sm:$0xff] %v15281_v2 }
 0xd27   :  { %v8998_v24 = vadd.f32 %v8997_v12, %v8996_v15  ;;  %v9005_v12 = vsel %vm4166_vm3, %v15242_v6, 0.0  ;;  %v15260_v15 = vpop.f32.mrf.mxu1  ;;  %v9009_v6 = vsel %vm4166_vm3, %v15258_v46, 0.0  ;;  %17053 = vst [vmem:[#allocation53_spill] sm:$0xff] %v15314_v25 }
 0xd29   :  { %v9000_v45 = vadd.f32 %v8999_v44, %v8998_v24 }
 0xd2a   :  { %v8800_v40 = vpop.f32.mrf.mxu2 }
 0xd2b   :  { %v15236_v8 = vadd.f32 %v8800_v40, %v17047_v35  ;;  %v9002_v40 = vadd.f32 %v9001_v62, %v9000_v45  ;;  %v15252_v35 = vpop.f32.mrf.mxu0 }
 0xd2d   :  { %v9004_v44 = vadd.f32 %v9003_v19, %v9002_v40  ;;  %v9011_v40 = vsel %vm4166_vm3, %v15266_v4, 0.0  ;;  %v15283_v48 = vpop.f32.mrf.mxu3 }
 0xd2f   :  { %v9006_v45 = vadd.f32 %v9005_v12, %v9004_v44  ;;  %v9013_v12 = vsel %vm4166_vm3, %v15275_v39, 0.0  ;;  %v15289_v44 = vadd.f32 %v15116_v7, %v15040_v32 }
 0xd31   :  { %v9008_v19 = vadd.f32 %v9007_v38, %v9006_v45  ;;  %17052 = vst [vmem:[#allocation52_spill] sm:$0xff] %v15289_v44  ;;  %v9015_v45 = vsel %vm4166_vm3, %v15281_v2, 0.0  ;;  %v9017_v32 = vsel %vm4166_vm3, %v15289_v44, 0.0  ;;  %v9019_v2 = vsel %vm4166_vm3, %v15297_v21, 0.0 }
 0xd32   :  { %v8803_v24 = vpop.f32.mrf.mxu2 }
 0xd33   :  { %v15269_v62 = vadd.f32 %v8803_v24, %v14908_v61  ;;  %v9010_v61 = vadd.f32 %v9009_v6, %v9008_v19  ;;  %v15291_v38 = vpop.f32.mrf.mxu0  ;;  %v15302_v19 = vpop.f32.mrf.mxu1 }
 0xd35   :  { %v9012_v31 = vadd.f32 %v9011_v40, %v9010_v61  ;;  %v15308_v40 = vadd.f32 %v15116_v7, %v15047_v23 }
 0xd37   :  { %v9014_v39 = vadd.f32 %v9013_v12, %v9012_v31  ;;  %v15320_v12 = vadd.f32 %v15116_v7, %v15054_v55  ;;  %v15322_v31 = vpop.f32.mrf.mxu3 }
 0xd39   :  { %v9016_v61 = vadd.f32 %v9015_v45, %v9014_v39  ;;  %17054 = vst [vmem:[#allocation54_spill] sm:$0xff] %v15320_v12  ;;  %v9023_v39 = vsel %vm4166_vm3, %v15314_v25, 0.0  ;;  %v15328_v45 = vadd.f32 %v15116_v7, %v15057_v41  ;;  %v9025_v55 = vsel %vm4166_vm3, %v15320_v12, 0.0 }
 0xd3a   :  { %v8805_v24 = vpop.f32.mrf.mxu2 }
 0xd3b   :  { %v15300_v6 = vadd.f32 %v8805_v24, %v14912_v37  ;;  %v9018_v37 = vadd.f32 %v9017_v32, %v9016_v61  ;;  %v9021_v24 = vsel %vm4166_vm3, %v15308_v40, 0.0  ;;  %v15333_v61 = vpop.f32.mrf.mxu0  ;;  %v9027_v41 = vsel %vm4166_vm3, %v15328_v45, 0.0 }
 0xd3d   :  { %v9020_v23 = vadd.f32 %v9019_v2, %v9018_v37  ;;  %v15339_v2 = vadd.f32 %v15116_v7, %v15061_v5  ;;  %v15341_v37 = vpop.f32.mrf.mxu1 }
 0xd3f   :  { %v9022_v32 = vadd.f32 %v9021_v24, %v9020_v23  ;;  %17055 = vst [vmem:[#allocation55_spill] sm:$0xff] %v15339_v2  ;;  %v9029_v24 = vsel %vm4166_vm3, %v15339_v2, 0.0  ;;  %v15353_v23 = vadd.f32 %v15116_v7, %v15068_v1  ;;  %v15369_v1 = vadd.f32 %v15116_v7, %v15075_v49 }
 0xd40   :  { %v15385_v49 = vadd.f32 %v15116_v7, %v15082_v18 }
 0xd41   :  { %v9024_v25 = vadd.f32 %v9023_v39, %v9022_v32  ;;  %17057 = vst [vmem:[#allocation57_spill] sm:$0xff] %v15353_v23  ;;  %v15361_v32 = vadd.f32 %v15116_v7, %v15071_v50  ;;  %v15377_v50 = vadd.f32 %v15116_v7, %v15078_v43  ;;  %v15393_v43 = vadd.f32 %v15116_v7, %v15085_v10 }
 0xd42   :  { %v8808_v44 = vpop.f32.mrf.mxu2  ;;  %17059 = vst [vmem:[#allocation59_spill] sm:$0xff] %v15369_v1 }
 0xd43   :  { %v15331_v26 = vadd.f32 %v8808_v44, %v14917_v3  ;;  %v15347_v3 = vadd.f32 %v15116_v7, %v15064_v11  ;;  %v9026_v44 = vadd.f32 %v9025_v55, %v9024_v25  ;;  %17058 = vst [vmem:[#allocation58_spill] sm:$0xff] %v15361_v32  ;;  %v15363_v11 = vpop.f32.mrf.mxu3  ;;  %v9033_v55 = vsel %vm4166_vm3, %v15353_v23, 0.0 }
 0xd44   :  { %17060 = vst [vmem:[#allocation60_spill] sm:$0xff] %v15377_v50 }
 0xd45   :  { %17056 = vst [vmem:[#allocation56_spill] sm:$0xff] %v15347_v3  ;;  %v9028_v5 = vadd.f32 %v9027_v41, %v9026_v44  ;;  %v9031_v39 = vsel %vm4166_vm3, %v15347_v3, 0.0  ;;  %v15371_v44 = vpop.f32.mrf.mxu0  ;;  %v9035_v3 = vsel %vm4166_vm3, %v15361_v32, 0.0  ;;  %v15379_v2 = vpop.f32.mrf.mxu1  ;;  %v9039_v32 = vsel %vm4166_vm3, %v15377_v50, 0.0 }
 0xd46   :  { %17061 = vst [vmem:[#allocation61_spill] sm:$0xff] %v15385_v49 }
 0xd47   :  { %v9030_v25 = vadd.f32 %v9029_v24, %v9028_v5  ;;  %v9037_v5 = vsel %vm4166_vm3, %v15369_v1, 0.0  ;;  %17062 = vst [vmem:[#allocation8_spill] sm:$0xff] %v15393_v43 }
 0xd49   :  { %v9032_v41 = vadd.f32 %v9031_v39, %v9030_v25 }
 0xd4a   :  { %v15355_v12 = vpop.f32.mrf.mxu2 }
 0xd4b   :  { %v9034_v24 = vadd.f32 %v9033_v55, %v9032_v41  ;;  %v9041_v55 = vsel %vm4166_vm3, %v15385_v49, 0.0  ;;  %v15399_v41 = vadd.f32 %v15116_v7, %v15089_v58  ;;  %v7517_v18 = vpop.f32.mrf.mxu3 }
 0xd4d   :  { %v9036_v39 = vadd.f32 %v9035_v3, %v9034_v24  ;;  %17063 = vst [vmem:[#allocation11_spill] sm:$0xff] %v15399_v41  ;;  %v9043_v3 = vsel %vm4166_vm3, %v15393_v43, 0.0  ;;  %v15405_v24 = vadd.f32 %v15116_v7, %v15092_v30  ;;  %v15407_v10 = vpop.f32.mrf.mxu0  ;;  %v15415_v58 = vpop.f32.mrf.mxu1  ;;  %v15423_v30 = vadd.f32 %v15116_v7, %v15099_v56 }
 0xd4f   :  { %v9038_v23 = vadd.f32 %v9037_v5, %v9036_v39  ;;  %17064 = vst [vmem:[#allocation10_spill] sm:$0xff] %v15405_v24  ;;  %v9045_v5 = vsel %vm4166_vm3, %v15399_v41, 0.0  ;;  %v15413_v39 = vadd.f32 %v15116_v7, %v15096_v29  ;;  %v9047_v43 = vsel %vm4166_vm3, %v15405_v24, 0.0 }
 0xd50   :  { %17066 = vst [vmem:[#allocation7_spill] sm:$0xff] %v15423_v30  ;;  %v15429_v29 = vadd.f32 %v15116_v7, %v15103_v59 }
 0xd51   :  { %v9040_v1 = vadd.f32 %v9039_v32, %v9038_v23  ;;  %17065 = vst [vmem:[#allocation14_spill] sm:$0xff] %v15413_v39 }
 0xd52   :  { %v15387_v25 = vpop.f32.mrf.mxu2  ;;  %v9053_v56 = vsel %vm4166_vm3, %v15429_v29, 0.0 }
 0xd53   :  { %v9042_v50 = vadd.f32 %v9041_v55, %v9040_v1  ;;  %v9049_v55 = vsel %vm4166_vm3, %v15413_v39, 0.0  ;;  %v7520_v24 = vpop.f32.mrf.mxu3 }
 0xd55   :  { %v9044_v23 = vadd.f32 %v9043_v3, %v9042_v50  ;;  %v9051_v50 = vsel %vm4166_vm3, %v15423_v30, 0.0  ;;  %v15435_v3 = vadd.f32 %v15116_v7, %v15106_v14  ;;  %v7955_v39 = vpop.f32.mrf.mxu0  ;;  %v8389_v14 = vpop.f32.mrf.mxu1 }
 0xd57   :  { %v9046_v1 = vadd.f32 %v9045_v5, %v9044_v23  ;;  %17067 = vst [vmem:[#allocation4_spill] sm:$0xff] %v15435_v3  ;;  %v15441_v5 = vadd.f32 %v15116_v7, %v15111_v33 }
 0xd59   :  { %v9048_v41 = vadd.f32 %v9047_v43, %v9046_v1  ;;  %17068 = vst [vmem:[#allocation16_spill] sm:$0xff] %v15441_v5  ;;  %v9055_v43 = vsel %vm4166_vm3, %v15435_v3, 0.0  ;;  %v15447_v1 = vadd.f32 %v15116_v7, %v15123_v27  ;;  %v15461_v27 = vadd.f32 %v15116_v7, %v15182_v52 }
 0xd5a   :  { %v15417_v32 = vpop.f32.mrf.mxu2 }
 0xd5b   :  { %v9050_v49 = vadd.f32 %v9049_v55, %v9048_v41  ;;  %17069 = vst [vmem:[#allocation19_spill] sm:$0xff] %v15447_v1  ;;  %v9057_v41 = vsel %vm4166_vm3, %v15441_v5, 0.0  ;;  %v15453_v55 = vadd.f32 %v15116_v7, %v15155_v51  ;;  %v15469_v51 = vadd.f32 %v15116_v7, %v15209_v17 }
 0xd5c   :  { %v9063_v3 = vsel %vm4166_vm3, %v15461_v27, 0.0 }
 0xd5d   :  { %v9052_v23 = vadd.f32 %v9051_v50, %v9050_v49  ;;  %v7588_v49 = vadd.f32 %v15244_v28, %v14915_v63  ;;  %v9059_v50 = vsel %vm4166_vm3, %v15447_v1, 0.0  ;;  %v9061_v5 = vsel %vm4166_vm3, %v15453_v55, 0.0  ;;  %v17070_v1 = vld [vmem:[#allocation38_spill] sm:$0xff] }
 0xd5e   :  { %v7590_v52 = vadd.f32 %v15322_v31, %v17070_v1  ;;  %v15488_v31 = vadd.f32 %v15116_v7, %v15269_v62 }
 0xd5f   :  { %v9054_v30 = vadd.f32 %v9053_v56, %v9052_v23  ;;  %v7589_v56 = vadd.f32 %v15283_v48, %v14921_v57  ;;  %v15478_v57 = vadd.f32 %v15116_v7, %v15236_v8  ;;  %v7592_v8 = vadd.f32 %v7517_v18, %v14931_v47 }
 0xd60   :  { %v9069_v18 = vsel %vm4166_vm3, %v15488_v31, 0.0 }
 0xd61   :  { %v9056_v33 = vadd.f32 %v9055_v43, %v9054_v30  ;;  %v7522_v30 = vpop.f32.mrf.mxu3  ;;  %v8023_v43 = vadd.f32 %v15252_v35, %v7588_v49  ;;  %v8024_v48 = vadd.f32 %v15291_v38, %v7589_v56  ;;  %v9065_v35 = vsel %vm4166_vm3, %v15469_v51, 0.0  ;;  %v8391_v49 = vpop.f32.mrf.mxu1 }
 0xd62   :  { %v8818_v59 = vpop.f32.mrf.mxu2  ;;  %v8025_v56 = vadd.f32 %v15333_v61, %v7590_v52  ;;  %v15507_v61 = vadd.f32 %v15116_v7, %v15331_v26 }
 0xd63   :  { %v9058_v23 = vadd.f32 %v9057_v41, %v9056_v33  ;;  %v17071_v41 = vld [vmem:[#allocation40_spill] sm:$0xff]  ;;  %v8458_v1 = vadd.f32 %v15302_v19, %v8024_v48  ;;  %v17073_v48 = vld [vmem:[#allocation33_spill] sm:$0xff] }
 0xd64   :  { %v7591_v17 = vadd.f32 %v15363_v11, %v17071_v41  ;;  %v9067_v11 = vsel %vm4166_vm3, %v15478_v57, 0.0  ;;  %v8459_v47 = vadd.f32 %v15341_v37, %v8025_v56 }
 0xd65   :  { %v9060_v63 = vadd.f32 %v9059_v50, %v9058_v23  ;;  %v8457_v50 = vadd.f32 %v15260_v15, %v8023_v43  ;;  %v7957_v23 = vpop.f32.mrf.mxu0  ;;  %v15497_v15 = vadd.f32 %v15116_v7, %v15300_v6 }
 0xd66   :  { %v8026_v62 = vadd.f32 %v15371_v44, %v7591_v17  ;;  %v8893_v17 = vadd.f32 %v15417_v32, %v8459_v47 }
 0xd67   :  { %v9062_v33 = vadd.f32 %v9061_v5, %v9060_v63  ;;  %v8891_v5 = vadd.f32 %v15355_v12, %v8457_v50  ;;  %v17072_v63 = vld [vmem:[#allocation20_spill] sm:$0xff]  ;;  %v8027_v12 = vadd.f32 %v15407_v10, %v7592_v8  ;;  %v9071_v37 = vsel %vm4166_vm3, %v15497_v15, 0.0 }
 0xd68   :  { %v7593_v43 = vadd.f32 %v7520_v24, %v17072_v63  ;;  %v8460_v6 = vadd.f32 %v15379_v2, %v8026_v62  ;;  %v7594_v24 = vadd.f32 %v7522_v30, %v17073_v48  ;;  %v9073_v2 = vsel %vm4166_vm3, %v15507_v61, 0.0 }
 0xd69   :  { %v9064_v38 = vadd.f32 %v9063_v3, %v9062_v33  ;;  %v8892_v3 = vadd.f32 %v15387_v25, %v8458_v1  ;;  %v15516_v41 = vadd.f32 %v15116_v7, %v8891_v5  ;;  %v7525_v33 = vpop.f32.mrf.mxu3  ;;  %v8461_v25 = vadd.f32 %v15415_v58, %v8027_v12 }
 0xd6a   :  { %v8820_v28 = vpop.f32.mrf.mxu2  ;;  %v8028_v26 = vadd.f32 %v7955_v39, %v7593_v43  ;;  %v8894_v30 = vadd.f32 %v8818_v59, %v8460_v6  ;;  %v15528_v39 = vadd.f32 %v15116_v7, %v8893_v17 }
 0xd6b   :  { %v9066_v19 = vadd.f32 %v9065_v35, %v9064_v38  ;;  %v15523_v10 = vadd.f32 %v15116_v7, %v8892_v3  ;;  %v8029_v38 = vadd.f32 %v7957_v23, %v7594_v24  ;;  %v9075_v56 = vsel %vm4166_vm3, %v15516_v41, 0.0  ;;  %v17074_v23 = vld [vmem:[#allocation41_spill] sm:$0xff] }
 0xd6c   :  { %v8462_v35 = vadd.f32 %v8389_v14, %v8028_v26  ;;  %v8895_v32 = vadd.f32 %v8820_v28, %v8461_v25  ;;  %v15533_v63 = vadd.f32 %v15116_v7, %v8894_v30  ;;  %v9079_v47 = vsel %vm4166_vm3, %v15528_v39, 0.0  ;;  %v17075_v30 = vld [vmem:[#allocation42_spill] sm:$0xff] }
 0xd6d   :  { %v9068_v52 = vadd.f32 %v9067_v11, %v9066_v19  ;;  %v7960_v8 = vpop.f32.mrf.mxu0  ;;  %v8394_v11 = vpop.f32.mrf.mxu1  ;;  %v8463_v5 = vadd.f32 %v8391_v49, %v8029_v38  ;;  %v9077_v62 = vsel %vm4166_vm3, %v15523_v10, 0.0  ;;  %v7595_v19 = vadd.f32 %v7525_v33, %v17074_v23  ;;  %v17076_v23 = vld [vmem:[#allocation23_spill] sm:$0xff] }
 0xd6e   :  { %v9081_v49 = vsel %vm4166_vm3, %v15533_v63, 0.0 }
 0xd6f   :  { %v9070_v50 = vadd.f32 %v9069_v18, %v9068_v52  ;;  %v15539_v18 = vadd.f32 %v15116_v7, %v8895_v32 }
 0xd71   :  { %v9072_v1 = vadd.f32 %v9071_v37, %v9070_v50  ;;  %v7527_v12 = vpop.f32.mrf.mxu3  ;;  %v9083_v48 = vsel %vm4166_vm3, %v15539_v18, 0.0 }
 0xd72   :  { %v8823_v44 = vpop.f32.mrf.mxu2 }
 0xd73   :  { %v9074_v58 = vadd.f32 %v9073_v2, %v9072_v1  ;;  %v8896_v59 = vadd.f32 %v8823_v44, %v8462_v35  ;;  %v8030_v44 = vadd.f32 %v7960_v8, %v7595_v19  ;;  %v7596_v35 = vadd.f32 %v7527_v12, %v17075_v30 }
 0xd75   :  { %v9076_v14 = vadd.f32 %v9075_v56, %v9074_v58  ;;  %v15544_v6 = vadd.f32 %v15116_v7, %v8896_v59  ;;  %v7962_v17 = vpop.f32.mrf.mxu0  ;;  %v8464_v26 = vadd.f32 %v8394_v11, %v8030_v44  ;;  %v8396_v50 = vpop.f32.mrf.mxu1 }
 0xd76   :  { %v8031_v58 = vadd.f32 %v7962_v17, %v7596_v35  ;;  %v17077_v17 = vld [vmem:[#allocation43_spill] sm:$0xff] }
 0xd77   :  { %v9078_v3 = vadd.f32 %v9077_v62, %v9076_v14  ;;  %v9085_v33 = vsel %vm4166_vm3, %v15544_v6, 0.0 }
 0xd78   :  { %v8465_v59 = vadd.f32 %v8396_v50, %v8031_v58 }
 0xd79   :  { %v9080_v52 = vadd.f32 %v9079_v47, %v9078_v3  ;;  %v7530_v62 = vpop.f32.mrf.mxu3 }
 0xd7a   :  { %v8825_v43 = vpop.f32.mrf.mxu2  ;;  %v7597_v19 = vadd.f32 %v7530_v62, %v17076_v23 }
 0xd7b   :  { %v8897_v28 = vadd.f32 %v8825_v43, %v8463_v5  ;;  %v9082_v37 = vadd.f32 %v9081_v49, %v9080_v52 }
 0xd7d   :  { %v8965_v24 = vadd.f32 %v15116_v7, %v8897_v28  ;;  %v9084_v25 = vadd.f32 %v9083_v48, %v9082_v37  ;;  %v7965_v14 = vpop.f32.mrf.mxu0  ;;  %v8399_v28 = vpop.f32.mrf.mxu1 }
 0xd7e   :  { %v8032_v49 = vadd.f32 %v7965_v14, %v7597_v19 }
 0xd7f   :  { %v9087_v1 = vsel %vm4166_vm3, %v8965_v24, 0.0  ;;  %v9086_v8 = vadd.f32 %v9085_v33, %v9084_v25 }
 0xd80   :  { %v8466_v44 = vadd.f32 %v8399_v28, %v8032_v49 }
 0xd81   :  { %v9088_v32 = vadd.f32 %v9087_v1, %v9086_v8  ;;  %v7532_v48 = vpop.f32.mrf.mxu3 }
 0xd82   :  { %v8828_v2 = vpop.f32.mrf.mxu2 }
 0xd83   :  { %v8898_v38 = vadd.f32 %v8828_v2, %v8464_v26  ;;  %v7598_v26 = vadd.f32 %v7532_v48, %v17077_v17 }
 0xd85   :  { %v8966_v56 = vadd.f32 %v15116_v7, %v8898_v38  ;;  %v7967_v25 = vpop.f32.mrf.mxu0  ;;  %v8401_v2 = vpop.f32.mrf.mxu1 }
 0xd86   :  { %v8033_v30 = vadd.f32 %v7967_v25, %v7598_v26 }
 0xd87   :  { %v9089_v5 = vsel %vm4166_vm3, %v8966_v56, 0.0 }
 0xd88   :  { %v9090_v11 = vadd.f32 %v9089_v5, %v9088_v32  ;;  %v8467_v38 = vadd.f32 %v8401_v2, %v8033_v30 }
 0xd8a   :  { %v8830_v43 = vpop.f32.mrf.mxu2 }
 0xd8b   :  { %v8899_v47 = vadd.f32 %v8830_v43, %v8465_v59 }
 0xd8d   :  { %v8967_v3 = vadd.f32 %v15116_v7, %v8899_v47  ;;  %v17078_v47 = vld [vmem:[#allocation6_spill] sm:$0xff] }
 0xd8f   :  { %v9091_v12 = vsel %vm4166_vm3, %v8967_v3, 0.0 }
 0xd90   :  { %v9092_v52 = vadd.f32 %v9091_v12, %v9090_v11 }
 0xd92   :  { %v8833_v37 = vpop.f32.mrf.mxu2 }
 0xd93   :  { %v8900_v33 = vadd.f32 %v8833_v37, %v8466_v44 }
 0xd95   :  { %v8968_v50 = vadd.f32 %v15116_v7, %v8900_v33 }
 0xd97   :  { %v9093_v35 = vsel %vm4166_vm3, %v8968_v50, 0.0 }
 0xd98   :  { %v9094_v1 = vadd.f32 %v9093_v35, %v9092_v52 }
 0xd9a   :  { %v8835_v8 = vpop.f32.mrf.mxu2 }
 0xd9b   :  { %v8901_v32 = vadd.f32 %v8835_v8, %v8467_v38 }
 0xd9d   :  { %v8969_v58 = vadd.f32 %v15116_v7, %v8901_v32 }
 0xd9f   :  { %v9095_v5 = vsel %vm4166_vm3, %v8969_v58, 0.0 }
 0xda0   :  { %v9096_v62 = vadd.f32 %v9095_v5, %v9094_v1 }
 0xda2   :  { %v9097_v11 = vrot.slane %v9096_v62, 4 }
 0xda4   :  { %v9098_v59 = vadd.f32 %v9097_v11, %v9096_v62 }
 0xda6   :  { %v9099_v14 = vrot.slane %v9098_v59, 2 }
 0xda8   :  { %v9100_v43 = vadd.f32 %v9099_v14, %v9098_v59 }
 0xdaa   :  { %v9101_v23 = vrot.slane %v9100_v43, 1 }
 0xdac   :  { %v9102_v19 = vadd.f32 %v9101_v23, %v9100_v43 }
 0xdae   :  { %v15564_v28 = vmul.f32 %v9102_v19, %v17078_v47 }
 0xdb0   :  { %v15567_v49 = vsub.f32 %v8965_v24, %v15564_v28  ;;  %v15570_v12 = vsub.f32 %v8966_v56, %v15564_v28  ;;  %v15573_v7 = vsub.f32 %v8967_v3, %v15564_v28  ;;  %v15576_v52 = vsub.f32 %v8968_v50, %v15564_v28  ;;  %v17083_v56 = vld [vmem:[#allocation44_spill] sm:$0xff]  ;;  %v17084_v3 = vld [vmem:[#allocation45_spill] sm:$0xff] }
 0xdb1   :  { %v15579_v44 = vsub.f32 %v8969_v58, %v15564_v28  ;;  %v15583_v48 = vsub.f32 %v15127_v60, %v15564_v28  ;;  %v15587_v24 = vsub.f32 %v15120_v0, %v15564_v28  ;;  %v15591_v37 = vsub.f32 %v17083_v56, %v15564_v28 }
 0xdb2   :  { %17079 = vst [vmem:[#allocation36_spill] sm:$0xff] %v15567_v49  ;;  %v15595_v17 = vsub.f32 %v17084_v3, %v15564_v28  ;;  %v15603_v60 = vsub.f32 %v15146_v53, %v15564_v28  ;;  %v15609_v25 = vsub.f32 %v15152_v22, %v15564_v28  ;;  %v15617_v1 = vsub.f32 %v15161_v34, %v15564_v28  ;;  %v17085_v22 = vld [vmem:[#allocation31_spill] sm:$0xff] }
 0xdb3   :  { %17080 = vst [vmem:[#allocation18_spill] sm:$0xff] %v15570_v12  ;;  %v9168_v26 = vmul.f32 %v15583_v48, %v15583_v48  ;;  %v9169_v33 = vmul.f32 %v15587_v24, %v15587_v24  ;;  %v9170_v0 = vmul.f32 %v15591_v37, %v15591_v37  ;;  %v15624_v32 = vsub.f32 %v17085_v22, %v15564_v28 }
 0xdb4   :  { %17081 = vst [vmem:[#allocation22_spill] sm:$0xff] %v15573_v7  ;;  %v9171_v50 = vmul.f32 %v15595_v17, %v15595_v17  ;;  %v9172_v53 = vmul.f32 %v15603_v60, %v15603_v60  ;;  %v9173_v58 = vmul.f32 %v15609_v25, %v15609_v25  ;;  %v15631_v34 = vsub.f32 %v15173_v42, %v15564_v28 }
 0xdb5   :  { %17082 = vst [vmem:[#allocation12_spill] sm:$0xff] %v15576_v52  ;;  %v9232_v2 = vsel %vm4166_vm3, %v9168_v26, 0.0  ;;  %v9233_v30 = vsel %vm4166_vm3, %v9169_v33, 0.0  ;;  %v9235_v38 = vsel %vm4166_vm3, %v9170_v0, 0.0  ;;  %v9174_v11 = vmul.f32 %v15617_v1, %v15617_v1  ;;  %v17086_v0 = vld [vmem:[#allocation32_spill] sm:$0xff] }
 0xdb6   :  { %v9234_v35 = vadd.f32 %v9233_v30, %v9232_v2  ;;  %v9237_v5 = vsel %vm4166_vm3, %v9171_v50, 0.0  ;;  %v9239_v59 = vsel %vm4166_vm3, %v9172_v53, 0.0  ;;  %v15638_v43 = vsub.f32 %v15179_v54, %v15564_v28 }
 0xdb7   :  { %v9175_v23 = vmul.f32 %v15624_v32, %v15624_v32  ;;  %v9241_v19 = vsel %vm4166_vm3, %v9173_v58, 0.0  ;;  %v15645_v42 = vsub.f32 %v15188_v9, %v15564_v28  ;;  %v9176_v3 = vmul.f32 %v15631_v34, %v15631_v34 }
 0xdb8   :  { %v9236_v8 = vadd.f32 %v9235_v38, %v9234_v35  ;;  %v9243_v26 = vsel %vm4166_vm3, %v9174_v11, 0.0  ;;  %v15652_v54 = vsub.f32 %v17086_v0, %v15564_v28  ;;  %v9177_v50 = vmul.f32 %v15638_v43, %v15638_v43  ;;  %v17088_v0 = vld [vmem:[#allocation47_spill] sm:$0xff] }
 0xdb9   :  { %v9245_v2 = vsel %vm4166_vm3, %v9175_v23, 0.0  ;;  %v15659_v9 = vsub.f32 %v15200_v13, %v15564_v28  ;;  %v9178_v35 = vmul.f32 %v15645_v42, %v15645_v42  ;;  %v9247_v53 = vsel %vm4166_vm3, %v9176_v3, 0.0 }
 0xdba   :  { %v9238_v62 = vadd.f32 %v9237_v5, %v9236_v8  ;;  %v15666_v8 = vsub.f32 %v15206_v36, %v15564_v28  ;;  %v9179_v22 = vmul.f32 %v15652_v54, %v15652_v54  ;;  %v9249_v58 = vsel %vm4166_vm3, %v9177_v50, 0.0 }
 0xdbb   :  { %v15673_v13 = vsub.f32 %v15215_v16, %v15564_v28  ;;  %v9251_v11 = vsel %vm4166_vm3, %v9178_v35, 0.0  ;;  %v15687_v16 = vsub.f32 %v15227_v20, %v15564_v28  ;;  %v15694_v50 = vsub.f32 %v17088_v0, %v15564_v28 }
 0xdbc   :  { %v9240_v14 = vadd.f32 %v9239_v59, %v9238_v62  ;;  %v9180_v62 = vmul.f32 %v15659_v9, %v15659_v9  ;;  %v9181_v23 = vmul.f32 %v15666_v8, %v15666_v8 }
 0xdbd   :  { %v9182_v3 = vmul.f32 %v15673_v13, %v15673_v13 }
 0xdbe   :  { %v9242_v56 = vadd.f32 %v9241_v19, %v9240_v14  ;;  %v17087_v14 = vld [vmem:[#allocation46_spill] sm:$0xff]  ;;  %v9253_v19 = vsel %vm4166_vm3, %v9179_v22, 0.0 }
 0xdbf   :  { %v15680_v36 = vsub.f32 %v17087_v14, %v15564_v28  ;;  %v9259_v22 = vsel %vm4166_vm3, %v9182_v3, 0.0 }
 0xdc0   :  { %v9244_v33 = vadd.f32 %v9243_v26, %v9242_v56  ;;  %v9255_v26 = vsel %vm4166_vm3, %v9180_v62, 0.0 }
 0xdc2   :  { %v9246_v30 = vadd.f32 %v9245_v2, %v9244_v33  ;;  %v9183_v2 = vmul.f32 %v15680_v36, %v15680_v36 }
 0xdc4   :  { %v9248_v38 = vadd.f32 %v9247_v53, %v9246_v30  ;;  %v9257_v30 = vsel %vm4166_vm3, %v9181_v23, 0.0  ;;  %v17089_v53 = vld [vmem:[#allocation48_spill] sm:$0xff]  ;;  %v15715_v23 = vsub.f32 %v15258_v46, %v15564_v28 }
 0xdc5   :  { %v15701_v20 = vsub.f32 %v17089_v53, %v15564_v28 }
 0xdc6   :  { %v9250_v5 = vadd.f32 %v9249_v58, %v9248_v38  ;;  %v9184_v38 = vmul.f32 %v15687_v16, %v15687_v16 }
 0xdc8   :  { %v9252_v59 = vadd.f32 %v9251_v11, %v9250_v5  ;;  %v17090_v5 = vld [vmem:[#allocation49_spill] sm:$0xff]  ;;  %v9185_v11 = vmul.f32 %v15694_v50, %v15694_v50 }
 0xdc9   :  { %v15708_v62 = vsub.f32 %v17090_v5, %v15564_v28 }
 0xdca   :  { %v9254_v56 = vadd.f32 %v9253_v19, %v9252_v59  ;;  %v9261_v59 = vsel %vm4166_vm3, %v9183_v2, 0.0  ;;  %v9186_v19 = vmul.f32 %v15701_v20, %v15701_v20  ;;  %v9265_v0 = vsel %vm4166_vm3, %v9185_v11, 0.0 }
 0xdcc   :  { %v9256_v33 = vadd.f32 %v9255_v26, %v9254_v56  ;;  %v9263_v56 = vsel %vm4166_vm3, %v9184_v38, 0.0  ;;  %v15722_v26 = vsub.f32 %v15266_v4, %v15564_v28  ;;  %v9267_v53 = vsel %vm4166_vm3, %v9186_v19, 0.0 }
 0xdce   :  { %v9258_v35 = vadd.f32 %v9257_v30, %v9256_v33  ;;  %v9187_v33 = vmul.f32 %v15708_v62, %v15708_v62  ;;  %v17091_v30 = vld [vmem:[#allocation50_spill] sm:$0xff] }
 0xdcf   :  { %v15729_v46 = vsub.f32 %v17091_v30, %v15564_v28 }
 0xdd0   :  { %v9260_v58 = vadd.f32 %v9259_v22, %v9258_v35  ;;  %v9188_v35 = vmul.f32 %v15715_v23, %v15715_v23  ;;  %v17092_v22 = vld [vmem:[#allocation51_spill] sm:$0xff]  ;;  %v9269_v5 = vsel %vm4166_vm3, %v9187_v33, 0.0 }
 0xdd1   :  { %v15736_v4 = vsub.f32 %v17092_v22, %v15564_v28 }
 0xdd2   :  { %v9262_v14 = vadd.f32 %v9261_v59, %v9260_v58  ;;  %v9189_v58 = vmul.f32 %v15722_v26, %v15722_v26  ;;  %v17093_v59 = vld [vmem:[#allocation52_spill] sm:$0xff]  ;;  %v9271_v19 = vsel %vm4166_vm3, %v9188_v35, 0.0 }
 0xdd4   :  { %v9264_v3 = vadd.f32 %v9263_v56, %v9262_v14  ;;  %v15743_v14 = vsub.f32 %v17093_v59, %v15564_v28  ;;  %v9190_v56 = vmul.f32 %v15729_v46, %v15729_v46  ;;  %v9273_v33 = vsel %vm4166_vm3, %v9189_v58, 0.0 }
 0xdd6   :  { %v9266_v2 = vadd.f32 %v9265_v0, %v9264_v3  ;;  %v15750_v0 = vsub.f32 %v15297_v21, %v15564_v28  ;;  %v9275_v35 = vsel %vm4166_vm3, %v9190_v56, 0.0 }
 0xdd8   :  { %v9268_v38 = vadd.f32 %v9267_v53, %v9266_v2  ;;  %v9191_v2 = vmul.f32 %v15736_v4, %v15736_v4  ;;  %v15757_v53 = vsub.f32 %v15308_v40, %v15564_v28 }
 0xdda   :  { %v9270_v11 = vadd.f32 %v9269_v5, %v9268_v38  ;;  %v9192_v38 = vmul.f32 %v15743_v14, %v15743_v14  ;;  %v17094_v5 = vld [vmem:[#allocation53_spill] sm:$0xff]  ;;  %v9277_v58 = vsel %vm4166_vm3, %v9191_v2, 0.0 }
 0xddb   :  { %v15764_v21 = vsub.f32 %v17094_v5, %v15564_v28  ;;  %v17099_v5 = vld [vmem:[#allocation55_spill] sm:$0xff] }
 0xddc   :  { %v9272_v3 = vadd.f32 %v9271_v19, %v9270_v11  ;;  %v9193_v11 = vmul.f32 %v15750_v0, %v15750_v0  ;;  %v17096_v19 = vld [vmem:[#allocation54_spill] sm:$0xff]  ;;  %v9279_v56 = vsel %vm4166_vm3, %v9192_v38, 0.0 }
 0xddd   :  { %17095 = vst [vmem:[#allocation9_spill] sm:$0xff] %v15764_v21  ;;  %v15771_v40 = vsub.f32 %v17096_v19, %v15564_v28 }
 0xdde   :  { %v9274_v30 = vadd.f32 %v9273_v33, %v9272_v3  ;;  %v9194_v3 = vmul.f32 %v15757_v53, %v15757_v53  ;;  %v9281_v2 = vsel %vm4166_vm3, %v9193_v11, 0.0 }
 0xddf   :  { %17097 = vst [vmem:[#allocation21_spill] sm:$0xff] %v15771_v40  ;;  %v9196_v19 = vmul.f32 %v15771_v40, %v15771_v40 }
 0xde0   :  { %v9276_v22 = vadd.f32 %v9275_v35, %v9274_v30  ;;  %v15778_v30 = vsub.f32 %v15328_v45, %v15564_v28  ;;  %v9195_v35 = vmul.f32 %v15764_v21, %v15764_v21  ;;  %v9283_v38 = vsel %vm4166_vm3, %v9194_v3, 0.0 }
 0xde1   :  { %v9287_v3 = vsel %vm4166_vm3, %v9196_v19, 0.0 }
 0xde2   :  { %v9278_v59 = vadd.f32 %v9277_v58, %v9276_v22  ;;  %17098 = vst [vmem:[#allocation25_spill] sm:$0xff] %v15778_v30  ;;  %v15785_v58 = vsub.f32 %v17099_v5, %v15564_v28  ;;  %v9197_v21 = vmul.f32 %v15778_v30, %v15778_v30  ;;  %v9285_v11 = vsel %vm4166_vm3, %v9195_v35, 0.0 }
 0xde4   :  { %v9280_v33 = vadd.f32 %v9279_v56, %v9278_v59  ;;  %17100 = vst [vmem:[#allocation15_spill] sm:$0xff] %v15785_v58  ;;  %v17101_v56 = vld [vmem:[#allocation56_spill] sm:$0xff]  ;;  %v9198_v40 = vmul.f32 %v15785_v58, %v15785_v58  ;;  %v9289_v35 = vsel %vm4166_vm3, %v9197_v21, 0.0 }
 0xde5   :  { %v15792_v45 = vsub.f32 %v17101_v56, %v15564_v28 }
 0xde6   :  { %v9282_v22 = vadd.f32 %v9281_v2, %v9280_v33  ;;  %v17103_v2 = vld [vmem:[#allocation57_spill] sm:$0xff]  ;;  %v9291_v19 = vsel %vm4166_vm3, %v9198_v40, 0.0 }
 0xde7   :  { %17102 = vst [vmem:[#allocation24_spill] sm:$0xff] %v15792_v45  ;;  %v15799_v5 = vsub.f32 %v17103_v2, %v15564_v28  ;;  %v9199_v30 = vmul.f32 %v15792_v45, %v15792_v45 }
 0xde8   :  { %v9284_v59 = vadd.f32 %v9283_v38, %v9282_v22  ;;  %v17105_v38 = vld [vmem:[#allocation58_spill] sm:$0xff] }
 0xde9   :  { %17104 = vst [vmem:[#allocation26_spill] sm:$0xff] %v15799_v5  ;;  %v15806_v56 = vsub.f32 %v17105_v38, %v15564_v28  ;;  %v9200_v58 = vmul.f32 %v15799_v5, %v15799_v5  ;;  %v9293_v21 = vsel %vm4166_vm3, %v9199_v30, 0.0 }
 0xdea   :  { %v9286_v33 = vadd.f32 %v9285_v11, %v9284_v59  ;;  %v17107_v11 = vld [vmem:[#allocation59_spill] sm:$0xff] }
 0xdeb   :  { %17106 = vst [vmem:[#allocation27_spill] sm:$0xff] %v15806_v56  ;;  %v15813_v2 = vsub.f32 %v17107_v11, %v15564_v28  ;;  %v9201_v45 = vmul.f32 %v15806_v56, %v15806_v56  ;;  %v9295_v40 = vsel %vm4166_vm3, %v9200_v58, 0.0 }
 0xdec   :  { %v9288_v22 = vadd.f32 %v9287_v3, %v9286_v33  ;;  %v17109_v3 = vld [vmem:[#allocation60_spill] sm:$0xff] }
 0xded   :  { %17108 = vst [vmem:[#allocation28_spill] sm:$0xff] %v15813_v2  ;;  %v15820_v38 = vsub.f32 %v17109_v3, %v15564_v28  ;;  %v9202_v5 = vmul.f32 %v15813_v2, %v15813_v2  ;;  %v9297_v30 = vsel %vm4166_vm3, %v9201_v45, 0.0 }
 0xdee   :  { %v9290_v59 = vadd.f32 %v9289_v35, %v9288_v22  ;;  %v17111_v35 = vld [vmem:[#allocation61_spill] sm:$0xff] }
 0xdef   :  { %17110 = vst [vmem:[#allocation29_spill] sm:$0xff] %v15820_v38  ;;  %v15827_v11 = vsub.f32 %v17111_v35, %v15564_v28  ;;  %v9203_v56 = vmul.f32 %v15820_v38, %v15820_v38  ;;  %v9299_v58 = vsel %vm4166_vm3, %v9202_v5, 0.0 }
 0xdf0   :  { %v9292_v33 = vadd.f32 %v9291_v19, %v9290_v59  ;;  %v17113_v19 = vld [vmem:[#allocation8_spill] sm:$0xff] }
 0xdf1   :  { %17112 = vst [vmem:[#allocation30_spill] sm:$0xff] %v15827_v11  ;;  %v15834_v3 = vsub.f32 %v17113_v19, %v15564_v28  ;;  %v9204_v2 = vmul.f32 %v15827_v11, %v15827_v11  ;;  %v9301_v45 = vsel %vm4166_vm3, %v9203_v56, 0.0 }
 0xdf2   :  { %v9294_v22 = vadd.f32 %v9293_v21, %v9292_v33  ;;  %v17115_v21 = vld [vmem:[#allocation11_spill] sm:$0xff] }
 0xdf3   :  { %17114 = vst [vmem:[#allocation13_spill] sm:$0xff] %v15834_v3  ;;  %v15841_v35 = vsub.f32 %v17115_v21, %v15564_v28  ;;  %v9205_v38 = vmul.f32 %v15834_v3, %v15834_v3  ;;  %v9303_v5 = vsel %vm4166_vm3, %v9204_v2, 0.0 }
 0xdf4   :  { %v9296_v59 = vadd.f32 %v9295_v40, %v9294_v22  ;;  %v17116_v40 = vld [vmem:[#allocation10_spill] sm:$0xff] }
 0xdf5   :  { %v15848_v19 = vsub.f32 %v17116_v40, %v15564_v28  ;;  %v9206_v11 = vmul.f32 %v15841_v35, %v15841_v35  ;;  %v9305_v56 = vsel %vm4166_vm3, %v9205_v38, 0.0 }
 0xdf6   :  { %v9298_v33 = vadd.f32 %v9297_v30, %v9296_v59  ;;  %v17118_v30 = vld [vmem:[#allocation14_spill] sm:$0xff] }
 0xdf7   :  { %17117 = vst [vmem:[#allocation17_spill] sm:$0xff] %v15848_v19  ;;  %v15855_v21 = vsub.f32 %v17118_v30, %v15564_v28  ;;  %v9207_v3 = vmul.f32 %v15848_v19, %v15848_v19  ;;  %v9307_v2 = vsel %vm4166_vm3, %v9206_v11, 0.0 }
 0xdf8   :  { %v9300_v22 = vadd.f32 %v9299_v58, %v9298_v33  ;;  %v17120_v58 = vld [vmem:[#allocation7_spill] sm:$0xff] }
 0xdf9   :  { %17119 = vst [vmem:[#allocation34_spill] sm:$0xff] %v15855_v21  ;;  %v15862_v40 = vsub.f32 %v17120_v58, %v15564_v28  ;;  %v9208_v30 = vmul.f32 %v15855_v21, %v15855_v21  ;;  %v9309_v38 = vsel %vm4166_vm3, %v9207_v3, 0.0 }
 0xdfa   :  { %v9302_v59 = vadd.f32 %v9301_v45, %v9300_v22  ;;  %v15869_v45 = vsub.f32 %v15429_v29, %v15564_v28 }
 0xdfb   :  { %17121 = vst [vmem:[#allocation5_spill] sm:$0xff] %v15862_v40  ;;  %v9209_v19 = vmul.f32 %v15862_v40, %v15862_v40  ;;  %v9311_v11 = vsel %vm4166_vm3, %v9208_v30, 0.0 }
 0xdfc   :  { %v9304_v33 = vadd.f32 %v9303_v5, %v9302_v59  ;;  %v17122_v5 = vld [vmem:[#allocation4_spill] sm:$0xff]  ;;  %v9210_v21 = vmul.f32 %v15869_v45, %v15869_v45 }
 0xdfd   :  { %v15876_v58 = vsub.f32 %v17122_v5, %v15564_v28  ;;  %v9313_v3 = vsel %vm4166_vm3, %v9209_v19, 0.0 }
 0xdfe   :  { %v9306_v22 = vadd.f32 %v9305_v56, %v9304_v33  ;;  %v17123_v56 = vld [vmem:[#allocation16_spill] sm:$0xff]  ;;  %v9315_v30 = vsel %vm4166_vm3, %v9210_v21, 0.0 }
 0xdff   :  { %v15883_v29 = vsub.f32 %v17123_v56, %v15564_v28  ;;  %v9211_v40 = vmul.f32 %v15876_v58, %v15876_v58 }
 0xe00   :  { %v9308_v59 = vadd.f32 %v9307_v2, %v9306_v22  ;;  %v17124_v2 = vld [vmem:[#allocation19_spill] sm:$0xff] }
 0xe01   :  { %v15890_v5 = vsub.f32 %v17124_v2, %v15564_v28  ;;  %v9212_v56 = vmul.f32 %v15883_v29, %v15883_v29  ;;  %v9317_v19 = vsel %vm4166_vm3, %v9211_v40, 0.0 }
 0xe02   :  { %v9310_v33 = vadd.f32 %v9309_v38, %v9308_v59  ;;  %v15897_v38 = vsub.f32 %v15453_v55, %v15564_v28  ;;  %v15911_v55 = vsub.f32 %v15469_v51, %v15564_v28  ;;  %v15925_v51 = vsub.f32 %v15488_v31, %v15564_v28 }
 0xe03   :  { %v9213_v2 = vmul.f32 %v15890_v5, %v15890_v5  ;;  %v9319_v21 = vsel %vm4166_vm3, %v9212_v56, 0.0  ;;  %v15939_v31 = vsub.f32 %v15507_v61, %v15564_v28  ;;  %v15953_v61 = vsub.f32 %v15523_v10, %v15564_v28 }
 0xe04   :  { %v9312_v22 = vadd.f32 %v9311_v11, %v9310_v33  ;;  %v15904_v11 = vsub.f32 %v15461_v27, %v15564_v28  ;;  %v15918_v27 = vsub.f32 %v15478_v57, %v15564_v28  ;;  %v15932_v57 = vsub.f32 %v15497_v15, %v15564_v28 }
 0xe05   :  { %v9321_v40 = vsel %vm4166_vm3, %v9213_v2, 0.0  ;;  %v15946_v15 = vsub.f32 %v15516_v41, %v15564_v28  ;;  %17125 = vst [vmem:[#allocation35_spill] sm:$0xff] %v15953_v61  ;;  %v15960_v41 = vsub.f32 %v15528_v39, %v15564_v28  ;;  %v15967_v10 = vsub.f32 %v15533_v63, %v15564_v28 }
 0xe06   :  { %v9314_v59 = vadd.f32 %v9313_v3, %v9312_v22  ;;  %v9214_v3 = vmul.f32 %v15897_v38, %v15897_v38  ;;  %v15974_v39 = vsub.f32 %v15539_v18, %v15564_v28  ;;  %v15981_v63 = vsub.f32 %v15544_v6, %v15564_v28 }
 0xe07   :  { %17126 = vst [vmem:[#allocation37_spill] sm:$0xff] %v15967_v10  ;;  %v9227_v6 = vmul.f32 %v15567_v49, %v15567_v49 }
 0xe08   :  { %v9316_v33 = vadd.f32 %v9315_v30, %v9314_v59  ;;  %v9215_v30 = vmul.f32 %v15904_v11, %v15904_v11  ;;  %v9323_v56 = vsel %vm4166_vm3, %v9214_v3, 0.0  ;;  %17127 = vst [vmem:[#allocation39_spill] sm:$0xff] %v15981_v63  ;;  %v9225_v18 = vmul.f32 %v15974_v39, %v15974_v39 }
 0xe0a   :  { %v9318_v22 = vadd.f32 %v9317_v19, %v9316_v33  ;;  %v9216_v19 = vmul.f32 %v15911_v55, %v15911_v55  ;;  %v9325_v2 = vsel %vm4166_vm3, %v9215_v30, 0.0  ;;  %v9345_v28 = vsel %vm4166_vm3, %v9225_v18, 0.0 }
 0xe0c   :  { %v9320_v59 = vadd.f32 %v9319_v21, %v9318_v22  ;;  %v9217_v21 = vmul.f32 %v15918_v27, %v15918_v27  ;;  %v9327_v3 = vsel %vm4166_vm3, %v9216_v19, 0.0 }
 0xe0e   :  { %v9322_v33 = vadd.f32 %v9321_v40, %v9320_v59  ;;  %v9218_v40 = vmul.f32 %v15925_v51, %v15925_v51  ;;  %v9329_v30 = vsel %vm4166_vm3, %v9217_v21, 0.0 }
 0xe10   :  { %v9324_v22 = vadd.f32 %v9323_v56, %v9322_v33  ;;  %v9219_v56 = vmul.f32 %v15932_v57, %v15932_v57  ;;  %v9331_v19 = vsel %vm4166_vm3, %v9218_v40, 0.0 }
 0xe12   :  { %v9326_v59 = vadd.f32 %v9325_v2, %v9324_v22  ;;  %v9220_v2 = vmul.f32 %v15939_v31, %v15939_v31  ;;  %v9333_v21 = vsel %vm4166_vm3, %v9219_v56, 0.0 }
 0xe14   :  { %v9328_v33 = vadd.f32 %v9327_v3, %v9326_v59  ;;  %v9221_v3 = vmul.f32 %v15946_v15, %v15946_v15  ;;  %v9335_v40 = vsel %vm4166_vm3, %v9220_v2, 0.0 }
 0xe16   :  { %v9330_v22 = vadd.f32 %v9329_v30, %v9328_v33  ;;  %v9222_v30 = vmul.f32 %v15953_v61, %v15953_v61  ;;  %v9337_v56 = vsel %vm4166_vm3, %v9221_v3, 0.0  ;;  %v9226_v3 = vmul.f32 %v15981_v63, %v15981_v63 }
 0xe18   :  { %v9332_v59 = vadd.f32 %v9331_v19, %v9330_v22  ;;  %v9223_v19 = vmul.f32 %v15960_v41, %v15960_v41  ;;  %v9339_v2 = vsel %vm4166_vm3, %v9222_v30, 0.0  ;;  %v9228_v30 = vmul.f32 %v15570_v12, %v15570_v12 }
 0xe1a   :  { %v9334_v33 = vadd.f32 %v9333_v21, %v9332_v59  ;;  %v9224_v21 = vmul.f32 %v15967_v10, %v15967_v10 }
 0xe1c   :  { %v9336_v22 = vadd.f32 %v9335_v40, %v9334_v33  ;;  %v9341_v40 = vsel %vm4166_vm3, %v9223_v19, 0.0  ;;  %v9229_v19 = vmul.f32 %v15573_v7, %v15573_v7 }
 0xe1e   :  { %v9338_v59 = vadd.f32 %v9337_v56, %v9336_v22  ;;  %v9343_v22 = vsel %vm4166_vm3, %v9224_v21, 0.0  ;;  %v9353_v18 = vsel %vm4166_vm3, %v9229_v19, 0.0 }
 0xe20   :  { %v9340_v33 = vadd.f32 %v9339_v2, %v9338_v59  ;;  %v9347_v59 = vsel %vm4166_vm3, %v9226_v3, 0.0 }
 0xe22   :  { %v9342_v61 = vadd.f32 %v9341_v40, %v9340_v33  ;;  %v9349_v33 = vsel %vm4166_vm3, %v9227_v6, 0.0 }
 0xe24   :  { %v9344_v56 = vadd.f32 %v9343_v22, %v9342_v61  ;;  %v9351_v61 = vsel %vm4166_vm3, %v9228_v30, 0.0  ;;  %v9230_v22 = vmul.f32 %v15576_v52, %v15576_v52 }
 0xe26   :  { %v9346_v10 = vadd.f32 %v9345_v28, %v9344_v56  ;;  %v9231_v28 = vmul.f32 %v15579_v44, %v15579_v44 }
 0xe28   :  { %v9348_v2 = vadd.f32 %v9347_v59, %v9346_v10  ;;  %v9355_v10 = vsel %vm4166_vm3, %v9230_v22, 0.0  ;;  %v9357_v59 = vsel %vm4166_vm3, %v9231_v28, 0.0 }
 0xe2a   :  { %v9350_v40 = vadd.f32 %v9349_v33, %v9348_v2 }
 0xe2c   :  { %v9352_v21 = vadd.f32 %v9351_v61, %v9350_v40 }
 0xe2e   :  { %v9354_v56 = vadd.f32 %v9353_v18, %v9352_v21 }
 0xe30   :  { %v9356_v3 = vadd.f32 %v9355_v10, %v9354_v56 }
 0xe32   :  { %v9358_v7 = vadd.f32 %v9357_v59, %v9356_v3 }
 0xe34   :  { %v9359_v6 = vrot.slane %v9358_v7, 4 }
 0xe36   :  { %v9360_v2 = vadd.f32 %v9359_v6, %v9358_v7 }
 0xe38   :  { %v9361_v33 = vrot.slane %v9360_v2, 2 }
 0xe3a   :  { %v9362_v30 = vadd.f32 %v9361_v33, %v9360_v2 }
 0xe3c   :  { %v9363_v40 = vrot.slane %v9362_v30, 1 }
 0xe3e   :  { %v9364_v61 = vadd.f32 %v9363_v40, %v9362_v30 }
 0xe40   :  { %v9365_v52 = vmul.f32 %v9364_v61, %v17078_v47 }
 0xe42   :  { %v9366_v12 = vadd.f32 1e-05, %v9365_v52  ;;  %v16021_v52 = vld [vmem:[%s16547_s10] ss:$0 sm:$0xff] }
 0xe44   :  { %10380 = vrsqrt.f32 %v9366_v12  ;;  %vm9373_vm9 = vweird.f32 %v9366_v12 }
 0xe4a   :  { %v10381_v19 = vpop.eup %10380 }
 0xe4b   :  { %v9368_v21 = vmul.f32 %v10381_v19, %v9366_v12  ;;  %vm9374_vm8 = vweird.f32 %v10381_v19 }
 0xe4c   :  { %vm9375_vm10 = vmor %vm9373_vm9, %vm9374_vm8 }
 0xe4d   :  { %v9369_v18 = vmul.f32 %v10381_v19, %v9368_v21 }
 0xe4f   :  { %v9370_v49 = vmul.f32 0.5, %v9369_v18 }
 0xe51   :  { %v9371_v63 = vsub.f32 1.5, %v9370_v49 }
 0xe53   :  { %v9372_v22 = vmul.f32 %v10381_v19, %v9371_v63 }
 0xe55   :  { %v16010_v56 = vsel %vm9375_vm10, %v10381_v19, %v9372_v22 }
 0xe56   :  { %v9377_v7 = vmul.f32 %v16010_v56, %v15583_v48  ;;  %v9378_v28 = vmul.f32 %v16010_v56, %v15587_v24  ;;  %v9379_v47 = vmul.f32 %v16010_v56, %v15591_v37  ;;  %v9380_v49 = vmul.f32 %v16010_v56, %v15595_v17  ;;  %v16039_v17 = vld [vmem:[%s16548_s11] ss:$0 sm:$0xff] }
 0xe57   :  { %v9381_v12 = vmul.f32 %v16010_v56, %v15603_v60  ;;  %v9382_v48 = vmul.f32 %v16010_v56, %v15609_v25  ;;  %v9440_v24 = vmul.f32 %v16010_v56, %v15579_v44  ;;  %v9383_v37 = vmul.f32 %v16010_v56, %v15617_v1 }
 0xe58   :  { %v9445_v63 = vmul.f32 %v16021_v52, %v9377_v7  ;;  %v9446_v10 = vmul.f32 %v16021_v52, %v9378_v28  ;;  %v9447_v3 = vmul.f32 %v16021_v52, %v9379_v47  ;;  %v9384_v60 = vmul.f32 %v16010_v56, %v15624_v32 }
 0xe59   :  { %v9448_v25 = vmul.f32 %v16021_v52, %v9380_v49  ;;  %v9385_v44 = vmul.f32 %v16010_v56, %v15631_v34  ;;  %v9449_v1 = vmul.f32 %v16021_v52, %v9381_v12  ;;  %v9386_v59 = vmul.f32 %v16010_v56, %v15638_v43 }
 0xe5a   :  { %v9387_v6 = vmul.f32 %v16010_v56, %v15645_v42  ;;  %v9450_v2 = vmul.f32 %v16021_v52, %v9382_v48  ;;  %v9508_v33 = vmul.f32 %v16021_v52, %v9440_v24  ;;  %v9451_v30 = vmul.f32 %v16021_v52, %v9383_v37 }
 0xe5b   :  { %v9513_v32 = vadd.f32 %v16039_v17, %v9445_v63  ;;  %v9514_v40 = vadd.f32 %v16039_v17, %v9446_v10  ;;  %v9515_v34 = vadd.f32 %v16039_v17, %v9447_v3  ;;  %v9388_v61 = vmul.f32 %v16010_v56, %v15652_v54 }
 0xe5c   :  { %v9389_v43 = vmul.f32 %v16010_v56, %v15659_v9  ;;  %v9452_v42 = vmul.f32 %v16021_v52, %v9384_v60  ;;  %v9516_v19 = vadd.f32 %v16039_v17, %v9448_v25  ;;  %v9390_v21 = vmul.f32 %v16010_v56, %v15666_v8 }
 0xe5d   :  { %v9391_v18 = vmul.f32 %v16010_v56, %v15673_v13  ;;  %v9453_v22 = vmul.f32 %v16021_v52, %v9385_v44  ;;  %v9517_v7 = vadd.f32 %v16039_v17, %v9449_v1  ;;  %v9454_v28 = vmul.f32 %v16021_v52, %v9386_v59 }
 0xe5e   :  { %v9455_v54 = vmul.f32 %v16021_v52, %v9387_v6  ;;  %v9518_v9 = vadd.f32 %v16039_v17, %v9450_v2  ;;  %v16073_v47 = vadd.f32 %v16039_v17, %v9508_v33  ;;  %v9519_v49 = vadd.f32 %v16039_v17, %v9451_v30 }
 0xe5f   :  { %v9577_v12 = vmax.f32 %v9513_v32, 0.0  ;;  %v9578_v8 = vmax.f32 %v9514_v40, 0.0  ;;  %v9579_v48 = vmax.f32 %v9515_v34, 0.0  ;;  %v9392_v13 = vmul.f32 %v16010_v56, %v15680_v36 }
 0xe60   :  { %v9456_v24 = vmul.f32 %v16021_v52, %v9388_v61  ;;  %v9520_v37 = vadd.f32 %v16039_v17, %v9452_v42  ;;  %v9580_v63 = vmax.f32 %v9516_v19, 0.0  ;;  %v9393_v10 = vmul.f32 %v16010_v56, %v15687_v16 }
 0xe61   :  { %v9457_v3 = vmul.f32 %v16021_v52, %v9389_v43  ;;  %v9521_v60 = vadd.f32 %v16039_v17, %v9453_v22  ;;  %v9581_v25 = vmax.f32 %v9517_v7, 0.0  ;;  %9641 = vst.msk [vmem:[%s16549_s12] sm:$0xff] %vm4166_vm3, %v9577_v12  ;;  %v9394_v36 = vmul.f32 %v16010_v56, %v15694_v50 }
 0xe62   :  { %v9458_v44 = vmul.f32 %v16021_v52, %v9390_v21  ;;  %v9522_v1 = vadd.f32 %v16039_v17, %v9454_v28  ;;  %v9582_v59 = vmax.f32 %v9518_v9, 0.0  ;;  %9642 = vst.msk [vmem:[%s16549_s12 + $0x8] sm:$0xff] %vm4166_vm3, %v9578_v8  ;;  %v9395_v16 = vmul.f32 %v16010_v56, %v15701_v20 }
 0xe63   :  { %v9459_v6 = vmul.f32 %v16021_v52, %v9391_v18  ;;  %v9523_v2 = vadd.f32 %v16039_v17, %v9455_v54  ;;  %v9583_v33 = vmax.f32 %v9519_v49, 0.0  ;;  %9643 = vst.msk [vmem:[%s16549_s12 + $0x10] sm:$0xff] %vm4166_vm3, %v9579_v48  ;;  %v9396_v50 = vmul.f32 %v16010_v56, %v15708_v62 }
 0xe64   :  { %v9460_v30 = vmul.f32 %v16021_v52, %v9392_v13  ;;  %v9524_v32 = vadd.f32 %v16039_v17, %v9456_v24  ;;  %v9584_v40 = vmax.f32 %v9520_v37, 0.0  ;;  %9644 = vst.msk [vmem:[%s16549_s12 + $0x18] sm:$0xff] %vm4166_vm3, %v9580_v63  ;;  %v9397_v20 = vmul.f32 %v16010_v56, %v15715_v23 }
 0xe65   :  { %v9461_v34 = vmul.f32 %v16021_v52, %v9393_v10  ;;  %v9525_v61 = vadd.f32 %v16039_v17, %v9457_v3  ;;  %v9585_v43 = vmax.f32 %v9521_v60, 0.0  ;;  %9645 = vst.msk [vmem:[%s16549_s12 + $0x20] sm:$0xff] %vm4166_vm3, %v9581_v25  ;;  %v9398_v62 = vmul.f32 %v16010_v56, %v15722_v26 }
 0xe66   :  { %v9462_v42 = vmul.f32 %v16021_v52, %v9394_v36  ;;  %v9526_v19 = vadd.f32 %v16039_v17, %v9458_v44  ;;  %v9586_v21 = vmax.f32 %v9522_v1, 0.0  ;;  %9646 = vst.msk [vmem:[%s16549_s12 + $0x28] sm:$0xff] %vm4166_vm3, %v9582_v59  ;;  %v9399_v23 = vmul.f32 %v16010_v56, %v15729_v46 }
 0xe67   :  { %v9463_v18 = vmul.f32 %v16021_v52, %v9395_v16  ;;  %v9527_v22 = vadd.f32 %v16039_v17, %v9459_v6  ;;  %v9587_v7 = vmax.f32 %v9523_v2, 0.0  ;;  %9647 = vst.msk [vmem:[%s16549_s12 + $0x30] sm:$0xff] %vm4166_vm3, %v9583_v33  ;;  %v9400_v26 = vmul.f32 %v16010_v56, %v15736_v4  ;;  %v17130_v6 = vld [vmem:[#allocation25_spill] sm:$0xff] }
 0xe68   :  { %v9464_v28 = vmul.f32 %v16021_v52, %v9396_v50  ;;  %v9528_v54 = vadd.f32 %v16039_v17, %v9460_v30  ;;  %v9588_v9 = vmax.f32 %v9524_v32, 0.0  ;;  %9648 = vst.msk [vmem:[%s16549_s12 + $0x38] sm:$0xff] %vm4166_vm3, %v9584_v40  ;;  %v9401_v46 = vmul.f32 %v16010_v56, %v15743_v14  ;;  %v17131_v32 = vld [vmem:[#allocation15_spill] sm:$0xff] }
 0xe69   :  { %v9465_v49 = vmul.f32 %v16021_v52, %v9397_v20  ;;  %v9529_v12 = vadd.f32 %v16039_v17, %v9461_v34  ;;  %v9589_v8 = vmax.f32 %v9525_v61, 0.0  ;;  %9649 = vst.msk [vmem:[%s16549_s12 + $0x40] sm:$0xff] %vm4166_vm3, %v9585_v43  ;;  %v9402_v4 = vmul.f32 %v16010_v56, %v15750_v0  ;;  %v17128_v0 = vld [vmem:[#allocation9_spill] sm:$0xff]  ;;  %v17132_v43 = vld [vmem:[#allocation24_spill] sm:$0xff] }
 0xe6a   :  { %v9466_v48 = vmul.f32 %v16021_v52, %v9398_v62  ;;  %v9530_v13 = vadd.f32 %v16039_v17, %v9462_v42  ;;  %v9590_v24 = vmax.f32 %v9526_v19, 0.0  ;;  %9650 = vst.msk [vmem:[%s16549_s12 + $0x48] sm:$0xff] %vm4166_vm3, %v9586_v21  ;;  %v9403_v14 = vmul.f32 %v16010_v56, %v15757_v53  ;;  %v17129_v53 = vld [vmem:[#allocation21_spill] sm:$0xff] }
 0xe6b   :  { %v9467_v37 = vmul.f32 %v16021_v52, %v9399_v23  ;;  %v9531_v63 = vadd.f32 %v16039_v17, %v9463_v18  ;;  %v9591_v10 = vmax.f32 %v9527_v22, 0.0  ;;  %9651 = vst.msk [vmem:[%s16549_s12 + $0x50] sm:$0xff] %vm4166_vm3, %v9587_v7  ;;  %v9404_v3 = vmul.f32 %v16010_v56, %v17128_v0  ;;  %v17133_v23 = vld [vmem:[#allocation26_spill] sm:$0xff] }
 0xe6c   :  { %v9468_v60 = vmul.f32 %v16021_v52, %v9400_v26  ;;  %v9532_v25 = vadd.f32 %v16039_v17, %v9464_v28  ;;  %v9592_v36 = vmax.f32 %v9528_v54, 0.0  ;;  %9652 = vst.msk [vmem:[%s16549_s12 + $0x58] sm:$0xff] %vm4166_vm3, %v9588_v9  ;;  %v9405_v44 = vmul.f32 %v16010_v56, %v17129_v53  ;;  %v17134_v28 = vld [vmem:[#allocation27_spill] sm:$0xff]  ;;  %v17137_v0 = vld [vmem:[#allocation30_spill] sm:$0xff]  ;;  %v17138_v53 = vld [vmem:[#allocation13_spill] sm:$0xff] }
 0xe6d   :  { %v9469_v1 = vmul.f32 %v16021_v52, %v9401_v46  ;;  %v9533_v59 = vadd.f32 %v16039_v17, %v9465_v49  ;;  %v9593_v16 = vmax.f32 %v9529_v12, 0.0  ;;  %9653 = vst.msk [vmem:[%s16549_s12 + $0x60] sm:$0xff] %vm4166_vm3, %v9589_v8  ;;  %v9406_v2 = vmul.f32 %v16010_v56, %v17130_v6  ;;  %v17135_v12 = vld [vmem:[#allocation28_spill] sm:$0xff] }
 0xe6e   :  { %v9470_v33 = vmul.f32 %v16021_v52, %v9402_v4  ;;  %v9534_v50 = vadd.f32 %v16039_v17, %v9466_v48  ;;  %v9594_v30 = vmax.f32 %v9530_v13, 0.0  ;;  %9654 = vst.msk [vmem:[%s16549_s12 + $0x68] sm:$0xff] %vm4166_vm3, %v9590_v24  ;;  %v9407_v40 = vmul.f32 %v16010_v56, %v17131_v32  ;;  %v17136_v24 = vld [vmem:[#allocation29_spill] sm:$0xff] }
 0xe6f   :  { %v9471_v20 = vmul.f32 %v16021_v52, %v9403_v14  ;;  %v9535_v34 = vadd.f32 %v16039_v17, %v9467_v37  ;;  %v9595_v61 = vmax.f32 %v9531_v63, 0.0  ;;  %9655 = vst.msk [vmem:[%s16549_s12 + $0x70] sm:$0xff] %vm4166_vm3, %v9591_v10  ;;  %v9408_v62 = vmul.f32 %v16010_v56, %v17132_v43 }
 0xe70   :  { %v9472_v42 = vmul.f32 %v16021_v52, %v9404_v3  ;;  %v9536_v19 = vadd.f32 %v16039_v17, %v9468_v60  ;;  %v9596_v21 = vmax.f32 %v9532_v25, 0.0  ;;  %9656 = vst.msk [vmem:[%s16549_s12 + $0x78] sm:$0xff] %vm4166_vm3, %v9592_v36  ;;  %v9409_v18 = vmul.f32 %v16010_v56, %v17133_v23 }
 0xe71   :  { %v9473_v22 = vmul.f32 %v16021_v52, %v9405_v44  ;;  %v9537_v7 = vadd.f32 %v16039_v17, %v9469_v1  ;;  %v9597_v26 = vmax.f32 %v9533_v59, 0.0  ;;  %9657 = vst.msk [vmem:[%s16549_s12 + $0x80] sm:$0xff] %vm4166_vm3, %v9593_v16  ;;  %v9410_v54 = vmul.f32 %v16010_v56, %v17134_v28 }
 0xe72   :  { %v9474_v9 = vmul.f32 %v16021_v52, %v9406_v2  ;;  %v9538_v46 = vadd.f32 %v16039_v17, %v9470_v33  ;;  %v9598_v49 = vmax.f32 %v9534_v50, 0.0  ;;  %9658 = vst.msk [vmem:[%s16549_s12 + $0x88] sm:$0xff] %vm4166_vm3, %v9594_v30  ;;  %v9411_v8 = vmul.f32 %v16010_v56, %v17135_v12  ;;  %v17139_v30 = vld [vmem:[#allocation17_spill] sm:$0xff] }
 0xe73   :  { %v9475_v4 = vmul.f32 %v16021_v52, %v9407_v40  ;;  %v9539_v48 = vadd.f32 %v16039_v17, %v9471_v20  ;;  %v9599_v13 = vmax.f32 %v9535_v34, 0.0  ;;  %9659 = vst.msk [vmem:[%s16549_s12 + $0x90] sm:$0xff] %vm4166_vm3, %v9595_v61  ;;  %v9412_v14 = vmul.f32 %v16010_v56, %v17136_v24 }
 0xe74   :  { %v9476_v37 = vmul.f32 %v16021_v52, %v9408_v62  ;;  %v9540_v63 = vadd.f32 %v16039_v17, %v9472_v42  ;;  %v9600_v10 = vmax.f32 %v9536_v19, 0.0  ;;  %9660 = vst.msk [vmem:[%s16549_s12 + $0x98] sm:$0xff] %vm4166_vm3, %v9596_v21  ;;  %v9413_v3 = vmul.f32 %v16010_v56, %v17137_v0  ;;  %v17141_v19 = vld [vmem:[#allocation5_spill] sm:$0xff] }
 0xe75   :  { %v9477_v60 = vmul.f32 %v16021_v52, %v9409_v18  ;;  %v9541_v25 = vadd.f32 %v16039_v17, %v9473_v22  ;;  %v9601_v36 = vmax.f32 %v9537_v7, 0.0  ;;  %9661 = vst.msk [vmem:[%s16549_s12 + $0xa0] sm:$0xff] %vm4166_vm3, %v9597_v26  ;;  %v9414_v44 = vmul.f32 %v16010_v56, %v17138_v53 }
 0xe76   :  { %v9478_v1 = vmul.f32 %v16021_v52, %v9410_v54  ;;  %v9542_v59 = vadd.f32 %v16039_v17, %v9474_v9  ;;  %v9602_v16 = vmax.f32 %v9538_v46, 0.0  ;;  %9662 = vst.msk [vmem:[%s16549_s12 + $0xa8] sm:$0xff] %vm4166_vm3, %v9598_v49  ;;  %v9415_v6 = vmul.f32 %v16010_v56, %v15841_v35  ;;  %v17140_v35 = vld [vmem:[#allocation34_spill] sm:$0xff] }
 0xe77   :  { %v9479_v2 = vmul.f32 %v16021_v52, %v9411_v8  ;;  %v9543_v33 = vadd.f32 %v16039_v17, %v9475_v4  ;;  %v9603_v50 = vmax.f32 %v9539_v48, 0.0  ;;  %9663 = vst.msk [vmem:[%s16549_s12 + $0xb0] sm:$0xff] %vm4166_vm3, %v9599_v13  ;;  %v9416_v32 = vmul.f32 %v16010_v56, %v17139_v30 }
 0xe78   :  { %v9480_v40 = vmul.f32 %v16021_v52, %v9412_v14  ;;  %v9544_v20 = vadd.f32 %v16039_v17, %v9476_v37  ;;  %v9604_v34 = vmax.f32 %v9540_v63, 0.0  ;;  %9664 = vst.msk [vmem:[%s16549_s12 + $0xb8] sm:$0xff] %vm4166_vm3, %v9600_v10  ;;  %v9417_v61 = vmul.f32 %v16010_v56, %v17140_v35 }
 0xe79   :  { %v9481_v43 = vmul.f32 %v16021_v52, %v9413_v3  ;;  %v9545_v62 = vadd.f32 %v16039_v17, %v9477_v60  ;;  %v9605_v42 = vmax.f32 %v9541_v25, 0.0  ;;  %9665 = vst.msk [vmem:[%s16549_s12 + $0xc0] sm:$0xff] %vm4166_vm3, %v9601_v36  ;;  %v9418_v21 = vmul.f32 %v16010_v56, %v17141_v19 }
 0xe7a   :  { %v9482_v23 = vmul.f32 %v16021_v52, %v9414_v44  ;;  %v9546_v18 = vadd.f32 %v16039_v17, %v9478_v1  ;;  %v9606_v22 = vmax.f32 %v9542_v59, 0.0  ;;  %9666 = vst.msk [vmem:[%s16549_s12 + $0xc8] sm:$0xff] %vm4166_vm3, %v9602_v16  ;;  %v9419_v7 = vmul.f32 %v16010_v56, %v15869_v45 }
 0xe7b   :  { %v9483_v26 = vmul.f32 %v16021_v52, %v9415_v6  ;;  %v9547_v28 = vadd.f32 %v16039_v17, %v9479_v2  ;;  %v9607_v54 = vmax.f32 %v9543_v33, 0.0  ;;  %9667 = vst.msk [vmem:[%s16549_s12 + $0xd0] sm:$0xff] %vm4166_vm3, %v9603_v50  ;;  %v9420_v9 = vmul.f32 %v16010_v56, %v15876_v58 }
 0xe7c   :  { %v9484_v46 = vmul.f32 %v16021_v52, %v9416_v32  ;;  %v9548_v49 = vadd.f32 %v16039_v17, %v9480_v40  ;;  %v9608_v12 = vmax.f32 %v9544_v20, 0.0  ;;  %9668 = vst.msk [vmem:[%s16549_s12 + $0xd8] sm:$0xff] %vm4166_vm3, %v9604_v34  ;;  %v9421_v45 = vmul.f32 %v16010_v56, %v15883_v29 }
 0xe7d   :  { %v9485_v8 = vmul.f32 %v16021_v52, %v9417_v61  ;;  %v9549_v4 = vadd.f32 %v16039_v17, %v9481_v43  ;;  %v9609_v48 = vmax.f32 %v9545_v62, 0.0  ;;  %9669 = vst.msk [vmem:[%s16549_s12 + $0xe0] sm:$0xff] %vm4166_vm3, %v9605_v42  ;;  %v9422_v58 = vmul.f32 %v16010_v56, %v15890_v5 }
 0xe7e   :  { %v9486_v13 = vmul.f32 %v16021_v52, %v9418_v21  ;;  %v9550_v24 = vadd.f32 %v16039_v17, %v9482_v23  ;;  %v9610_v14 = vmax.f32 %v9546_v18, 0.0  ;;  %9670 = vst.msk [vmem:[%s16549_s12 + $0xe8] sm:$0xff] %vm4166_vm3, %v9606_v22  ;;  %v9423_v29 = vmul.f32 %v16010_v56, %v15897_v38  ;;  %v17143_v22 = vld [vmem:[#allocation37_spill] sm:$0xff] }
 0xe7f   :  { %v9487_v37 = vmul.f32 %v16021_v52, %v9419_v7  ;;  %v9551_v63 = vadd.f32 %v16039_v17, %v9483_v26  ;;  %v9611_v10 = vmax.f32 %v9547_v28, 0.0  ;;  %9671 = vst.msk [vmem:[%s16549_s12 + $0xf0] sm:$0xff] %vm4166_vm3, %v9607_v54  ;;  %v9424_v5 = vmul.f32 %v16010_v56, %v15904_v11 }
 0xe80   :  { %v9488_v0 = vmul.f32 %v16021_v52, %v9420_v9  ;;  %v9552_v3 = vadd.f32 %v16039_v17, %v9484_v46  ;;  %v9612_v60 = vmax.f32 %v9548_v49, 0.0  ;;  %9672 = vst.msk [vmem:[%s16549_s12 + $0xf8] sm:$0xff] %vm4166_vm3, %v9608_v12  ;;  %v9425_v38 = vmul.f32 %v16010_v56, %v15911_v55  ;;  %v17144_v12 = vld [vmem:[#allocation39_spill] sm:$0xff] }
 0xe81   :  { %v9489_v25 = vmul.f32 %v16021_v52, %v9421_v45  ;;  %v9553_v36 = vadd.f32 %v16039_v17, %v9485_v8  ;;  %v9613_v53 = vmax.f32 %v9549_v4, 0.0  ;;  %9673 = vst.msk [vmem:[%s16549_s12 + $0x100] sm:$0xff] %vm4166_vm3, %v9609_v48  ;;  %v9426_v11 = vmul.f32 %v16010_v56, %v15918_v27 }
 0xe82   :  { %v9490_v44 = vmul.f32 %v16021_v52, %v9422_v58  ;;  %v9554_v1 = vadd.f32 %v16039_v17, %v9486_v13  ;;  %v9614_v59 = vmax.f32 %v9550_v24, 0.0  ;;  %9674 = vst.msk [vmem:[%s16549_s12 + $0x108] sm:$0xff] %vm4166_vm3, %v9610_v14  ;;  %v9427_v55 = vmul.f32 %v16010_v56, %v15925_v51 }
 0xe83   :  { %v9491_v16 = vmul.f32 %v16021_v52, %v9423_v29  ;;  %v9555_v6 = vadd.f32 %v16039_v17, %v9487_v37  ;;  %v9615_v2 = vmax.f32 %v9551_v63, 0.0  ;;  %9675 = vst.msk [vmem:[%s16549_s12 + $0x110] sm:$0xff] %vm4166_vm3, %v9611_v10  ;;  %v9428_v27 = vmul.f32 %v16010_v56, %v15932_v57  ;;  %v17146_v29 = vld [vmem:[#allocation18_spill] sm:$0xff] }
 0xe84   :  { %v9492_v33 = vmul.f32 %v16021_v52, %v9424_v5  ;;  %v9556_v50 = vadd.f32 %v16039_v17, %v9488_v0  ;;  %v9616_v30 = vmax.f32 %v9552_v3, 0.0  ;;  %9676 = vst.msk [vmem:[%s16549_s12 + $0x118] sm:$0xff] %vm4166_vm3, %v9612_v60  ;;  %v9429_v51 = vmul.f32 %v16010_v56, %v15939_v31  ;;  %v17142_v31 = vld [vmem:[#allocation35_spill] sm:$0xff]  ;;  %v17147_v0 = vld [vmem:[#allocation22_spill] sm:$0xff] }
 0xe85   :  { %v9493_v32 = vmul.f32 %v16021_v52, %v9425_v38  ;;  %v9557_v40 = vadd.f32 %v16039_v17, %v9489_v25  ;;  %v9617_v20 = vmax.f32 %v9553_v36, 0.0  ;;  %9677 = vst.msk [vmem:[%s16549_s12 + $0x120] sm:$0xff] %vm4166_vm3, %v9613_v53  ;;  %v9430_v57 = vmul.f32 %v16010_v56, %v15946_v15  ;;  %v17148_v36 = vld [vmem:[#allocation12_spill] sm:$0xff] }
 0xe86   :  { %v9494_v34 = vmul.f32 %v16021_v52, %v9426_v11  ;;  %v9558_v35 = vadd.f32 %v16039_v17, %v9490_v44  ;;  %v9618_v61 = vmax.f32 %v9554_v1, 0.0  ;;  %9678 = vst.msk [vmem:[%s16549_s12 + $0x128] sm:$0xff] %vm4166_vm3, %v9614_v59  ;;  %v9431_v43 = vmul.f32 %v16010_v56, %v17142_v31 }
 0xe87   :  { %v9495_v62 = vmul.f32 %v16021_v52, %v9427_v55  ;;  %v9559_v42 = vadd.f32 %v16039_v17, %v9491_v16  ;;  %v9619_v19 = vmax.f32 %v9555_v6, 0.0  ;;  %9679 = vst.msk [vmem:[%s16549_s12 + $0x130] sm:$0xff] %vm4166_vm3, %v9615_v2  ;;  %v9432_v15 = vmul.f32 %v16010_v56, %v15960_v41 }
 0xe88   :  { %v9496_v21 = vmul.f32 %v16021_v52, %v9428_v27  ;;  %v9560_v23 = vadd.f32 %v16039_v17, %v9492_v33  ;;  %v9620_v18 = vmax.f32 %v9556_v50, 0.0  ;;  %9680 = vst.msk [vmem:[%s16549_s12 + $0x138] sm:$0xff] %vm4166_vm3, %v9616_v30  ;;  %v9433_v7 = vmul.f32 %v16010_v56, %v17143_v22 }
 0xe89   :  { %v9497_v26 = vmul.f32 %v16021_v52, %v9429_v51  ;;  %v9561_v28 = vadd.f32 %v16039_v17, %v9493_v32  ;;  %v9621_v54 = vmax.f32 %v9557_v40, 0.0  ;;  %9681 = vst.msk [vmem:[%s16549_s12 + $0x140] sm:$0xff] %vm4166_vm3, %v9617_v20  ;;  %v9434_v41 = vmul.f32 %v16010_v56, %v15974_v39  ;;  %v17145_v39 = vld [vmem:[#allocation36_spill] sm:$0xff] }
 0xe8a   :  { %v9498_v9 = vmul.f32 %v16021_v52, %v9430_v57  ;;  %v9562_v46 = vadd.f32 %v16039_v17, %v9494_v34  ;;  %v9622_v49 = vmax.f32 %v9558_v35, 0.0  ;;  %9682 = vst.msk [vmem:[%s16549_s12 + $0x148] sm:$0xff] %vm4166_vm3, %v9618_v61  ;;  %v9435_v45 = vmul.f32 %v16010_v56, %v17144_v12 }
 0xe8b   :  { %v9499_v8 = vmul.f32 %v16021_v52, %v9431_v43  ;;  %v9563_v4 = vadd.f32 %v16039_v17, %v9495_v62  ;;  %v9623_v48 = vmax.f32 %v9559_v42, 0.0  ;;  %9683 = vst.msk [vmem:[%s16549_s12 + $0x150] sm:$0xff] %vm4166_vm3, %v9619_v19  ;;  %v9436_v58 = vmul.f32 %v16010_v56, %v17145_v39 }
 0xe8c   :  { %v9500_v13 = vmul.f32 %v16021_v52, %v9432_v15  ;;  %v9564_v24 = vadd.f32 %v16039_v17, %v9496_v21  ;;  %v9624_v14 = vmax.f32 %v9560_v23, 0.0  ;;  %9684 = vst.msk [vmem:[%s16549_s12 + $0x158] sm:$0xff] %vm4166_vm3, %v9620_v18  ;;  %v9437_v37 = vmul.f32 %v16010_v56, %v17146_v29 }
 0xe8d   :  { %v9501_v63 = vmul.f32 %v16021_v52, %v9433_v7  ;;  %v9565_v10 = vadd.f32 %v16039_v17, %v9497_v26  ;;  %v9625_v5 = vmax.f32 %v9561_v28, 0.0  ;;  %9685 = vst.msk [vmem:[%s16549_s12 + $0x160] sm:$0xff] %vm4166_vm3, %v9621_v54  ;;  %v9438_v3 = vmul.f32 %v16010_v56, %v17147_v0 }
 0xe8e   :  { %v9502_v60 = vmul.f32 %v16021_v52, %v9434_v41  ;;  %v9566_v38 = vadd.f32 %v16039_v17, %v9498_v9  ;;  %v9626_v25 = vmax.f32 %v9562_v46, 0.0  ;;  %9686 = vst.msk [vmem:[%s16549_s12 + $0x168] sm:$0xff] %vm4166_vm3, %v9622_v49  ;;  %v9439_v53 = vmul.f32 %v16010_v56, %v17148_v36 }
 0xe8f   :  { %v9503_v11 = vmul.f32 %v16021_v52, %v9435_v45  ;;  %v9567_v44 = vadd.f32 %v16039_v17, %v9499_v8  ;;  %v9627_v1 = vmax.f32 %v9563_v4, 0.0  ;;  %9687 = vst.msk [vmem:[%s16549_s12 + $0x170] sm:$0xff] %vm4166_vm3, %v9623_v48  ;;  %v9504_v59 = vmul.f32 %v16021_v52, %v9436_v58 }
 0xe90   :  { %v9568_v55 = vadd.f32 %v16039_v17, %v9500_v13  ;;  %v9628_v16 = vmax.f32 %v9564_v24, 0.0  ;;  %9688 = vst.msk [vmem:[%s16549_s12 + $0x178] sm:$0xff] %vm4166_vm3, %v9624_v14  ;;  %v9505_v56 = vmul.f32 %v16021_v52, %v9437_v37  ;;  %v9569_v6 = vadd.f32 %v16039_v17, %v9501_v63 }
 0xe91   :  { %v9629_v2 = vmax.f32 %v9565_v10, 0.0  ;;  %9689 = vst.msk [vmem:[%s16549_s12 + $0x180] sm:$0xff] %vm4166_vm3, %v9625_v5  ;;  %v9506_v27 = vmul.f32 %v16021_v52, %v9438_v3  ;;  %v9570_v33 = vadd.f32 %v16039_v17, %v9502_v60  ;;  %v9630_v50 = vmax.f32 %v9566_v38, 0.0 }
 0xe92   :  { %9690 = vst.msk [vmem:[%s16549_s12 + $0x188] sm:$0xff] %vm4166_vm3, %v9626_v25  ;;  %v9507_v30 = vmul.f32 %v16021_v52, %v9439_v53  ;;  %v9571_v51 = vadd.f32 %v16039_v17, %v9503_v11  ;;  %v9631_v32 = vmax.f32 %v9567_v44, 0.0  ;;  %v9572_v40 = vadd.f32 %v16039_v17, %v9504_v59 }
 0xe93   :  { %9691 = vst.msk [vmem:[%s16549_s12 + $0x190] sm:$0xff] %vm4166_vm3, %v9627_v1  ;;  %v9632_v20 = vmax.f32 %v9568_v55, 0.0  ;;  %v9573_v57 = vadd.f32 %v16039_v17, %v9505_v56  ;;  %v9633_v34 = vmax.f32 %v9569_v6, 0.0  ;;  %v9574_v52 = vadd.f32 %v16039_v17, %v9506_v27 }
 0xe94   :  { %9692 = vst.msk [vmem:[%s16549_s12 + $0x198] sm:$0xff] %vm4166_vm3, %v9628_v16  ;;  %v9634_v35 = vmax.f32 %v9570_v33, 0.0  ;;  %v9575_v61 = vadd.f32 %v16039_v17, %v9507_v30  ;;  %v9635_v31 = vmax.f32 %v9571_v51, 0.0  ;;  %v9636_v43 = vmax.f32 %v9572_v40, 0.0 }
 0xe95   :  { %9693 = vst.msk [vmem:[%s16549_s12 + $0x1a0] sm:$0xff] %vm4166_vm3, %v9629_v2  ;;  %v9637_v62 = vmax.f32 %v9573_v57, 0.0  ;;  %v9638_v42 = vmax.f32 %v9574_v52, 0.0  ;;  %v9640_v19 = vmax.f32 %v16073_v47, 0.0 }
 0xe96   :  { %9694 = vst.msk [vmem:[%s16549_s12 + $0x1a8] sm:$0xff] %vm4166_vm3, %v9630_v50  ;;  %v9639_v17 = vmax.f32 %v9575_v61, 0.0 }
 0xe97   :  { %9695 = vst.msk [vmem:[%s16549_s12 + $0x1b0] sm:$0xff] %vm4166_vm3, %v9631_v32 }
 0xe98   :  { %9696 = vst.msk [vmem:[%s16549_s12 + $0x1b8] sm:$0xff] %vm4166_vm3, %v9632_v20 }
 0xe99   :  { %9697 = vst.msk [vmem:[%s16549_s12 + $0x1c0] sm:$0xff] %vm4166_vm3, %v9633_v34 }
 0xe9a   :  { %9698 = vst.msk [vmem:[%s16549_s12 + $0x1c8] sm:$0xff] %vm4166_vm3, %v9634_v35 }
 0xe9b   :  { %9699 = vst.msk [vmem:[%s16549_s12 + $0x1d0] sm:$0xff] %vm4166_vm3, %v9635_v31 }
 0xe9c   :  { %9700 = vst.msk [vmem:[%s16549_s12 + $0x1d8] sm:$0xff] %vm4166_vm3, %v9636_v43 }
 0xe9d   :  { %9701 = vst.msk [vmem:[%s16549_s12 + $0x1e0] sm:$0xff] %vm4166_vm3, %v9637_v62 }
 0xe9e   :  { %9702 = vst.msk [vmem:[%s16549_s12 + $0x1e8] sm:$0xff] %vm4166_vm3, %v9638_v42 }
 0xe9f   :  { %9703 = vst.msk [vmem:[%s16549_s12 + $0x1f0] sm:$0xff] %vm4166_vm3, %v9639_v17 }
 0xea0   :  { %9704 = vst.msk [vmem:[%s16549_s12 + $0x1f8] sm:$0xff] %vm4166_vm3, %v9640_v19 }

</bundles_post_ra>
